<compile_context>
chip_gen: v7x
topology: tpu7x:2x2x1
jax: 0.10.0
libtpu: 0.0.40
codegen_flags: <defaults>
</compile_context>

<pallas_src>
import functools

import jax
import jax.numpy as jnp
from jax.experimental import pallas as pl
from jax.experimental.pallas import tpu as pltpu

_EPS = 1e-5


# ---------------------------------------------------------------------------
# Stage 1: Linear (+ per-channel sum / sum-of-squares for bn0)
# ---------------------------------------------------------------------------
def _tree_fold(v, groups, C):
    """v: (1, groups*C) -> (1, C); sums the `groups` lane blocks in log depth."""
    parts = [v[:, g * C:(g + 1) * C] for g in range(groups)]
    while len(parts) > 1:
        nxt = [parts[i] + parts[i + 1] for i in range(0, len(parts) - 1, 2)]
        if len(parts) % 2:
            nxt[-1] = nxt[-1] + parts[-1]
        parts = nxt
    return parts[0]


def _linear_stats_kernel(z_ref, w_ref, b_ref, y_ref, st_ref, *, groups, C):
    y = (jnp.dot(z_ref[...].astype(jnp.bfloat16), w_ref[...],
                 preferred_element_type=jnp.float32) + b_ref[...])
    y_ref[...] = y
    # bn0 partial statistics: reduce over batch, then tree-fold the pixel
    # groups of this feature tile with lane-aligned 128-wide slices.
    cs = jnp.sum(y, axis=0, keepdims=True)
    cq = jnp.sum(y * y, axis=0, keepdims=True)
    st_ref[0:1, :] = _tree_fold(cs, groups, C)
    st_ref[1:2, :] = _tree_fold(cq, groups, C)


def linear_with_stats(z, w, b, *, channels):
    B, in_dim = z.shape
    feat = w.shape[1]
    if feat % 4096 == 0 and feat > 4096:
        tile = 4096
    elif feat % (2 * channels) == 0 and feat > channels:
        tile = feat // 2
    else:
        tile = feat
    n_ft = feat // tile
    groups = tile // channels
    kernel = functools.partial(_linear_stats_kernel, groups=groups, C=channels)
    y, st = pl.pallas_call(
        kernel,
        grid=(n_ft,),
        out_shape=(jax.ShapeDtypeStruct((B, feat), jnp.float32),
                   jax.ShapeDtypeStruct((n_ft, 2, channels), jnp.float32)),
        in_specs=[
            pl.BlockSpec((B, in_dim), lambda f: (0, 0)),
            pl.BlockSpec((in_dim, tile), lambda f: (0, f)),
            pl.BlockSpec((1, tile), lambda f: (0, f)),
        ],
        out_specs=(
            pl.BlockSpec((B, tile), lambda f: (0, f)),
            pl.BlockSpec((None, 2, channels), lambda f: (f, 0, 0)),
        ),
        compiler_params=pltpu.CompilerParams(dimension_semantics=("parallel",)),
    )(z, w, b)
    return y, st


# ---------------------------------------------------------------------------
# Fused: [previous BN (+LeakyReLU)] -> nearest 2x upsample -> 3x3 "same" conv
# ---------------------------------------------------------------------------
def _fold_upsample_conv_weights(w):
    """Fold nearest-2x upsample + zero-pad + 3x3 conv into 3 matrices.

    w: (3, 3, Cin, Cout).  Returns (w_top, w_mid, w_bot):
      w_top (3Cin, 2Cout): even output rows 2i, applied to input row i-1
      w_mid (3Cin, 4Cout): [even | odd] contributions of input row i
      w_bot (3Cin, 2Cout): odd output rows 2i+1, applied to input row i+1
    K axis = db*Cin + ci  <-> input column j-1+db ; N axis = rj*Cout + co
    <-> output column 2j+rj.
    """
    _, _, Cin, Cout = w.shape
    z = jnp.zeros((3, Cin, Cout), w.dtype)
    v_even = jnp.concatenate([w[:, 0], w[:, 1] + w[:, 2], z], axis=1)  # rj=0
    v_odd = jnp.concatenate([z, w[:, 0] + w[:, 1], w[:, 2]], axis=1)   # rj=1
    V = jnp.concatenate([v_even, v_odd], axis=2)            # (3, 3Cin, 2Cout)
    w_top = V[0]
    w_mid = jnp.concatenate([V[1] + V[2], V[0] + V[1]], axis=1)
    w_bot = V[2]
    return w_top, w_mid, w_bot


def _upsample_conv_kernel(x_ref, wt_ref, wm_ref, wb_ref, b_ref, sc_ref, sh_ref,
                          o_ref, st_ref, xpad_ref, pat_ref, *, T, n_rt, lrelu):
    _, Win, Cin = x_ref.shape
    C2 = o_ref.shape[-1]                       # 2 * Cout
    Cout = C2 // 2
    rt = pl.program_id(1)
    i0 = rt * T

    def act(v):                                # previous stage's BN (+LReLU)
        v = v * sc_ref[...] + sh_ref[...]
        if lrelu:
            v = jnp.where(v > 0, v, 0.2 * v)
        return v

    # Zero-padded slab of *pre-upsample* rows i0-1 .. i0+T (halo stays 0).
    xpad_ref[...] = jnp.zeros_like(xpad_ref)
    xpad_ref[1:T + 1, 1:Win + 1, :] = act(x_ref[pl.ds(i0, T), :, :])
    if n_rt > 1:
        @pl.when(rt > 0)
        def _():
            xpad_ref[0:1, 1:Win + 1, :] = act(x_ref[pl.ds(i0 - 1, 1), :, :])

        @pl.when(rt < n_rt - 1)
        def _():
            xpad_ref[T + 1:T + 2, 1:Win + 1, :] = act(x_ref[pl.ds(i0 + T, 1), :, :])

    # Column-patch slab: pat[a*Win + j, db*Cin + ci] = xpad[a, j+db, ci]
    for db in range(3):
        pat_ref[:, db * Cin:(db + 1) * Cin] = (
            xpad_ref[:, db:db + Win, :].reshape((T + 2) * Win, Cin))

    m = T * Win
    p_top = pat_ref[0:m, :].astype(jnp.bfloat16)
    p_mid = pat_ref[Win:Win + m, :].astype(jnp.bfloat16)
    p_bot = pat_ref[2 * Win:2 * Win + m, :].astype(jnp.bfloat16)
    bias = b_ref[...]

    # Single fat matmul for the shared middle input row (even|odd halves).
    mid = jnp.dot(p_mid, wm_ref[...], preferred_element_type=jnp.float32)

    out_even = (jnp.dot(p_top, wt_ref[...], preferred_element_type=jnp.float32)
                + mid[:, :C2] + bias)
    o_ref[:, 0, :, :] = out_even.reshape(T, Win, C2)       # store before odd
    se = jnp.sum(out_even, axis=0, keepdims=True)
    sq = jnp.sum(out_even * out_even, axis=0, keepdims=True)

    out_odd = (jnp.dot(p_bot, wb_ref[...], preferred_element_type=jnp.float32)
               + mid[:, C2:] + bias)
    o_ref[:, 1, :, :] = out_odd.reshape(T, Win, C2)
    se = se + jnp.sum(out_odd, axis=0, keepdims=True)
    sq = sq + jnp.sum(out_odd * out_odd, axis=0, keepdims=True)

    # Partial BN statistics of *this* conv's output (fold the rj pair).
    st_ref[0:1, :] = se[:, :Cout] + se[:, Cout:]
    st_ref[1:2, :] = sq[:, :Cout] + sq[:, Cout:]


def upsample_conv(x, w_top, w_mid, w_bot, b2, scale, shift, *, lrelu):
    """x: (B, Hin, Win, Cin) raw previous-conv output.  Applies the previous
    BatchNorm scale/shift (+ optional LeakyReLU), nearest-2x upsample and a 3x3
    'same' conv.  Returns (y_raw NHWC at 2x res, per-channel sum, sumsq, n)."""
    B, Hin, Win, Cin = x.shape
    C2 = w_top.shape[1]                        # 2 * Cout
    Cout = C2 // 2
    # Whole image per step at these sizes; keep row tiling for larger images.
    T = Hin if Hin <= 32 else (8 if Hin % 8 == 0 else Hin)
    n_rt = Hin // T
    kernel = functools.partial(_upsample_conv_kernel, T=T, n_rt=n_rt, lrelu=lrelu)
    y, st = pl.pallas_call(
        kernel,
        grid=(B, n_rt),
        out_shape=(
            jax.ShapeDtypeStruct((B, Hin, 2, Win, C2), jnp.float32),
            jax.ShapeDtypeStruct((B, n_rt, 2, Cout), jnp.float32),
        ),
        in_specs=[
            pl.BlockSpec((None, Hin, Win, Cin), lambda bi, ri: (bi, 0, 0, 0)),
            pl.BlockSpec((3 * Cin, C2), lambda bi, ri: (0, 0)),
            pl.BlockSpec((3 * Cin, 2 * C2), lambda bi, ri: (0, 0)),
            pl.BlockSpec((3 * Cin, C2), lambda bi, ri: (0, 0)),
            pl.BlockSpec((1, C2), lambda bi, ri: (0, 0)),
            pl.BlockSpec((1, 1, Cin), lambda bi, ri: (0, 0, 0)),
            pl.BlockSpec((1, 1, Cin), lambda bi, ri: (0, 0, 0)),
        ],
        out_specs=(
            pl.BlockSpec((None, T, 2, Win, C2),
                         lambda bi, ri: (bi, ri, 0, 0, 0)),
            pl.BlockSpec((None, None, 2, Cout), lambda bi, ri: (bi, ri, 0, 0)),
        ),
        scratch_shapes=[
            pltpu.VMEM((T + 2, Win + 2, Cin), jnp.float32),
            pltpu.VMEM(((T + 2) * Win, 3 * Cin), jnp.float32),
        ],
        compiler_params=pltpu.CompilerParams(
            dimension_semantics=("parallel", "parallel")),
    )(x, w_top, w_mid, w_bot, b2, scale.reshape(1, 1, Cin),
      shift.reshape(1, 1, Cin))
    y = y.reshape(B, 2 * Hin, 2 * Win, Cout)   # contiguous: metadata only
    totals = jnp.sum(st, axis=(0, 1))          # (2, Cout)
    n = B * (2 * Hin) * (2 * Win)
    return y, totals[0], totals[1], n


# ---------------------------------------------------------------------------
# Tail: [bn2 + LeakyReLU] -> 3x3 conv (64 -> 1) -> tanh, lane-dense output
# ---------------------------------------------------------------------------
def _build_banded_conv3_rhs(w, width):
    """w: (3, 3, Cin, 1) -> R (3, (width+2)*Cin, width) with
    R[dy, jp*Cin + c, j] = w[dy, jp - j, c, 0] if 0 <= jp-j <= 2 else 0.
    Folds the output-column index into the matmul N axis so the kernel's
    result is a dense (H, W) tile even though Cout == 1."""
    kh, kw, Cin, Cout = w.shape
    assert (kh, kw, Cout) == (3, 3, 1)
    jp = jnp.arange(width + 2)[:, None]
    j = jnp.arange(width)[None, :]
    dx = jp - j
    valid = (dx >= 0) & (dx <= 2)
    dx_c = jnp.clip(dx, 0, 2)
    g = w[:, :, :, 0][:, dx_c, :]                       # (3, W+2, W, Cin)
    g = jnp.where(valid[None, :, :, None], g, 0.0)
    return jnp.transpose(g, (0, 1, 3, 2)).reshape(3, (width + 2) * Cin, width)


def _conv3_tanh_kernel(x_ref, r_ref, b_ref, sc_ref, sh_ref, o_ref, xf_ref):
    H, WC = x_ref.shape                        # WC = W * Cin (channel-minor)
    K = xf_ref.shape[1]                        # (W + 2) * Cin
    Cin = (K - WC) // 2

    v = x_ref[...] * sc_ref[...] + sh_ref[...]
    v = jnp.where(v > 0, v, 0.2 * v)           # LeakyReLU(0.2)

    # Flat zero-padded slab: xf[a, jp*Cin + c] = padded input row a, col jp.
    xf_ref[...] = jnp.zeros_like(xf_ref)
    xf_ref[1:H + 1, Cin:Cin + WC] = v

    acc = (jnp.dot(xf_ref[0:H, :].astype(jnp.bfloat16), r_ref[0],
                   preferred_element_type=jnp.float32)
           + jnp.dot(xf_ref[1:H + 1, :].astype(jnp.bfloat16), r_ref[1],
                     preferred_element_type=jnp.float32)
           + jnp.dot(xf_ref[2:H + 2, :].astype(jnp.bfloat16), r_ref[2],
                     preferred_element_type=jnp.float32)
           + b_ref[...])
    o_ref[...] = jnp.tanh(acc)                 # EUP, cheap on the dense tile


def conv3_tanh(x, r_band, bias, scale, shift):
    """x: (B, H, W, Cin) raw conv2 output.  Applies bn2 scale/shift + LReLU,
    the 3x3 conv to a single channel and tanh.  Returns (B, H, W) float32."""
    B, H, W, Cin = x.shape
    K = (W + 2) * Cin
    x_flat = x.reshape(B, H, W * Cin)          # metadata-only reshape
    sc = jnp.tile(scale, W).reshape(1, W * Cin)
    sh = jnp.tile(shift, W).reshape(1, W * Cin)
    # TODO(synk): tile rows / K before scaling img_size (whole-image blocks).
    return pl.pallas_call(
        _conv3_tanh_kernel,
        grid=(B,),
        out_shape=jax.ShapeDtypeStruct((B, H, W), jnp.float32),
        in_specs=[
            pl.BlockSpec((None, H, W * Cin), lambda b: (b, 0, 0)),
            pl.BlockSpec((3, K, W), lambda b: (0, 0, 0)),
            pl.BlockSpec((1, 1), lambda b: (0, 0)),
            pl.BlockSpec((1, W * Cin), lambda b: (0, 0)),
            pl.BlockSpec((1, W * Cin), lambda b: (0, 0)),
        ],
        out_specs=pl.BlockSpec((None, H, W), lambda b: (b, 0, 0)),
        scratch_shapes=[pltpu.VMEM((H + 2, K), jnp.float32)],
        compiler_params=pltpu.CompilerParams(dimension_semantics=("parallel",)),
    )(x_flat, r_band, bias, sc, sh)


# ---------------------------------------------------------------------------
# Parameters and forward pass
# ---------------------------------------------------------------------------
def _bn_scale_shift(ssum, ssq, n, gamma, beta, eps=_EPS):
    mean = ssum.reshape(-1) / n
    var = ssq.reshape(-1) / n - mean * mean    # biased variance
    scale = gamma * jax.lax.rsqrt(var + eps)
    shift = beta - mean * scale
    return scale, shift


def init_params(key, input_dim, img_size):
    c_out, img_h, img_w = img_size
    assert c_out == 1, "tail kernel assumes a single output channel"
    h0, w0 = img_h // 4, img_w // 4
    feat = 128 * h0 * w0
    keys = jax.random.split(key, 8)

    def rnd(k, fan_in, shape):
        return jax.random.normal(k, shape, jnp.float32) / jnp.sqrt(jnp.float32(fan_in))

    # l1 weight generated in PyTorch column order (c, y, x), then permuted once
    # to channels-last (y, x, c) so the linear output reshapes to NHWC for free.
    w_l1 = rnd(keys[0], input_dim, (input_dim, feat))
    b_l1 = rnd(keys[1], input_dim, (feat,))
    w_l1p = (w_l1.reshape(input_dim, 128, h0, w0)
             .transpose(0, 2, 3, 1).reshape(input_dim, feat))
    b_l1p = b_l1.reshape(128, h0, w0).transpose(1, 2, 0).reshape(1, feat)

    conv1_w = rnd(keys[2], 9 * 128, (3, 3, 128, 128))     # (kh, kw, Cin, Cout)
    conv1_b = rnd(keys[3], 9 * 128, (128,))
    conv2_w = rnd(keys[4], 9 * 128, (3, 3, 128, 64))
    conv2_b = rnd(keys[5], 9 * 128, (64,))
    conv3_w = rnd(keys[6], 9 * 64, (3, 3, 64, c_out))
    conv3_b = rnd(keys[7], 9 * 64, (c_out,))

    c1_top, c1_mid, c1_bot = (a.astype(jnp.bfloat16)
                              for a in _fold_upsample_conv_weights(conv1_w))
    c2_top, c2_mid, c2_bot = (a.astype(jnp.bfloat16)
                              for a in _fold_upsample_conv_weights(conv2_w))
    c3_band = _build_banded_conv3_rhs(conv3_w, img_w).astype(jnp.bfloat16)

    return dict(
        l1_w=w_l1p.astype(jnp.bfloat16), l1_b=b_l1p,
        bn0_g=jnp.ones((128,), jnp.float32), bn0_b=jnp.zeros((128,), jnp.float32),
        c1_top=c1_top, c1_mid=c1_mid, c1_bot=c1_bot,
        c1_b2=jnp.concatenate([conv1_b, conv1_b])[None, :],
        bn1_g=jnp.ones((128,), jnp.float32), bn1_b=jnp.zeros((128,), jnp.float32),
        c2_top=c2_top, c2_mid=c2_mid, c2_bot=c2_bot,
        c2_b2=jnp.concatenate([conv2_b, conv2_b])[None, :],
        bn2_g=jnp.ones((64,), jnp.float32), bn2_b=jnp.zeros((64,), jnp.float32),
        c3_band=c3_band, c3_b=conv3_b.reshape(1, 1),
    )


def generator_forward(params, z, *, img_size=(1, 32, 32)):
    c_out, img_h, img_w = img_size
    assert c_out == 1, "tail kernel assumes a single output channel"
    # TODO(synk): support imgSize[0] > 1 (per-channel bn3 + banded RHS per channel).
    h0, w0 = img_h // 4, img_w // 4
    B = z.shape[0]

    # l1 (+ bn0 statistics); reshape == PyTorch img.view(B,128,h0,w0) in NHWC.
    y0, st0 = linear_with_stats(z.reshape(B, -1), params["l1_w"],
                                params["l1_b"], channels=128)
    x0 = y0.reshape(B, h0, w0, 128)
    st0 = jnp.sum(st0, axis=0)                             # (2, 128)
    sc0, sh0 = _bn_scale_shift(st0[0], st0[1], B * h0 * w0,
                               params["bn0_g"], params["bn0_b"])

    # bn0 -> up 2x -> conv1   (+ bn1 statistics)
    y1, s1, q1, n1 = upsample_conv(x0, params["c1_top"], params["c1_mid"],
                                   params["c1_bot"], params["c1_b2"],
                                   sc0, sh0, lrelu=False)
    sc1, sh1 = _bn_scale_shift(s1, q1, n1, params["bn1_g"], params["bn1_b"])

    # bn1 -> lrelu -> up 2x -> conv2   (+ bn2 statistics)
    y2, s2, q2, n2 = upsample_conv(y1, params["c2_top"], params["c2_mid"],
                                   params["c2_bot"], params["c2_b2"],
                                   sc1, sh1, lrelu=True)
    sc2, sh2 = _bn_scale_shift(s2, q2, n2, params["bn2_g"], params["bn2_b"])

    # bn2 -> lrelu -> conv3 (64 -> 1) -> tanh, lane-dense (B, H, W) output.
    t = conv3_tanh(y2, params["c3_band"], params["c3_b"], sc2, sh2)

    # bn3: BatchNorm2d(1, affine=False), biased batch statistics.  The result
    # is only B*H*W floats, so this is a trivial fused XLA epilogue.
    mean = jnp.mean(t)
    var = jnp.mean(jnp.square(t)) - jnp.square(mean)
    out = (t - mean) * jax.lax.rsqrt(var + _EPS)
    return out.reshape(B, c_out, img_h, img_w)


if __name__ == "__main__":
    key = jax.random.PRNGKey(0)
    pkey, zkey = jax.random.split(key)

    input_dim = 64
    img_size = (1, 32, 32)
    batch = 2

    params = init_params(pkey, input_dim, img_size)
    z = jax.random.normal(zkey, (batch, input_dim), jnp.float32)

    fwd = jax.jit(functools.partial(generator_forward, img_size=img_size))
    out = jax.block_until_ready(fwd(params, z))

    assert out.shape == (batch, img_size[0], img_size[1], img_size[2]), out.shape
    assert out.dtype == jnp.float32
    assert bool(jnp.all(jnp.isfinite(out)))
    print("KERNEL_OK")
</pallas_src>

<mosaic_0001>
module attributes {stable_mosaic.version = 11 : i64} {
  func.func @_linear_stats_kernel(%arg0: i32, %arg1: memref<2x64xf32, #tpu.memory_space<vmem>>, %arg2: memref<64x4096xbf16, #tpu.memory_space<vmem>>, %arg3: memref<1x4096xf32, #tpu.memory_space<vmem>>, %arg4: memref<2x4096xf32, #tpu.memory_space<vmem>>, %arg5: memref<1x2x128xf32, #tpu.memory_space<vmem>>) attributes {dimension_semantics = [#tpu.dimension_semantics<parallel>], iteration_bounds = array<i64: 2>, scalar_prefetch = 0 : i64, scratch_operands = 0 : i64, tpu.core_type = #tpu.core_type<tc>, window_params = [{pipeline_mode = #tpu.pipeline_mode<synchronous>, transform_indices = @transform_0, window_bounds = array<i64: 2, 64>}, {transform_indices = @transform_1, window_bounds = array<i64: 64, 4096>}, {transform_indices = @transform_2, window_bounds = array<i64: 1, 4096>}, {transform_indices = @transform_3, window_bounds = array<i64: 2, 4096>}, {transform_indices = @transform_4, window_bounds = array<i64: 1, 2, 128>}]} {
    %c0 = arith.constant 0 : index
    %c0_0 = arith.constant 0 : index
    %0 = vector.load %arg1[%c0, %c0_0] : memref<2x64xf32, #tpu.memory_space<vmem>>, vector<2x64xf32>
    %1 = arith.truncf %0 : vector<2x64xf32> to vector<2x64xbf16>
    %c0_1 = arith.constant 0 : index
    %c0_2 = arith.constant 0 : index
    %2 = vector.load %arg2[%c0_1, %c0_2] : memref<64x4096xbf16, #tpu.memory_space<vmem>>, vector<64x4096xbf16>
    %cst = arith.constant dense<0.000000e+00> : vector<2x4096xf32>
    %3 = tpu.matmul %1, %2, %cst {dimension_numbers = #tpu.dot_dimension_numbers<[1], [0], [0], [1], [0, 0, 1, 1], [], []>} : vector<2x64xbf16>, vector<64x4096xbf16>, vector<2x4096xf32> -> vector<2x4096xf32>
    %c0_3 = arith.constant 0 : index
    %c0_4 = arith.constant 0 : index
    %4 = vector.load %arg3[%c0_3, %c0_4] : memref<1x4096xf32, #tpu.memory_space<vmem>>, vector<1x4096xf32>
    %5 = vector.broadcast %4 : vector<1x4096xf32> to vector<2x4096xf32>
    %6 = arith.addf %3, %5 : vector<2x4096xf32>
    %c0_5 = arith.constant 0 : index
    %c0_6 = arith.constant 0 : index
    %7 = vector.load %arg4[%c0_5, %c0_6] : memref<2x4096xf32, #tpu.memory_space<vmem>>, vector<2x4096xf32>
    tpu.vector_store %arg4[%c0_5, %c0_6], %6 {strides = array<i32>} : memref<2x4096xf32, #tpu.memory_space<vmem>>, vector<2x4096xf32>,
    %cst_7 = arith.constant dense<0.000000e+00> : vector<4096xf32>
    %8 = vector.multi_reduction <add>, %6, %cst_7 [0] : vector<2x4096xf32> to vector<4096xf32>
    %9 = vector.shape_cast %8 : vector<4096xf32> to vector<1x4096xf32>
    %10 = arith.mulf %6, %6 : vector<2x4096xf32>
    %cst_8 = arith.constant dense<0.000000e+00> : vector<4096xf32>
    %11 = vector.multi_reduction <add>, %10, %cst_8 [0] : vector<2x4096xf32> to vector<4096xf32>
    %12 = vector.shape_cast %11 : vector<4096xf32> to vector<1x4096xf32>
    %13 = vector.extract_strided_slice %9 {offsets = [0, 0], sizes = [1, 128], strides = [1, 1]} : vector<1x4096xf32> to vector<1x128xf32>
    %14 = vector.extract_strided_slice %9 {offsets = [0, 128], sizes = [1, 128], strides = [1, 1]} : vector<1x4096xf32> to vector<1x128xf32>
    %15 = vector.extract_strided_slice %9 {offsets = [0, 256], sizes = [1, 128], strides = [1, 1]} : vector<1x4096xf32> to vector<1x128xf32>
    %16 = vector.extract_strided_slice %9 {offsets = [0, 384], sizes = [1, 128], strides = [1, 1]} : vector<1x4096xf32> to vector<1x128xf32>
    %17 = vector.extract_strided_slice %9 {offsets = [0, 512], sizes = [1, 128], strides = [1, 1]} : vector<1x4096xf32> to vector<1x128xf32>
    %18 = vector.extract_strided_slice %9 {offsets = [0, 640], sizes = [1, 128], strides = [1, 1]} : vector<1x4096xf32> to vector<1x128xf32>
    %19 = vector.extract_strided_slice %9 {offsets = [0, 768], sizes = [1, 128], strides = [1, 1]} : vector<1x4096xf32> to vector<1x128xf32>
    %20 = vector.extract_strided_slice %9 {offsets = [0, 896], sizes = [1, 128], strides = [1, 1]} : vector<1x4096xf32> to vector<1x128xf32>
    %21 = vector.extract_strided_slice %9 {offsets = [0, 1024], sizes = [1, 128], strides = [1, 1]} : vector<1x4096xf32> to vector<1x128xf32>
    %22 = vector.extract_strided_slice %9 {offsets = [0, 1152], sizes = [1, 128], strides = [1, 1]} : vector<1x4096xf32> to vector<1x128xf32>
    %23 = vector.extract_strided_slice %9 {offsets = [0, 1280], sizes = [1, 128], strides = [1, 1]} : vector<1x4096xf32> to vector<1x128xf32>
    %24 = vector.extract_strided_slice %9 {offsets = [0, 1408], sizes = [1, 128], strides = [1, 1]} : vector<1x4096xf32> to vector<1x128xf32>
    %25 = vector.extract_strided_slice %9 {offsets = [0, 1536], sizes = [1, 128], strides = [1, 1]} : vector<1x4096xf32> to vector<1x128xf32>
    %26 = vector.extract_strided_slice %9 {offsets = [0, 1664], sizes = [1, 128], strides = [1, 1]} : vector<1x4096xf32> to vector<1x128xf32>
    %27 = vector.extract_strided_slice %9 {offsets = [0, 1792], sizes = [1, 128], strides = [1, 1]} : vector<1x4096xf32> to vector<1x128xf32>
    %28 = vector.extract_strided_slice %9 {offsets = [0, 1920], sizes = [1, 128], strides = [1, 1]} : vector<1x4096xf32> to vector<1x128xf32>
    %29 = vector.extract_strided_slice %9 {offsets = [0, 2048], sizes = [1, 128], strides = [1, 1]} : vector<1x4096xf32> to vector<1x128xf32>
    %30 = vector.extract_strided_slice %9 {offsets = [0, 2176], sizes = [1, 128], strides = [1, 1]} : vector<1x4096xf32> to vector<1x128xf32>
    %31 = vector.extract_strided_slice %9 {offsets = [0, 2304], sizes = [1, 128], strides = [1, 1]} : vector<1x4096xf32> to vector<1x128xf32>
    %32 = vector.extract_strided_slice %9 {offsets = [0, 2432], sizes = [1, 128], strides = [1, 1]} : vector<1x4096xf32> to vector<1x128xf32>
    %33 = vector.extract_strided_slice %9 {offsets = [0, 2560], sizes = [1, 128], strides = [1, 1]} : vector<1x4096xf32> to vector<1x128xf32>
    %34 = vector.extract_strided_slice %9 {offsets = [0, 2688], sizes = [1, 128], strides = [1, 1]} : vector<1x4096xf32> to vector<1x128xf32>
    %35 = vector.extract_strided_slice %9 {offsets = [0, 2816], sizes = [1, 128], strides = [1, 1]} : vector<1x4096xf32> to vector<1x128xf32>
    %36 = vector.extract_strided_slice %9 {offsets = [0, 2944], sizes = [1, 128], strides = [1, 1]} : vector<1x4096xf32> to vector<1x128xf32>
    %37 = vector.extract_strided_slice %9 {offsets = [0, 3072], sizes = [1, 128], strides = [1, 1]} : vector<1x4096xf32> to vector<1x128xf32>
    %38 = vector.extract_strided_slice %9 {offsets = [0, 3200], sizes = [1, 128], strides = [1, 1]} : vector<1x4096xf32> to vector<1x128xf32>
    %39 = vector.extract_strided_slice %9 {offsets = [0, 3328], sizes = [1, 128], strides = [1, 1]} : vector<1x4096xf32> to vector<1x128xf32>
    %40 = vector.extract_strided_slice %9 {offsets = [0, 3456], sizes = [1, 128], strides = [1, 1]} : vector<1x4096xf32> to vector<1x128xf32>
    %41 = vector.extract_strided_slice %9 {offsets = [0, 3584], sizes = [1, 128], strides = [1, 1]} : vector<1x4096xf32> to vector<1x128xf32>
    %42 = vector.extract_strided_slice %9 {offsets = [0, 3712], sizes = [1, 128], strides = [1, 1]} : vector<1x4096xf32> to vector<1x128xf32>
    %43 = vector.extract_strided_slice %9 {offsets = [0, 3840], sizes = [1, 128], strides = [1, 1]} : vector<1x4096xf32> to vector<1x128xf32>
    %44 = vector.extract_strided_slice %9 {offsets = [0, 3968], sizes = [1, 128], strides = [1, 1]} : vector<1x4096xf32> to vector<1x128xf32>
    %45 = arith.addf %13, %14 : vector<1x128xf32>
    %46 = arith.addf %15, %16 : vector<1x128xf32>
    %47 = arith.addf %17, %18 : vector<1x128xf32>
    %48 = arith.addf %19, %20 : vector<1x128xf32>
    %49 = arith.addf %21, %22 : vector<1x128xf32>
    %50 = arith.addf %23, %24 : vector<1x128xf32>
    %51 = arith.addf %25, %26 : vector<1x128xf32>
    %52 = arith.addf %27, %28 : vector<1x128xf32>
    %53 = arith.addf %29, %30 : vector<1x128xf32>
    %54 = arith.addf %31, %32 : vector<1x128xf32>
    %55 = arith.addf %33, %34 : vector<1x128xf32>
    %56 = arith.addf %35, %36 : vector<1x128xf32>
    %57 = arith.addf %37, %38 : vector<1x128xf32>
    %58 = arith.addf %39, %40 : vector<1x128xf32>
    %59 = arith.addf %41, %42 : vector<1x128xf32>
    %60 = arith.addf %43, %44 : vector<1x128xf32>
    %61 = arith.addf %45, %46 : vector<1x128xf32>
    %62 = arith.addf %47, %48 : vector<1x128xf32>
    %63 = arith.addf %49, %50 : vector<1x128xf32>
    %64 = arith.addf %51, %52 : vector<1x128xf32>
    %65 = arith.addf %53, %54 : vector<1x128xf32>
    %66 = arith.addf %55, %56 : vector<1x128xf32>
    %67 = arith.addf %57, %58 : vector<1x128xf32>
    %68 = arith.addf %59, %60 : vector<1x128xf32>
    %69 = arith.addf %61, %62 : vector<1x128xf32>
    %70 = arith.addf %63, %64 : vector<1x128xf32>
    %71 = arith.addf %65, %66 : vector<1x128xf32>
    %72 = arith.addf %67, %68 : vector<1x128xf32>
    %73 = arith.addf %69, %70 : vector<1x128xf32>
    %74 = arith.addf %71, %72 : vector<1x128xf32>
    %75 = arith.addf %73, %74 : vector<1x128xf32>
    %c0_9 = arith.constant 0 : index
    %c0_10 = arith.constant 0 : index
    %c0_11 = arith.constant 0 : index
    %76 = vector.load %arg5[%c0_9, %c0_10, %c0_11] : memref<1x2x128xf32, #tpu.memory_space<vmem>>, vector<1x1x128xf32>
    %77 = vector.shape_cast %76 : vector<1x1x128xf32> to vector<1x128xf32>
    %78 = vector.shape_cast %75 : vector<1x128xf32> to vector<1x1x128xf32>
    tpu.vector_store %arg5[%c0_9, %c0_10, %c0_11], %78 {strides = array<i32>} : memref<1x2x128xf32, #tpu.memory_space<vmem>>, vector<1x1x128xf32>,
    %79 = vector.extract_strided_slice %12 {offsets = [0, 0], sizes = [1, 128], strides = [1, 1]} : vector<1x4096xf32> to vector<1x128xf32>
    %80 = vector.extract_strided_slice %12 {offsets = [0, 128], sizes = [1, 128], strides = [1, 1]} : vector<1x4096xf32> to vector<1x128xf32>
    %81 = vector.extract_strided_slice %12 {offsets = [0, 256], sizes = [1, 128], strides = [1, 1]} : vector<1x4096xf32> to vector<1x128xf32>
    %82 = vector.extract_strided_slice %12 {offsets = [0, 384], sizes = [1, 128], strides = [1, 1]} : vector<1x4096xf32> to vector<1x128xf32>
    %83 = vector.extract_strided_slice %12 {offsets = [0, 512], sizes = [1, 128], strides = [1, 1]} : vector<1x4096xf32> to vector<1x128xf32>
    %84 = vector.extract_strided_slice %12 {offsets = [0, 640], sizes = [1, 128], strides = [1, 1]} : vector<1x4096xf32> to vector<1x128xf32>
    %85 = vector.extract_strided_slice %12 {offsets = [0, 768], sizes = [1, 128], strides = [1, 1]} : vector<1x4096xf32> to vector<1x128xf32>
    %86 = vector.extract_strided_slice %12 {offsets = [0, 896], sizes = [1, 128], strides = [1, 1]} : vector<1x4096xf32> to vector<1x128xf32>
    %87 = vector.extract_strided_slice %12 {offsets = [0, 1024], sizes = [1, 128], strides = [1, 1]} : vector<1x4096xf32> to vector<1x128xf32>
    %88 = vector.extract_strided_slice %12 {offsets = [0, 1152], sizes = [1, 128], strides = [1, 1]} : vector<1x4096xf32> to vector<1x128xf32>
    %89 = vector.extract_strided_slice %12 {offsets = [0, 1280], sizes = [1, 128], strides = [1, 1]} : vector<1x4096xf32> to vector<1x128xf32>
    %90 = vector.extract_strided_slice %12 {offsets = [0, 1408], sizes = [1, 128], strides = [1, 1]} : vector<1x4096xf32> to vector<1x128xf32>
    %91 = vector.extract_strided_slice %12 {offsets = [0, 1536], sizes = [1, 128], strides = [1, 1]} : vector<1x4096xf32> to vector<1x128xf32>
    %92 = vector.extract_strided_slice %12 {offsets = [0, 1664], sizes = [1, 128], strides = [1, 1]} : vector<1x4096xf32> to vector<1x128xf32>
    %93 = vector.extract_strided_slice %12 {offsets = [0, 1792], sizes = [1, 128], strides = [1, 1]} : vector<1x4096xf32> to vector<1x128xf32>
    %94 = vector.extract_strided_slice %12 {offsets = [0, 1920], sizes = [1, 128], strides = [1, 1]} : vector<1x4096xf32> to vector<1x128xf32>
    %95 = vector.extract_strided_slice %12 {offsets = [0, 2048], sizes = [1, 128], strides = [1, 1]} : vector<1x4096xf32> to vector<1x128xf32>
    %96 = vector.extract_strided_slice %12 {offsets = [0, 2176], sizes = [1, 128], strides = [1, 1]} : vector<1x4096xf32> to vector<1x128xf32>
    %97 = vector.extract_strided_slice %12 {offsets = [0, 2304], sizes = [1, 128], strides = [1, 1]} : vector<1x4096xf32> to vector<1x128xf32>
    %98 = vector.extract_strided_slice %12 {offsets = [0, 2432], sizes = [1, 128], strides = [1, 1]} : vector<1x4096xf32> to vector<1x128xf32>
    %99 = vector.extract_strided_slice %12 {offsets = [0, 2560], sizes = [1, 128], strides = [1, 1]} : vector<1x4096xf32> to vector<1x128xf32>
    %100 = vector.extract_strided_slice %12 {offsets = [0, 2688], sizes = [1, 128], strides = [1, 1]} : vector<1x4096xf32> to vector<1x128xf32>
    %101 = vector.extract_strided_slice %12 {offsets = [0, 2816], sizes = [1, 128], strides = [1, 1]} : vector<1x4096xf32> to vector<1x128xf32>
    %102 = vector.extract_strided_slice %12 {offsets = [0, 2944], sizes = [1, 128], strides = [1, 1]} : vector<1x4096xf32> to vector<1x128xf32>
    %103 = vector.extract_strided_slice %12 {offsets = [0, 3072], sizes = [1, 128], strides = [1, 1]} : vector<1x4096xf32> to vector<1x128xf32>
    %104 = vector.extract_strided_slice %12 {offsets = [0, 3200], sizes = [1, 128], strides = [1, 1]} : vector<1x4096xf32> to vector<1x128xf32>
    %105 = vector.extract_strided_slice %12 {offsets = [0, 3328], sizes = [1, 128], strides = [1, 1]} : vector<1x4096xf32> to vector<1x128xf32>
    %106 = vector.extract_strided_slice %12 {offsets = [0, 3456], sizes = [1, 128], strides = [1, 1]} : vector<1x4096xf32> to vector<1x128xf32>
    %107 = vector.extract_strided_slice %12 {offsets = [0, 3584], sizes = [1, 128], strides = [1, 1]} : vector<1x4096xf32> to vector<1x128xf32>
    %108 = vector.extract_strided_slice %12 {offsets = [0, 3712], sizes = [1, 128], strides = [1, 1]} : vector<1x4096xf32> to vector<1x128xf32>
    %109 = vector.extract_strided_slice %12 {offsets = [0, 3840], sizes = [1, 128], strides = [1, 1]} : vector<1x4096xf32> to vector<1x128xf32>
    %110 = vector.extract_strided_slice %12 {offsets = [0, 3968], sizes = [1, 128], strides = [1, 1]} : vector<1x4096xf32> to vector<1x128xf32>
    %111 = arith.addf %79, %80 : vector<1x128xf32>
    %112 = arith.addf %81, %82 : vector<1x128xf32>
    %113 = arith.addf %83, %84 : vector<1x128xf32>
    %114 = arith.addf %85, %86 : vector<1x128xf32>
    %115 = arith.addf %87, %88 : vector<1x128xf32>
    %116 = arith.addf %89, %90 : vector<1x128xf32>
    %117 = arith.addf %91, %92 : vector<1x128xf32>
    %118 = arith.addf %93, %94 : vector<1x128xf32>
    %119 = arith.addf %95, %96 : vector<1x128xf32>
    %120 = arith.addf %97, %98 : vector<1x128xf32>
    %121 = arith.addf %99, %100 : vector<1x128xf32>
    %122 = arith.addf %101, %102 : vector<1x128xf32>
    %123 = arith.addf %103, %104 : vector<1x128xf32>
    %124 = arith.addf %105, %106 : vector<1x128xf32>
    %125 = arith.addf %107, %108 : vector<1x128xf32>
    %126 = arith.addf %109, %110 : vector<1x128xf32>
    %127 = arith.addf %111, %112 : vector<1x128xf32>
    %128 = arith.addf %113, %114 : vector<1x128xf32>
    %129 = arith.addf %115, %116 : vector<1x128xf32>
    %130 = arith.addf %117, %118 : vector<1x128xf32>
    %131 = arith.addf %119, %120 : vector<1x128xf32>
    %132 = arith.addf %121, %122 : vector<1x128xf32>
    %133 = arith.addf %123, %124 : vector<1x128xf32>
    %134 = arith.addf %125, %126 : vector<1x128xf32>
    %135 = arith.addf %127, %128 : vector<1x128xf32>
    %136 = arith.addf %129, %130 : vector<1x128xf32>
    %137 = arith.addf %131, %132 : vector<1x128xf32>
    %138 = arith.addf %133, %134 : vector<1x128xf32>
    %139 = arith.addf %135, %136 : vector<1x128xf32>
    %140 = arith.addf %137, %138 : vector<1x128xf32>
    %141 = arith.addf %139, %140 : vector<1x128xf32>
    %c0_12 = arith.constant 0 : index
    %c1 = arith.constant 1 : index
    %c0_13 = arith.constant 0 : index
    %142 = vector.load %arg5[%c0_12, %c1, %c0_13] : memref<1x2x128xf32, #tpu.memory_space<vmem>>, vector<1x1x128xf32>
    %143 = vector.shape_cast %142 : vector<1x1x128xf32> to vector<1x128xf32>
    %144 = vector.shape_cast %141 : vector<1x128xf32> to vector<1x1x128xf32>
    tpu.vector_store %arg5[%c0_12, %c1, %c0_13], %144 {strides = array<i32>} : memref<1x2x128xf32, #tpu.memory_space<vmem>>, vector<1x1x128xf32>,
    return
  }
  func.func @transform_0(%arg0: i32) -> (i32, i32) {
    %c0_i32 = arith.constant 0 : i32
    %c0_i32_0 = arith.constant 0 : i32
    %c0_i32_1 = arith.constant 0 : i32
    return %c0_i32, %c0_i32_0 : i32, i32
  }
  func.func @transform_1(%arg0: i32) -> (i32, i32) {
    %c0_i32 = arith.constant 0 : i32
    %c0_i32_0 = arith.constant 0 : i32
    return %c0_i32, %arg0 : i32, i32
  }
  func.func @transform_2(%arg0: i32) -> (i32, i32) {
    %c0_i32 = arith.constant 0 : i32
    %c0_i32_0 = arith.constant 0 : i32
    return %c0_i32, %arg0 : i32, i32
  }
  func.func @transform_3(%arg0: i32) -> (i32, i32) {
    %c0_i32 = arith.constant 0 : i32
    %c0_i32_0 = arith.constant 0 : i32
    return %c0_i32, %arg0 : i32, i32
  }
  func.func @transform_4(%arg0: i32) -> (i32, i32, i32) {
    %c0_i32 = arith.constant 0 : i32
    %c0_i32_0 = arith.constant 0 : i32
    %c0_i32_1 = arith.constant 0 : i32
    return %arg0, %c0_i32, %c0_i32_0 : i32, i32, i32
  }
}

module attributes {stable_mosaic.version = 11 : i64} {
  func.func @_upsample_conv_kernel(%arg0: i32, %arg1: i32, %arg2: memref<1x8x8x128xf32, #tpu.memory_space<vmem>>, %arg3: memref<384x256xbf16, #tpu.memory_space<vmem>>, %arg4: memref<384x512xbf16, #tpu.memory_space<vmem>>, %arg5: memref<384x256xbf16, #tpu.memory_space<vmem>>, %arg6: memref<1x256xf32, #tpu.memory_space<vmem>>, %arg7: memref<1x1x128xf32, #tpu.memory_space<vmem>>, %arg8: memref<1x1x128xf32, #tpu.memory_space<vmem>>, %arg9: memref<1x8x2x8x256xf32, #tpu.memory_space<vmem>>, %arg10: memref<1x1x2x128xf32, #tpu.memory_space<vmem>>, %arg11: memref<10x10x128xf32, #tpu.memory_space<vmem>>, %arg12: memref<80x384xf32, #tpu.memory_space<vmem>>) attributes {dimension_semantics = [#tpu.dimension_semantics<parallel>, #tpu.dimension_semantics<parallel>], iteration_bounds = array<i64: 2, 1>, scalar_prefetch = 0 : i64, scratch_operands = 2 : i64, tpu.core_type = #tpu.core_type<tc>, window_params = [{transform_indices = @transform_0, window_bounds = array<i64: 1, 8, 8, 128>}, {pipeline_mode = #tpu.pipeline_mode<synchronous>, transform_indices = @transform_1, window_bounds = array<i64: 384, 256>}, {pipeline_mode = #tpu.pipeline_mode<synchronous>, transform_indices = @transform_2, window_bounds = array<i64: 384, 512>}, {pipeline_mode = #tpu.pipeline_mode<synchronous>, transform_indices = @transform_3, window_bounds = array<i64: 384, 256>}, {pipeline_mode = #tpu.pipeline_mode<synchronous>, transform_indices = @transform_4, window_bounds = array<i64: 1, 256>}, {pipeline_mode = #tpu.pipeline_mode<synchronous>, transform_indices = @transform_5, window_bounds = array<i64: 1, 1, 128>}, {pipeline_mode = #tpu.pipeline_mode<synchronous>, transform_indices = @transform_6, window_bounds = array<i64: 1, 1, 128>}, {transform_indices = @transform_7, window_bounds = array<i64: 1, 8, 2, 8, 256>}, {transform_indices = @transform_8, window_bounds = array<i64: 1, 1, 2, 128>}]} {
    %c8_i32 = arith.constant 8 : i32
    %0 = arith.muli %arg1, %c8_i32 : i32
    %cst = arith.constant 0.000000e+00 : f32
    %1 = vector.broadcast %cst : f32 to vector<10x10x128xf32>
    %c0 = arith.constant 0 : index
    %c0_0 = arith.constant 0 : index
    %c0_1 = arith.constant 0 : index
    %2 = vector.load %arg11[%c0, %c0_0, %c0_1] : memref<10x10x128xf32, #tpu.memory_space<vmem>>, vector<10x10x128xf32>
    tpu.vector_store %arg11[%c0, %c0_0, %c0_1], %1 {strides = array<i32>} : memref<10x10x128xf32, #tpu.memory_space<vmem>>, vector<10x10x128xf32>,
    %c0_2 = arith.constant 0 : index
    %3 = arith.index_cast %0 : i32 to index
    %c0_3 = arith.constant 0 : index
    %c0_4 = arith.constant 0 : index
    %4 = vector.load %arg2[%c0_2, %3, %c0_3, %c0_4] : memref<1x8x8x128xf32, #tpu.memory_space<vmem>>, vector<1x8x8x128xf32>
    %5 = vector.shape_cast %4 : vector<1x8x8x128xf32> to vector<8x8x128xf32>
    %c0_5 = arith.constant 0 : index
    %c0_6 = arith.constant 0 : index
    %c0_7 = arith.constant 0 : index
    %6 = vector.load %arg7[%c0_5, %c0_6, %c0_7] : memref<1x1x128xf32, #tpu.memory_space<vmem>>, vector<1x1x128xf32>
    %7 = vector.broadcast %6 : vector<1x1x128xf32> to vector<8x8x128xf32>
    %8 = arith.mulf %5, %7 : vector<8x8x128xf32>
    %c0_8 = arith.constant 0 : index
    %c0_9 = arith.constant 0 : index
    %c0_10 = arith.constant 0 : index
    %9 = vector.load %arg8[%c0_8, %c0_9, %c0_10] : memref<1x1x128xf32, #tpu.memory_space<vmem>>, vector<1x1x128xf32>
    %10 = vector.broadcast %9 : vector<1x1x128xf32> to vector<8x8x128xf32>
    %11 = arith.addf %8, %10 : vector<8x8x128xf32>
    %c1 = arith.constant 1 : index
    %c1_11 = arith.constant 1 : index
    %c0_12 = arith.constant 0 : index
    %12 = vector.load %arg11[%c1, %c1_11, %c0_12] : memref<10x10x128xf32, #tpu.memory_space<vmem>>, vector<8x8x128xf32>
    tpu.vector_store %arg11[%c1, %c1_11, %c0_12], %11 {strides = array<i32>} : memref<10x10x128xf32, #tpu.memory_space<vmem>>, vector<8x8x128xf32>,
    %c0_13 = arith.constant 0 : index
    %c0_14 = arith.constant 0 : index
    %c0_15 = arith.constant 0 : index
    %13 = vector.load %arg11[%c0_13, %c0_14, %c0_15] : memref<10x10x128xf32, #tpu.memory_space<vmem>>, vector<10x8x128xf32>
    %14 = vector.shape_cast %13 : vector<10x8x128xf32> to vector<80x128xf32>
    %c0_16 = arith.constant 0 : index
    %c0_17 = arith.constant 0 : index
    %15 = vector.load %arg12[%c0_16, %c0_17] : memref<80x384xf32, #tpu.memory_space<vmem>>, vector<80x128xf32>
    tpu.vector_store %arg12[%c0_16, %c0_17], %14 {strides = array<i32>} : memref<80x384xf32, #tpu.memory_space<vmem>>, vector<80x128xf32>,
    %c0_18 = arith.constant 0 : index
    %c1_19 = arith.constant 1 : index
    %c0_20 = arith.constant 0 : index
    %16 = vector.load %arg11[%c0_18, %c1_19, %c0_20] : memref<10x10x128xf32, #tpu.memory_space<vmem>>, vector<10x8x128xf32>
    %17 = vector.shape_cast %16 : vector<10x8x128xf32> to vector<80x128xf32>
    %c0_21 = arith.constant 0 : index
    %c128 = arith.constant 128 : index
    %18 = vector.load %arg12[%c0_21, %c128] : memref<80x384xf32, #tpu.memory_space<vmem>>, vector<80x128xf32>
    tpu.vector_store %arg12[%c0_21, %c128], %17 {strides = array<i32>} : memref<80x384xf32, #tpu.memory_space<vmem>>, vector<80x128xf32>,
    %c0_22 = arith.constant 0 : index
    %c2 = arith.constant 2 : index
    %c0_23 = arith.constant 0 : index
    %19 = vector.load %arg11[%c0_22, %c2, %c0_23] : memref<10x10x128xf32, #tpu.memory_space<vmem>>, vector<10x8x128xf32>
    %20 = vector.shape_cast %19 : vector<10x8x128xf32> to vector<80x128xf32>
    %c0_24 = arith.constant 0 : index
    %c256 = arith.constant 256 : index
    %21 = vector.load %arg12[%c0_24, %c256] : memref<80x384xf32, #tpu.memory_space<vmem>>, vector<80x128xf32>
    tpu.vector_store %arg12[%c0_24, %c256], %20 {strides = array<i32>} : memref<80x384xf32, #tpu.memory_space<vmem>>, vector<80x128xf32>,
    %c0_25 = arith.constant 0 : index
    %c0_26 = arith.constant 0 : index
    %22 = vector.load %arg12[%c0_25, %c0_26] : memref<80x384xf32, #tpu.memory_space<vmem>>, vector<64x384xf32>
    %23 = arith.truncf %22 : vector<64x384xf32> to vector<64x384xbf16>
    %c8 = arith.constant 8 : index
    %c0_27 = arith.constant 0 : index
    %24 = vector.load %arg12[%c8, %c0_27] : memref<80x384xf32, #tpu.memory_space<vmem>>, vector<64x384xf32>
    %25 = arith.truncf %24 : vector<64x384xf32> to vector<64x384xbf16>
    %c16 = arith.constant 16 : index
    %c0_28 = arith.constant 0 : index
    %26 = vector.load %arg12[%c16, %c0_28] : memref<80x384xf32, #tpu.memory_space<vmem>>, vector<64x384xf32>
    %27 = arith.truncf %26 : vector<64x384xf32> to vector<64x384xbf16>
    %c0_29 = arith.constant 0 : index
    %c0_30 = arith.constant 0 : index
    %28 = vector.load %arg6[%c0_29, %c0_30] : memref<1x256xf32, #tpu.memory_space<vmem>>, vector<1x256xf32>
    %c0_31 = arith.constant 0 : index
    %c0_32 = arith.constant 0 : index
    %29 = vector.load %arg4[%c0_31, %c0_32] : memref<384x512xbf16, #tpu.memory_space<vmem>>, vector<384x512xbf16>
    %cst_33 = arith.constant dense<0.000000e+00> : vector<64x512xf32>
    %30 = tpu.matmul %25, %29, %cst_33 {dimension_numbers = #tpu.dot_dimension_numbers<[1], [0], [0], [1], [0, 0, 1, 1], [], []>} : vector<64x384xbf16>, vector<384x512xbf16>, vector<64x512xf32> -> vector<64x512xf32>
    %c0_34 = arith.constant 0 : index
    %c0_35 = arith.constant 0 : index
    %31 = vector.load %arg3[%c0_34, %c0_35] : memref<384x256xbf16, #tpu.memory_space<vmem>>, vector<384x256xbf16>
    %cst_36 = arith.constant dense<0.000000e+00> : vector<64x256xf32>
    %32 = tpu.matmul %23, %31, %cst_36 {dimension_numbers = #tpu.dot_dimension_numbers<[1], [0], [0], [1], [0, 0, 1, 1], [], []>} : vector<64x384xbf16>, vector<384x256xbf16>, vector<64x256xf32> -> vector<64x256xf32>
    %33 = vector.extract_strided_slice %30 {offsets = [0, 0], sizes = [64, 256], strides = [1, 1]} : vector<64x512xf32> to vector<64x256xf32>
    %34 = arith.addf %32, %33 : vector<64x256xf32>
    %35 = vector.broadcast %28 : vector<1x256xf32> to vector<64x256xf32>
    %36 = arith.addf %34, %35 : vector<64x256xf32>
    %37 = vector.shape_cast %36 : vector<64x256xf32> to vector<8x8x256xf32>
    %c0_37 = arith.constant 0 : index
    %c0_38 = arith.constant 0 : index
    %c0_39 = arith.constant 0 : index
    %c0_40 = arith.constant 0 : index
    %c0_41 = arith.constant 0 : index
    %38 = vector.load %arg9[%c0_37, %c0_38, %c0_39, %c0_40, %c0_41] : memref<1x8x2x8x256xf32, #tpu.memory_space<vmem>>, vector<1x8x1x8x256xf32>
    %39 = vector.shape_cast %38 : vector<1x8x1x8x256xf32> to vector<8x8x256xf32>
    %40 = vector.shape_cast %37 : vector<8x8x256xf32> to vector<1x8x1x8x256xf32>
    tpu.vector_store %arg9[%c0_37, %c0_38, %c0_39, %c0_40, %c0_41], %40 {strides = array<i32>} : memref<1x8x2x8x256xf32, #tpu.memory_space<vmem>>, vector<1x8x1x8x256xf32>,
    %cst_42 = arith.constant dense<0.000000e+00> : vector<256xf32>
    %41 = vector.multi_reduction <add>, %36, %cst_42 [0] : vector<64x256xf32> to vector<256xf32>
    %42 = vector.shape_cast %41 : vector<256xf32> to vector<1x256xf32>
    %43 = arith.mulf %36, %36 : vector<64x256xf32>
    %cst_43 = arith.constant dense<0.000000e+00> : vector<256xf32>
    %44 = vector.multi_reduction <add>, %43, %cst_43 [0] : vector<64x256xf32> to vector<256xf32>
    %45 = vector.shape_cast %44 : vector<256xf32> to vector<1x256xf32>
    %c0_44 = arith.constant 0 : index
    %c0_45 = arith.constant 0 : index
    %46 = vector.load %arg5[%c0_44, %c0_45] : memref<384x256xbf16, #tpu.memory_space<vmem>>, vector<384x256xbf16>
    %cst_46 = arith.constant dense<0.000000e+00> : vector<64x256xf32>
    %47 = tpu.matmul %27, %46, %cst_46 {dimension_numbers = #tpu.dot_dimension_numbers<[1], [0], [0], [1], [0, 0, 1, 1], [], []>} : vector<64x384xbf16>, vector<384x256xbf16>, vector<64x256xf32> -> vector<64x256xf32>
    %48 = vector.extract_strided_slice %30 {offsets = [0, 256], sizes = [64, 256], strides = [1, 1]} : vector<64x512xf32> to vector<64x256xf32>
    %49 = arith.addf %47, %48 : vector<64x256xf32>
    %50 = vector.broadcast %28 : vector<1x256xf32> to vector<64x256xf32>
    %51 = arith.addf %49, %50 : vector<64x256xf32>
    %52 = vector.shape_cast %51 : vector<64x256xf32> to vector<8x8x256xf32>
    %c0_47 = arith.constant 0 : index
    %c0_48 = arith.constant 0 : index
    %c1_49 = arith.constant 1 : index
    %c0_50 = arith.constant 0 : index
    %c0_51 = arith.constant 0 : index
    %53 = vector.load %arg9[%c0_47, %c0_48, %c1_49, %c0_50, %c0_51] : memref<1x8x2x8x256xf32, #tpu.memory_space<vmem>>, vector<1x8x1x8x256xf32>
    %54 = vector.shape_cast %53 : vector<1x8x1x8x256xf32> to vector<8x8x256xf32>
    %55 = vector.shape_cast %52 : vector<8x8x256xf32> to vector<1x8x1x8x256xf32>
    tpu.vector_store %arg9[%c0_47, %c0_48, %c1_49, %c0_50, %c0_51], %55 {strides = array<i32>} : memref<1x8x2x8x256xf32, #tpu.memory_space<vmem>>, vector<1x8x1x8x256xf32>,
    %cst_52 = arith.constant dense<0.000000e+00> : vector<256xf32>
    %56 = vector.multi_reduction <add>, %51, %cst_52 [0] : vector<64x256xf32> to vector<256xf32>
    %57 = vector.shape_cast %56 : vector<256xf32> to vector<1x256xf32>
    %58 = arith.addf %42, %57 : vector<1x256xf32>
    %59 = arith.mulf %51, %51 : vector<64x256xf32>
    %cst_53 = arith.constant dense<0.000000e+00> : vector<256xf32>
    %60 = vector.multi_reduction <add>, %59, %cst_53 [0] : vector<64x256xf32> to vector<256xf32>
    %61 = vector.shape_cast %60 : vector<256xf32> to vector<1x256xf32>
    %62 = arith.addf %45, %61 : vector<1x256xf32>
    %63 = vector.extract_strided_slice %58 {offsets = [0, 0], sizes = [1, 128], strides = [1, 1]} : vector<1x256xf32> to vector<1x128xf32>
    %64 = vector.extract_strided_slice %58 {offsets = [0, 128], sizes = [1, 128], strides = [1, 1]} : vector<1x256xf32> to vector<1x128xf32>
    %65 = arith.addf %63, %64 : vector<1x128xf32>
    %c0_54 = arith.constant 0 : index
    %c0_55 = arith.constant 0 : index
    %c0_56 = arith.constant 0 : index
    %c0_57 = arith.constant 0 : index
    %66 = vector.load %arg10[%c0_54, %c0_55, %c0_56, %c0_57] : memref<1x1x2x128xf32, #tpu.memory_space<vmem>>, vector<1x1x1x128xf32>
    %67 = vector.shape_cast %66 : vector<1x1x1x128xf32> to vector<1x128xf32>
    %68 = vector.shape_cast %65 : vector<1x128xf32> to vector<1x1x1x128xf32>
    tpu.vector_store %arg10[%c0_54, %c0_55, %c0_56, %c0_57], %68 {strides = array<i32>} : memref<1x1x2x128xf32, #tpu.memory_space<vmem>>, vector<1x1x1x128xf32>,
    %69 = vector.extract_strided_slice %62 {offsets = [0, 0], sizes = [1, 128], strides = [1, 1]} : vector<1x256xf32> to vector<1x128xf32>
    %70 = vector.extract_strided_slice %62 {offsets = [0, 128], sizes = [1, 128], strides = [1, 1]} : vector<1x256xf32> to vector<1x128xf32>
    %71 = arith.addf %69, %70 : vector<1x128xf32>
    %c0_58 = arith.constant 0 : index
    %c0_59 = arith.constant 0 : index
    %c1_60 = arith.constant 1 : index
    %c0_61 = arith.constant 0 : index
    %72 = vector.load %arg10[%c0_58, %c0_59, %c1_60, %c0_61] : memref<1x1x2x128xf32, #tpu.memory_space<vmem>>, vector<1x1x1x128xf32>
    %73 = vector.shape_cast %72 : vector<1x1x1x128xf32> to vector<1x128xf32>
    %74 = vector.shape_cast %71 : vector<1x128xf32> to vector<1x1x1x128xf32>
    tpu.vector_store %arg10[%c0_58, %c0_59, %c1_60, %c0_61], %74 {strides = array<i32>} : memref<1x1x2x128xf32, #tpu.memory_space<vmem>>, vector<1x1x1x128xf32>,
    return
  }
  func.func @transform_0(%arg0: i32, %arg1: i32) -> (i32, i32, i32, i32) {
    %c0_i32 = arith.constant 0 : i32
    %c0_i32_0 = arith.constant 0 : i32
    %c0_i32_1 = arith.constant 0 : i32
    %c0_i32_2 = arith.constant 0 : i32
    return %arg0, %c0_i32, %c0_i32_0, %c0_i32_1 : i32, i32, i32, i32
  }
  func.func @transform_1(%arg0: i32, %arg1: i32) -> (i32, i32) {
    %c0_i32 = arith.constant 0 : i32
    %c0_i32_0 = arith.constant 0 : i32
    %c0_i32_1 = arith.constant 0 : i32
    return %c0_i32, %c0_i32_0 : i32, i32
  }
  func.func @transform_2(%arg0: i32, %arg1: i32) -> (i32, i32) {
    %c0_i32 = arith.constant 0 : i32
    %c0_i32_0 = arith.constant 0 : i32
    %c0_i32_1 = arith.constant 0 : i32
    return %c0_i32, %c0_i32_0 : i32, i32
  }
  func.func @transform_3(%arg0: i32, %arg1: i32) -> (i32, i32) {
    %c0_i32 = arith.constant 0 : i32
    %c0_i32_0 = arith.constant 0 : i32
    %c0_i32_1 = arith.constant 0 : i32
    return %c0_i32, %c0_i32_0 : i32, i32
  }
  func.func @transform_4(%arg0: i32, %arg1: i32) -> (i32, i32) {
    %c0_i32 = arith.constant 0 : i32
    %c0_i32_0 = arith.constant 0 : i32
    %c0_i32_1 = arith.constant 0 : i32
    return %c0_i32, %c0_i32_0 : i32, i32
  }
  func.func @transform_5(%arg0: i32, %arg1: i32) -> (i32, i32, i32) {
    %c0_i32 = arith.constant 0 : i32
    %c0_i32_0 = arith.constant 0 : i32
    %c0_i32_1 = arith.constant 0 : i32
    %c0_i32_2 = arith.constant 0 : i32
    return %c0_i32, %c0_i32_0, %c0_i32_1 : i32, i32, i32
  }
  func.func @transform_6(%arg0: i32, %arg1: i32) -> (i32, i32, i32) {
    %c0_i32 = arith.constant 0 : i32
    %c0_i32_0 = arith.constant 0 : i32
    %c0_i32_1 = arith.constant 0 : i32
    %c0_i32_2 = arith.constant 0 : i32
    return %c0_i32, %c0_i32_0, %c0_i32_1 : i32, i32, i32
  }
  func.func @transform_7(%arg0: i32, %arg1: i32) -> (i32, i32, i32, i32, i32) {
    %c0_i32 = arith.constant 0 : i32
    %c0_i32_0 = arith.constant 0 : i32
    %c0_i32_1 = arith.constant 0 : i32
    %c0_i32_2 = arith.constant 0 : i32
    return %arg0, %arg1, %c0_i32, %c0_i32_0, %c0_i32_1 : i32, i32, i32, i32, i32
  }
  func.func @transform_8(%arg0: i32, %arg1: i32) -> (i32, i32, i32, i32) {
    %c0_i32 = arith.constant 0 : i32
    %c0_i32_0 = arith.constant 0 : i32
    %c0_i32_1 = arith.constant 0 : i32
    return %arg0, %arg1, %c0_i32, %c0_i32_0 : i32, i32, i32, i32
  }
}

module attributes {stable_mosaic.version = 11 : i64} {
  func.func @_upsample_conv_kernel(%arg0: i32, %arg1: i32, %arg2: memref<1x16x16x128xf32, #tpu.memory_space<vmem>>, %arg3: memref<384x128xbf16, #tpu.memory_space<vmem>>, %arg4: memref<384x256xbf16, #tpu.memory_space<vmem>>, %arg5: memref<384x128xbf16, #tpu.memory_space<vmem>>, %arg6: memref<1x128xf32, #tpu.memory_space<vmem>>, %arg7: memref<1x1x128xf32, #tpu.memory_space<vmem>>, %arg8: memref<1x1x128xf32, #tpu.memory_space<vmem>>, %arg9: memref<1x16x2x16x128xf32, #tpu.memory_space<vmem>>, %arg10: memref<1x1x2x64xf32, #tpu.memory_space<vmem>>, %arg11: memref<18x18x128xf32, #tpu.memory_space<vmem>>, %arg12: memref<288x384xf32, #tpu.memory_space<vmem>>) attributes {dimension_semantics = [#tpu.dimension_semantics<parallel>, #tpu.dimension_semantics<parallel>], iteration_bounds = array<i64: 2, 1>, scalar_prefetch = 0 : i64, scratch_operands = 2 : i64, tpu.core_type = #tpu.core_type<tc>, window_params = [{transform_indices = @transform_0, window_bounds = array<i64: 1, 16, 16, 128>}, {pipeline_mode = #tpu.pipeline_mode<synchronous>, transform_indices = @transform_1, window_bounds = array<i64: 384, 128>}, {pipeline_mode = #tpu.pipeline_mode<synchronous>, transform_indices = @transform_2, window_bounds = array<i64: 384, 256>}, {pipeline_mode = #tpu.pipeline_mode<synchronous>, transform_indices = @transform_3, window_bounds = array<i64: 384, 128>}, {pipeline_mode = #tpu.pipeline_mode<synchronous>, transform_indices = @transform_4, window_bounds = array<i64: 1, 128>}, {pipeline_mode = #tpu.pipeline_mode<synchronous>, transform_indices = @transform_5, window_bounds = array<i64: 1, 1, 128>}, {pipeline_mode = #tpu.pipeline_mode<synchronous>, transform_indices = @transform_6, window_bounds = array<i64: 1, 1, 128>}, {transform_indices = @transform_7, window_bounds = array<i64: 1, 16, 2, 16, 128>}, {transform_indices = @transform_8, window_bounds = array<i64: 1, 1, 2, 64>}]} {
    %c16_i32 = arith.constant 16 : i32
    %0 = arith.muli %arg1, %c16_i32 : i32
    %cst = arith.constant 0.000000e+00 : f32
    %1 = vector.broadcast %cst : f32 to vector<18x18x128xf32>
    %c0 = arith.constant 0 : index
    %c0_0 = arith.constant 0 : index
    %c0_1 = arith.constant 0 : index
    %2 = vector.load %arg11[%c0, %c0_0, %c0_1] : memref<18x18x128xf32, #tpu.memory_space<vmem>>, vector<18x18x128xf32>
    tpu.vector_store %arg11[%c0, %c0_0, %c0_1], %1 {strides = array<i32>} : memref<18x18x128xf32, #tpu.memory_space<vmem>>, vector<18x18x128xf32>,
    %c0_2 = arith.constant 0 : index
    %3 = arith.index_cast %0 : i32 to index
    %c0_3 = arith.constant 0 : index
    %c0_4 = arith.constant 0 : index
    %4 = vector.load %arg2[%c0_2, %3, %c0_3, %c0_4] : memref<1x16x16x128xf32, #tpu.memory_space<vmem>>, vector<1x16x16x128xf32>
    %5 = vector.shape_cast %4 : vector<1x16x16x128xf32> to vector<16x16x128xf32>
    %c0_5 = arith.constant 0 : index
    %c0_6 = arith.constant 0 : index
    %c0_7 = arith.constant 0 : index
    %6 = vector.load %arg7[%c0_5, %c0_6, %c0_7] : memref<1x1x128xf32, #tpu.memory_space<vmem>>, vector<1x1x128xf32>
    %7 = vector.broadcast %6 : vector<1x1x128xf32> to vector<16x16x128xf32>
    %8 = arith.mulf %5, %7 : vector<16x16x128xf32>
    %c0_8 = arith.constant 0 : index
    %c0_9 = arith.constant 0 : index
    %c0_10 = arith.constant 0 : index
    %9 = vector.load %arg8[%c0_8, %c0_9, %c0_10] : memref<1x1x128xf32, #tpu.memory_space<vmem>>, vector<1x1x128xf32>
    %10 = vector.broadcast %9 : vector<1x1x128xf32> to vector<16x16x128xf32>
    %11 = arith.addf %8, %10 : vector<16x16x128xf32>
    %cst_11 = arith.constant 0.000000e+00 : f32
    %12 = vector.broadcast %cst_11 : f32 to vector<16x16x128xf32>
    %13 = arith.cmpf ogt, %11, %12 : vector<16x16x128xf32>
    %cst_12 = arith.constant 2.000000e-01 : f32
    %14 = vector.broadcast %cst_12 : f32 to vector<16x16x128xf32>
    %15 = arith.mulf %14, %11 : vector<16x16x128xf32>
    %16 = arith.select %13, %11, %15 : vector<16x16x128xi1>, vector<16x16x128xf32>
    %c1 = arith.constant 1 : index
    %c1_13 = arith.constant 1 : index
    %c0_14 = arith.constant 0 : index
    %17 = vector.load %arg11[%c1, %c1_13, %c0_14] : memref<18x18x128xf32, #tpu.memory_space<vmem>>, vector<16x16x128xf32>
    tpu.vector_store %arg11[%c1, %c1_13, %c0_14], %16 {strides = array<i32>} : memref<18x18x128xf32, #tpu.memory_space<vmem>>, vector<16x16x128xf32>,
    %c0_15 = arith.constant 0 : index
    %c0_16 = arith.constant 0 : index
    %c0_17 = arith.constant 0 : index
    %18 = vector.load %arg11[%c0_15, %c0_16, %c0_17] : memref<18x18x128xf32, #tpu.memory_space<vmem>>, vector<18x16x128xf32>
    %19 = vector.shape_cast %18 : vector<18x16x128xf32> to vector<288x128xf32>
    %c0_18 = arith.constant 0 : index
    %c0_19 = arith.constant 0 : index
    %20 = vector.load %arg12[%c0_18, %c0_19] : memref<288x384xf32, #tpu.memory_space<vmem>>, vector<288x128xf32>
    tpu.vector_store %arg12[%c0_18, %c0_19], %19 {strides = array<i32>} : memref<288x384xf32, #tpu.memory_space<vmem>>, vector<288x128xf32>,
    %c0_20 = arith.constant 0 : index
    %c1_21 = arith.constant 1 : index
    %c0_22 = arith.constant 0 : index
    %21 = vector.load %arg11[%c0_20, %c1_21, %c0_22] : memref<18x18x128xf32, #tpu.memory_space<vmem>>, vector<18x16x128xf32>
    %22 = vector.shape_cast %21 : vector<18x16x128xf32> to vector<288x128xf32>
    %c0_23 = arith.constant 0 : index
    %c128 = arith.constant 128 : index
    %23 = vector.load %arg12[%c0_23, %c128] : memref<288x384xf32, #tpu.memory_space<vmem>>, vector<288x128xf32>
    tpu.vector_store %arg12[%c0_23, %c128], %22 {strides = array<i32>} : memref<288x384xf32, #tpu.memory_space<vmem>>, vector<288x128xf32>,
    %c0_24 = arith.constant 0 : index
    %c2 = arith.constant 2 : index
    %c0_25 = arith.constant 0 : index
    %24 = vector.load %arg11[%c0_24, %c2, %c0_25] : memref<18x18x128xf32, #tpu.memory_space<vmem>>, vector<18x16x128xf32>
    %25 = vector.shape_cast %24 : vector<18x16x128xf32> to vector<288x128xf32>
    %c0_26 = arith.constant 0 : index
    %c256 = arith.constant 256 : index
    %26 = vector.load %arg12[%c0_26, %c256] : memref<288x384xf32, #tpu.memory_space<vmem>>, vector<288x128xf32>
    tpu.vector_store %arg12[%c0_26, %c256], %25 {strides = array<i32>} : memref<288x384xf32, #tpu.memory_space<vmem>>, vector<288x128xf32>,
    %c0_27 = arith.constant 0 : index
    %c0_28 = arith.constant 0 : index
    %27 = vector.load %arg12[%c0_27, %c0_28] : memref<288x384xf32, #tpu.memory_space<vmem>>, vector<256x384xf32>
    %28 = arith.truncf %27 : vector<256x384xf32> to vector<256x384xbf16>
    %c16 = arith.constant 16 : index
    %c0_29 = arith.constant 0 : index
    %29 = vector.load %arg12[%c16, %c0_29] : memref<288x384xf32, #tpu.memory_space<vmem>>, vector<256x384xf32>
    %30 = arith.truncf %29 : vector<256x384xf32> to vector<256x384xbf16>
    %c32 = arith.constant 32 : index
    %c0_30 = arith.constant 0 : index
    %31 = vector.load %arg12[%c32, %c0_30] : memref<288x384xf32, #tpu.memory_space<vmem>>, vector<256x384xf32>
    %32 = arith.truncf %31 : vector<256x384xf32> to vector<256x384xbf16>
    %c0_31 = arith.constant 0 : index
    %c0_32 = arith.constant 0 : index
    %33 = vector.load %arg6[%c0_31, %c0_32] : memref<1x128xf32, #tpu.memory_space<vmem>>, vector<1x128xf32>
    %c0_33 = arith.constant 0 : index
    %c0_34 = arith.constant 0 : index
    %34 = vector.load %arg4[%c0_33, %c0_34] : memref<384x256xbf16, #tpu.memory_space<vmem>>, vector<384x256xbf16>
    %cst_35 = arith.constant dense<0.000000e+00> : vector<256x256xf32>
    %35 = tpu.matmul %30, %34, %cst_35 {dimension_numbers = #tpu.dot_dimension_numbers<[1], [0], [0], [1], [0, 0, 1, 1], [], []>} : vector<256x384xbf16>, vector<384x256xbf16>, vector<256x256xf32> -> vector<256x256xf32>
    %c0_36 = arith.constant 0 : index
    %c0_37 = arith.constant 0 : index
    %36 = vector.load %arg3[%c0_36, %c0_37] : memref<384x128xbf16, #tpu.memory_space<vmem>>, vector<384x128xbf16>
    %cst_38 = arith.constant dense<0.000000e+00> : vector<256x128xf32>
    %37 = tpu.matmul %28, %36, %cst_38 {dimension_numbers = #tpu.dot_dimension_numbers<[1], [0], [0], [1], [0, 0, 1, 1], [], []>} : vector<256x384xbf16>, vector<384x128xbf16>, vector<256x128xf32> -> vector<256x128xf32>
    %38 = vector.extract_strided_slice %35 {offsets = [0, 0], sizes = [256, 128], strides = [1, 1]} : vector<256x256xf32> to vector<256x128xf32>
    %39 = arith.addf %37, %38 : vector<256x128xf32>
    %40 = vector.broadcast %33 : vector<1x128xf32> to vector<256x128xf32>
    %41 = arith.addf %39, %40 : vector<256x128xf32>
    %42 = vector.shape_cast %41 : vector<256x128xf32> to vector<16x16x128xf32>
    %c0_39 = arith.constant 0 : index
    %c0_40 = arith.constant 0 : index
    %c0_41 = arith.constant 0 : index
    %c0_42 = arith.constant 0 : index
    %c0_43 = arith.constant 0 : index
    %43 = vector.load %arg9[%c0_39, %c0_40, %c0_41, %c0_42, %c0_43] : memref<1x16x2x16x128xf32, #tpu.memory_space<vmem>>, vector<1x16x1x16x128xf32>
    %44 = vector.shape_cast %43 : vector<1x16x1x16x128xf32> to vector<16x16x128xf32>
    %45 = vector.shape_cast %42 : vector<16x16x128xf32> to vector<1x16x1x16x128xf32>
    tpu.vector_store %arg9[%c0_39, %c0_40, %c0_41, %c0_42, %c0_43], %45 {strides = array<i32>} : memref<1x16x2x16x128xf32, #tpu.memory_space<vmem>>, vector<1x16x1x16x128xf32>,
    %cst_44 = arith.constant dense<0.000000e+00> : vector<128xf32>
    %46 = vector.multi_reduction <add>, %41, %cst_44 [0] : vector<256x128xf32> to vector<128xf32>
    %47 = vector.shape_cast %46 : vector<128xf32> to vector<1x128xf32>
    %48 = arith.mulf %41, %41 : vector<256x128xf32>
    %cst_45 = arith.constant dense<0.000000e+00> : vector<128xf32>
    %49 = vector.multi_reduction <add>, %48, %cst_45 [0] : vector<256x128xf32> to vector<128xf32>
    %50 = vector.shape_cast %49 : vector<128xf32> to vector<1x128xf32>
    %c0_46 = arith.constant 0 : index
    %c0_47 = arith.constant 0 : index
    %51 = vector.load %arg5[%c0_46, %c0_47] : memref<384x128xbf16, #tpu.memory_space<vmem>>, vector<384x128xbf16>
    %cst_48 = arith.constant dense<0.000000e+00> : vector<256x128xf32>
    %52 = tpu.matmul %32, %51, %cst_48 {dimension_numbers = #tpu.dot_dimension_numbers<[1], [0], [0], [1], [0, 0, 1, 1], [], []>} : vector<256x384xbf16>, vector<384x128xbf16>, vector<256x128xf32> -> vector<256x128xf32>
    %53 = vector.extract_strided_slice %35 {offsets = [0, 128], sizes = [256, 128], strides = [1, 1]} : vector<256x256xf32> to vector<256x128xf32>
    %54 = arith.addf %52, %53 : vector<256x128xf32>
    %55 = vector.broadcast %33 : vector<1x128xf32> to vector<256x128xf32>
    %56 = arith.addf %54, %55 : vector<256x128xf32>
    %57 = vector.shape_cast %56 : vector<256x128xf32> to vector<16x16x128xf32>
    %c0_49 = arith.constant 0 : index
    %c0_50 = arith.constant 0 : index
    %c1_51 = arith.constant 1 : index
    %c0_52 = arith.constant 0 : index
    %c0_53 = arith.constant 0 : index
    %58 = vector.load %arg9[%c0_49, %c0_50, %c1_51, %c0_52, %c0_53] : memref<1x16x2x16x128xf32, #tpu.memory_space<vmem>>, vector<1x16x1x16x128xf32>
    %59 = vector.shape_cast %58 : vector<1x16x1x16x128xf32> to vector<16x16x128xf32>
    %60 = vector.shape_cast %57 : vector<16x16x128xf32> to vector<1x16x1x16x128xf32>
    tpu.vector_store %arg9[%c0_49, %c0_50, %c1_51, %c0_52, %c0_53], %60 {strides = array<i32>} : memref<1x16x2x16x128xf32, #tpu.memory_space<vmem>>, vector<1x16x1x16x128xf32>,
    %cst_54 = arith.constant dense<0.000000e+00> : vector<128xf32>
    %61 = vector.multi_reduction <add>, %56, %cst_54 [0] : vector<256x128xf32> to vector<128xf32>
    %62 = vector.shape_cast %61 : vector<128xf32> to vector<1x128xf32>
    %63 = arith.addf %47, %62 : vector<1x128xf32>
    %64 = arith.mulf %56, %56 : vector<256x128xf32>
    %cst_55 = arith.constant dense<0.000000e+00> : vector<128xf32>
    %65 = vector.multi_reduction <add>, %64, %cst_55 [0] : vector<256x128xf32> to vector<128xf32>
    %66 = vector.shape_cast %65 : vector<128xf32> to vector<1x128xf32>
    %67 = arith.addf %50, %66 : vector<1x128xf32>
    %68 = vector.extract_strided_slice %63 {offsets = [0, 0], sizes = [1, 64], strides = [1, 1]} : vector<1x128xf32> to vector<1x64xf32>
    %69 = vector.extract_strided_slice %63 {offsets = [0, 64], sizes = [1, 64], strides = [1, 1]} : vector<1x128xf32> to vector<1x64xf32>
    %70 = arith.addf %68, %69 : vector<1x64xf32>
    %c0_56 = arith.constant 0 : index
    %c0_57 = arith.constant 0 : index
    %c0_58 = arith.constant 0 : index
    %c0_59 = arith.constant 0 : index
    %71 = vector.load %arg10[%c0_56, %c0_57, %c0_58, %c0_59] : memref<1x1x2x64xf32, #tpu.memory_space<vmem>>, vector<1x1x1x64xf32>
    %72 = vector.shape_cast %71 : vector<1x1x1x64xf32> to vector<1x64xf32>
    %73 = vector.shape_cast %70 : vector<1x64xf32> to vector<1x1x1x64xf32>
    tpu.vector_store %arg10[%c0_56, %c0_57, %c0_58, %c0_59], %73 {strides = array<i32>} : memref<1x1x2x64xf32, #tpu.memory_space<vmem>>, vector<1x1x1x64xf32>,
    %74 = vector.extract_strided_slice %67 {offsets = [0, 0], sizes = [1, 64], strides = [1, 1]} : vector<1x128xf32> to vector<1x64xf32>
    %75 = vector.extract_strided_slice %67 {offsets = [0, 64], sizes = [1, 64], strides = [1, 1]} : vector<1x128xf32> to vector<1x64xf32>
    %76 = arith.addf %74, %75 : vector<1x64xf32>
    %c0_60 = arith.constant 0 : index
    %c0_61 = arith.constant 0 : index
    %c1_62 = arith.constant 1 : index
    %c0_63 = arith.constant 0 : index
    %77 = vector.load %arg10[%c0_60, %c0_61, %c1_62, %c0_63] : memref<1x1x2x64xf32, #tpu.memory_space<vmem>>, vector<1x1x1x64xf32>
    %78 = vector.shape_cast %77 : vector<1x1x1x64xf32> to vector<1x64xf32>
    %79 = vector.shape_cast %76 : vector<1x64xf32> to vector<1x1x1x64xf32>
    tpu.vector_store %arg10[%c0_60, %c0_61, %c1_62, %c0_63], %79 {strides = array<i32>} : memref<1x1x2x64xf32, #tpu.memory_space<vmem>>, vector<1x1x1x64xf32>,
    return
  }
  func.func @transform_0(%arg0: i32, %arg1: i32) -> (i32, i32, i32, i32) {
    %c0_i32 = arith.constant 0 : i32
    %c0_i32_0 = arith.constant 0 : i32
    %c0_i32_1 = arith.constant 0 : i32
    %c0_i32_2 = arith.constant 0 : i32
    return %arg0, %c0_i32, %c0_i32_0, %c0_i32_1 : i32, i32, i32, i32
  }
  func.func @transform_1(%arg0: i32, %arg1: i32) -> (i32, i32) {
    %c0_i32 = arith.constant 0 : i32
    %c0_i32_0 = arith.constant 0 : i32
    %c0_i32_1 = arith.constant 0 : i32
    return %c0_i32, %c0_i32_0 : i32, i32
  }
  func.func @transform_2(%arg0: i32, %arg1: i32) -> (i32, i32) {
    %c0_i32 = arith.constant 0 : i32
    %c0_i32_0 = arith.constant 0 : i32
    %c0_i32_1 = arith.constant 0 : i32
    return %c0_i32, %c0_i32_0 : i32, i32
  }
  func.func @transform_3(%arg0: i32, %arg1: i32) -> (i32, i32) {
    %c0_i32 = arith.constant 0 : i32
    %c0_i32_0 = arith.constant 0 : i32
    %c0_i32_1 = arith.constant 0 : i32
    return %c0_i32, %c0_i32_0 : i32, i32
  }
  func.func @transform_4(%arg0: i32, %arg1: i32) -> (i32, i32) {
    %c0_i32 = arith.constant 0 : i32
    %c0_i32_0 = arith.constant 0 : i32
    %c0_i32_1 = arith.constant 0 : i32
    return %c0_i32, %c0_i32_0 : i32, i32
  }
  func.func @transform_5(%arg0: i32, %arg1: i32) -> (i32, i32, i32) {
    %c0_i32 = arith.constant 0 : i32
    %c0_i32_0 = arith.constant 0 : i32
    %c0_i32_1 = arith.constant 0 : i32
    %c0_i32_2 = arith.constant 0 : i32
    return %c0_i32, %c0_i32_0, %c0_i32_1 : i32, i32, i32
  }
  func.func @transform_6(%arg0: i32, %arg1: i32) -> (i32, i32, i32) {
    %c0_i32 = arith.constant 0 : i32
    %c0_i32_0 = arith.constant 0 : i32
    %c0_i32_1 = arith.constant 0 : i32
    %c0_i32_2 = arith.constant 0 : i32
    return %c0_i32, %c0_i32_0, %c0_i32_1 : i32, i32, i32
  }
  func.func @transform_7(%arg0: i32, %arg1: i32) -> (i32, i32, i32, i32, i32) {
    %c0_i32 = arith.constant 0 : i32
    %c0_i32_0 = arith.constant 0 : i32
    %c0_i32_1 = arith.constant 0 : i32
    %c0_i32_2 = arith.constant 0 : i32
    return %arg0, %arg1, %c0_i32, %c0_i32_0, %c0_i32_1 : i32, i32, i32, i32, i32
  }
  func.func @transform_8(%arg0: i32, %arg1: i32) -> (i32, i32, i32, i32) {
    %c0_i32 = arith.constant 0 : i32
    %c0_i32_0 = arith.constant 0 : i32
    %c0_i32_1 = arith.constant 0 : i32
    return %arg0, %arg1, %c0_i32, %c0_i32_0 : i32, i32, i32, i32
  }
}

module attributes {stable_mosaic.version = 11 : i64} {
  func.func @_conv3_tanh_kernel(%arg0: i32, %arg1: memref<1x32x2048xf32, #tpu.memory_space<vmem>>, %arg2: memref<3x2176x32xbf16, #tpu.memory_space<vmem>>, %arg3: memref<1x1xf32, #tpu.memory_space<vmem>>, %arg4: memref<1x2048xf32, #tpu.memory_space<vmem>>, %arg5: memref<1x2048xf32, #tpu.memory_space<vmem>>, %arg6: memref<1x32x32xf32, #tpu.memory_space<vmem>>, %arg7: memref<34x2176xf32, #tpu.memory_space<vmem>>) attributes {dimension_semantics = [#tpu.dimension_semantics<parallel>], iteration_bounds = array<i64: 2>, scalar_prefetch = 0 : i64, scratch_operands = 1 : i64, tpu.core_type = #tpu.core_type<tc>, window_params = [{transform_indices = @transform_0, window_bounds = array<i64: 1, 32, 2048>}, {pipeline_mode = #tpu.pipeline_mode<synchronous>, transform_indices = @transform_1, window_bounds = array<i64: 3, 2176, 32>}, {pipeline_mode = #tpu.pipeline_mode<synchronous>, transform_indices = @transform_2, window_bounds = array<i64: 1, 1>}, {pipeline_mode = #tpu.pipeline_mode<synchronous>, transform_indices = @transform_3, window_bounds = array<i64: 1, 2048>}, {pipeline_mode = #tpu.pipeline_mode<synchronous>, transform_indices = @transform_4, window_bounds = array<i64: 1, 2048>}, {transform_indices = @transform_5, window_bounds = array<i64: 1, 32, 32>}]} {
    %c0 = arith.constant 0 : index
    %c0_0 = arith.constant 0 : index
    %c0_1 = arith.constant 0 : index
    %0 = vector.load %arg1[%c0, %c0_0, %c0_1] : memref<1x32x2048xf32, #tpu.memory_space<vmem>>, vector<1x32x2048xf32>
    %1 = vector.shape_cast %0 : vector<1x32x2048xf32> to vector<32x2048xf32>
    %c0_2 = arith.constant 0 : index
    %c0_3 = arith.constant 0 : index
    %2 = vector.load %arg4[%c0_2, %c0_3] : memref<1x2048xf32, #tpu.memory_space<vmem>>, vector<1x2048xf32>
    %3 = vector.broadcast %2 : vector<1x2048xf32> to vector<32x2048xf32>
    %4 = arith.mulf %1, %3 : vector<32x2048xf32>
    %c0_4 = arith.constant 0 : index
    %c0_5 = arith.constant 0 : index
    %5 = vector.load %arg5[%c0_4, %c0_5] : memref<1x2048xf32, #tpu.memory_space<vmem>>, vector<1x2048xf32>
    %6 = vector.broadcast %5 : vector<1x2048xf32> to vector<32x2048xf32>
    %7 = arith.addf %4, %6 : vector<32x2048xf32>
    %cst = arith.constant 0.000000e+00 : f32
    %8 = vector.broadcast %cst : f32 to vector<32x2048xf32>
    %9 = arith.cmpf ogt, %7, %8 : vector<32x2048xf32>
    %cst_6 = arith.constant 2.000000e-01 : f32
    %10 = vector.broadcast %cst_6 : f32 to vector<32x2048xf32>
    %11 = arith.mulf %10, %7 : vector<32x2048xf32>
    %12 = arith.select %9, %7, %11 : vector<32x2048xi1>, vector<32x2048xf32>
    %cst_7 = arith.constant 0.000000e+00 : f32
    %13 = vector.broadcast %cst_7 : f32 to vector<34x2176xf32>
    %c0_8 = arith.constant 0 : index
    %c0_9 = arith.constant 0 : index
    %14 = vector.load %arg7[%c0_8, %c0_9] : memref<34x2176xf32, #tpu.memory_space<vmem>>, vector<34x2176xf32>
    tpu.vector_store %arg7[%c0_8, %c0_9], %13 {strides = array<i32>} : memref<34x2176xf32, #tpu.memory_space<vmem>>, vector<34x2176xf32>,
    %c1 = arith.constant 1 : index
    %c64 = arith.constant 64 : index
    %15 = vector.load %arg7[%c1, %c64] : memref<34x2176xf32, #tpu.memory_space<vmem>>, vector<32x2048xf32>
    tpu.vector_store %arg7[%c1, %c64], %12 {strides = array<i32>} : memref<34x2176xf32, #tpu.memory_space<vmem>>, vector<32x2048xf32>,
    %c0_10 = arith.constant 0 : index
    %c0_11 = arith.constant 0 : index
    %16 = vector.load %arg7[%c0_10, %c0_11] : memref<34x2176xf32, #tpu.memory_space<vmem>>, vector<32x2176xf32>
    %17 = arith.truncf %16 : vector<32x2176xf32> to vector<32x2176xbf16>
    %c0_12 = arith.constant 0 : index
    %c0_13 = arith.constant 0 : index
    %c0_14 = arith.constant 0 : index
    %18 = vector.load %arg2[%c0_12, %c0_13, %c0_14] : memref<3x2176x32xbf16, #tpu.memory_space<vmem>>, vector<1x2176x32xbf16>
    %19 = vector.shape_cast %18 : vector<1x2176x32xbf16> to vector<2176x32xbf16>
    %cst_15 = arith.constant dense<0.000000e+00> : vector<32x32xf32>
    %20 = tpu.matmul %17, %19, %cst_15 {dimension_numbers = #tpu.dot_dimension_numbers<[1], [0], [0], [1], [0, 0, 1, 1], [], []>} : vector<32x2176xbf16>, vector<2176x32xbf16>, vector<32x32xf32> -> vector<32x32xf32>
    %c1_16 = arith.constant 1 : index
    %c0_17 = arith.constant 0 : index
    %21 = vector.load %arg7[%c1_16, %c0_17] : memref<34x2176xf32, #tpu.memory_space<vmem>>, vector<32x2176xf32>
    %22 = arith.truncf %21 : vector<32x2176xf32> to vector<32x2176xbf16>
    %c1_18 = arith.constant 1 : index
    %c0_19 = arith.constant 0 : index
    %c0_20 = arith.constant 0 : index
    %23 = vector.load %arg2[%c1_18, %c0_19, %c0_20] : memref<3x2176x32xbf16, #tpu.memory_space<vmem>>, vector<1x2176x32xbf16>
    %24 = vector.shape_cast %23 : vector<1x2176x32xbf16> to vector<2176x32xbf16>
    %cst_21 = arith.constant dense<0.000000e+00> : vector<32x32xf32>
    %25 = tpu.matmul %22, %24, %cst_21 {dimension_numbers = #tpu.dot_dimension_numbers<[1], [0], [0], [1], [0, 0, 1, 1], [], []>} : vector<32x2176xbf16>, vector<2176x32xbf16>, vector<32x32xf32> -> vector<32x32xf32>
    %26 = arith.addf %20, %25 : vector<32x32xf32>
    %c2 = arith.constant 2 : index
    %c0_22 = arith.constant 0 : index
    %27 = vector.load %arg7[%c2, %c0_22] : memref<34x2176xf32, #tpu.memory_space<vmem>>, vector<32x2176xf32>
    %28 = arith.truncf %27 : vector<32x2176xf32> to vector<32x2176xbf16>
    %c2_23 = arith.constant 2 : index
    %c0_24 = arith.constant 0 : index
    %c0_25 = arith.constant 0 : index
    %29 = vector.load %arg2[%c2_23, %c0_24, %c0_25] : memref<3x2176x32xbf16, #tpu.memory_space<vmem>>, vector<1x2176x32xbf16>
    %30 = vector.shape_cast %29 : vector<1x2176x32xbf16> to vector<2176x32xbf16>
    %cst_26 = arith.constant dense<0.000000e+00> : vector<32x32xf32>
    %31 = tpu.matmul %28, %30, %cst_26 {dimension_numbers = #tpu.dot_dimension_numbers<[1], [0], [0], [1], [0, 0, 1, 1], [], []>} : vector<32x2176xbf16>, vector<2176x32xbf16>, vector<32x32xf32> -> vector<32x32xf32>
    %32 = arith.addf %26, %31 : vector<32x32xf32>
    %c0_27 = arith.constant 0 : index
    %c0_28 = arith.constant 0 : index
    %33 = vector.load %arg3[%c0_27, %c0_28] : memref<1x1xf32, #tpu.memory_space<vmem>>, vector<1x1xf32>
    %34 = vector.broadcast %33 : vector<1x1xf32> to vector<32x32xf32>
    %35 = arith.addf %32, %34 : vector<32x32xf32>
    %36 = math.tanh %35 : vector<32x32xf32>
    %c0_29 = arith.constant 0 : index
    %c0_30 = arith.constant 0 : index
    %c0_31 = arith.constant 0 : index
    %37 = vector.load %arg6[%c0_29, %c0_30, %c0_31] : memref<1x32x32xf32, #tpu.memory_space<vmem>>, vector<1x32x32xf32>
    %38 = vector.shape_cast %37 : vector<1x32x32xf32> to vector<32x32xf32>
    %39 = vector.shape_cast %36 : vector<32x32xf32> to vector<1x32x32xf32>
    tpu.vector_store %arg6[%c0_29, %c0_30, %c0_31], %39 {strides = array<i32>} : memref<1x32x32xf32, #tpu.memory_space<vmem>>, vector<1x32x32xf32>,
    return
  }
  func.func @transform_0(%arg0: i32) -> (i32, i32, i32) {
    %c0_i32 = arith.constant 0 : i32
    %c0_i32_0 = arith.constant 0 : i32
    %c0_i32_1 = arith.constant 0 : i32
    return %arg0, %c0_i32, %c0_i32_0 : i32, i32, i32
  }
  func.func @transform_1(%arg0: i32) -> (i32, i32, i32) {
    %c0_i32 = arith.constant 0 : i32
    %c0_i32_0 = arith.constant 0 : i32
    %c0_i32_1 = arith.constant 0 : i32
    %c0_i32_2 = arith.constant 0 : i32
    return %c0_i32, %c0_i32_0, %c0_i32_1 : i32, i32, i32
  }
  func.func @transform_2(%arg0: i32) -> (i32, i32) {
    %c0_i32 = arith.constant 0 : i32
    %c0_i32_0 = arith.constant 0 : i32
    %c0_i32_1 = arith.constant 0 : i32
    return %c0_i32, %c0_i32_0 : i32, i32
  }
  func.func @transform_3(%arg0: i32) -> (i32, i32) {
    %c0_i32 = arith.constant 0 : i32
    %c0_i32_0 = arith.constant 0 : i32
    %c0_i32_1 = arith.constant 0 : i32
    return %c0_i32, %c0_i32_0 : i32, i32
  }
  func.func @transform_4(%arg0: i32) -> (i32, i32) {
    %c0_i32 = arith.constant 0 : i32
    %c0_i32_0 = arith.constant 0 : i32
    %c0_i32_1 = arith.constant 0 : i32
    return %c0_i32, %c0_i32_0 : i32, i32
  }
  func.func @transform_5(%arg0: i32) -> (i32, i32, i32) {
    %c0_i32 = arith.constant 0 : i32
    %c0_i32_0 = arith.constant 0 : i32
    %c0_i32_1 = arith.constant 0 : i32
    return %arg0, %c0_i32, %c0_i32_0 : i32, i32, i32
  }
}

</mosaic_0001>

<bundles_post_ra>
// kernel: tile.18
= control target key start
LH: loop header
LB: loop body
LE: loop exit
PB: predicated region body
PF: predicated region fallthrough
CT: control target
= control target key end

     0   :  { %s40_s0 = inlined_call_operand.vmem [shape: f32[64], index: 0, kind: input, shape index: {}]   ;;  %s41_s1 = inlined_call_operand.vmem [shape: f32[32,64], index: 1, kind: output, shape index: {}]  }
   0x1   :  { %v4_v0 = vld [vmem:[%s40_s0] ss:$0 sm:$0xff] }
   0x2   :  { %5 = vst [vmem:[%s41_s1] sm:$0xff] %v4_v0  ;;  %12 = vst [vmem:[%s41_s1 + $0x8] sm:$0xff] %v4_v0 }
   0x3   :  { %13 = vst [vmem:[%s41_s1 + $0x10] sm:$0xff] %v4_v0  ;;  %14 = vst [vmem:[%s41_s1 + $0x18] sm:$0xff] %v4_v0 }

// kernel: tile.19
= control target key start
LH: loop header
LB: loop body
LE: loop exit
PB: predicated region body
PF: predicated region fallthrough
CT: control target
= control target key end

     0   :  { %s157_s8 = smov 64   ;;  %vm3_vm0 = vcmask 523264   ;;  %vm17_vm1 = vcmask 1048064   ;;  %s228_s0 = inlined_call_operand.vmem [shape: f32[32,64], index: 0, kind: input, shape index: {}]   ;;  %s229_s1 = inlined_call_operand.vmem [shape: f32[1,2048], index: 1, kind: output, shape index: {}]  }
   0x1   :  { %v139_v0 = vld [vmem:[%s228_s0 + $0x1] ss:$2 sm:$0xff]   ;;  %v2_v1 = vld [vmem:[%s228_s0] ss:$2 sm:$0xff]   ;;  %v138_v2 = vld [vmem:[%s228_s0 + $0x10] ss:$2 sm:$0xff]  }
   0x2   :  { %15 = vrot.lane.b32.xlu0 %v139_v0, %s157_s8  ;;  %v140_v3 = vld [vmem:[%s228_s0 + $0x11] ss:$2 sm:$0xff]   ;;  %4 = vst.msk [vmem:[#allocation0] ss:$8 sm:$0xf] %vm3_vm0, %v2_v1  }
   0x3   :  { %5 = vst.msk [vmem:[#allocation0] ss:$8 sm:$0xf0] %vm3_vm0, %v2_v1   ;;  %10 = vst.msk [vmem:[#allocation0 + $0x40] ss:$8 sm:$0xf] %vm3_vm0, %v138_v2  }
   0x4   :  { %12 = vst.msk [vmem:[#allocation0 + $0x40] ss:$8 sm:$0xf0] %vm3_vm0, %v138_v2  }
   0x6   :  { %22 = vrot.lane.b32.xlu0 %v140_v3, %s157_s8 }
  0x74   :  { %v16_v4 = vpop.permute.xlu0 %15  }
  0x75   :  { %18 = vst.msk [vmem:[#allocation0] ss:$8 sm:$0xf] %vm17_vm1, %v16_v4   ;;  %19 = vst.msk [vmem:[#allocation0] ss:$8 sm:$0xf0] %vm17_vm1, %v16_v4  }
  0x78   :  { %v23_v5 = vpop.permute.xlu0 %22  }
  0x79   :  { %26 = vst.msk [vmem:[#allocation0 + $0x40] ss:$8 sm:$0xf] %vm17_vm1, %v23_v5   ;;  %28 = vst.msk [vmem:[#allocation0 + $0x40] ss:$8 sm:$0xf0] %vm17_vm1, %v23_v5  }
  0x7c   :  { %v32_v6 = vld [vmem:[#allocation0] sm:$0x1]  ;;  %v36_v7 = vld [vmem:[#allocation0 + $0x8] sm:$0x1]  ;;  %v41_v8 = vld [vmem:[#allocation0 + $0x10] sm:$0x1] }
  0x7d   :  { %34 = vst [vmem:[%s229_s1] sm:$0x1] %v32_v6  ;;  %141 = vst [vmem:[%s229_s1 + $0x1] sm:$0x1] %v36_v7  ;;  %v47_v9 = vld [vmem:[#allocation0 + $0x18] sm:$0x1] }
  0x7e   :  { %142 = vst [vmem:[%s229_s1 + $0x2] sm:$0x1] %v41_v8  ;;  %v53_v10 = vld [vmem:[#allocation0 + $0x20] sm:$0x1]  ;;  %v59_v11 = vld [vmem:[#allocation0 + $0x28] sm:$0x1] }
  0x7f   :  { %143 = vst [vmem:[%s229_s1 + $0x3] sm:$0x1] %v47_v9  ;;  %144 = vst [vmem:[%s229_s1 + $0x4] sm:$0x1] %v53_v10  ;;  %v65_v12 = vld [vmem:[#allocation0 + $0x30] sm:$0x1] }
  0x80   :  { %145 = vst [vmem:[%s229_s1 + $0x5] sm:$0x1] %v59_v11  ;;  %v71_v13 = vld [vmem:[#allocation0 + $0x38] sm:$0x1]  ;;  %146 = vst [vmem:[%s229_s1 + $0x6] sm:$0x1] %v65_v12 }
  0x81   :  { %147 = vst [vmem:[%s229_s1 + $0x7] sm:$0x1] %v71_v13  ;;  %v77_v14 = vld [vmem:[#allocation0 + $0x40] sm:$0x1]  ;;  %v83_v15 = vld [vmem:[#allocation0 + $0x48] sm:$0x1] }
  0x82   :  { %v89_v16 = vld [vmem:[#allocation0 + $0x50] sm:$0x1]  ;;  %148 = vst [vmem:[%s229_s1 + $0x8] sm:$0x1] %v77_v14  ;;  %149 = vst [vmem:[%s229_s1 + $0x9] sm:$0x1] %v83_v15 }
  0x83   :  { %150 = vst [vmem:[%s229_s1 + $0xa] sm:$0x1] %v89_v16  ;;  %v95_v17 = vld [vmem:[#allocation0 + $0x58] sm:$0x1]  ;;  %v101_v18 = vld [vmem:[#allocation0 + $0x60] sm:$0x1] }
  0x84   :  { %v107_v19 = vld [vmem:[#allocation0 + $0x68] sm:$0x1]  ;;  %151 = vst [vmem:[%s229_s1 + $0xb] sm:$0x1] %v95_v17  ;;  %152 = vst [vmem:[%s229_s1 + $0xc] sm:$0x1] %v101_v18 }
  0x85   :  { %153 = vst [vmem:[%s229_s1 + $0xd] sm:$0x1] %v107_v19  ;;  %v113_v20 = vld [vmem:[#allocation0 + $0x70] sm:$0x1]  ;;  %v119_v21 = vld [vmem:[#allocation0 + $0x78] sm:$0x1] }
  0x86   :  { %154 = vst [vmem:[%s229_s1 + $0xe] sm:$0x1] %v113_v20  ;;  %155 = vst [vmem:[%s229_s1 + $0xf] sm:$0x1] %v119_v21 }

// kernel: generator_forward.4
= control target key start
LH: loop header
LB: loop body
LE: loop exit
PB: predicated region body
PF: predicated region fallthrough
CT: control target
= control target key end

     0   :  { %10 = vsyncpa [#allocation3], 0  ;;  %s3901_s0 = inlined_call_operand.hbm [shape: f32[2,64], index: 0, kind: input, shape index: {}]   ;;  %s3902_s1 = inlined_call_operand.hbm [shape: bf16[64,8192], index: 1, kind: input, shape index: {}]   ;;  %s3903_s2 = inlined_call_operand.hbm [shape: f32[1,8192], index: 2, kind: input, shape index: {}]   ;;  %s3904_s3 = inlined_call_operand.vmem [shape: f32[2,8192], index: 3, kind: output, shape index: {0}]   ;;  %s3905_s4 = inlined_call_operand.vmem [shape: f32[2,2,128], index: 4, kind: output, shape index: {1}]  }
   0x1   :  { %11 = vsyncpa [#allocation5], 0 }
   0x2   :  { %13 = vsyncpa [#allocation5 + $0x1], 0  ;;  %s3126_s15 = smov 0   ;;  %s3128_s16 = smov 0  }
   0x3   :  { %s3130_s17 = smov 0   ;;  %s3132_s18 = smov 0  }
   0x4 LB: > { %s3147_s19 = sadd.s32 1, %s3091_s18   ;;  %s47_s20 = sadd.s32 1, %s3087_s17  ;;  %s3091_s18 = sphi %s3132_s18, %s3931_s18   ;;  %s3087_s17 = sphi %s3130_s17, %s3930_s17   ;;  %s3083_s16 = sphi %s3128_s16, %s3929_s16   ;;  %s3079_s15 = sphi %s3126_s15, %s3928_s15  }
   0x5   : > { %s44_s21 = ssub.s32 %s3091_s18, %s3147_s19  ;;  %p54_p0 = scmp.ne.s32.totalorder %s3087_s17, %s3083_s16 }
   0x6   : > { %p45_p1 = scmp.eq.s32.totalorder %s44_s21, 0  ;;  %p55_p2 = scmp.eq.s32.totalorder %s3091_s18, 0 }
   0x7   : > { %p2924_p3 = scmp.lt.s32.totalorder %s3091_s18, 2  ;;  %s173_s23 = sand.u32 1, %s3091_s18  }
   0x8   : > { %s3157_s22 = scalar_select %p45_p1, %s3087_s17, %s47_s20  }
   0x9   : > { %p56_p4 = por %p55_p2, %p54_p0  ;;  %s175_s24 = sand.u32 1, %s3087_s17  }
   0xa   : > { %s2743_s25 = sshll.u32 %s175_s24, 10  ;;  %s2902_s26 = sshll.u32 %s3091_s18, 11 }
   0xb   : > { %s3167_s29 = scalar_lea.hbm %s3902_s1, %s2902_s26  ;;  %s177_s30 = scalar_lea.vmem [#allocation4], %s2743_s25 }
   0xc   : > { %s184_s5 = sshll.u32 %s177_s30, 4  ;;  %p3169_p5 = pnand %p2924_p3, %p56_p4  ;;  %s3173_s5 = int_to_ptr.vmem [resolvable:$true] %s184_s5 }
   0xd   : > { %s3175_s7 = scalar_lea.sflag [#allocation5], %s173_s23  ;;  %s2965_s8 = scalar_lea.hbm %s3167_s29, 16384 }
   0xe   : > { %s3912_s6 = scalar_select %p3169_p5, 1, 0 }
   0xf   : > { %p2966_p6 = scmp.ne.s32.totalorder %s3167_s29, %s2965_s8  ;;  %p3907_p7 = pneg %p3169_p5 }
  0x10   : > { %s2970_s11 = scalar_lea.hbm %s3902_s1, 32768  ;;  %p2971_p10 = scmp.lt.u32.totalorder %s3167_s29, %s3902_s1 }
  0x11   : > { %p2968_p8 = pnand %p3907_p7, %p2966_p6  ;;  %p2972_p11 = scmp.lt.u32.totalorder %s2970_s11, %s2965_s8 }
  0x12   : > { %p2974_p13 = scmp.lt.u32.totalorder %s2965_s8, %s3167_s29 }
  0x13   : > { %p2969_p9 = pneg %p2968_p8  ;;  %p2973_p12 = por %p2972_p11, %p2971_p10 }
  0x15   : > { %p2975_p0 = por %p2974_p13, %p2973_p12 }
  0x17   : > { %p2976_p1 = pnand %p2975_p0, %p2969_p9 }
  0x19   : > { %2979 = shalt.err (!%p2976_p1)
}
  0x1a   : > { %s2980_s14 = scalar_lea.vmem %s3173_s5, 16384  ;;  %s3093_s20 = smov [#allocation4]  }
  0x1b   : > { %p2981_p2 = scmp.ne.s32.totalorder %s3173_s5, %s2980_s14  ;;  %s2985_s21 = sshll.u32 %s3093_s20, 4  ;;  %s2986_s21 = int_to_ptr.vmem [resolvable:$false] %s2985_s21 }
  0x1c   : > { %s2987_s23 = scalar_lea.vmem %s2986_s21, 32768  ;;  %p2988_p6 = scmp.lt.s32.totalorder %s3173_s5, %s2986_s21 }
  0x1d   : > { %p2983_p3 = pnand %p2981_p2, %p3907_p7  ;;  %p2989_p8 = scmp.lt.s32.totalorder %s2987_s23, %s2980_s14 }
  0x1f   : > { %p2984_p4 = pneg %p2983_p3  ;;  %p2990_p10 = por %p2989_p8, %p2988_p6 }
  0x21   : > { %p2991_p11 = pnand %p2990_p10, %p2984_p4 }
  0x23   : > { %2994 = shalt.err (!%p2991_p11)
}
  0x24   : > { %s3094_s25 = smov 4096   ;;  %s3095_s26 = smov 2048  }
  0x25   : > { %s3096_s27 = smov 128   ;;  %s3204_s28 = sadd.s32 4294967295, %s3091_s18  }
  0x26   : > { %2919 = dma.hbm_to_vmem [thread:$0]  (!%p3169_p5), %s3167_s29, 16384, %s3173_s5, %s3175_s7, %s3094_s25, %s3095_s26, %s3096_s27  }
  0x27   : > { %p60_p9 = scmp.ne.s32.totalorder %s3083_s16, %s3079_s15  ;;  %p3906_p12 = scmp.eq.s32.totalorder %s3204_s28, 0 }
  0x28   : > { %p2740_p13 = scmp.ge.s32.totalorder %s3091_s18, 1  ;;  %p149_p0 = scmp.lt.s32.totalorder %s3091_s18, 3 }
  0x29   : > { %p3213_p1 = por %p3906_p12, %p60_p9  ;;  %s3097_s29 = smov [#allocation2]  }
  0x2a   : > { %p3217_p2 = pnand %p2740_p13, %p149_p0  ;;  %s162_s5 = sshll.u32 %s3097_s29, 4  ;;  %s163_s5 = int_to_ptr.vmem [resolvable:$true] %s162_s5 }
  0x2b   : > { %s3913_s30 = scalar_select %p3213_p1, 1, 0 }
  0x2c   : > { %s3914_s8 = scalar_select %p3217_p2, 1, 0 }
  0x2d   : > { %s2746_s9 = sshll.u32 %s175_s24, 5  ;;  %p2912_p3 = pneg %p3217_p2 }
  0x2e   : > { %s2903_s15 = sshll.u32 %s3091_s18, 9  ;;  %s198_s14 = scalar_lea.vmem [#allocation6], %s2746_s9 }
  0x2f   : > { %p3228_p4 = pnand %p2912_p3, %p3906_p12  ;;  %s3235_s13 = scalar_lea.hbm %s3903_s2, %s2903_s15 }
  0x30   : > { %s206_s20 = sshll.u32 %s198_s14, 4  ;;  %s2995_s18 = scalar_lea.hbm %s3901_s0, 32  ;;  %s3237_s20 = int_to_ptr.vmem [resolvable:$true] %s206_s20 }
  0x31   : > { %p2996_p6 = scmp.ne.s32.totalorder %s3901_s0, %s2995_s18  ;;  %p2997_p8 = pneg %p3228_p4 }
  0x32   : > { %p3002_p9 = scmp.lt.u32.totalorder %s2995_s18, %s3901_s0 }
  0x33   : > { %p2998_p10 = pnand %p2997_p8, %p2996_p6 }
  0x35   : > { %p2999_p11 = pneg %p2998_p10 }
  0x37   : > { %p3004_p13 = pnand %p3002_p9, %p2999_p11 }
  0x39   : > { %3007 = shalt.err (!%p3004_p13)
}
  0x3a   : > { %s3008_s29 = scalar_lea.vmem %s163_s5, 32  ;;  %p3016_p7 = scmp.lt.s32.totalorder %s163_s5, %s163_s5 }
  0x3b   : > { %p3009_p0 = scmp.ne.s32.totalorder %s163_s5, %s3008_s29  ;;  %p3017_p1 = scmp.lt.s32.totalorder %s3008_s29, %s3008_s29 }
  0x3d   : > { %p3011_p3 = pnand %p3009_p0, %p2997_p8  ;;  %p3018_p2 = por %p3017_p1, %p3016_p7 }
  0x3f   : > { %p3012_p12 = pneg %p3011_p3 }
  0x41   : > { %p3019_p5 = pnand %p3018_p2, %p3012_p12 }
  0x43   : > { %3022 = shalt.err (!%p3019_p5)
}
  0x44   : > { %2915 = dma.hbm_to_vmem [thread:$0]  (!%p3228_p4), %s3901_s0, 32, %s163_s5, [#allocation3]  }
  0x45   : > { %s3023_s11 = scalar_lea.hbm %s3235_s13, 512  ;;  %p3916_p8 = scmp.ne.s32.totalorder %s3912_s6, 0 }
  0x46   : > { %p3024_p6 = scmp.ne.s32.totalorder %s3235_s13, %s3023_s11  ;;  %s3028_s24 = scalar_lea.hbm %s3903_s2, 1024 }
  0x47   : > { %p3917_p10 = pneg %p3916_p8  ;;  %p3029_p5 = scmp.lt.u32.totalorder %s3235_s13, %s3903_s2 }
  0x48   : > { %p3030_p7 = scmp.lt.u32.totalorder %s3028_s24, %s3023_s11  ;;  %p3032_p1 = scmp.lt.u32.totalorder %s3023_s11, %s3235_s13 }
  0x49   : > { %p3026_p11 = pnand %p3024_p6, %p3917_p10 }
  0x4a   : > { %p3031_p12 = por %p3030_p7, %p3029_p5 }
  0x4b   : > { %p3027_p9 = pneg %p3026_p11 }
  0x4c   : > { %p3033_p2 = por %p3032_p1, %p3031_p12 }
  0x4e   : > { %p3034_p13 = pnand %p3033_p2, %p3027_p9 }
  0x50   : > { %3037 = shalt.err (!%p3034_p13)
}
  0x51   : > { %s3038_s5 = scalar_lea.vmem %s3237_s20, 512  ;;  %p3918_p0 = pmov %p3917_p10 }
  0x52   : > { %p3039_p4 = scmp.ne.s32.totalorder %s3237_s20, %s3038_s5  ;;  %s3098_s18 = smov [#allocation6]  }
  0x53   : > { %s3043_s23 = sshll.u32 %s3098_s18, 4  ;;  %s3044_s23 = int_to_ptr.vmem [resolvable:$false] %s3043_s23 }
  0x54   : > { %p3041_p3 = pnand %p3039_p4, %p3918_p0  ;;  %s3045_s25 = scalar_lea.vmem %s3044_s23, 1024 }
  0x55   : > { %p3046_p10 = scmp.lt.s32.totalorder %s3237_s20, %s3044_s23  ;;  %p3047_p11 = scmp.lt.s32.totalorder %s3045_s25, %s3038_s5 }
  0x56   : > { %p3042_p6 = pneg %p3041_p3 }
  0x57   : > { %p3048_p5 = por %p3047_p11, %p3046_p10 }
  0x59   : > { %p3049_p7 = pnand %p3048_p5, %p3042_p6 }
  0x5b   : > { %3052 = shalt.err (!%p3049_p7)
}
  0x5c   : > { %2922 = dma.hbm_to_vmem [thread:$0]  (!%p3916_p8), %s3235_s13, 512, %s3237_s20, %s3175_s7  }
  0x5d   : > { %p3919_p9 = scmp.ne.s32.totalorder %s3914_s8, 0 }
  0x5e   : > { %p3920_p12 = scmp.eq.s32.totalorder (!%p3919_p9), %s3204_s28, 0 }
  0x5f   : > { %215 = sbr.rel (%p3919_p9) target bundleno = 512 (0x200), region = 32 }
  0x66   : > { %3070 = dma.done.wait (%p3920_p12), [#allocation3], 32   ;;  %p3921_p1 = pmov %p3920_p12 }
  0x67   : > { %s221_s26 = sand.u32 1, %s3204_s28   ;;  %s223_s27 = sand.u32 1, %s3083_s16  }
  0x68   : > { %3072 = vsyncadd (%p3921_p1), [#allocation3], 4294967264  ;;  %s2751_s6 = sshll.u32 %s223_s27, 10  ;;  %s222_s29 = scalar_lea.sflag [#allocation5], %s221_s26 }
  0x69   : > { %s3289_s9 = scalar_lea.vmem [#allocation4], %s2751_s6  ;;  %p3922_p8 = scmp.ne.s32.totalorder %s3913_s30, 0 }
  0x6b   : > { %3074 = dma.done.wait (%p3922_p8), %s222_s29, 16896  }
  0x6c   : > { %3076 = vsyncadd (%p3922_p8), %s222_s29, 4294950400  ;;  %v3099_v0 = vmov 0   ;;  %v283_v1 = vld [vmem:[%s3289_s9] sm:$0xff]  ;;  %v284_v3 = vld [vmem:[%s3289_s9 + $0x8] sm:$0xff]  ;;  %vm1219_vm0 = vcmask 523264   ;;  %s2752_s7 = sshll.u32 %s223_s27, 5 }
  0x6d   : > { %1255 = vmatprep.mubr.bf16.mxu0 %v3099_v0  ;;  %1296 = vmatprep.mubr.bf16.mxu1 %v3099_v0  ;;  %v299_v2 = vld [vmem:[%s3289_s9 + $0x80] sm:$0xff]  ;;  %v300_v5 = vld [vmem:[%s3289_s9 + $0x88] sm:$0xff]  ;;  %v285_v31 = vld [vmem:[%s3289_s9 + $0x10] sm:$0xff]  ;;  %s3479_s30 = scalar_lea.vmem [#allocation6], %s2752_s7  ;;  %vm2063_vm1 = vcmask 1041408   ;;  %s2753_s8 = sshll.u32 %s3204_s28, 5 }
  0x6e   : > { %v2757_v4 = vcombine.high %v283_v1, %v299_v2  ;;  %v2756_v6 = vcombine.low %v283_v1, %v299_v2  ;;  %v315_v7 = vld [vmem:[%s3289_s9 + $0x100] sm:$0xff]  ;;  %v2759_v9 = vcombine.high %v284_v3, %v300_v5  ;;  %v2758_v10 = vcombine.low %v284_v3, %v300_v5  ;;  %v316_v12 = vld [vmem:[%s3289_s9 + $0x108] sm:$0xff]  ;;  %v301_v32 = vld [vmem:[%s3289_s9 + $0x90] sm:$0xff]  ;;  %p3544_p2 = scmp.lt.s32.totalorder %s2753_s8, 63  ;;  %p276_p13 = scmp.lt.s32.totalorder %s3204_s28, 1 }
  0x6f   : > { %v331_v8 = vld [vmem:[%s3289_s9 + $0x180] sm:$0xff]  ;;  %v332_v13 = vld [vmem:[%s3289_s9 + $0x188] sm:$0xff]  ;;  %v286_v33 = vld [vmem:[%s3289_s9 + $0x18] sm:$0xff]  ;;  %v2761_v38 = vcombine.high %v285_v31, %v301_v32  ;;  %v2760_v45 = vcombine.low %v285_v31, %v301_v32 }
  0x70   : > { %v2789_v11 = vcombine.high %v315_v7, %v331_v8  ;;  %v347_v14 = vld [vmem:[%s3289_s9 + $0x200] sm:$0xff]  ;;  %1223 = vmatprep.subr.bf16.mxu0 %v2757_v4  ;;  %v2791_v15 = vcombine.high %v316_v12, %v332_v13  ;;  %v348_v17 = vld [vmem:[%s3289_s9 + $0x208] sm:$0xff]  ;;  %1264 = vmatprep.subr.bf16.mxu1 %v2759_v9  ;;  %v2788_v19 = vcombine.low %v315_v7, %v331_v8  ;;  %v302_v34 = vld [vmem:[%s3289_s9 + $0x98] sm:$0xff]  ;;  %s3933_s8 = smov (!%p3544_p2, %s2753_s8), 63  ;;  %s3935_s28 = smov (!%p276_p13, %s3204_s28), 1 }
  0x71   : > { %v363_v16 = vld [vmem:[%s3289_s9 + $0x280] sm:$0xff]  ;;  %v364_v18 = vld [vmem:[%s3289_s9 + $0x288] sm:$0xff]  ;;  %1224 = vmatpush1.bf16.msra.mxu0 %v2756_v6  ;;  %1265 = vmatpush1.bf16.msra.mxu1 %v2758_v10  ;;  %v2790_v20 = vcombine.low %v316_v12, %v332_v13  ;;  %v281_v36 = vld [vmem:[#allocation2] sm:$0x3]  ;;  %v2763_v39 = vcombine.high %v286_v33, %v302_v34  ;;  %v2762_v46 = vcombine.low %v286_v33, %v302_v34  ;;  %s2754_s20 = sshll.u32 %s3933_s8, 1  ;;  %s2755_s14 = sshll.u32 %s3935_s28, 1 }
  0x72   : > { %1225 = vmatprep.subr.bf16.mxu0 %v2789_v11  ;;  %v2821_v21 = vcombine.high %v347_v14, %v363_v16  ;;  %1266 = vmatprep.subr.bf16.mxu1 %v2791_v15  ;;  %v2823_v22 = vcombine.high %v348_v17, %v364_v18  ;;  %v379_v23 = vld [vmem:[%s3289_s9 + $0x300] sm:$0xff]  ;;  %v380_v25 = vld [vmem:[%s3289_s9 + $0x308] sm:$0xff]  ;;  %v2820_v27 = vcombine.low %v347_v14, %v363_v16  ;;  %v317_v40 = vld [vmem:[%s3289_s9 + $0x110] sm:$0xff]  ;;  %s3587_s12 = scalar_lea.vmem %s3904_s3, %s2754_s20  ;;  %s279_s21 = scalar_lea.vmem %s3905_s4, %s2755_s14 }
  0x73   : > { %v395_v24 = vld [vmem:[%s3289_s9 + $0x380] sm:$0xff]  ;;  %v396_v26 = vld [vmem:[%s3289_s9 + $0x388] sm:$0xff]  ;;  %v2822_v28 = vcombine.low %v348_v17, %v364_v18  ;;  %v333_v41 = vld [vmem:[%s3289_s9 + $0x190] sm:$0xff]  ;;  %v3319_v42 = vpack.c.bf16 %v281_v36, %v281_v36 }
  0x74   : > { %v2853_v29 = vcombine.high %v379_v23, %v395_v24  ;;  %v2855_v30 = vcombine.high %v380_v25, %v396_v26  ;;  %v2852_v35 = vcombine.low %v379_v23, %v395_v24  ;;  %v2854_v37 = vcombine.low %v380_v25, %v396_v26  ;;  %v318_v43 = vld [vmem:[%s3289_s9 + $0x118] sm:$0xff]  ;;  %v349_v49 = vld [vmem:[%s3289_s9 + $0x210] sm:$0xff]  ;;  %v287_v2 = vld [vmem:[%s3289_s9 + $0x20] sm:$0xff] }
  0x75   : > { %1226 = vmatpush1.bf16.msra.mxu0 %v2788_v19  ;;  %1267 = vmatpush1.bf16.msra.mxu1 %v2790_v20  ;;  %v334_v44 = vld [vmem:[%s3289_s9 + $0x198] sm:$0xff]  ;;  %v2793_v47 = vcombine.high %v317_v40, %v333_v41  ;;  %v365_v50 = vld [vmem:[%s3289_s9 + $0x290] sm:$0xff]  ;;  %v2792_v53 = vcombine.low %v317_v40, %v333_v41  ;;  %v303_v3 = vld [vmem:[%s3289_s9 + $0xa0] sm:$0xff] }
  0x76   : > { %1227 = vmatprep.subr.bf16.mxu0 %v2821_v21  ;;  %1268 = vmatprep.subr.bf16.mxu1 %v2823_v22  ;;  %v2795_v48 = vcombine.high %v318_v43, %v334_v44  ;;  %v350_v51 = vld [vmem:[%s3289_s9 + $0x218] sm:$0xff]  ;;  %v2794_v54 = vcombine.low %v318_v43, %v334_v44  ;;  %v2825_v55 = vcombine.high %v349_v49, %v365_v50  ;;  %v381_v57 = vld [vmem:[%s3289_s9 + $0x310] sm:$0xff]  ;;  %v288_v4 = vld [vmem:[%s3289_s9 + $0x28] sm:$0xff] }
  0x77   : > { %v366_v52 = vld [vmem:[%s3289_s9 + $0x298] sm:$0xff]  ;;  %v397_v58 = vld [vmem:[%s3289_s9 + $0x390] sm:$0xff]  ;;  %v2824_v61 = vcombine.low %v349_v49, %v365_v50  ;;  %v304_v5 = vld [vmem:[%s3289_s9 + $0xa8] sm:$0xff]  ;;  %v2765_v8 = vcombine.high %v287_v2, %v303_v3  ;;  %v2764_v14 = vcombine.low %v287_v2, %v303_v3 }
  0x78   : > { %v2827_v56 = vcombine.high %v350_v51, %v366_v52  ;;  %v382_v59 = vld [vmem:[%s3289_s9 + $0x318] sm:$0xff]  ;;  %v2826_v62 = vcombine.low %v350_v51, %v366_v52  ;;  %v2857_v63 = vcombine.high %v381_v57, %v397_v58  ;;  %v2856_v6 = vcombine.low %v381_v57, %v397_v58  ;;  %v319_v10 = vld [vmem:[%s3289_s9 + $0x120] sm:$0xff]  ;;  %v320_v12 = vld [vmem:[%s3289_s9 + $0x128] sm:$0xff] }
  0x79   : > { %1228 = vmatpush1.bf16.msra.mxu0 %v2820_v27  ;;  %1269 = vmatpush1.bf16.msra.mxu1 %v2822_v28  ;;  %v398_v60 = vld [vmem:[%s3289_s9 + $0x398] sm:$0xff]  ;;  %v2767_v9 = vcombine.high %v288_v4, %v304_v5  ;;  %v335_v11 = vld [vmem:[%s3289_s9 + $0x1a0] sm:$0xff]  ;;  %v336_v13 = vld [vmem:[%s3289_s9 + $0x1a8] sm:$0xff]  ;;  %v2766_v15 = vcombine.low %v288_v4, %v304_v5 }
  0x7a   : > { %1229 = vmatprep.subr.bf16.mxu0 %v2853_v29  ;;  %1270 = vmatprep.subr.bf16.mxu1 %v2855_v30  ;;  %v2859_v1 = vcombine.high %v382_v59, %v398_v60  ;;  %v2858_v7 = vcombine.low %v382_v59, %v398_v60  ;;  %v2797_v16 = vcombine.high %v319_v10, %v335_v11  ;;  %v351_v18 = vld [vmem:[%s3289_s9 + $0x220] sm:$0xff]  ;;  %v352_v20 = vld [vmem:[%s3289_s9 + $0x228] sm:$0xff]  ;;  %v289_v34 = vld [vmem:[%s3289_s9 + $0x30] sm:$0xff] }
  0x7b   : > { %v2799_v17 = vcombine.high %v320_v12, %v336_v13  ;;  %v367_v19 = vld [vmem:[%s3289_s9 + $0x2a0] sm:$0xff]  ;;  %v368_v21 = vld [vmem:[%s3289_s9 + $0x2a8] sm:$0xff]  ;;  %v2796_v22 = vcombine.low %v319_v10, %v335_v11  ;;  %v2798_v23 = vcombine.low %v320_v12, %v336_v13  ;;  %v290_v36 = vld [vmem:[%s3289_s9 + $0x38] sm:$0xff] }
  0x7c   : > { %v2829_v24 = vcombine.high %v351_v18, %v367_v19  ;;  %v2831_v25 = vcombine.high %v352_v20, %v368_v21  ;;  %v383_v26 = vld [vmem:[%s3289_s9 + $0x320] sm:$0xff]  ;;  %v384_v28 = vld [vmem:[%s3289_s9 + $0x328] sm:$0xff]  ;;  %v2828_v30 = vcombine.low %v351_v18, %v367_v19  ;;  %v2830_v31 = vcombine.low %v352_v20, %v368_v21  ;;  %v321_v43 = vld [vmem:[%s3289_s9 + $0x130] sm:$0xff] }
  0x7d   : > { %1230 = vmatpush1.bf16.msra.mxu0 %v2852_v35  ;;  %1271 = vmatpush1.bf16.msra.mxu1 %v2854_v37  ;;  %v399_v27 = vld [vmem:[%s3289_s9 + $0x3a0] sm:$0xff]  ;;  %v400_v29 = vld [vmem:[%s3289_s9 + $0x3a8] sm:$0xff]  ;;  %v305_v35 = vld [vmem:[%s3289_s9 + $0xb0] sm:$0xff] }
  0x7e   : > { %1305 = vmatprep.subr.bf16.mxu0 %v2761_v38  ;;  %1346 = vmatprep.subr.bf16.mxu1 %v2763_v39  ;;  %v2861_v32 = vcombine.high %v383_v26, %v399_v27  ;;  %v2863_v33 = vcombine.high %v384_v28, %v400_v29  ;;  %v306_v37 = vld [vmem:[%s3289_s9 + $0xb8] sm:$0xff]  ;;  %v2860_v38 = vcombine.low %v383_v26, %v399_v27  ;;  %v337_v44 = vld [vmem:[%s3289_s9 + $0x1b0] sm:$0xff]  ;;  %v291_v4 = vld [vmem:[%s3289_s9 + $0x40] sm:$0xff] }
  0x7f   : > { %v2862_v39 = vcombine.low %v384_v28, %v400_v29  ;;  %v2769_v40 = vcombine.high %v289_v34, %v305_v35  ;;  %v2771_v41 = vcombine.high %v290_v36, %v306_v37  ;;  %v2801_v49 = vcombine.high %v321_v43, %v337_v44  ;;  %v353_v51 = vld [vmem:[%s3289_s9 + $0x230] sm:$0xff]  ;;  %v307_v5 = vld [vmem:[%s3289_s9 + $0xc0] sm:$0xff] }
  0x80   : > { %2884 = vmatmul.mubr.msk.bf16.vlgmr.msra.gmra.mrb[0].mxu0 %vm1219_vm0, %v3319_v42  ;;  %2885 = vmatmul.mubr.msk.bf16.vlgmr.msra.gmra.mrb[0].mxu1 %vm1219_vm0, %v3319_v42  ;;  %v369_v52 = vld [vmem:[%s3289_s9 + $0x2b0] sm:$0xff]  ;;  %v2773_v10 = vcombine.high %v291_v4, %v307_v5  ;;  %v323_v12 = vld [vmem:[%s3289_s9 + $0x140] sm:$0xff] }
  0x81   : > { %1306 = vmatpush1.bf16.msra.mxu0 %v2760_v45  ;;  %1347 = vmatpush1.bf16.msra.mxu1 %v2762_v46  ;;  %v322_v45 = vld [vmem:[%s3289_s9 + $0x138] sm:$0xff]  ;;  %v2833_v57 = vcombine.high %v353_v51, %v369_v52  ;;  %v385_v59 = vld [vmem:[%s3289_s9 + $0x330] sm:$0xff]  ;;  %v339_v13 = vld [vmem:[%s3289_s9 + $0x1c0] sm:$0xff] }
  0x82   : > { %1307 = vmatprep.subr.bf16.mxu0 %v2793_v47  ;;  %1348 = vmatprep.subr.bf16.mxu1 %v2795_v48  ;;  %v338_v46 = vld [vmem:[%s3289_s9 + $0x1b8] sm:$0xff]  ;;  %v2768_v47 = vcombine.low %v289_v34, %v305_v35  ;;  %v2770_v48 = vcombine.low %v290_v36, %v306_v37  ;;  %v401_v60 = vld [vmem:[%s3289_s9 + $0x3b0] sm:$0xff]  ;;  %v2805_v18 = vcombine.high %v323_v12, %v339_v13  ;;  %v355_v20 = vld [vmem:[%s3289_s9 + $0x240] sm:$0xff] }
  0x83   : > { %1337 = vmatprep.mubr.bf16.mxu0 %v3099_v0  ;;  %1378 = vmatprep.mubr.bf16.mxu1 %v3099_v0  ;;  %v2803_v50 = vcombine.high %v322_v45, %v338_v46  ;;  %v2865_v2 = vcombine.high %v385_v59, %v401_v60  ;;  %v371_v21 = vld [vmem:[%s3289_s9 + $0x2c0] sm:$0xff]  ;;  %v293_v36 = vld [vmem:[%s3289_s9 + $0x50] sm:$0xff] }
  0x84   : > { %v2837_v26 = vcombine.high %v355_v20, %v371_v21  ;;  %v387_v28 = vld [vmem:[%s3289_s9 + $0x340] sm:$0xff]  ;;  %v309_v37 = vld [vmem:[%s3289_s9 + $0xd0] sm:$0xff] }
  0x85   : > { %1308 = vmatpush1.bf16.msra.mxu0 %v2792_v53  ;;  %1349 = vmatpush1.bf16.msra.mxu1 %v2794_v54  ;;  %v354_v53 = vld [vmem:[%s3289_s9 + $0x238] sm:$0xff]  ;;  %v403_v29 = vld [vmem:[%s3289_s9 + $0x3c0] sm:$0xff] }
  0x86   : > { %1309 = vmatprep.subr.bf16.mxu0 %v2825_v55  ;;  %1350 = vmatprep.subr.bf16.mxu1 %v2827_v56  ;;  %v370_v54 = vld [vmem:[%s3289_s9 + $0x2b8] sm:$0xff]  ;;  %v2800_v55 = vcombine.low %v321_v43, %v337_v44  ;;  %v2802_v56 = vcombine.low %v322_v45, %v338_v46  ;;  %v2869_v34 = vcombine.high %v387_v28, %v403_v29  ;;  %v325_v45 = vld [vmem:[%s3289_s9 + $0x150] sm:$0xff] }
  0x87   : > { %v2835_v58 = vcombine.high %v354_v53, %v370_v54  ;;  %v2777_v43 = vcombine.high %v293_v36, %v309_v37  ;;  %v341_v46 = vld [vmem:[%s3289_s9 + $0x1d0] sm:$0xff] }
  0x89   : > { %1310 = vmatpush1.bf16.msra.mxu0 %v2824_v61  ;;  %1351 = vmatpush1.bf16.msra.mxu1 %v2826_v62  ;;  %v386_v61 = vld [vmem:[%s3289_s9 + $0x338] sm:$0xff] }
  0x8a   : > { %1311 = vmatprep.subr.bf16.mxu0 %v2857_v63  ;;  %1352 = vmatprep.subr.bf16.mxu1 %v2859_v1  ;;  %v402_v62 = vld [vmem:[%s3289_s9 + $0x3b8] sm:$0xff]  ;;  %v2832_v63 = vcombine.low %v353_v51, %v369_v52  ;;  %v2834_v1 = vcombine.low %v354_v53, %v370_v54  ;;  %v2809_v51 = vcombine.high %v325_v45, %v341_v46  ;;  %v357_v53 = vld [vmem:[%s3289_s9 + $0x250] sm:$0xff] }
  0x8b   : > { %v2867_v3 = vcombine.high %v386_v61, %v402_v62  ;;  %v373_v54 = vld [vmem:[%s3289_s9 + $0x2d0] sm:$0xff] }
  0x8d   : > { %1312 = vmatpush1.bf16.msra.mxu0 %v2856_v6  ;;  %1353 = vmatpush1.bf16.msra.mxu1 %v2858_v7  ;;  %v292_v6 = vld [vmem:[%s3289_s9 + $0x48] sm:$0xff] }
  0x8e   : > { %1387 = vmatprep.subr.bf16.mxu0 %v2765_v8  ;;  %1428 = vmatprep.subr.bf16.mxu1 %v2767_v9  ;;  %v308_v7 = vld [vmem:[%s3289_s9 + $0xc8] sm:$0xff]  ;;  %v2864_v8 = vcombine.low %v385_v59, %v401_v60  ;;  %v2866_v9 = vcombine.low %v386_v61, %v402_v62  ;;  %v2841_v59 = vcombine.high %v357_v53, %v373_v54  ;;  %v389_v61 = vld [vmem:[%s3289_s9 + $0x350] sm:$0xff] }
  0x8f   : > { %v2775_v11 = vcombine.high %v292_v6, %v308_v7  ;;  %v405_v62 = vld [vmem:[%s3289_s9 + $0x3d0] sm:$0xff] }
  0x90   : > { %2886 = vmatmul.mubr.msk.bf16.vlgmr.msra.gmra.mrb[4].mxu0 %vm1219_vm0, %v3319_v42  ;;  %2887 = vmatmul.mubr.msk.bf16.vlgmr.msra.gmra.mrb[4].mxu1 %vm1219_vm0, %v3319_v42 }
  0x91   : > { %1388 = vmatpush1.bf16.msra.mxu0 %v2764_v14  ;;  %1429 = vmatpush1.bf16.msra.mxu1 %v2766_v15  ;;  %v324_v14 = vld [vmem:[%s3289_s9 + $0x148] sm:$0xff] }
  0x92   : > { %1389 = vmatprep.subr.bf16.mxu0 %v2797_v16  ;;  %1430 = vmatprep.subr.bf16.mxu1 %v2799_v17  ;;  %v340_v15 = vld [vmem:[%s3289_s9 + $0x1c8] sm:$0xff]  ;;  %v2772_v16 = vcombine.low %v291_v4, %v307_v5  ;;  %v2774_v17 = vcombine.low %v292_v6, %v308_v7  ;;  %v2873_v4 = vcombine.high %v389_v61, %v405_v62  ;;  %v295_v6 = vld [vmem:[%s3289_s9 + $0x60] sm:$0xff] }
  0x93   : > { %1419 = vmatprep.mubr.bf16.mxu0 %v3099_v0  ;;  %1460 = vmatprep.mubr.bf16.mxu1 %v3099_v0  ;;  %v2807_v19 = vcombine.high %v324_v14, %v340_v15  ;;  %v311_v7 = vld [vmem:[%s3289_s9 + $0xe0] sm:$0xff] }
  0x95   : > { %1390 = vmatpush1.bf16.msra.mxu0 %v2796_v22  ;;  %1431 = vmatpush1.bf16.msra.mxu1 %v2798_v23  ;;  %v356_v22 = vld [vmem:[%s3289_s9 + $0x248] sm:$0xff] }
  0x96   : > { %1391 = vmatprep.subr.bf16.mxu0 %v2829_v24  ;;  %1432 = vmatprep.subr.bf16.mxu1 %v2831_v25  ;;  %v372_v23 = vld [vmem:[%s3289_s9 + $0x2c8] sm:$0xff]  ;;  %v2804_v24 = vcombine.low %v323_v12, %v339_v13  ;;  %v2806_v25 = vcombine.low %v324_v14, %v340_v15  ;;  %v2781_v12 = vcombine.high %v295_v6, %v311_v7  ;;  %v327_v14 = vld [vmem:[%s3289_s9 + $0x160] sm:$0xff] }
  0x97   : > { %v2839_v27 = vcombine.high %v356_v22, %v372_v23  ;;  %v343_v15 = vld [vmem:[%s3289_s9 + $0x1e0] sm:$0xff] }
  0x99   : > { %1392 = vmatpush1.bf16.msra.mxu0 %v2828_v30  ;;  %1433 = vmatpush1.bf16.msra.mxu1 %v2830_v31  ;;  %v388_v30 = vld [vmem:[%s3289_s9 + $0x348] sm:$0xff] }
  0x9a   : > { %1393 = vmatprep.subr.bf16.mxu0 %v2861_v32  ;;  %1434 = vmatprep.subr.bf16.mxu1 %v2863_v33  ;;  %v404_v31 = vld [vmem:[%s3289_s9 + $0x3c8] sm:$0xff]  ;;  %v2836_v32 = vcombine.low %v355_v20, %v371_v21  ;;  %v2838_v33 = vcombine.low %v356_v22, %v372_v23  ;;  %v2813_v20 = vcombine.high %v327_v14, %v343_v15  ;;  %v359_v22 = vld [vmem:[%s3289_s9 + $0x260] sm:$0xff] }
  0x9b   : > { %v2871_v35 = vcombine.high %v388_v30, %v404_v31  ;;  %v375_v23 = vld [vmem:[%s3289_s9 + $0x2e0] sm:$0xff] }
  0x9d   : > { %1394 = vmatpush1.bf16.msra.mxu0 %v2860_v38  ;;  %1435 = vmatpush1.bf16.msra.mxu1 %v2862_v39  ;;  %v294_v38 = vld [vmem:[%s3289_s9 + $0x58] sm:$0xff] }
  0x9e   : > { %1469 = vmatprep.subr.bf16.mxu0 %v2769_v40  ;;  %1510 = vmatprep.subr.bf16.mxu1 %v2771_v41  ;;  %v310_v39 = vld [vmem:[%s3289_s9 + $0xd8] sm:$0xff]  ;;  %v2868_v40 = vcombine.low %v387_v28, %v403_v29  ;;  %v2870_v41 = vcombine.low %v388_v30, %v404_v31  ;;  %v2845_v28 = vcombine.high %v359_v22, %v375_v23  ;;  %v391_v30 = vld [vmem:[%s3289_s9 + $0x360] sm:$0xff] }
  0x9f   : > { %v2779_v44 = vcombine.high %v294_v38, %v310_v39  ;;  %v407_v31 = vld [vmem:[%s3289_s9 + $0x3e0] sm:$0xff] }
  0xa0   : > { %2888 = vmatmul.mubr.msk.bf16.vlgmr.msra.gmra.mrb[8].mxu0 %vm1219_vm0, %v3319_v42  ;;  %2889 = vmatmul.mubr.msk.bf16.vlgmr.msra.gmra.mrb[8].mxu1 %vm1219_vm0, %v3319_v42 }
  0xa1   : > { %1470 = vmatpush1.bf16.msra.mxu0 %v2768_v47  ;;  %1511 = vmatpush1.bf16.msra.mxu1 %v2770_v48  ;;  %v326_v47 = vld [vmem:[%s3289_s9 + $0x158] sm:$0xff] }
  0xa2   : > { %1471 = vmatprep.subr.bf16.mxu0 %v2801_v49  ;;  %1512 = vmatprep.subr.bf16.mxu1 %v2803_v50  ;;  %v342_v48 = vld [vmem:[%s3289_s9 + $0x1d8] sm:$0xff]  ;;  %v2776_v49 = vcombine.low %v293_v36, %v309_v37  ;;  %v2778_v50 = vcombine.low %v294_v38, %v310_v39  ;;  %v2877_v36 = vcombine.high %v391_v30, %v407_v31  ;;  %v297_v38 = vld [vmem:[%s3289_s9 + $0x70] sm:$0xff] }
  0xa3   : > { %1501 = vmatprep.mubr.bf16.mxu0 %v3099_v0  ;;  %1542 = vmatprep.mubr.bf16.mxu1 %v3099_v0  ;;  %v2811_v52 = vcombine.high %v326_v47, %v342_v48  ;;  %v313_v39 = vld [vmem:[%s3289_s9 + $0xf0] sm:$0xff] }
  0xa5   : > { %1472 = vmatpush1.bf16.msra.mxu0 %v2800_v55  ;;  %1513 = vmatpush1.bf16.msra.mxu1 %v2802_v56  ;;  %v358_v55 = vld [vmem:[%s3289_s9 + $0x258] sm:$0xff] }
  0xa6   : > { %1473 = vmatprep.subr.bf16.mxu0 %v2833_v57  ;;  %1514 = vmatprep.subr.bf16.mxu1 %v2835_v58  ;;  %v374_v56 = vld [vmem:[%s3289_s9 + $0x2d8] sm:$0xff]  ;;  %v2808_v57 = vcombine.low %v325_v45, %v341_v46  ;;  %v2810_v58 = vcombine.low %v326_v47, %v342_v48  ;;  %v2785_v45 = vcombine.high %v297_v38, %v313_v39  ;;  %v329_v47 = vld [vmem:[%s3289_s9 + $0x170] sm:$0xff] }
  0xa7   : > { %v2843_v60 = vcombine.high %v358_v55, %v374_v56  ;;  %v345_v48 = vld [vmem:[%s3289_s9 + $0x1f0] sm:$0xff] }
  0xa9   : > { %1474 = vmatpush1.bf16.msra.mxu0 %v2832_v63  ;;  %1515 = vmatpush1.bf16.msra.mxu1 %v2834_v1  ;;  %v390_v63 = vld [vmem:[%s3289_s9 + $0x358] sm:$0xff] }
  0xaa   : > { %1475 = vmatprep.subr.bf16.mxu0 %v2865_v2  ;;  %1516 = vmatprep.subr.bf16.mxu1 %v2867_v3  ;;  %v406_v1 = vld [vmem:[%s3289_s9 + $0x3d8] sm:$0xff]  ;;  %v2840_v2 = vcombine.low %v357_v53, %v373_v54  ;;  %v2842_v3 = vcombine.low %v358_v55, %v374_v56  ;;  %v2817_v53 = vcombine.high %v329_v47, %v345_v48  ;;  %v361_v55 = vld [vmem:[%s3289_s9 + $0x270] sm:$0xff] }
  0xab   : > { %v2875_v5 = vcombine.high %v390_v63, %v406_v1  ;;  %v377_v56 = vld [vmem:[%s3289_s9 + $0x2f0] sm:$0xff] }
  0xad   : > { %1476 = vmatpush1.bf16.msra.mxu0 %v2864_v8  ;;  %1517 = vmatpush1.bf16.msra.mxu1 %v2866_v9  ;;  %v296_v8 = vld [vmem:[%s3289_s9 + $0x68] sm:$0xff] }
  0xae   : > { %1551 = vmatprep.subr.bf16.mxu0 %v2773_v10  ;;  %1592 = vmatprep.subr.bf16.mxu1 %v2775_v11  ;;  %v312_v9 = vld [vmem:[%s3289_s9 + $0xe8] sm:$0xff]  ;;  %v2872_v10 = vcombine.low %v389_v61, %v405_v62  ;;  %v2874_v11 = vcombine.low %v390_v63, %v406_v1  ;;  %v2849_v61 = vcombine.high %v361_v55, %v377_v56  ;;  %v393_v63 = vld [vmem:[%s3289_s9 + $0x370] sm:$0xff] }
  0xaf   : > { %v2783_v13 = vcombine.high %v296_v8, %v312_v9  ;;  %v409_v1 = vld [vmem:[%s3289_s9 + $0x3f0] sm:$0xff] }
  0xb0   : > { %2890 = vmatmul.mubr.msk.bf16.vlgmr.msra.gmra.mrb[12].mxu0 %vm1219_vm0, %v3319_v42  ;;  %2891 = vmatmul.mubr.msk.bf16.vlgmr.msra.gmra.mrb[12].mxu1 %vm1219_vm0, %v3319_v42 }
  0xb1   : > { %1552 = vmatpush1.bf16.msra.mxu0 %v2772_v16  ;;  %1593 = vmatpush1.bf16.msra.mxu1 %v2774_v17  ;;  %v328_v16 = vld [vmem:[%s3289_s9 + $0x168] sm:$0xff] }
  0xb2   : > { %1553 = vmatprep.subr.bf16.mxu0 %v2805_v18  ;;  %1594 = vmatprep.subr.bf16.mxu1 %v2807_v19  ;;  %v344_v17 = vld [vmem:[%s3289_s9 + $0x1e8] sm:$0xff]  ;;  %v2780_v18 = vcombine.low %v295_v6, %v311_v7  ;;  %v2782_v19 = vcombine.low %v296_v8, %v312_v9  ;;  %v2881_v6 = vcombine.high %v393_v63, %v409_v1 }
  0xb3   : > { %1583 = vmatprep.mubr.bf16.mxu0 %v3099_v0  ;;  %1624 = vmatprep.mubr.bf16.mxu1 %v3099_v0  ;;  %v2815_v21 = vcombine.high %v328_v16, %v344_v17  ;;  %v2880_v8 = vcombine.low %v393_v63, %v409_v1 }
  0xb5   : > { %1554 = vmatpush1.bf16.msra.mxu0 %v2804_v24  ;;  %1595 = vmatpush1.bf16.msra.mxu1 %v2806_v25  ;;  %v360_v24 = vld [vmem:[%s3289_s9 + $0x268] sm:$0xff] }
  0xb6   : > { %1555 = vmatprep.subr.bf16.mxu0 %v2837_v26  ;;  %1596 = vmatprep.subr.bf16.mxu1 %v2839_v27  ;;  %v376_v25 = vld [vmem:[%s3289_s9 + $0x2e8] sm:$0xff]  ;;  %v2812_v26 = vcombine.low %v327_v14, %v343_v15  ;;  %v2814_v27 = vcombine.low %v328_v16, %v344_v17  ;;  %v3482_v15 = vld [vmem:[%s3479_s30] sm:$0xff] }
  0xb7   : > { %v2847_v29 = vcombine.high %v360_v24, %v376_v25 }
  0xb9   : > { %1556 = vmatpush1.bf16.msra.mxu0 %v2836_v32  ;;  %1597 = vmatpush1.bf16.msra.mxu1 %v2838_v33  ;;  %v392_v32 = vld [vmem:[%s3289_s9 + $0x368] sm:$0xff] }
  0xba   : > { %1557 = vmatprep.subr.bf16.mxu0 %v2869_v34  ;;  %1598 = vmatprep.subr.bf16.mxu1 %v2871_v35  ;;  %v408_v33 = vld [vmem:[%s3289_s9 + $0x3e8] sm:$0xff]  ;;  %v2844_v34 = vcombine.low %v359_v22, %v375_v23  ;;  %v2846_v35 = vcombine.low %v360_v24, %v376_v25 }
  0xbb   : > { %v2879_v37 = vcombine.high %v392_v32, %v408_v33  ;;  %v3497_v22 = vld [vmem:[%s3479_s30 + $0x8] sm:$0xff] }
  0xbd   : > { %1558 = vmatpush1.bf16.msra.mxu0 %v2868_v40  ;;  %1599 = vmatpush1.bf16.msra.mxu1 %v2870_v41  ;;  %v298_v40 = vld [vmem:[%s3289_s9 + $0x78] sm:$0xff] }
  0xbe   : > { %1633 = vmatprep.subr.bf16.mxu0 %v2777_v43  ;;  %1674 = vmatprep.subr.bf16.mxu1 %v2779_v44  ;;  %v314_v41 = vld [vmem:[%s3289_s9 + $0xf8] sm:$0xff]  ;;  %v2876_v43 = vcombine.low %v391_v30, %v407_v31  ;;  %v2878_v44 = vcombine.low %v392_v32, %v408_v33 }
  0xbf   : > { %v2787_v46 = vcombine.high %v298_v40, %v314_v41 }
  0xc0   : > { %2892 = vmatmul.mubr.msk.bf16.vlgmr.msra.gmra.mrb[16].mxu0 %vm1219_vm0, %v3319_v42  ;;  %2893 = vmatmul.mubr.msk.bf16.vlgmr.msra.gmra.mrb[16].mxu1 %vm1219_vm0, %v3319_v42 }
  0xc1   : > { %1634 = vmatpush1.bf16.msra.mxu0 %v2776_v49  ;;  %1675 = vmatpush1.bf16.msra.mxu1 %v2778_v50  ;;  %v330_v49 = vld [vmem:[%s3289_s9 + $0x178] sm:$0xff] }
  0xc2   : > { %1635 = vmatprep.subr.bf16.mxu0 %v2809_v51  ;;  %1676 = vmatprep.subr.bf16.mxu1 %v2811_v52  ;;  %v346_v50 = vld [vmem:[%s3289_s9 + $0x1f8] sm:$0xff]  ;;  %v2784_v51 = vcombine.low %v297_v38, %v313_v39  ;;  %v2786_v52 = vcombine.low %v298_v40, %v314_v41 }
  0xc3   : > { %1665 = vmatprep.mubr.bf16.mxu0 %v3099_v0  ;;  %1706 = vmatprep.mubr.bf16.mxu1 %v3099_v0  ;;  %v2819_v54 = vcombine.high %v330_v49, %v346_v50 }
  0xc5   : > { %1636 = vmatpush1.bf16.msra.mxu0 %v2808_v57  ;;  %1677 = vmatpush1.bf16.msra.mxu1 %v2810_v58  ;;  %v362_v57 = vld [vmem:[%s3289_s9 + $0x278] sm:$0xff] }
  0xc6   : > { %1637 = vmatprep.subr.bf16.mxu0 %v2841_v59  ;;  %1678 = vmatprep.subr.bf16.mxu1 %v2843_v60  ;;  %v378_v58 = vld [vmem:[%s3289_s9 + $0x2f8] sm:$0xff]  ;;  %v2816_v59 = vcombine.low %v329_v47, %v345_v48  ;;  %v2818_v60 = vcombine.low %v330_v49, %v346_v50 }
  0xc7   : > { %v2851_v62 = vcombine.high %v362_v57, %v378_v58 }
  0xc9   : > { %1638 = vmatpush1.bf16.msra.mxu0 %v2840_v2  ;;  %1679 = vmatpush1.bf16.msra.mxu1 %v2842_v3  ;;  %v394_v2 = vld [vmem:[%s3289_s9 + $0x378] sm:$0xff] }
  0xca   : > { %1639 = vmatprep.subr.bf16.mxu0 %v2873_v4  ;;  %1680 = vmatprep.subr.bf16.mxu1 %v2875_v5  ;;  %v410_v3 = vld [vmem:[%s3289_s9 + $0x3f8] sm:$0xff]  ;;  %v2848_v4 = vcombine.low %v361_v55, %v377_v56  ;;  %v2850_v5 = vcombine.low %v362_v57, %v378_v58 }
  0xcb   : > { %v2883_v7 = vcombine.high %v394_v2, %v410_v3  ;;  %v2882_v9 = vcombine.low %v394_v2, %v410_v3 }
  0xcd   : > { %1640 = vmatpush1.bf16.msra.mxu0 %v2872_v10  ;;  %1681 = vmatpush1.bf16.msra.mxu1 %v2874_v11  ;;  %v3100_v11 = vmov 1983009808  }
  0xce   : > { %1715 = vmatprep.subr.bf16.mxu0 %v2781_v12  ;;  %1756 = vmatprep.subr.bf16.mxu1 %v2783_v13  ;;  %v1914_v12 = vunpack.c.l.s4 %v3100_v11 }
  0xd0   : > { %2894 = vmatmul.mubr.msk.bf16.vlgmr.msra.gmra.mrb[20].mxu0 %vm1219_vm0, %v3319_v42  ;;  %2895 = vmatmul.mubr.msk.bf16.vlgmr.msra.gmra.mrb[20].mxu1 %vm1219_vm0, %v3319_v42 }
  0xd1   : > { %1716 = vmatpush1.bf16.msra.mxu0 %v2780_v18  ;;  %1757 = vmatpush1.bf16.msra.mxu1 %v2782_v19 }
  0xd2   : > { %1717 = vmatprep.subr.bf16.mxu0 %v2813_v20  ;;  %1758 = vmatprep.subr.bf16.mxu1 %v2815_v21 }
  0xd3   : > { %1747 = vmatprep.mubr.bf16.mxu0 %v3099_v0  ;;  %1788 = vmatprep.mubr.bf16.mxu1 %v3099_v0 }
  0xd5   : > { %1718 = vmatpush1.bf16.msra.mxu0 %v2812_v26  ;;  %1759 = vmatpush1.bf16.msra.mxu1 %v2814_v27 }
  0xd6   : > { %1719 = vmatprep.subr.bf16.mxu0 %v2845_v28  ;;  %1760 = vmatprep.subr.bf16.mxu1 %v2847_v29  ;;  %v3512_v29 = vld [vmem:[%s3479_s30 + $0x10] sm:$0xff] }
  0xd9   : > { %1720 = vmatpush1.bf16.msra.mxu0 %v2844_v34  ;;  %1761 = vmatpush1.bf16.msra.mxu1 %v2846_v35 }
  0xda   : > { %1721 = vmatprep.subr.bf16.mxu0 %v2877_v36  ;;  %1762 = vmatprep.subr.bf16.mxu1 %v2879_v37 }
  0xdd   : > { %1722 = vmatpush1.bf16.msra.mxu0 %v2876_v43  ;;  %1763 = vmatpush1.bf16.msra.mxu1 %v2878_v44  ;;  %v3540_v43 = vld [vmem:[%s3479_s30 + $0x18] sm:$0xff] }
  0xde   : > { %1797 = vmatprep.subr.bf16.mxu0 %v2785_v45  ;;  %1838 = vmatprep.subr.bf16.mxu1 %v2787_v46 }
  0xe0   : > { %2896 = vmatmul.mubr.msk.bf16.vlgmr.msra.gmra.mrb[24].mxu0 %vm1219_vm0, %v3319_v42  ;;  %2897 = vmatmul.mubr.msk.bf16.vlgmr.msra.gmra.mrb[24].mxu1 %vm1219_vm0, %v3319_v42 }
  0xe1   : > { %1798 = vmatpush1.bf16.msra.mxu0 %v2784_v51  ;;  %1839 = vmatpush1.bf16.msra.mxu1 %v2786_v52 }
  0xe2   : > { %1799 = vmatprep.subr.bf16.mxu0 %v2817_v53  ;;  %1840 = vmatprep.subr.bf16.mxu1 %v2819_v54 }
  0xe3   : > { %1829 = vmatprep.mubr.bf16.mxu0 %v3099_v0  ;;  %1870 = vmatprep.mubr.bf16.mxu1 %v3099_v0  ;;  %v419_v0 = vlaneseq }
  0xe5   : > { %1800 = vmatpush1.bf16.msra.mxu0 %v2816_v59  ;;  %1841 = vmatpush1.bf16.msra.mxu1 %v2818_v60  ;;  %v420_v10 = vshrl.u32 %v419_v0, 7 }
  0xe6   : > { %1801 = vmatprep.subr.bf16.mxu0 %v2849_v61  ;;  %1842 = vmatprep.subr.bf16.mxu1 %v2851_v62 }
  0xe7   : > { %v3475_v13 = vsub.s32 0, %v420_v10  ;;  %v3477_v14 = vsub.s32 2, %v420_v10  ;;  %v3484_v16 = vsub.s32 1, %v420_v10  ;;  %v3486_v17 = vsub.s32 3, %v420_v10 }
  0xe8   : > { %v3488_v18 = vsub.s32 4, %v420_v10  ;;  %v3490_v19 = vsub.s32 6, %v420_v10  ;;  %v3492_v20 = vsub.s32 5, %v420_v10  ;;  %v3494_v21 = vsub.s32 7, %v420_v10 }
  0xe9   : > { %1802 = vmatpush1.bf16.msra.mxu0 %v2848_v4  ;;  %1843 = vmatpush1.bf16.msra.mxu1 %v2850_v5  ;;  %v422_v23 = vrot.slane %v3482_v15, %v3475_v13  ;;  %v430_v24 = vrot.slane %v3482_v15, %v3477_v14  ;;  %v426_v25 = vrot.slane %v3482_v15, %v3484_v16 }
  0xea   : > { %1803 = vmatprep.subr.bf16.mxu0 %v2881_v6  ;;  %1844 = vmatprep.subr.bf16.mxu1 %v2883_v7  ;;  %v434_v27 = vrot.slane %v3482_v15, %v3486_v17  ;;  %v438_v28 = vrot.slane %v3482_v15, %v3488_v18  ;;  %v446_v30 = vrot.slane %v3482_v15, %v3490_v19 }
  0xeb   : > { %v442_v31 = vrot.slane %v3482_v15, %v3492_v20  ;;  %v450_v32 = vrot.slane %v3482_v15, %v3494_v21  ;;  %v454_v33 = vrot.slane %v3497_v22, %v3475_v13  ;;  %v462_v34 = vrot.slane %v3497_v22, %v3477_v14 }
  0xec   : > { %v458_v35 = vrot.slane %v3497_v22, %v3484_v16  ;;  %v466_v36 = vrot.slane %v3497_v22, %v3486_v17  ;;  %v470_v37 = vrot.slane %v3497_v22, %v3488_v18  ;;  %v478_v38 = vrot.slane %v3497_v22, %v3490_v19 }
  0xed   : > { %1804 = vmatpush1.bf16.msra.mxu0 %v2880_v8  ;;  %1845 = vmatpush1.bf16.msra.mxu1 %v2882_v9  ;;  %v474_v39 = vrot.slane %v3497_v22, %v3492_v20  ;;  %v482_v40 = vrot.slane %v3497_v22, %v3494_v21  ;;  %v486_v41 = vrot.slane %v3512_v29, %v3475_v13 }
  0xee   : > { %v494_v45 = vrot.slane %v3512_v29, %v3477_v14  ;;  %v490_v46 = vrot.slane %v3512_v29, %v3484_v16  ;;  %v498_v47 = vrot.slane %v3512_v29, %v3486_v17  ;;  %v502_v48 = vrot.slane %v3512_v29, %v3488_v18 }
  0xef   : > { %v510_v52 = vrot.slane %v3512_v29, %v3490_v19  ;;  %v506_v53 = vrot.slane %v3512_v29, %v3492_v20 }
  0xf0   : > { %2898 = vmatmul.mubr.msk.bf16.vlgmr.msra.gmra.mrb[28].mxu0 %vm1219_vm0, %v3319_v42  ;;  %2899 = vmatmul.mubr.msk.bf16.vlgmr.msra.gmra.mrb[28].mxu1 %vm1219_vm0, %v3319_v42  ;;  %v1915_v42 = vunpack.c.0.s8 %v1914_v12 }
  0xf2   : > { %v3505_v26 = vsub.s32 %v1915_v42, %v420_v10 }
 0x153   : > { %v1257_v44 = vpop.f32.mrb[0].mxu0  ;;  %v1298_v50 = vpop.f32.mrb[0].mxu1 }
 0x154   : > { %v1258_v49 = vadd.f32 %v1257_v44, %v422_v23  ;;  %v1259_v51 = vpop.f32.mrb[1].mxu0  ;;  %v1299_v55 = vadd.f32 %v1298_v50, %v430_v24  ;;  %v1300_v57 = vpop.f32.mrb[1].mxu1 }
 0x155   : > { %v1260_v56 = vadd.f32 %v1259_v51, %v426_v25  ;;  %v1261_v58 = vpop.f32.mrb[2].mxu0  ;;  %v1301_v63 = vadd.f32 %v1300_v57, %v434_v27  ;;  %v1302_v1 = vpop.f32.mrb[2].mxu1 }
 0x156   : > { %v2064_v61 = vsel %vm2063_vm1, %v1258_v49, 0.0  ;;  %v2288_v62 = vmul.f32 %v1258_v49, %v1258_v49  ;;  %v1262_v2 = vpop.f32.mrb[3].mxu0  ;;  %v2078_v5 = vsel %vm2063_vm1, %v1299_v55, 0.0  ;;  %v2290_v6 = vmul.f32 %v1299_v55, %v1299_v55  ;;  %v1303_v8 = vpop.f32.mrb[3].mxu1 }
 0x157   : > { %v2065_v4 = vrot.slane %v2064_v61, 4  ;;  %v1911_v7 = vcombine.low %v1258_v49, %v1260_v56  ;;  %v2079_v0 = vrot.slane %v2078_v5, 4  ;;  %v2071_v10 = vsel %vm2063_vm1, %v1260_v56, 0.0 }
 0x158   : > { %v2320_v9 = vsel %vm2063_vm1, %v2288_v62, 0.0  ;;  %v2289_v11 = vmul.f32 %v1260_v56, %v1260_v56  ;;  %v2334_v23 = vsel %vm2063_vm1, %v2290_v6, 0.0  ;;  %v2072_v44 = vrot.slane %v2071_v10, 4 }
 0x159   : > { %v2066_v12 = vadd.f32 %v2065_v4, %v2064_v61  ;;  %v2321_v42 = vrot.slane %v2320_v9, 4  ;;  %v1919_v24 = vrot.slane %v1911_v7, %v3505_v26  ;;  %v2080_v25 = vadd.f32 %v2079_v0, %v2078_v5 }
 0x15a   : > { %v2335_v27 = vrot.slane %v2334_v23, 4  ;;  %v2327_v49 = vsel %vm2063_vm1, %v2289_v11, 0.0  ;;  %v1912_v58 = vcombine.low %v1299_v55, %v1301_v63  ;;  %v2073_v2 = vadd.f32 %v2072_v44, %v2071_v10 }
 0x15b   : > { %v2067_v50 = vrot.slane %v2066_v12, 2  ;;  %v2322_v51 = vadd.f32 %v2321_v42, %v2320_v9  ;;  %v2328_v57 = vrot.slane %v2327_v49, 4  ;;  %v2081_v62 = vrot.slane %v2080_v25, 2 }
 0x15c   : > { %v2336_v1 = vadd.f32 %v2335_v27, %v2334_v23  ;;  %v2085_v56 = vsel %vm2063_vm1, %v1301_v63, 0.0  ;;  %v1926_v7 = vrot.slane %v1912_v58, %v3505_v26  ;;  %v2074_v0 = vrot.slane %v2073_v2, 2 }
 0x15d   : > { %v2068_v61 = vadd.f32 %v2067_v50, %v2066_v12  ;;  %v2323_v4 = vrot.slane %v2322_v51, 2  ;;  %v2329_v6 = vadd.f32 %v2328_v57, %v2327_v49  ;;  %v2082_v5 = vadd.f32 %v2081_v62, %v2080_v25 }
 0x15e   : > { %v2337_v8 = vrot.slane %v2336_v1, 2  ;;  %v2086_v55 = vrot.slane %v2085_v56, 4  ;;  %v1927_v42 = vcombine.low %v1919_v24, %v1926_v7  ;;  %v2075_v27 = vadd.f32 %v2074_v0, %v2073_v2 }
 0x15f   : > { %v2069_v9 = vrot.slane %v2068_v61, 1  ;;  %v2324_v11 = vadd.f32 %v2323_v4, %v2322_v51  ;;  %v2330_v10 = vrot.slane %v2329_v6, 2  ;;  %v2083_v23 = vrot.slane %v2082_v5, 1 }
 0x160   : > { %v2338_v12 = vadd.f32 %v2337_v8, %v2336_v1  ;;  %v2087_v44 = vadd.f32 %v2086_v55, %v2085_v56  ;;  %2055 = vst [vmem:[%s3587_s12] sm:$0xff] %v1927_v42  ;;  %v2291_v25 = vmul.f32 %v1301_v63, %v1301_v63  ;;  %v530_v57 = vrot.slane %v3540_v43, %v3486_v17 }
 0x161   : > { %v2325_v49 = vrot.slane %v2324_v11, 1  ;;  %v2331_v50 = vadd.f32 %v2330_v10, %v2329_v6  ;;  %v2070_v58 = vadd.f32 %v2069_v9, %v2068_v61  ;;  %v2076_v3 = vrot.slane %v2075_v27, 1 }
 0x162   : > { %v2339_v62 = vrot.slane %v2338_v12, 1  ;;  %v2088_v60 = vrot.slane %v2087_v44, 2  ;;  %v2084_v54 = vadd.f32 %v2083_v23, %v2082_v5  ;;  %v2341_v24 = vsel %vm2063_vm1, %v2291_v25, 0.0 }
 0x163   : > { %v2326_v59 = vadd.f32 %v2325_v49, %v2324_v11  ;;  %v2332_v51 = vrot.slane %v2331_v50, 1  ;;  %v1339_v4 = vpop.f32.mrb[4].mxu0  ;;  %v2077_v2 = vadd.f32 %v2076_v3, %v2075_v27  ;;  %v2342_v7 = vrot.slane %v2341_v24, 4  ;;  %v1380_v6 = vpop.f32.mrb[4].mxu1 }
 0x164   : > { %v2340_v1 = vadd.f32 %v2339_v62, %v2338_v12  ;;  %v2089_v56 = vadd.f32 %v2088_v60, %v2087_v44  ;;  %v1341_v8 = vpop.f32.mrb[5].mxu0  ;;  %v1340_v61 = vadd.f32 %v1339_v4, %v438_v28  ;;  %v1381_v0 = vadd.f32 %v1380_v6, %v446_v30  ;;  %v1382_v55 = vpop.f32.mrb[5].mxu1 }
 0x165   : > { %v2333_v63 = vadd.f32 %v2332_v51, %v2331_v50  ;;  %v1342_v5 = vadd.f32 %v1341_v8, %v442_v31  ;;  %v1343_v9 = vpop.f32.mrb[6].mxu0  ;;  %v2544_v3 = vadd.f32 %v2077_v2, %v2070_v58  ;;  %v2343_v11 = vadd.f32 %v2342_v7, %v2341_v24  ;;  %v1384_v42 = vpop.f32.mrb[6].mxu1 }
 0x166   : > { %v2090_v60 = vrot.slane %v2089_v56, 1  ;;  %v1383_v10 = vadd.f32 %v1382_v55, %v450_v32  ;;  %v1344_v23 = vpop.f32.mrb[7].mxu0  ;;  %v2092_v12 = vsel %vm2063_vm1, %v1340_v61, 0.0  ;;  %v2292_v27 = vmul.f32 %v1340_v61, %v1340_v61  ;;  %v1385_v44 = vpop.f32.mrb[7].mxu1 }
 0x167   : > { %v2576_v28 = vadd.f32 %v2333_v63, %v2326_v59  ;;  %v2106_v30 = vsel %vm2063_vm1, %v1381_v0, 0.0  ;;  %v2344_v31 = vrot.slane %v2343_v11, 2  ;;  %v2093_v50 = vrot.slane %v2092_v12, 4 }
 0x168   : > { %v2091_v49 = vadd.f32 %v2090_v60, %v2089_v56  ;;  %v2107_v25 = vrot.slane %v2106_v30, 4  ;;  %v2348_v58 = vsel %vm2063_vm1, %v2292_v27, 0.0  ;;  %v2294_v62 = vmul.f32 %v1381_v0, %v1381_v0 }
 0x169   : > { %v1928_v51 = vcombine.low %v1340_v61, %v1342_v5  ;;  %v2099_v15 = vsel %vm2063_vm1, %v1342_v5, 0.0  ;;  %v2345_v32 = vadd.f32 %v2344_v31, %v2343_v11  ;;  %v2094_v4 = vadd.f32 %v2093_v50, %v2092_v12 }
 0x16a   : > { %v2545_v24 = vadd.f32 %v2091_v49, %v2084_v54  ;;  %v2349_v59 = vrot.slane %v2348_v58, 4  ;;  %v2108_v2 = vadd.f32 %v2107_v25, %v2106_v30  ;;  %v2362_v7 = vsel %vm2063_vm1, %v2294_v62, 0.0 }
 0x16b   : > { %v1936_v6 = vrot.slane %v1928_v51, %v3505_v26  ;;  %v2100_v8 = vrot.slane %v2099_v15, 4  ;;  %v2346_v56 = vrot.slane %v2345_v32, 1  ;;  %v2095_v55 = vrot.slane %v2094_v4, 2 }
 0x16c   : > { %v3611_v63 = vadd.f32 %v2545_v24, %v2544_v3  ;;  %v2350_v9 = vadd.f32 %v2349_v59, %v2348_v58  ;;  %v2109_v60 = vrot.slane %v2108_v2, 2  ;;  %v2363_v42 = vrot.slane %v2362_v7, 4 }
 0x16d   : > { %v2101_v61 = vadd.f32 %v2100_v8, %v2099_v15  ;;  %v2293_v23 = vmul.f32 %v1342_v5, %v1342_v5  ;;  %v2347_v27 = vadd.f32 %v2346_v56, %v2345_v32  ;;  %v2096_v11 = vadd.f32 %v2095_v55, %v2094_v4 }
 0x16e   : > { %v2351_v54 = vrot.slane %v2350_v9, 2  ;;  %v1929_v12 = vcombine.low %v1381_v0, %v1383_v10  ;;  %v2110_v44 = vadd.f32 %v2109_v60, %v2108_v2  ;;  %v2364_v30 = vadd.f32 %v2363_v42, %v2362_v7 }
 0x16f   : > { %v2102_v49 = vrot.slane %v2101_v61, 2  ;;  %v2355_v31 = vsel %vm2063_vm1, %v2293_v23, 0.0  ;;  %v2577_v50 = vadd.f32 %v2347_v27, %v2340_v1  ;;  %v2097_v25 = vrot.slane %v2096_v11, 1 }
 0x170   : > { %v2352_v62 = vadd.f32 %v2351_v54, %v2350_v9  ;;  %v2356_v3 = vrot.slane %v2355_v31, 4  ;;  %v2111_v51 = vrot.slane %v2110_v44, 1  ;;  %v2365_v24 = vrot.slane %v2364_v30, 2 }
 0x171   : > { %v2103_v58 = vadd.f32 %v2102_v49, %v2101_v61  ;;  %v1943_v59 = vrot.slane %v1929_v12, %v3505_v26  ;;  %v3615_v15 = vadd.f32 %v2577_v50, %v2576_v28  ;;  %v2098_v5 = vadd.f32 %v2097_v25, %v2096_v11 }
 0x172   : > { %v2353_v32 = vrot.slane %v2352_v62, 1  ;;  %v2357_v0 = vadd.f32 %v2356_v3, %v2355_v31  ;;  %v3617_v4 = vadd.f32 %v2111_v51, %v2110_v44  ;;  %v2366_v2 = vadd.f32 %v2365_v24, %v2364_v30 }
 0x173   : > { %v2104_v7 = vrot.slane %v2103_v58, 1  ;;  %v1944_v8 = vcombine.low %v1936_v6, %v1943_v59  ;;  %v1421_v1 = vpop.f32.mrb[8].mxu0  ;;  %v2113_v9 = vsel %vm2063_vm1, %v1383_v10, 0.0  ;;  %v2295_v60 = vmul.f32 %v1383_v10, %v1383_v10  ;;  %v1462_v42 = vpop.f32.mrb[8].mxu1 }
 0x174   : > { %v2354_v56 = vadd.f32 %v2353_v32, %v2352_v62  ;;  %v2358_v55 = vrot.slane %v2357_v0, 2  ;;  %v1423_v61 = vpop.f32.mrb[9].mxu0  ;;  %v2367_v23 = vrot.slane %v2366_v2, 1  ;;  %v2114_v27 = vrot.slane %v2113_v9, 4  ;;  %v3624_v54 = vpop.f32.mrb[9].mxu1 }
 0x175   : > { %v2105_v28 = vadd.f32 %v2104_v7, %v2103_v58  ;;  %2056 = vst [vmem:[%s3587_s12 + $0x8] sm:$0xff] %v1944_v8  ;;  %v1422_v11 = vadd.f32 %v1421_v1, %v454_v33  ;;  %v1425_v12 = vpop.f32.mrb[10].mxu0  ;;  %v2369_v44 = vsel %vm2063_vm1, %v2295_v60, 0.0  ;;  %v3630_v10 = vadd.f32 %v1462_v42, %v462_v34  ;;  %v1466_v49 = vpop.f32.mrb[10].mxu1 }
 0x176   : > { %v2359_v6 = vadd.f32 %v2358_v55, %v2357_v0  ;;  %v1424_v30 = vadd.f32 %v1423_v61, %v458_v35  ;;  %v1426_v31 = vpop.f32.mrb[11].mxu0  ;;  %v2368_v50 = vadd.f32 %v2367_v23, %v2366_v2  ;;  %v2115_v33 = vadd.f32 %v2114_v27, %v2113_v9  ;;  %v1467_v3 = vpop.f32.mrb[11].mxu1 }
 0x177   : > { %v2546_v25 = vadd.f32 %v2105_v28, %v2098_v5  ;;  %v2370_v62 = vrot.slane %v2369_v44, 4  ;;  %v2120_v24 = vsel %vm2063_vm1, %v1422_v11, 0.0  ;;  %v2296_v58 = vmul.f32 %v1422_v11, %v1422_v11 }
 0x178   : > { %v2360_v51 = vrot.slane %v2359_v6, 1  ;;  %v2134_v59 = vsel %vm2063_vm1, %v3630_v10, 0.0  ;;  %v2116_v34 = vrot.slane %v2115_v33, 2  ;;  %v2121_v0 = vrot.slane %v2120_v24, 4 }
 0x179   : > { %v2371_v32 = vadd.f32 %v2370_v62, %v2369_v44  ;;  %v2135_v7 = vrot.slane %v2134_v59, 4  ;;  %v2376_v35 = vsel %vm2063_vm1, %v2296_v58, 0.0  ;;  %v2298_v5 = vmul.f32 %v3630_v10, %v3630_v10 }
 0x17a   : > { %v2361_v8 = vadd.f32 %v2360_v51, %v2359_v6  ;;  %v1945_v2 = vcombine.low %v1422_v11, %v1424_v30  ;;  %v2117_v1 = vadd.f32 %v2116_v34, %v2115_v33  ;;  %v2122_v9 = vadd.f32 %v2121_v0, %v2120_v24 }
 0x17b   : > { %v2372_v55 = vrot.slane %v2371_v32, 2  ;;  %v2377_v60 = vrot.slane %v2376_v35, 4  ;;  %v2136_v61 = vadd.f32 %v2135_v7, %v2134_v59  ;;  %v2390_v23 = vsel %vm2063_vm1, %v2298_v5, 0.0 }
 0x17c   : > { %v2578_v42 = vadd.f32 %v2361_v8, %v2354_v56  ;;  %v3643_v28 = vrot.slane %v1945_v2, %v3505_v26  ;;  %v2118_v27 = vrot.slane %v2117_v1, 1  ;;  %v2123_v6 = vrot.slane %v2122_v9, 2 }
 0x17d   : > { %v2373_v12 = vadd.f32 %v2372_v55, %v2371_v32  ;;  %v2378_v44 = vadd.f32 %v2377_v60, %v2376_v35  ;;  %v2137_v49 = vrot.slane %v2136_v61, 2  ;;  %v2391_v31 = vrot.slane %v2390_v23, 4 }
 0x17e   : > { %v2127_v62 = vsel %vm2063_vm1, %v1424_v30, 0.0  ;;  %v2297_v11 = vmul.f32 %v1424_v30, %v1424_v30  ;;  %v2119_v33 = vadd.f32 %v2118_v27, %v2117_v1  ;;  %v2124_v51 = vadd.f32 %v2123_v6, %v2122_v9 }
 0x17f   : > { %v2374_v3 = vrot.slane %v2373_v12, 1  ;;  %v2379_v24 = vrot.slane %v2378_v44, 2  ;;  %v2138_v56 = vadd.f32 %v2137_v49, %v2136_v61  ;;  %v2392_v58 = vadd.f32 %v2391_v31, %v2390_v23 }
 0x180   : > { %v2128_v59 = vrot.slane %v2127_v62, 4  ;;  %v2383_v34 = vsel %vm2063_vm1, %v2297_v11, 0.0  ;;  %v2547_v7 = vadd.f32 %v2119_v33, %v3617_v4  ;;  %v2125_v32 = vrot.slane %v2124_v51, 1 }
 0x181   : > { %v2375_v0 = vadd.f32 %v2374_v3, %v2373_v12  ;;  %v2380_v8 = vadd.f32 %v2379_v24, %v2378_v44  ;;  %v2139_v35 = vrot.slane %v2138_v56, 1  ;;  %v2393_v5 = vrot.slane %v2392_v58, 2 }
 0x182   : > { %v2129_v2 = vadd.f32 %v2128_v59, %v2127_v62  ;;  %v2384_v55 = vrot.slane %v2383_v34, 4  ;;  %v2561_v60 = vadd.f32 %v2547_v7, %v2546_v25  ;;  %v2126_v1 = vadd.f32 %v2125_v32, %v2124_v51 }
 0x183   : > { %v2579_v30 = vadd.f32 %v2375_v0, %v2368_v50  ;;  %v2381_v27 = vrot.slane %v2380_v8, 1  ;;  %v1503_v9 = vpop.f32.mrb[12].mxu0  ;;  %v3648_v6 = vadd.f32 %v2139_v35, %v2138_v56  ;;  %v2394_v61 = vadd.f32 %v2393_v5, %v2392_v58  ;;  %v1544_v31 = vpop.f32.mrb[12].mxu1 }
 0x184   : > { %v2130_v23 = vrot.slane %v2129_v2, 2  ;;  %v2385_v49 = vadd.f32 %v2384_v55, %v2383_v34  ;;  %v1505_v12 = vpop.f32.mrb[13].mxu0  ;;  %v3651_v4 = vadd.f32 %v2561_v60, %v3611_v63  ;;  %v1465_v50 = vadd.f32 %v3624_v54, %v466_v36  ;;  %v3657_v25 = vpop.f32.mrb[13].mxu1 }
 0x185   : > { %v2593_v44 = vadd.f32 %v2579_v30, %v2578_v42  ;;  %v2382_v11 = vadd.f32 %v2381_v27, %v2380_v8  ;;  %v1507_v62 = vpop.f32.mrb[14].mxu0  ;;  %v2395_v33 = vrot.slane %v2394_v61, 1  ;;  %v1504_v24 = vadd.f32 %v1503_v9, %v470_v37  ;;  %v1548_v56 = vpop.f32.mrb[14].mxu1 }
 0x186   : > { %v2131_v3 = vadd.f32 %v2130_v23, %v2129_v2  ;;  %v2386_v51 = vrot.slane %v2385_v49, 2  ;;  %v1508_v63 = vpop.f32.mrb[15].mxu0  ;;  %v1946_v58 = vcombine.low %v3630_v10, %v1465_v50  ;;  %v2141_v59 = vsel %vm2063_vm1, %v1465_v50, 0.0  ;;  %v1549_v54 = vpop.f32.mrb[15].mxu1 }
 0x187   : > { %v3663_v42 = vadd.f32 %v2593_v44, %v3615_v15  ;;  %v2299_v36 = vmul.f32 %v1465_v50, %v1465_v50  ;;  %v3667_v34 = vadd.f32 %v2395_v33, %v2394_v61  ;;  %v2142_v32 = vrot.slane %v2141_v59, 4 }
 0x188   : > { %v2132_v0 = vrot.slane %v2131_v3, 1  ;;  %v2387_v7 = vadd.f32 %v2386_v51, %v2385_v49  ;;  %v1960_v8 = vrot.slane %v1946_v58, %v3505_v26  ;;  %v2148_v35 = vsel %vm2063_vm1, %v1504_v24, 0.0 }
 0x189   : > { %v2397_v37 = vsel %vm2063_vm1, %v2299_v36, 0.0  ;;  %v2300_v15 = vmul.f32 %v1504_v24, %v1504_v24  ;;  %v2143_v10 = vadd.f32 %v2142_v32, %v2141_v59  ;;  %v2149_v30 = vrot.slane %v2148_v35, 4 }
 0x18a   : > { %v2133_v5 = vadd.f32 %v2132_v0, %v2131_v3  ;;  %v2388_v2 = vrot.slane %v2387_v7, 1  ;;  %v2398_v55 = vrot.slane %v2397_v37, 4  ;;  %v1961_v60 = vcombine.low %v3643_v28, %v1960_v8 }
 0x18b   : > { %v2404_v27 = vsel %vm2063_vm1, %v2300_v15, 0.0  ;;  %v3677_v9 = vadd.f32 %v1544_v31, %v478_v38  ;;  %v2144_v49 = vrot.slane %v2143_v10, 2  ;;  %v2150_v50 = vadd.f32 %v2149_v30, %v2148_v35 }
 0x18c   : > { %v2389_v61 = vadd.f32 %v2388_v2, %v2387_v7  ;;  %v2548_v23 = vadd.f32 %v2133_v5, %v2126_v1  ;;  %v2399_v44 = vadd.f32 %v2398_v55, %v2397_v37  ;;  %2057 = vst [vmem:[%s3587_s12 + $0x10] sm:$0xff] %v1961_v60  ;;  %v2405_v62 = vrot.slane %v2404_v27, 4 }
 0x18d   : > { %v2162_v33 = vsel %vm2063_vm1, %v3677_v9, 0.0  ;;  %v2302_v28 = vmul.f32 %v3677_v9, %v3677_v9  ;;  %v2145_v51 = vadd.f32 %v2144_v49, %v2143_v10  ;;  %v2151_v58 = vrot.slane %v2150_v50, 2 }
 0x18e   : > { %v2580_v3 = vadd.f32 %v2389_v61, %v2382_v11  ;;  %v2400_v56 = vrot.slane %v2399_v44, 2  ;;  %v2163_v63 = vrot.slane %v2162_v33, 4  ;;  %v2406_v38 = vadd.f32 %v2405_v62, %v2404_v27 }
 0x18f   : > { %v2418_v31 = vsel %vm2063_vm1, %v2302_v28, 0.0  ;;  %v1506_v1 = vadd.f32 %v1505_v12, %v474_v39  ;;  %v2146_v59 = vrot.slane %v2145_v51, 1  ;;  %v2152_v7 = vadd.f32 %v2151_v58, %v2150_v50 }
 0x190   : > { %v2401_v36 = vadd.f32 %v2400_v56, %v2399_v44  ;;  %v2164_v54 = vadd.f32 %v2163_v63, %v2162_v33  ;;  %v2419_v0 = vrot.slane %v2418_v31, 4  ;;  %v2407_v32 = vrot.slane %v2406_v38, 2 }
 0x191   : > { %v1962_v8 = vcombine.low %v1504_v24, %v1506_v1  ;;  %v2155_v11 = vsel %vm2063_vm1, %v1506_v1, 0.0  ;;  %v2147_v37 = vadd.f32 %v2146_v59, %v2145_v51  ;;  %v2153_v2 = vrot.slane %v2152_v7, 1 }
 0x192   : > { %v2402_v35 = vrot.slane %v2401_v36, 1  ;;  %v2165_v15 = vrot.slane %v2164_v54, 2  ;;  %v2420_v5 = vadd.f32 %v2419_v0, %v2418_v31  ;;  %v2408_v10 = vadd.f32 %v2407_v32, %v2406_v38 }
 0x193   : > { %v1970_v55 = vrot.slane %v1962_v8, %v3505_v26  ;;  %v2156_v60 = vrot.slane %v2155_v11, 4  ;;  %v1585_v30 = vpop.f32.mrb[16].mxu0  ;;  %v2549_v12 = vadd.f32 %v2147_v37, %v3648_v6  ;;  %v1626_v49 = vpop.f32.mrb[16].mxu1  ;;  %v2154_v24 = vadd.f32 %v2153_v2, %v2152_v7 }
 0x194   : > { %v2403_v39 = vadd.f32 %v2402_v35, %v2401_v36  ;;  %v2166_v27 = vadd.f32 %v2165_v15, %v2164_v54  ;;  %v2421_v61 = vrot.slane %v2420_v5, 2  ;;  %v1587_v44 = vpop.f32.mrb[17].mxu0  ;;  %v2409_v50 = vrot.slane %v2408_v10, 1  ;;  %v3691_v28 = vpop.f32.mrb[17].mxu1 }
 0x195   : > { %v2157_v62 = vadd.f32 %v2156_v60, %v2155_v11  ;;  %v2301_v33 = vmul.f32 %v1506_v1, %v1506_v1  ;;  %v1589_v51 = vpop.f32.mrb[18].mxu0  ;;  %v3693_v56 = vadd.f32 %v2549_v12, %v2548_v23  ;;  %v1630_v31 = vpop.f32.mrb[18].mxu1  ;;  %v1547_v1 = vadd.f32 %v3657_v25, %v482_v40 }
 0x196   : > { %v2581_v63 = vadd.f32 %v2403_v39, %v3667_v34  ;;  %v2167_v58 = vrot.slane %v2166_v27, 1  ;;  %v2422_v38 = vadd.f32 %v2421_v61, %v2420_v5  ;;  %v1590_v59 = vpop.f32.mrb[19].mxu0  ;;  %v2410_v6 = vadd.f32 %v2409_v50, %v2408_v10  ;;  %v1631_v0 = vpop.f32.mrb[19].mxu1 }
 0x197   : > { %v2158_v36 = vrot.slane %v2157_v62, 2  ;;  %v2411_v54 = vsel %vm2063_vm1, %v2301_v33, 0.0  ;;  %v1963_v11 = vcombine.low %v3677_v9, %v1547_v1  ;;  %v2169_v37 = vsel %vm2063_vm1, %v1547_v1, 0.0 }
 0x198   : > { %v3701_v7 = vadd.f32 %v2581_v63, %v2580_v3  ;;  %v2168_v23 = vadd.f32 %v2167_v58, %v2166_v27  ;;  %v2423_v32 = vrot.slane %v2422_v38, 1  ;;  %v2412_v8 = vrot.slane %v2411_v54, 4 }
 0x199   : > { %v2159_v34 = vadd.f32 %v2158_v36, %v2157_v62  ;;  %v2303_v35 = vmul.f32 %v1547_v1, %v1547_v1  ;;  %v2170_v2 = vrot.slane %v2169_v37, 4  ;;  %v1586_v22 = vadd.f32 %v1585_v30, %v486_v41 }
 0x19a   : > { %v3705_v15 = vadd.f32 %v2423_v32, %v2422_v38  ;;  %v2413_v5 = vadd.f32 %v2412_v8, %v2411_v54  ;;  %v1977_v25 = vrot.slane %v1963_v11, %v3505_v26  ;;  %v3715_v9 = vadd.f32 %v1626_v49, %v494_v45 }
 0x19b   : > { %v2160_v40 = vrot.slane %v2159_v34, 1  ;;  %v2425_v3 = vsel %vm2063_vm1, %v2303_v35, 0.0  ;;  %v2171_v60 = vadd.f32 %v2170_v2, %v2169_v37  ;;  %v2176_v12 = vsel %vm2063_vm1, %v1586_v22, 0.0 }
 0x19c   : > { %v2414_v10 = vrot.slane %v2413_v5, 2  ;;  %v2426_v39 = vrot.slane %v2425_v3, 4  ;;  %v1978_v61 = vcombine.low %v1970_v55, %v1977_v25  ;;  %v2177_v50 = vrot.slane %v2176_v12, 4 }
 0x19d   : > { %v2161_v27 = vadd.f32 %v2160_v40, %v2159_v34  ;;  %v2304_v41 = vmul.f32 %v1586_v22, %v1586_v22  ;;  %v2172_v62 = vrot.slane %v2171_v60, 2  ;;  %v2190_v51 = vsel %vm2063_vm1, %v3715_v9, 0.0 }
 0x19e   : > { %v2415_v30 = vadd.f32 %v2414_v10, %v2413_v5  ;;  %v2427_v33 = vadd.f32 %v2426_v39, %v2425_v3  ;;  %2058 = vst [vmem:[%s3587_s12 + $0x18] sm:$0xff] %v1978_v61  ;;  %v2178_v58 = vadd.f32 %v2177_v50, %v2176_v12  ;;  %v2191_v49 = vrot.slane %v2190_v51, 4 }
 0x19f   : > { %v2550_v63 = vadd.f32 %v2161_v27, %v2154_v24  ;;  %v2432_v45 = vsel %vm2063_vm1, %v2304_v41, 0.0  ;;  %v2173_v31 = vadd.f32 %v2172_v62, %v2171_v60  ;;  %v2306_v1 = vmul.f32 %v3715_v9, %v3715_v9 }
 0x1a0   : > { %v2416_v38 = vrot.slane %v2415_v30, 1  ;;  %v2428_v59 = vrot.slane %v2427_v33, 2  ;;  %v2433_v36 = vrot.slane %v2432_v45, 4  ;;  %v2179_v54 = vrot.slane %v2178_v58, 2 }
 0x1a1   : > { %v2192_v55 = vadd.f32 %v2191_v49, %v2190_v51  ;;  %v1588_v0 = vadd.f32 %v1587_v44, %v490_v46  ;;  %v2174_v24 = vrot.slane %v2173_v31, 1  ;;  %v2446_v35 = vsel %vm2063_vm1, %v2306_v1, 0.0 }
 0x1a2   : > { %v2417_v32 = vadd.f32 %v2416_v38, %v2415_v30  ;;  %v2429_v8 = vadd.f32 %v2428_v59, %v2427_v33  ;;  %v2434_v34 = vadd.f32 %v2433_v36, %v2432_v45  ;;  %v2180_v11 = vadd.f32 %v2179_v54, %v2178_v58 }
 0x1a3   : > { %v2193_v37 = vrot.slane %v2192_v55, 2  ;;  %v1979_v5 = vcombine.low %v1586_v22, %v1588_v0  ;;  %v1667_v2 = vpop.f32.mrb[20].mxu0  ;;  %v2175_v25 = vadd.f32 %v2174_v24, %v2173_v31  ;;  %v1708_v60 = vpop.f32.mrb[20].mxu1  ;;  %v2447_v61 = vrot.slane %v2446_v35, 4 }
 0x1a4   : > { %v2582_v40 = vadd.f32 %v2417_v32, %v2410_v6  ;;  %v2430_v3 = vrot.slane %v2429_v8, 1  ;;  %v2435_v10 = vrot.slane %v2434_v34, 2  ;;  %v1669_v39 = vpop.f32.mrb[21].mxu0  ;;  %v2181_v12 = vrot.slane %v2180_v11, 1  ;;  %v3729_v44 = vpop.f32.mrb[21].mxu1 }
 0x1a5   : > { %v2194_v27 = vadd.f32 %v2193_v37, %v2192_v55  ;;  %v1987_v46 = vrot.slane %v1979_v5, %v3505_v26  ;;  %v1671_v50 = vpop.f32.mrb[22].mxu0  ;;  %v2551_v30 = vadd.f32 %v2175_v25, %v2168_v23  ;;  %v2183_v22 = vsel %vm2063_vm1, %v1588_v0, 0.0  ;;  %v1712_v33 = vpop.f32.mrb[22].mxu1 }
 0x1a6   : > { %v2431_v41 = vadd.f32 %v2430_v3, %v2429_v8  ;;  %v2436_v62 = vadd.f32 %v2435_v10, %v2434_v34  ;;  %v1672_v6 = vpop.f32.mrb[23].mxu0  ;;  %v2182_v51 = vadd.f32 %v2181_v12, %v2180_v11  ;;  %v2448_v45 = vadd.f32 %v2447_v61, %v2446_v35  ;;  %v1713_v38 = vpop.f32.mrb[23].mxu1 }
 0x1a7   : > { %v2195_v58 = vrot.slane %v2194_v27, 1  ;;  %v2184_v49 = vrot.slane %v2183_v22, 4  ;;  %v2563_v31 = vadd.f32 %v2551_v30, %v2550_v63  ;;  %v2305_v54 = vmul.f32 %v1588_v0, %v1588_v0 }
 0x1a8   : > { %v2583_v59 = vadd.f32 %v2431_v41, %v3705_v15  ;;  %v2437_v36 = vrot.slane %v2436_v62, 1  ;;  %v2449_v1 = vrot.slane %v2448_v45, 2  ;;  %v1629_v23 = vadd.f32 %v3691_v28, %v498_v47 }
 0x1a9   : > { %v3733_v55 = vadd.f32 %v2195_v58, %v2194_v27  ;;  %v2185_v32 = vadd.f32 %v2184_v49, %v2183_v22  ;;  %v2569_v24 = vadd.f32 %v2563_v31, %v3693_v56  ;;  %v2439_v11 = vsel %vm2063_vm1, %v2305_v54, 0.0 }
 0x1aa   : > { %v2595_v8 = vadd.f32 %v2583_v59, %v2582_v40  ;;  %v2438_v34 = vadd.f32 %v2437_v36, %v2436_v62  ;;  %v2450_v63 = vadd.f32 %v2449_v1, %v2448_v45  ;;  %v2440_v15 = vrot.slane %v2439_v11, 4 }
 0x1ab   : > { %v2186_v37 = vrot.slane %v2185_v32, 2  ;;  %v1980_v0 = vcombine.low %v3715_v9, %v1629_v23  ;;  %v3743_v35 = vadd.f32 %v2569_v24, %v3651_v4  ;;  %v2197_v25 = vsel %vm2063_vm1, %v1629_v23, 0.0 }
 0x1ac   : > { %v2601_v5 = vadd.f32 %v2595_v8, %v3701_v7  ;;  %v2307_v3 = vmul.f32 %v1629_v23, %v1629_v23  ;;  %v2451_v47 = vrot.slane %v2450_v63, 1  ;;  %v2441_v56 = vadd.f32 %v2440_v15, %v2439_v11 }
 0x1ad   : > { %v2187_v28 = vadd.f32 %v2186_v37, %v2185_v32  ;;  %v1994_v40 = vrot.slane %v1980_v0, %v3505_v26  ;;  %v2198_v12 = vrot.slane %v2197_v25, 4  ;;  %v1668_v4 = vadd.f32 %v1667_v2, %v502_v48 }
 0x1ae   : > { %v3749_v10 = vadd.f32 %v2601_v5, %v3663_v42  ;;  %v2453_v9 = vsel %vm2063_vm1, %v2307_v3, 0.0  ;;  %v2452_v7 = vadd.f32 %v2451_v47, %v2450_v63  ;;  %v2442_v61 = vrot.slane %v2441_v56, 2 }
 0x1af   : > { %v2188_v27 = vrot.slane %v2187_v28, 1  ;;  %v1995_v50 = vcombine.low %v1987_v46, %v1994_v40  ;;  %v2199_v41 = vadd.f32 %v2198_v12, %v2197_v25  ;;  %v2454_v30 = vrot.slane %v2453_v9, 4 }
 0x1b0   : > { %v2204_v62 = vsel %vm2063_vm1, %v1668_v4, 0.0  ;;  %v2308_v22 = vmul.f32 %v1668_v4, %v1668_v4  ;;  %v2443_v6 = vadd.f32 %v2442_v61, %v2441_v56  ;;  %v3760_v58 = vadd.f32 %v1708_v60, %v510_v52 }
 0x1b1   : > { %v2189_v33 = vadd.f32 %v2188_v27, %v2187_v28  ;;  %2059 = vst [vmem:[%s3587_s12 + $0x20] sm:$0xff] %v1995_v50  ;;  %v2205_v42 = vrot.slane %v2204_v62, 4  ;;  %v2200_v45 = vrot.slane %v2199_v41, 2  ;;  %v2455_v48 = vadd.f32 %v2454_v30, %v2453_v9 }
 0x1b2   : > { %v2460_v2 = vsel %vm2063_vm1, %v2308_v22, 0.0  ;;  %v1670_v46 = vadd.f32 %v1669_v39, %v506_v53  ;;  %v2444_v49 = vrot.slane %v2443_v6, 1  ;;  %v2218_v32 = vsel %vm2063_vm1, %v3760_v58, 0.0 }
 0x1b3   : > { %v2552_v38 = vadd.f32 %v2189_v33, %v2182_v51  ;;  %v2206_v31 = vadd.f32 %v2205_v42, %v2204_v62  ;;  %v2461_v59 = vrot.slane %v2460_v2, 4  ;;  %v1749_v36 = vpop.f32.mrb[24].mxu0  ;;  %v2201_v54 = vadd.f32 %v2200_v45, %v2199_v41  ;;  %v1790_v60 = vpop.f32.mrb[24].mxu1 }
 0x1b4   : > { %v2456_v1 = vrot.slane %v2455_v48, 2  ;;  %v2310_v52 = vmul.f32 %v3760_v58, %v3760_v58  ;;  %v3770_v23 = vpop.f32.mrb[25].mxu0  ;;  %v2445_v24 = vadd.f32 %v2444_v49, %v2443_v6  ;;  %v2219_v53 = vrot.slane %v2218_v32, 4  ;;  %v3772_v39 = vpop.f32.mrb[25].mxu1 }
 0x1b5   : > { %v2207_v8 = vrot.slane %v2206_v31, 2  ;;  %v2462_v11 = vadd.f32 %v2461_v59, %v2460_v2  ;;  %v1753_v51 = vpop.f32.mrb[26].mxu0  ;;  %v2202_v63 = vrot.slane %v2201_v54, 1  ;;  %v1996_v0 = vcombine.low %v1668_v4, %v1670_v46  ;;  %v1794_v5 = vpop.f32.mrb[26].mxu1 }
 0x1b6   : > { %v2457_v37 = vadd.f32 %v2456_v1, %v2455_v48  ;;  %v2474_v15 = vsel %vm2063_vm1, %v2310_v52, 0.0  ;;  %v1754_v25 = vpop.f32.mrb[27].mxu0  ;;  %v2584_v3 = vadd.f32 %v2445_v24, %v2438_v34  ;;  %v2220_v56 = vadd.f32 %v2219_v53, %v2218_v32  ;;  %v1795_v40 = vpop.f32.mrb[27].mxu1 }
 0x1b7   : > { %v2208_v47 = vadd.f32 %v2207_v8, %v2206_v31  ;;  %v2463_v28 = vrot.slane %v2462_v11, 2  ;;  %v2203_v12 = vadd.f32 %v2202_v63, %v2201_v54  ;;  %v2475_v27 = vrot.slane %v2474_v15, 4 }
 0x1b8   : > { %v2458_v9 = vrot.slane %v2457_v37, 1  ;;  %v2004_v61 = vrot.slane %v1996_v0, %v3505_v26  ;;  %v2221_v30 = vrot.slane %v2220_v56, 2  ;;  %v2211_v62 = vsel %vm2063_vm1, %v1670_v46, 0.0 }
 0x1b9   : > { %v2209_v50 = vrot.slane %v2208_v47, 1  ;;  %v2464_v41 = vadd.f32 %v2463_v28, %v2462_v11  ;;  %v2553_v4 = vadd.f32 %v2203_v12, %v3733_v55  ;;  %v2476_v33 = vadd.f32 %v2475_v27, %v2474_v15 }
 0x1ba   : > { %v2459_v22 = vadd.f32 %v2458_v9, %v2457_v37  ;;  %v2212_v6 = vrot.slane %v2211_v62, 4  ;;  %v2222_v45 = vadd.f32 %v2221_v30, %v2220_v56  ;;  %v2309_v48 = vmul.f32 %v1670_v46, %v1670_v46 }
 0x1bb   : > { %v2210_v34 = vadd.f32 %v2209_v50, %v2208_v47  ;;  %v2465_v42 = vrot.slane %v2464_v41, 1  ;;  %v3778_v2 = vadd.f32 %v2553_v4, %v2552_v38  ;;  %v2477_v31 = vrot.slane %v2476_v33, 2 }
 0x1bc   : > { %v2585_v49 = vadd.f32 %v2459_v22, %v2452_v7  ;;  %v2213_v59 = vadd.f32 %v2212_v6, %v2211_v62  ;;  %v2223_v1 = vrot.slane %v2222_v45, 1  ;;  %v2467_v32 = vsel %vm2063_vm1, %v2309_v48, 0.0 }
 0x1bd   : > { %v2466_v54 = vadd.f32 %v2465_v42, %v2464_v41  ;;  %v3924_v52 = vrot.slane %v3512_v29, %v3494_v21  ;;  %v2478_v8 = vadd.f32 %v2477_v31, %v2476_v33  ;;  %v2468_v53 = vrot.slane %v2467_v32, 4 }
 0x1be   : > { %v3785_v24 = vadd.f32 %v2585_v49, %v2584_v3  ;;  %v2214_v11 = vrot.slane %v2213_v59, 2  ;;  %v2224_v46 = vadd.f32 %v2223_v1, %v2222_v45  ;;  %v3926_v3 = vrot.slane %v3540_v43, %v3477_v14 }
 0x1bf   : > { %v1711_v55 = vadd.f32 %v3729_v44, %v3924_v52  ;;  %v2479_v63 = vrot.slane %v2478_v8, 1  ;;  %v2469_v15 = vadd.f32 %v2468_v53, %v2467_v32  ;;  %v3925_v44 = vrot.slane %v3540_v43, %v3475_v13 }
 0x1c0   : > { %v2215_v37 = vadd.f32 %v2214_v11, %v2213_v59 }
 0x1c1   : > { %v1997_v38 = vcombine.low %v3760_v58, %v1711_v55  ;;  %v2225_v7 = vsel %vm2063_vm1, %v1711_v55, 0.0  ;;  %v2311_v51 = vmul.f32 %v1711_v55, %v1711_v55  ;;  %v3794_v25 = vadd.f32 %v1749_v36, %v3925_v44 }
 0x1c2   : > { %v2226_v0 = vrot.slane %v2225_v7, 4  ;;  %v3799_v58 = vadd.f32 %v1790_v60, %v3926_v3  ;;  %v2480_v47 = vadd.f32 %v2479_v63, %v2478_v8  ;;  %v2216_v28 = vrot.slane %v2215_v37, 1 }
 0x1c3   : > { %v2011_v5 = vrot.slane %v1997_v38, %v3505_v26  ;;  %v2481_v29 = vsel %vm2063_vm1, %v2311_v51, 0.0  ;;  %v2470_v56 = vrot.slane %v2469_v15, 2  ;;  %v2232_v27 = vsel %vm2063_vm1, %v3794_v25, 0.0  ;;  %v3805_v36 = vpop.f32.mrb[28].mxu0  ;;  %v3807_v30 = vpop.f32.mrb[28].mxu1 }
 0x1c4   : > { %v2227_v40 = vadd.f32 %v2226_v0, %v2225_v7  ;;  %v2482_v9 = vrot.slane %v2481_v29, 4  ;;  %v2312_v13 = vmul.f32 %v3794_v25, %v3794_v25  ;;  %v2217_v50 = vadd.f32 %v2216_v28, %v2215_v37  ;;  %v3809_v62 = vpop.f32.mrb[29].mxu0  ;;  %v3817_v6 = vpop.f32.mrb[29].mxu1 }
 0x1c5   : > { %v2012_v12 = vcombine.low %v2004_v61, %v2011_v5  ;;  %v2471_v41 = vadd.f32 %v2470_v56, %v2469_v15  ;;  %v2233_v60 = vrot.slane %v2232_v27, 4  ;;  %v2246_v4 = vsel %vm2063_vm1, %v3799_v58, 0.0  ;;  %v1835_v42 = vpop.f32.mrb[30].mxu0  ;;  %v1876_v59 = vpop.f32.mrb[30].mxu1 }
 0x1c6   : > { %v2228_v14 = vrot.slane %v2227_v40, 2  ;;  %v2483_v22 = vadd.f32 %v2482_v9, %v2481_v29  ;;  %v2488_v61 = vsel %vm2063_vm1, %v2312_v13, 0.0  ;;  %v2314_v33 = vmul.f32 %v3799_v58, %v3799_v58  ;;  %v1836_v1 = vpop.f32.mrb[31].mxu0  ;;  %v1877_v11 = vpop.f32.mrb[31].mxu1 }
 0x1c7   : > { %2060 = vst [vmem:[%s3587_s12 + $0x28] sm:$0xff] %v2012_v12  ;;  %v2472_v45 = vrot.slane %v2471_v41, 1  ;;  %v2554_v48 = vadd.f32 %v2217_v50, %v2210_v34  ;;  %v2234_v31 = vadd.f32 %v2233_v60, %v2232_v27  ;;  %v2489_v52 = vrot.slane %v2488_v61, 4 }
 0x1c8   : > { %v2229_v49 = vadd.f32 %v2228_v14, %v2227_v40  ;;  %v2484_v32 = vrot.slane %v2483_v22, 2  ;;  %v2247_v55 = vrot.slane %v2246_v4, 4  ;;  %v2502_v8 = vsel %vm2063_vm1, %v2314_v33, 0.0  ;;  %v3830_v33 = vld [vmem:[%s3479_s30 + $0x18] sm:$0xff] }
 0x1c9   : > { %v2473_v53 = vadd.f32 %v2472_v45, %v2471_v41  ;;  %v2235_v7 = vrot.slane %v2234_v31, 2  ;;  %v2503_v51 = vrot.slane %v2502_v8, 4  ;;  %v2490_v37 = vadd.f32 %v2489_v52, %v2488_v61 }
 0x1ca   : > { %v2230_v38 = vrot.slane %v2229_v49, 1  ;;  %v2485_v63 = vadd.f32 %v2484_v32, %v2483_v22  ;;  %v2248_v15 = vadd.f32 %v2247_v55, %v2246_v4  ;;  %v3927_v34 = vrot.slane %v3540_v43, %v3484_v16 }
 0x1cb   : > { %v2586_v5 = vadd.f32 %v2473_v53, %v2466_v54  ;;  %v2236_v44 = vadd.f32 %v2235_v7, %v2234_v31  ;;  %v2504_v3 = vadd.f32 %v2503_v51, %v2502_v8  ;;  %v2491_v56 = vrot.slane %v2490_v37, 2 }
 0x1cc   : > { %v1752_v0 = vadd.f32 %v3770_v23, %v3927_v34  ;;  %v2231_v29 = vadd.f32 %v2230_v38, %v2229_v49  ;;  %v2486_v28 = vrot.slane %v2485_v63, 1  ;;  %v2249_v40 = vrot.slane %v2248_v15, 2 }
 0x1cd   : > { %v2237_v27 = vrot.slane %v2236_v44, 1  ;;  %v2505_v13 = vrot.slane %v2504_v3, 2  ;;  %v2492_v14 = vadd.f32 %v2491_v56, %v2490_v37  ;;  %v542_v38 = vrot.slane %v3830_v33, %v3490_v19 }
 0x1ce   : > { %v2013_v12 = vcombine.low %v3794_v25, %v1752_v0  ;;  %v2555_v9 = vadd.f32 %v2231_v29, %v2224_v46  ;;  %v2239_v50 = vsel %vm2063_vm1, %v1752_v0, 0.0  ;;  %v2487_v41 = vadd.f32 %v2486_v28, %v2485_v63 }
 0x1cf   : > { %v2250_v16 = vadd.f32 %v2249_v40, %v2248_v15  ;;  %v3826_v23 = vadd.f32 %v2505_v13, %v2504_v3  ;;  %v2240_v54 = vrot.slane %v2239_v50, 4  ;;  %v2313_v4 = vmul.f32 %v1752_v0, %v1752_v0 }
 0x1d0   : > { %v2565_v60 = vadd.f32 %v2555_v9, %v2554_v48  ;;  %v2587_v22 = vadd.f32 %v2487_v41, %v2480_v47  ;;  %v2021_v61 = vrot.slane %v2013_v12, %v3505_v26  ;;  %v534_v46 = vrot.slane %v3830_v33, %v3488_v18 }
 0x1d1   : > { %v2238_v42 = vadd.f32 %v2237_v27, %v2236_v44  ;;  %v2241_v45 = vadd.f32 %v2240_v54, %v2239_v50  ;;  %v1793_v48 = vadd.f32 %v3772_v39, %v530_v57  ;;  %v2493_v47 = vrot.slane %v2492_v14, 1 }
 0x1d2   : > { %v3835_v25 = vadd.f32 %v2565_v60, %v3778_v2  ;;  %v2597_v49 = vadd.f32 %v2587_v22, %v2586_v5  ;;  %v2251_v31 = vrot.slane %v2250_v16, 1  ;;  %v2495_v59 = vsel %vm2063_vm1, %v2313_v4, 0.0 }
 0x1d3   : > { %v2507_v1 = vrot.slane %v3826_v23, 1  ;;  %v2242_v32 = vrot.slane %v2241_v45, 2  ;;  %v2496_v52 = vrot.slane %v2495_v59, 4  ;;  %v2014_v18 = vcombine.low %v3799_v58, %v1793_v48 }
 0x1d4   : > { %v3845_v2 = vadd.f32 %v2597_v49, %v3785_v24  ;;  %v2253_v55 = vsel %vm2063_vm1, %v1793_v48, 0.0  ;;  %v2315_v8 = vmul.f32 %v1793_v48, %v1793_v48  ;;  %v3849_v17 = vadd.f32 %v3805_v36, %v534_v46 }
 0x1d5   : > { %v2243_v43 = vadd.f32 %v2242_v32, %v2241_v45  ;;  %v2497_v57 = vadd.f32 %v2496_v52, %v2495_v59  ;;  %v2028_v39 = vrot.slane %v2014_v18, %v3505_v26  ;;  %v2254_v11 = vrot.slane %v2253_v55, 4 }
 0x1d6   : > { %v2509_v53 = vsel %vm2063_vm1, %v2315_v8, 0.0  ;;  %v2260_v58 = vsel %vm2063_vm1, %v3849_v17, 0.0  ;;  %v2316_v24 = vmul.f32 %v3849_v17, %v3849_v17  ;;  %v1873_v0 = vadd.f32 %v3807_v30, %v542_v38 }
 0x1d7   : > { %v2244_v7 = vrot.slane %v2243_v43, 1  ;;  %v2498_v36 = vrot.slane %v2497_v57, 2  ;;  %v2029_v51 = vcombine.low %v2021_v61, %v2028_v39  ;;  %v2255_v63 = vadd.f32 %v2254_v11, %v2253_v55 }
 0x1d8   : > { %v2510_v37 = vrot.slane %v2509_v53, 4  ;;  %v2261_v15 = vrot.slane %v2260_v58, 4  ;;  %v2516_v34 = vsel %vm2063_vm1, %v2316_v24, 0.0  ;;  %v2274_v40 = vsel %vm2063_vm1, %v1873_v0, 0.0 }
 0x1d9   : > { %v2245_v5 = vadd.f32 %v2244_v7, %v2243_v43  ;;  %v2499_v29 = vadd.f32 %v2498_v36, %v2497_v57  ;;  %2061 = vst [vmem:[%s3587_s12 + $0x30] sm:$0xff] %v2029_v51  ;;  %v2256_v44 = vrot.slane %v2255_v63, 2  ;;  %v2517_v3 = vrot.slane %v2516_v34, 4 }
 0x1da   : > { %v2511_v28 = vadd.f32 %v2510_v37, %v2509_v53  ;;  %v2262_v56 = vadd.f32 %v2261_v15, %v2260_v58  ;;  %v2318_v19 = vmul.f32 %v1873_v0, %v1873_v0  ;;  %v2494_v12 = vadd.f32 %v2493_v47, %v2492_v14 }
 0x1db   : > { %v2500_v9 = vrot.slane %v2499_v29, 1  ;;  %v2556_v27 = vadd.f32 %v2245_v5, %v2238_v42  ;;  %v2257_v13 = vadd.f32 %v2256_v44, %v2255_v63  ;;  %v2252_v50 = vadd.f32 %v2251_v31, %v2250_v16 }
 0x1dc   : > { %v2512_v41 = vrot.slane %v2511_v28, 2  ;;  %v2275_v60 = vrot.slane %v2274_v40, 4  ;;  %v2530_v54 = vsel %vm2063_vm1, %v2318_v19, 0.0  ;;  %v2263_v61 = vrot.slane %v2262_v56, 2 }
 0x1dd   : > { %v2501_v30 = vadd.f32 %v2500_v9, %v2499_v29  ;;  %v2258_v22 = vrot.slane %v2257_v13, 1  ;;  %v2518_v4 = vadd.f32 %v2517_v3, %v2516_v34  ;;  %v2531_v48 = vrot.slane %v2530_v54, 4 }
 0x1de   : > { %v2513_v46 = vadd.f32 %v2512_v41, %v2511_v28  ;;  %v2276_v45 = vadd.f32 %v2275_v60, %v2274_v40  ;;  %v538_v49 = vrot.slane %v3830_v33, %v3492_v20  ;;  %v2508_v42 = vadd.f32 %v2507_v1, %v3826_v23 }
 0x1df   : > { %v2588_v59 = vadd.f32 %v2501_v30, %v2494_v12  ;;  %v2259_v14 = vadd.f32 %v2258_v22, %v2257_v13  ;;  %v2264_v32 = vadd.f32 %v2263_v61, %v2262_v56  ;;  %v2519_v52 = vrot.slane %v2518_v4, 2 }
 0x1e0   : > { %v2514_v47 = vrot.slane %v2513_v46, 1  ;;  %v1834_v16 = vadd.f32 %v3809_v62, %v538_v49  ;;  %v546_v18 = vrot.slane %v3830_v33, %v3494_v21  ;;  %v2277_v8 = vrot.slane %v2276_v45, 2 }
 0x1e1   : > { %v2557_v31 = vadd.f32 %v2259_v14, %v2252_v50  ;;  %v2532_v43 = vadd.f32 %v2531_v48, %v2530_v54  ;;  %v2265_v23 = vrot.slane %v2264_v32, 1  ;;  %v2520_v1 = vadd.f32 %v2519_v52, %v2518_v4 }
 0x1e2   : > { %v2515_v55 = vadd.f32 %v2514_v47, %v2513_v46  ;;  %v2030_v57 = vcombine.low %v3849_v17, %v1834_v16  ;;  %v2267_v20 = vsel %vm2063_vm1, %v1834_v16, 0.0  ;;  %v2317_v58 = vmul.f32 %v1834_v16, %v1834_v16 }
 0x1e3   : > { %v2566_v39 = vadd.f32 %v2557_v31, %v2556_v27  ;;  %v2268_v53 = vrot.slane %v2267_v20, 4  ;;  %v1875_v62 = vadd.f32 %v3817_v6, %v546_v18  ;;  %v2278_v38 = vadd.f32 %v2277_v8, %v2276_v45 }
 0x1e4   : > { %v2589_v11 = vadd.f32 %v2515_v55, %v2508_v42  ;;  %v2533_v7 = vrot.slane %v2532_v43, 2  ;;  %v2038_v21 = vrot.slane %v2030_v57, %v3505_v26  ;;  %v2523_v33 = vsel %vm2063_vm1, %v2317_v58, 0.0 }
 0x1e5   : > { %v2269_v36 = vadd.f32 %v2268_v53, %v2267_v20  ;;  %v2031_v51 = vcombine.low %v1873_v0, %v1875_v62  ;;  %v2281_v17 = vsel %vm2063_vm1, %v1875_v62, 0.0  ;;  %v2524_v37 = vrot.slane %v2523_v33, 4 }
 0x1e6   : > { %v2598_v24 = vadd.f32 %v2589_v11, %v2588_v59  ;;  %v2282_v15 = vrot.slane %v2281_v17, 4  ;;  %v2319_v34 = vmul.f32 %v1875_v62, %v1875_v62  ;;  %v2521_v5 = vrot.slane %v2520_v1, 1 }
 0x1e7   : > { %v2270_v63 = vrot.slane %v2269_v36, 2  ;;  %v2045_v29 = vrot.slane %v2031_v51, %v3505_v26  ;;  %v2525_v44 = vadd.f32 %v2524_v37, %v2523_v33  ;;  %v2266_v56 = vadd.f32 %v2265_v23, %v2264_v32 }
 0x1e8   : > { %v2283_v3 = vadd.f32 %v2282_v15, %v2281_v17  ;;  %v2537_v28 = vsel %vm2063_vm1, %v2319_v34, 0.0  ;;  %v2534_v40 = vadd.f32 %v2533_v7, %v2532_v43  ;;  %v2279_v0 = vrot.slane %v2278_v38, 1 }
 0x1e9   : > { %v2271_v6 = vadd.f32 %v2270_v63, %v2269_v36  ;;  %v2046_v19 = vcombine.low %v2038_v21, %v2045_v29  ;;  %v2538_v12 = vrot.slane %v2537_v28, 4  ;;  %v2526_v27 = vrot.slane %v2525_v44, 2 }
 0x1ea   : > { %v2284_v13 = vrot.slane %v2283_v3, 2  ;;  %v2522_v54 = vadd.f32 %v2521_v5, %v2520_v1  ;;  %v2535_v30 = vrot.slane %v2534_v40, 1  ;;  %v2280_v61 = vadd.f32 %v2279_v0, %v2278_v38 }
 0x1eb   : > { %v2272_v9 = vrot.slane %v2271_v6, 1  ;;  %2062 = vst [vmem:[%s3587_s12 + $0x38] sm:$0xff] %v2046_v19  ;;  %v2539_v50 = vadd.f32 %v2538_v12, %v2537_v28  ;;  %v2527_v60 = vadd.f32 %v2526_v27, %v2525_v44 }
 0x1ec   : > { %v2285_v26 = vadd.f32 %v2284_v13, %v2283_v3  ;;  %v2536_v14 = vadd.f32 %v2535_v30, %v2534_v40 }
 0x1ed   : > { %v2273_v41 = vadd.f32 %v2272_v9, %v2271_v6  ;;  %v2540_v22 = vrot.slane %v2539_v50, 2  ;;  %v2528_v4 = vrot.slane %v2527_v60, 1 }
 0x1ee   : > { %v2286_v45 = vrot.slane %v2285_v26, 1 }
 0x1ef   : > { %v2558_v46 = vadd.f32 %v2273_v41, %v2266_v56  ;;  %v2541_v48 = vadd.f32 %v2540_v22, %v2539_v50  ;;  %v2529_v49 = vadd.f32 %v2528_v4, %v2527_v60 }
 0x1f0   : > { %v2287_v59 = vadd.f32 %v2286_v45, %v2285_v26 }
 0x1f1   : > { %v2542_v42 = vrot.slane %v2541_v48, 1  ;;  %v2590_v47 = vadd.f32 %v2529_v49, %v2522_v54 }
 0x1f2   : > { %v2559_v16 = vadd.f32 %v2287_v59, %v2280_v61 }
 0x1f3   : > { %v2543_v31 = vadd.f32 %v2542_v42, %v2541_v48 }
 0x1f4   : > { %v2567_v32 = vadd.f32 %v2559_v16, %v2558_v46 }
 0x1f5   : > { %v2591_v52 = vadd.f32 %v2543_v31, %v2536_v14 }
 0x1f6   : > { %v2571_v18 = vadd.f32 %v2567_v32, %v2566_v39 }
 0x1f7   : > { %v2599_v55 = vadd.f32 %v2591_v52, %v2590_v47 }
 0x1f8   : > { %v2573_v8 = vadd.f32 %v2571_v18, %v3835_v25 }
 0x1f9   : > { %v2603_v43 = vadd.f32 %v2599_v55, %v2598_v24 }
 0x1fa   : > { %v2574_v57 = vadd.f32 %v2573_v8, %v3743_v35 }
 0x1fb   : > { %v2605_v20 = vadd.f32 %v2603_v43, %v3845_v2 }
 0x1fc   : > { %2575 = vst [vmem:[%s279_s21] sm:$0x1] %v2574_v57 }
 0x1fd   : > { %v2606_v11 = vadd.f32 %v2605_v20, %v3749_v10 }
 0x1ff   : > { %2607 = vst [vmem:[%s279_s21 + $0x1] sm:$0x1] %v2606_v11 }
 0x200 PF: > { %p16_p4 = scmp.ge.s32.totalorder %s3147_s19, 4   ;;  %s3928_s15 = smov %s3083_s16 }
 0x201   : > { %s3929_s16 = smov %s3087_s17  ;;  %s3930_s17 = smov %s3157_s22 }
 0x202   : > { %s3931_s18 = smov %s3147_s19  ;;  %18 = sbr.rel (!%p16_p4) target bundleno = 4 (0x4), region = 100 }
 0x209   :  { %2644 = vsyncpa [#allocation3], 1 }
 0x20a   :  { %2646 = vsyncpa [#allocation3 + $0x1], 1 }
 0x20b   :  { %2647 = vsyncpa [#allocation5], 1 }
 0x20c   :  { %2649 = vsyncpa [#allocation5 + $0x1], 1 }

// kernel: generator_forward.5
= control target key start
LH: loop header
LB: loop body
LE: loop exit
PB: predicated region body
PF: predicated region fallthrough
CT: control target
= control target key end

     0   :  { %s4004_s0 = inlined_call_operand.vmem [shape: f32[2,8,8,128], index: 0, kind: input, shape index: {}]   ;;  %s4005_s1 = inlined_call_operand.hbm [shape: bf16[384,256], index: 1, kind: input, shape index: {}]   ;;  %s4006_s2 = inlined_call_operand.hbm [shape: bf16[384,512], index: 2, kind: input, shape index: {}]   ;;  %s4007_s3 = inlined_call_operand.hbm [shape: bf16[384,256], index: 3, kind: input, shape index: {}]   ;;  %s4008_s4 = inlined_call_operand.hbm [shape: f32[1,256], index: 4, kind: input, shape index: {}]   ;;  %s4009_s5 = inlined_call_operand.vmem [shape: f32[1,1,128], index: 5, kind: input, shape index: {}]   ;;  %s4010_s6 = inlined_call_operand.vmem [shape: f32[1,1,128], index: 6, kind: input, shape index: {}]   ;;  %s4011_s7 = inlined_call_operand.vmem [shape: f32[2,8,2,8,256], index: 7, kind: output, shape index: {0}]   ;;  %s4012_s8 = inlined_call_operand.vmem [shape: f32[2,1,2,128], index: 8, kind: output, shape index: {1}]  }
   0x1   :  { %4016 = sst [smem:[#allocation15_spill]] %s4006_s2 }
   0x2   :  { %14 = vsyncpa [#allocation5], 0 }
   0x3   :  { %15 = vsyncpa [#allocation7], 0 }
   0x4   :  { %16 = vsyncpa [#allocation10], 0  ;;  %s3644_s27 = smov 0   ;;  %s3646_s28 = smov 0  }
   0x5   :  { %s3648_s29 = smov 0  }
   0x6 LB: > { %s3589_s30 = smov [#allocation6]   ;;  %s2753_s10 = sadd.s32 4294967295, %s3587_s29   ;;  %s3587_s29 = sphi %s3648_s29, %s22_s29   ;;  %s3583_s28 = sphi %s3646_s28, %s4028_s28   ;;  %s3579_s27 = sphi %s3644_s27, %s4027_s27  }
   0x7   : > { %s272_s9 = sshll.u32 %s3589_s30, 4  ;;  %p2755_p0 = scmp.ge.s32.totalorder %s3587_s29, 1  ;;  %s3666_s9 = int_to_ptr.vmem [resolvable:$true] %s272_s9 }
   0x8   : > { %p247_p1 = scmp.lt.s32.totalorder %s3587_s29, 3  ;;  %p3662_p2 = scmp.eq.s32.totalorder %s2753_s10, 0 }
   0x9   : > { %s34_s14 = sadd.s32 1, %s3583_s28  ;;  %s3590_s16 = smov [#allocation4]  }
   0xa   : > { %s4017_s11 = scalar_select %p3662_p2, 1, 0 }
   0xb   : > { %p3668_p3 = pnand %p2755_p0, %p247_p1  ;;  %p3681_p6 = scmp.ge.s32.totalorder %s34_s14, 2 }
   0xc   : > { %s259_s17 = sshll.u32 %s3590_s16, 4  ;;  %s4021_s2 = sld [smem:[#allocation15_spill]]  ;;  %s260_s17 = int_to_ptr.vmem [resolvable:$true] %s259_s17 }
   0xd   : > { %s4018_s12 = scalar_select %p3668_p3, 1, 0 }
   0xe   : > { %p3097_p4 = pneg %p3668_p3 }
  0x10   : > { %p3676_p5 = pnand %p3662_p2, %p3097_p4 }
  0x12   : > { %s3441_s20 = scalar_lea.hbm %s4021_s2, 12288  ;;  %p3693_p8 = pneg %p3676_p5 }
  0x13   : > { %p3442_p7 = scmp.ne.s32.totalorder %s4021_s2, %s3441_s20  ;;  %p3448_p11 = scmp.lt.u32.totalorder %s3441_s20, %s4021_s2 }
  0x15   : > { %p3444_p9 = pnand %p3693_p8, %p3442_p7 }
  0x17   : > { %p3445_p10 = pneg %p3444_p9 }
  0x19   : > { %p3450_p12 = pnand %p3448_p11, %p3445_p10 }
  0x1b   : > { %3453 = shalt.err (!%p3450_p12)
}
  0x1c   : > { %s3454_s26 = scalar_lea.vmem %s3666_s9, 12288  ;;  %p3462_p4 = scmp.lt.s32.totalorder %s3666_s9, %s3666_s9 }
  0x1d   : > { %p3455_p13 = scmp.ne.s32.totalorder %s3666_s9, %s3454_s26  ;;  %p3463_p2 = scmp.lt.s32.totalorder %s3454_s26, %s3454_s26 }
  0x1f   : > { %p3457_p0 = pnand %p3455_p13, %p3693_p8  ;;  %p3464_p7 = por %p3463_p2, %p3462_p4 }
  0x21   : > { %p3458_p1 = pneg %p3457_p0 }
  0x23   : > { %p3465_p9 = pnand %p3464_p7, %p3458_p1 }
  0x25   : > { %3468 = shalt.err (!%p3465_p9)
}
  0x26   : > { %s3591_s30 = smov 256   ;;  %s3592_s10 = smov 16  }
  0x27   : > { %3103 = dma.hbm_to_vmem [thread:$0]  (!%p3676_p5), %s4021_s2, 12288, %s3666_s9, [#allocation7], %s3591_s30, %s3591_s30, %s3592_s10  }
  0x28   : > { %s4030_s14 = smov (%p3681_p6, %s34_s14), 0  ;;  %s3469_s21 = scalar_lea.hbm %s4005_s1, 6144 }
  0x29   : > { %4023 = sst [smem:[#allocation14_spill]] %s4030_s14  ;;  %p3470_p2 = scmp.ne.s32.totalorder %s4005_s1, %s3469_s21 }
  0x2a   : > { %p3476_p12 = scmp.lt.u32.totalorder %s3469_s21, %s4005_s1 }
  0x2b   : > { %p3472_p10 = pnand %p3470_p2, %p3693_p8 }
  0x2d   : > { %p3473_p11 = pneg %p3472_p10 }
  0x2f   : > { %p3478_p13 = pnand %p3476_p12, %p3473_p11 }
  0x31   : > { %3481 = shalt.err (!%p3478_p13)
}
  0x32   : > { %s3482_s9 = scalar_lea.vmem %s260_s17, 6144  ;;  %p3490_p4 = scmp.lt.s32.totalorder %s260_s17, %s260_s17 }
  0x33   : > { %p3483_p6 = scmp.ne.s32.totalorder %s260_s17, %s3482_s9  ;;  %p3491_p7 = scmp.lt.s32.totalorder %s3482_s9, %s3482_s9 }
  0x35   : > { %p3485_p0 = pnand %p3483_p6, %p3693_p8  ;;  %p3492_p9 = por %p3491_p7, %p3490_p4 }
  0x37   : > { %p3486_p1 = pneg %p3485_p0 }
  0x39   : > { %p3493_p3 = pnand %p3492_p9, %p3486_p1 }
  0x3b   : > { %3496 = shalt.err (!%p3493_p3)
}
  0x3c   : > { %s3593_s15 = smov 128   ;;  %s3594_s30 = smov 8  }
  0x3d   : > { %3100 = dma.hbm_to_vmem [thread:$0]  (!%p3676_p5), %s4005_s1, 6144, %s260_s17, [#allocation5], %s3593_s15, %s3593_s15, %s3594_s30  }
  0x3e   : > { %s3595_s18 = smov [#allocation8]   ;;  %s3596_s20 = smov [#allocation9]  }
  0x3f   : > { %s285_s19 = sshll.u32 %s3595_s18, 4  ;;  %s299_s21 = sshll.u32 %s3596_s20, 4  ;;  %s286_s19 = int_to_ptr.vmem [resolvable:$true] %s285_s19  ;;  %s300_s21 = int_to_ptr.vmem [resolvable:$true] %s299_s21 }
  0x40   : > { %s3497_s25 = scalar_lea.hbm %s4007_s3, 6144 }
  0x41   : > { %p3498_p3 = scmp.ne.s32.totalorder %s4007_s3, %s3497_s25  ;;  %p3504_p11 = scmp.lt.u32.totalorder %s3497_s25, %s4007_s3 }
  0x43   : > { %p3500_p2 = pnand %p3498_p3, %p3693_p8 }
  0x45   : > { %p3501_p10 = pneg %p3500_p2 }
  0x47   : > { %p3506_p12 = pnand %p3504_p11, %p3501_p10 }
  0x49   : > { %3509 = shalt.err (!%p3506_p12)
}
  0x4a   : > { %s3510_s17 = scalar_lea.vmem %s286_s19, 6144  ;;  %p3518_p1 = scmp.lt.s32.totalorder %s286_s19, %s286_s19 }
  0x4b   : > { %p3511_p13 = scmp.ne.s32.totalorder %s286_s19, %s3510_s17  ;;  %p3519_p4 = scmp.lt.s32.totalorder %s3510_s17, %s3510_s17 }
  0x4d   : > { %p3513_p6 = pnand %p3511_p13, %p3693_p8  ;;  %p3520_p7 = por %p3519_p4, %p3518_p1 }
  0x4f   : > { %p3514_p0 = pneg %p3513_p6 }
  0x51   : > { %p3521_p9 = pnand %p3520_p7, %p3514_p0 }
  0x53   : > { %3524 = shalt.err (!%p3521_p9)
}
  0x54   : > { %3106 = dma.hbm_to_vmem [thread:$0]  (!%p3676_p5), %s4007_s3, 6144, %s286_s19, [#allocation7], %s3593_s15, %s3593_s15, %s3594_s30  }
  0x55   : > { %s3525_s18 = scalar_lea.hbm %s4008_s4, 32 }
  0x56   : > { %p3526_p3 = scmp.ne.s32.totalorder %s4008_s4, %s3525_s18  ;;  %p3532_p11 = scmp.lt.u32.totalorder %s3525_s18, %s4008_s4 }
  0x58   : > { %p3528_p2 = pnand %p3526_p3, %p3693_p8 }
  0x5a   : > { %p3529_p10 = pneg %p3528_p2 }
  0x5c   : > { %p3534_p12 = pnand %p3532_p11, %p3529_p10 }
  0x5e   : > { %3537 = shalt.err (!%p3534_p12)
}
  0x5f   : > { %s3538_s26 = scalar_lea.vmem %s300_s21, 32  ;;  %p3546_p1 = scmp.lt.s32.totalorder %s300_s21, %s300_s21 }
  0x60   : > { %p3539_p13 = scmp.ne.s32.totalorder %s300_s21, %s3538_s26  ;;  %p3547_p4 = scmp.lt.s32.totalorder %s3538_s26, %s3538_s26 }
  0x62   : > { %p3541_p6 = pnand %p3539_p13, %p3693_p8  ;;  %p3548_p7 = por %p3547_p4, %p3546_p1 }
  0x64   : > { %p3542_p0 = pneg %p3541_p6 }
  0x66   : > { %p3549_p9 = pnand %p3548_p7, %p3542_p0 }
  0x68   : > { %3552 = shalt.err (!%p3549_p9)
}
  0x69   : > { %3109 = dma.hbm_to_vmem [thread:$0]  (!%p3676_p5), %s4008_s4, 32, %s300_s21, [#allocation10]  }
  0x6a   : > { %p4024_p3 = scmp.ne.s32.totalorder %s4018_s12, 0 }
  0x6b   : > { %p4025_p2 = scmp.ne.s32.totalorder (!%p4024_p3), %s4017_s11, 0 }
  0x6c   : > { %326 = sbr.rel (%p4024_p3) target bundleno = 581 (0x245), region = 48 }
  0x73   : > { %3566 = dma.done.wait (%p4025_p2), [#allocation5], 6144  }
  0x74   : > { %3568 = vsyncadd (%p4025_p2), [#allocation5], 4294961152 }
  0x75   : > { %3570 = dma.done.wait (%p4025_p2), [#allocation7], 18432  }
  0x76   : > { %3572 = vsyncadd (%p4025_p2), [#allocation7], 4294948864 }
  0x77   : > { %3574 = dma.done.wait (%p4025_p2), [#allocation10], 32  }
  0x78   : > { %3576 = vsyncadd (%p4025_p2), [#allocation10], 4294967264  ;;  %v3597_v0 = vmov 0.0   ;;  %v3152_v1 = vld [vmem:[#allocation6 + $0x4] ss:$16 sps:$4 sm:$0xff]   ;;  %p384_p5 = scmp.lt.s32.totalorder %s3579_s27, 1 }
  0x79   : > { %409 = vst [vmem:[#allocation2] sm:$0xff] %v3597_v0  ;;  %410 = vst [vmem:[#allocation2 + $0x8] sm:$0x3] %v3597_v0  ;;  %v3154_v2 = vld [vmem:[#allocation6 + $0xc] ss:$16 sps:$4 sm:$0xff]   ;;  %1202 = vmatprep.subr.bf16.mxu0 %v3152_v1 }
  0x7a   : > { %411 = vst [vmem:[#allocation2 + $0x10] sm:$0xff] %v3597_v0  ;;  %412 = vst [vmem:[#allocation2 + $0x18] sm:$0x3] %v3597_v0  ;;  %v3156_v3 = vld [vmem:[#allocation6] ss:$16 sps:$4 sm:$0xff]   ;;  %1348 = vmatprep.subr.bf16.mxu1 %v3154_v2  ;;  %s4032_s27 = smov (!%p384_p5, %s3579_s27), 1 }
  0x7b   : > { %413 = vst [vmem:[#allocation2 + $0x20] sm:$0xff] %v3597_v0  ;;  %414 = vst [vmem:[#allocation2 + $0x28] sm:$0x3] %v3597_v0  ;;  %v3157_v4 = vld [vmem:[#allocation6 + $0x8] ss:$16 sps:$4 sm:$0xff]   ;;  %1203 = vmatpush1.bf16.msra.mxu0 %v3156_v3  ;;  %s2983_s11 = sshll.u32 %s4032_s27, 6 }
  0x7c   : > { %415 = vst [vmem:[#allocation2 + $0x30] sm:$0xff] %v3597_v0  ;;  %416 = vst [vmem:[#allocation2 + $0x38] sm:$0x3] %v3597_v0  ;;  %v3158_v5 = vld [vmem:[#allocation6 + $0x24] ss:$16 sps:$4 sm:$0xff]   ;;  %1349 = vmatpush1.bf16.msra.mxu1 %v3157_v4  ;;  %s3794_s23 = scalar_lea.vmem %s4004_s0, %s2983_s11  ;;  %s2984_s10 = sshll.u32 %s4032_s27, 8 }
  0x7d   : > { %417 = vst [vmem:[#allocation2 + $0x40] sm:$0xff] %v3597_v0  ;;  %418 = vst [vmem:[#allocation2 + $0x48] sm:$0x3] %v3597_v0  ;;  %v3160_v6 = vld [vmem:[#allocation6 + $0x2c] ss:$16 sps:$4 sm:$0xff]   ;;  %1204 = vmatprep.subr.bf16.mxu0 %v3158_v5  ;;  %v431_v48 = vld [vmem:[%s3794_s23] sm:$0xff]  ;;  %s3925_s14 = scalar_lea.vmem %s4011_s7, %s2984_s10 }
  0x7e   : > { %419 = vst [vmem:[#allocation2 + $0x50] sm:$0xff] %v3597_v0  ;;  %420 = vst [vmem:[#allocation2 + $0x58] sm:$0x3] %v3597_v0  ;;  %v3162_v7 = vld [vmem:[#allocation6 + $0x20] ss:$16 sps:$4 sm:$0xff]   ;;  %1350 = vmatprep.subr.bf16.mxu1 %v3160_v6  ;;  %v432_v49 = vld [vmem:[%s3794_s23 + $0x8] sm:$0xff] }
  0x7f   : > { %421 = vst [vmem:[#allocation2 + $0x60] sm:$0xff] %v3597_v0  ;;  %422 = vst [vmem:[#allocation2 + $0x68] sm:$0x3] %v3597_v0  ;;  %v3163_v8 = vld [vmem:[#allocation6 + $0x28] ss:$16 sps:$4 sm:$0xff]   ;;  %1205 = vmatpush1.bf16.msra.mxu0 %v3162_v7  ;;  %v433_v50 = vld [vmem:[%s3794_s23 + $0x10] sm:$0xff] }
  0x80   : > { %423 = vst [vmem:[#allocation2 + $0x70] sm:$0xff] %v3597_v0  ;;  %424 = vst [vmem:[#allocation2 + $0x78] sm:$0x3] %v3597_v0  ;;  %v3164_v9 = vld [vmem:[#allocation6 + $0x44] ss:$16 sps:$4 sm:$0xff]   ;;  %1351 = vmatpush1.bf16.msra.mxu1 %v3163_v8  ;;  %v434_v4 = vld [vmem:[%s3794_s23 + $0x18] sm:$0xff] }
  0x81   : > { %425 = vst [vmem:[#allocation2 + $0x80] sm:$0xff] %v3597_v0  ;;  %426 = vst [vmem:[#allocation2 + $0x88] sm:$0x3] %v3597_v0  ;;  %v3166_v10 = vld [vmem:[#allocation6 + $0x4c] ss:$16 sps:$4 sm:$0xff]   ;;  %1206 = vmatprep.subr.bf16.mxu0 %v3164_v9  ;;  %s2770_s18 = sshll.u32 %s4032_s27, 1 }
  0x82   : > { %427 = vst [vmem:[#allocation2 + $0x90] sm:$0xff] %v3597_v0  ;;  %428 = vst [vmem:[#allocation2 + $0x98] sm:$0x3] %v3597_v0  ;;  %v3168_v11 = vld [vmem:[#allocation6 + $0x40] ss:$16 sps:$4 sm:$0xff]   ;;  %1352 = vmatprep.subr.bf16.mxu1 %v3166_v10  ;;  %s406_s24 = scalar_lea.vmem %s4012_s8, %s2770_s18 }
  0x83   : > { %v3169_v12 = vld [vmem:[#allocation6 + $0x48] ss:$16 sps:$4 sm:$0xff]   ;;  %v3170_v13 = vld [vmem:[#allocation6 + $0x64] ss:$16 sps:$4 sm:$0xff]   ;;  %v3172_v14 = vld [vmem:[#allocation6 + $0x6c] ss:$16 sps:$4 sm:$0xff]   ;;  %1207 = vmatpush1.bf16.msra.mxu0 %v3168_v11 }
  0x84   : > { %v3174_v15 = vld [vmem:[#allocation6 + $0x60] ss:$16 sps:$4 sm:$0xff]   ;;  %1353 = vmatpush1.bf16.msra.mxu1 %v3169_v12  ;;  %v3175_v16 = vld [vmem:[#allocation6 + $0x68] ss:$16 sps:$4 sm:$0xff]   ;;  %v3176_v17 = vld [vmem:[#allocation6 + $0x84] ss:$16 sps:$4 sm:$0xff]   ;;  %1208 = vmatprep.subr.bf16.mxu0 %v3170_v13 }
  0x85   : > { %1354 = vmatprep.subr.bf16.mxu1 %v3172_v14  ;;  %v3178_v18 = vld [vmem:[#allocation6 + $0x8c] ss:$16 sps:$4 sm:$0xff]   ;;  %v3180_v19 = vld [vmem:[#allocation6 + $0x80] ss:$16 sps:$4 sm:$0xff]   ;;  %v3181_v20 = vld [vmem:[#allocation6 + $0x88] ss:$16 sps:$4 sm:$0xff]  }
  0x86   : > { %v3182_v21 = vld [vmem:[#allocation6 + $0xa4] ss:$16 sps:$4 sm:$0xff]   ;;  %v3184_v22 = vld [vmem:[#allocation6 + $0xac] ss:$16 sps:$4 sm:$0xff]   ;;  %v3186_v23 = vld [vmem:[#allocation6 + $0xa0] ss:$16 sps:$4 sm:$0xff]  }
  0x87   : > { %1209 = vmatpush1.bf16.msra.mxu0 %v3174_v15  ;;  %v3187_v24 = vld [vmem:[#allocation6 + $0xa8] ss:$16 sps:$4 sm:$0xff]   ;;  %v3188_v25 = vld [vmem:[#allocation6 + $0xc4] ss:$16 sps:$4 sm:$0xff]   ;;  %v3190_v26 = vld [vmem:[#allocation6 + $0xcc] ss:$16 sps:$4 sm:$0xff]  }
  0x88   : > { %1355 = vmatpush1.bf16.msra.mxu1 %v3175_v16  ;;  %1210 = vmatprep.subr.bf16.mxu0 %v3176_v17  ;;  %v3192_v27 = vld [vmem:[#allocation6 + $0xc0] ss:$16 sps:$4 sm:$0xff]   ;;  %v3193_v28 = vld [vmem:[#allocation6 + $0xc8] ss:$16 sps:$4 sm:$0xff]   ;;  %v3194_v29 = vld [vmem:[#allocation6 + $0xe4] ss:$16 sps:$4 sm:$0xff]  }
  0x89   : > { %1356 = vmatprep.subr.bf16.mxu1 %v3178_v18  ;;  %v3196_v30 = vld [vmem:[#allocation6 + $0xec] ss:$16 sps:$4 sm:$0xff]   ;;  %v3198_v31 = vld [vmem:[#allocation6 + $0xe0] ss:$16 sps:$4 sm:$0xff]   ;;  %v3199_v32 = vld [vmem:[#allocation6 + $0xe8] ss:$16 sps:$4 sm:$0xff]  }
  0x8a   : > { %v3200_v33 = vld [vmem:[#allocation6 + $0x104] ss:$16 sps:$4 sm:$0xff]   ;;  %v3202_v34 = vld [vmem:[#allocation6 + $0x10c] ss:$16 sps:$4 sm:$0xff]   ;;  %v3204_v35 = vld [vmem:[#allocation6 + $0x100] ss:$16 sps:$4 sm:$0xff]  }
  0x8b   : > { %1211 = vmatpush1.bf16.msra.mxu0 %v3180_v19  ;;  %v3205_v36 = vld [vmem:[#allocation6 + $0x108] ss:$16 sps:$4 sm:$0xff]   ;;  %v3206_v37 = vld [vmem:[#allocation6 + $0x124] ss:$16 sps:$4 sm:$0xff]   ;;  %v3208_v38 = vld [vmem:[#allocation6 + $0x12c] ss:$16 sps:$4 sm:$0xff]  }
  0x8c   : > { %1357 = vmatpush1.bf16.msra.mxu1 %v3181_v20  ;;  %1212 = vmatprep.subr.bf16.mxu0 %v3182_v21  ;;  %v3210_v39 = vld [vmem:[#allocation6 + $0x120] ss:$16 sps:$4 sm:$0xff]   ;;  %v3211_v40 = vld [vmem:[#allocation6 + $0x128] ss:$16 sps:$4 sm:$0xff]   ;;  %v3212_v41 = vld [vmem:[#allocation6 + $0x144] ss:$16 sps:$4 sm:$0xff]  }
  0x8d   : > { %1358 = vmatprep.subr.bf16.mxu1 %v3184_v22  ;;  %v3214_v42 = vld [vmem:[#allocation6 + $0x14c] ss:$16 sps:$4 sm:$0xff]   ;;  %v3216_v43 = vld [vmem:[#allocation6 + $0x140] ss:$16 sps:$4 sm:$0xff]   ;;  %v3217_v44 = vld [vmem:[#allocation6 + $0x148] ss:$16 sps:$4 sm:$0xff]  }
  0x8e   : > { %v3218_v45 = vld [vmem:[#allocation6 + $0x164] ss:$16 sps:$4 sm:$0xff]   ;;  %v3220_v46 = vld [vmem:[#allocation6 + $0x16c] ss:$16 sps:$4 sm:$0xff]   ;;  %v3222_v47 = vld [vmem:[#allocation6 + $0x160] ss:$16 sps:$4 sm:$0xff]  }
  0x8f   : > { %1213 = vmatpush1.bf16.msra.mxu0 %v3186_v23  ;;  %v3802_v51 = vld [vmem:[%s4009_s5] ss:$0 sm:$0xff]  ;;  %v3223_v52 = vld [vmem:[#allocation6 + $0x168] ss:$16 sps:$4 sm:$0xff]   ;;  %v3224_v57 = vld [vmem:[#allocation6 + $0x184] ss:$16 sps:$4 sm:$0xff]  }
  0x90   : > { %1359 = vmatpush1.bf16.msra.mxu1 %v3187_v24  ;;  %1214 = vmatprep.subr.bf16.mxu0 %v3188_v25  ;;  %v446_v53 = vmul.f32 %v3802_v51, %v431_v48  ;;  %v447_v54 = vmul.f32 %v3802_v51, %v432_v49  ;;  %v448_v55 = vmul.f32 %v3802_v51, %v433_v50  ;;  %v3810_v56 = vld [vmem:[%s4010_s6] ss:$0 sm:$0xff]  ;;  %v3226_v58 = vld [vmem:[#allocation6 + $0x18c] ss:$16 sps:$4 sm:$0xff]   ;;  %v3229_v63 = vld [vmem:[#allocation6 + $0x188] ss:$16 sps:$4 sm:$0xff]  }
  0x91   : > { %1360 = vmatprep.subr.bf16.mxu1 %v3190_v26  ;;  %v3228_v62 = vld [vmem:[#allocation6 + $0x180] ss:$16 sps:$4 sm:$0xff]   ;;  %v3230_v2 = vld [vmem:[#allocation6 + $0x1a4] ss:$16 sps:$4 sm:$0xff]   ;;  %v3232_v3 = vld [vmem:[#allocation6 + $0x1ac] ss:$16 sps:$4 sm:$0xff]   ;;  %v449_v6 = vmul.f32 %v3802_v51, %v434_v4 }
  0x92   : > { %v3813_v59 = vadd.f32 %v3810_v56, %v446_v53  ;;  %v462_v60 = vadd.f32 %v3810_v56, %v447_v54  ;;  %v3817_v61 = vadd.f32 %v3810_v56, %v448_v55  ;;  %v3234_v5 = vld [vmem:[#allocation6 + $0x1a0] ss:$16 sps:$4 sm:$0xff]   ;;  %v3235_v7 = vld [vmem:[#allocation6 + $0x1a8] ss:$16 sps:$4 sm:$0xff]   ;;  %v3236_v8 = vld [vmem:[#allocation6 + $0x1c4] ss:$16 sps:$4 sm:$0xff]  }
  0x93   : > { %1215 = vmatpush1.bf16.msra.mxu0 %v3192_v27  ;;  %v3238_v9 = vld [vmem:[#allocation6 + $0x1cc] ss:$16 sps:$4 sm:$0xff]   ;;  %v464_v10 = vadd.f32 %v3810_v56, %v449_v6  ;;  %v3240_v11 = vld [vmem:[#allocation6 + $0x1c0] ss:$16 sps:$4 sm:$0xff]   ;;  %v3241_v12 = vld [vmem:[#allocation6 + $0x1c8] ss:$16 sps:$4 sm:$0xff]  }
  0x94   : > { %1361 = vmatpush1.bf16.msra.mxu1 %v3193_v28  ;;  %1216 = vmatprep.subr.bf16.mxu0 %v3194_v29  ;;  %470 = vst [vmem:[#allocation2 + $0x11] sm:$0xff] %v3813_v59  ;;  %471 = vst [vmem:[#allocation2 + $0x21] sm:$0xff] %v462_v60  ;;  %v3822_v0 = vpack.c.bf16 %v3817_v61, %v462_v60  ;;  %v578_v1 = vpack.c.bf16 %v462_v60, %v3813_v59  ;;  %v3242_v15 = vld [vmem:[#allocation6 + $0x1e4] ss:$16 sps:$4 sm:$0xff]   ;;  %v3244_v16 = vld [vmem:[#allocation6 + $0x1ec] ss:$16 sps:$4 sm:$0xff]  }
  0x95   : > { %1362 = vmatprep.subr.bf16.mxu1 %v3196_v30  ;;  %472 = vst [vmem:[#allocation2 + $0x31] sm:$0xff] %v3817_v61  ;;  %473 = vst [vmem:[#allocation2 + $0x41] sm:$0xff] %v464_v10  ;;  %v435_v18 = vld [vmem:[%s3794_s23 + $0x20] sm:$0xff]  ;;  %v436_v19 = vld [vmem:[%s3794_s23 + $0x28] sm:$0xff] }
  0x96   : > { %1234 = vmatprep.mubr.bf16.mxu0 %v578_v1  ;;  %1380 = vmatprep.mubr.bf16.mxu1 %v578_v1  ;;  %v450_v20 = vmul.f32 %v3802_v51, %v435_v18  ;;  %v3246_v21 = vld [vmem:[#allocation6 + $0x1e0] ss:$16 sps:$4 sm:$0xff]   ;;  %v451_v22 = vmul.f32 %v3802_v51, %v436_v19  ;;  %v3247_v23 = vld [vmem:[#allocation6 + $0x1e8] ss:$16 sps:$4 sm:$0xff]   ;;  %v3250_v24 = vld [vmem:[#allocation6 + $0x204] ss:$16 sps:$4 sm:$0xff]  }
  0x97   : > { %1217 = vmatpush1.bf16.msra.mxu0 %v3198_v31  ;;  %v3253_v28 = vld [vmem:[#allocation6 + $0x20c] ss:$16 sps:$4 sm:$0xff]   ;;  %v3248_v30 = vld [vmem:[#allocation6 + $0x200] ss:$16 sps:$4 sm:$0xff]   ;;  %v3268_v53 = vld [vmem:[#allocation6 + $0x264] ss:$16 sps:$4 sm:$0xff]  }
  0x98   : > { %1363 = vmatpush1.bf16.msra.mxu1 %v3199_v32  ;;  %1218 = vmatprep.subr.bf16.mxu0 %v3200_v33  ;;  %v465_v25 = vadd.f32 %v3810_v56, %v450_v20  ;;  %v466_v27 = vadd.f32 %v3810_v56, %v451_v22  ;;  %v437_v32 = vld [vmem:[%s3794_s23 + $0x30] sm:$0xff]  ;;  %v438_v33 = vld [vmem:[%s3794_s23 + $0x38] sm:$0xff]  ;;  %v3298_v22 = vld [vmem:[#allocation4 + $0x4] ss:$8 sps:$4 sm:$0xff]  }
  0x99   : > { %1364 = vmatprep.subr.bf16.mxu1 %v3202_v34  ;;  %v3251_v34 = vld [vmem:[#allocation6 + $0x208] ss:$16 sps:$4 sm:$0xff]   ;;  %v3265_v48 = vld [vmem:[#allocation6 + $0x24c] ss:$16 sps:$4 sm:$0xff]   ;;  %v3272_v1 = vld [vmem:[#allocation6 + $0x280] ss:$16 sps:$4 sm:$0xff]  }
  0x9a   : > { %474 = vst [vmem:[#allocation2 + $0x51] sm:$0xff] %v465_v25  ;;  %v3838_v29 = vpack.c.bf16 %v465_v25, %v464_v10  ;;  %475 = vst [vmem:[#allocation2 + $0x61] sm:$0xff] %v466_v27  ;;  %v3271_v54 = vld [vmem:[#allocation6 + $0x26c] ss:$16 sps:$4 sm:$0xff]   ;;  %v584_v55 = vpack.c.bf16 %v466_v27, %v465_v25  ;;  %v3269_v60 = vld [vmem:[#allocation6 + $0x268] ss:$16 sps:$4 sm:$0xff]  }
  0x9b   : > { %1219 = vmatpush1.bf16.msra.mxu0 %v3204_v35  ;;  %v480_v13 = vld [vmem:[#allocation2 + $0x20] sm:$0xff]  ;;  %v3835_v26 = vld [vmem:[#allocation2 + $0x10] sm:$0xff]  ;;  %v3293_v19 = vld [vmem:[#allocation6 + $0x2e8] ss:$16 sps:$4 sm:$0xff]  }
  0x9c   : > { %1365 = vmatpush1.bf16.msra.mxu1 %v3205_v36  ;;  %1220 = vmatprep.subr.bf16.mxu0 %v3206_v37  ;;  %v481_v14 = vld [vmem:[#allocation2 + $0x30] sm:$0xff]  ;;  %v577_v31 = vpack.c.bf16 %v480_v13, %v3835_v26  ;;  %v452_v36 = vmul.f32 %v3802_v51, %v437_v32  ;;  %v453_v37 = vmul.f32 %v3802_v51, %v438_v33  ;;  %v3296_v25 = vld [vmem:[#allocation4] ss:$8 sps:$4 sm:$0xff]  }
  0x9d   : > { %1366 = vmatprep.subr.bf16.mxu1 %v3208_v38  ;;  %v3828_v17 = vpack.c.bf16 %v481_v14, %v480_v13  ;;  %v3256_v35 = vld [vmem:[#allocation6 + $0x224] ss:$16 sps:$4 sm:$0xff]   ;;  %v3259_v38 = vld [vmem:[#allocation6 + $0x22c] ss:$16 sps:$4 sm:$0xff]   ;;  %v3260_v51 = vld [vmem:[#allocation6 + $0x240] ss:$16 sps:$4 sm:$0xff]  }
  0x9e   : > { %v3280_v4 = vld [vmem:[#allocation6 + $0x2a4] ss:$16 sps:$4 sm:$0xff]   ;;  %v3278_v6 = vld [vmem:[#allocation6 + $0x2a0] ss:$16 sps:$4 sm:$0xff]  }
  0x9f   : > { %1221 = vmatpush1.bf16.msra.mxu0 %v3210_v39  ;;  %v581_v39 = vpack.c.bf16 %v464_v10, %v3817_v61  ;;  %v3286_v10 = vld [vmem:[#allocation6 + $0x2c4] ss:$16 sps:$4 sm:$0xff]   ;;  %v3290_v18 = vld [vmem:[#allocation6 + $0x2e0] ss:$16 sps:$4 sm:$0xff]  }
  0xa0   : > { %1367 = vmatpush1.bf16.msra.mxu1 %v3211_v40  ;;  %1222 = vmatprep.subr.bf16.mxu0 %v3212_v41  ;;  %v467_v40 = vadd.f32 %v3810_v56, %v452_v36  ;;  %v3848_v41 = vadd.f32 %v3810_v56, %v453_v37  ;;  %v3266_v56 = vld [vmem:[#allocation6 + $0x260] ss:$16 sps:$4 sm:$0xff]   ;;  %v3310_v36 = vld [vmem:[#allocation4 + $0x24] ss:$8 sps:$4 sm:$0xff]  }
  0xa1   : > { %1368 = vmatprep.subr.bf16.mxu1 %v3214_v42  ;;  %v3254_v42 = vld [vmem:[#allocation6 + $0x220] ss:$16 sps:$4 sm:$0xff]  }
  0xa2   : > { %476 = vst [vmem:[#allocation2 + $0x71] sm:$0xff] %v467_v40  ;;  %477 = vst [vmem:[#allocation2 + $0x81] sm:$0xff] %v3848_v41  ;;  %v3861_v20 = vld [vmem:[#allocation2 + $0x12] sm:$0xff]  ;;  %v522_v37 = vld [vmem:[#allocation2 + $0x42] sm:$0xff] }
  0xa3   : > { %1223 = vmatpush1.bf16.msra.mxu0 %v3216_v43  ;;  %v3257_v43 = vld [vmem:[#allocation6 + $0x228] ss:$16 sps:$4 sm:$0xff]  }
  0xa4   : > { %1369 = vmatpush1.bf16.msra.mxu1 %v3217_v44  ;;  %1224 = vmatprep.subr.bf16.mxu0 %v3218_v45  ;;  %v482_v44 = vld [vmem:[#allocation2 + $0x40] sm:$0xff]  ;;  %v483_v45 = vld [vmem:[#allocation2 + $0x50] sm:$0xff] }
  0xa5   : > { %1370 = vmatprep.subr.bf16.mxu1 %v3220_v46  ;;  %v3851_v46 = vpack.c.bf16 %v467_v40, %v466_v27  ;;  %v3853_v49 = vpack.c.bf16 %v483_v45, %v482_v44  ;;  %v580_v50 = vpack.c.bf16 %v482_v44, %v481_v14  ;;  %v3287_v14 = vld [vmem:[#allocation6 + $0x2c8] ss:$16 sps:$4 sm:$0xff]  }
  0xa6   : > { %v521_v32 = vld [vmem:[#allocation2 + $0x32] sm:$0xff] }
  0xa7   : > { %1225 = vmatpush1.bf16.msra.mxu0 %v3222_v47  ;;  %v3262_v47 = vld [vmem:[#allocation6 + $0x244] ss:$16 sps:$4 sm:$0xff]  }
  0xa8   : > { %1371 = vmatpush1.bf16.msra.mxu1 %v3223_v52  ;;  %1226 = vmatprep.subr.bf16.mxu0 %v3224_v57  ;;  %v3263_v52 = vld [vmem:[#allocation6 + $0x248] ss:$16 sps:$4 sm:$0xff]   ;;  %v484_v57 = vld [vmem:[#allocation2 + $0x60] sm:$0xff] }
  0xa9   : > { %1372 = vmatprep.subr.bf16.mxu1 %v3226_v58  ;;  %v485_v58 = vld [vmem:[#allocation2 + $0x70] sm:$0xff] }
  0xaa   : > { %v3855_v61 = vpack.c.bf16 %v485_v58, %v484_v57 }
  0xab   : > { %1227 = vmatpush1.bf16.msra.mxu0 %v3228_v62  ;;  %v3274_v62 = vld [vmem:[#allocation6 + $0x284] ss:$16 sps:$4 sm:$0xff]  }
  0xac   : > { %1373 = vmatpush1.bf16.msra.mxu1 %v3229_v63  ;;  %1228 = vmatprep.subr.bf16.mxu0 %v3230_v2  ;;  %v3277_v63 = vld [vmem:[#allocation6 + $0x28c] ss:$16 sps:$4 sm:$0xff]   ;;  %v583_v2 = vpack.c.bf16 %v484_v57, %v483_v45 }
  0xad   : > { %1374 = vmatprep.subr.bf16.mxu1 %v3232_v3  ;;  %v3275_v3 = vld [vmem:[#allocation6 + $0x288] ss:$16 sps:$4 sm:$0xff]   ;;  %v3316_v45 = vld [vmem:[#allocation4 + $0x34] ss:$8 sps:$4 sm:$0xff]  }
  0xaf   : > { %1229 = vmatpush1.bf16.msra.mxu0 %v3234_v5  ;;  %v3283_v5 = vld [vmem:[#allocation6 + $0x2ac] ss:$16 sps:$4 sm:$0xff]  }
  0xb0   : > { %1375 = vmatpush1.bf16.msra.mxu1 %v3235_v7  ;;  %1230 = vmatprep.subr.bf16.mxu0 %v3236_v8  ;;  %v587_v7 = vpack.c.bf16 %v3848_v41, %v467_v40  ;;  %v3281_v8 = vld [vmem:[#allocation6 + $0x2a8] ss:$16 sps:$4 sm:$0xff]   ;;  %v582_v40 = vpack.c.bf16 %v522_v37, %v521_v32 }
  0xb1   : > { %1376 = vmatprep.subr.bf16.mxu1 %v3238_v9  ;;  %v3858_v9 = vld [vmem:[#allocation2 + $0x80] sm:$0xff] }
  0xb2   : > { %v586_v13 = vpack.c.bf16 %v3858_v9, %v485_v58  ;;  %v3323_v58 = vld [vmem:[#allocation8 + $0x40] ss:$8 sps:$4 sm:$0xff]  }
  0xb3   : > { %1231 = vmatpush1.bf16.msra.mxu0 %v3240_v11  ;;  %v3289_v11 = vld [vmem:[#allocation6 + $0x2cc] ss:$16 sps:$4 sm:$0xff]  }
  0xb4   : > { %1377 = vmatpush1.bf16.msra.mxu1 %v3241_v12  ;;  %1232 = vmatprep.subr.bf16.mxu0 %v3242_v15  ;;  %v3284_v12 = vld [vmem:[#allocation6 + $0x2c0] ss:$16 sps:$4 sm:$0xff]   ;;  %v3292_v15 = vld [vmem:[#allocation6 + $0x2e4] ss:$16 sps:$4 sm:$0xff]  }
  0xb5   : > { %1378 = vmatprep.subr.bf16.mxu1 %v3244_v16  ;;  %v3295_v16 = vld [vmem:[#allocation6 + $0x2ec] ss:$16 sps:$4 sm:$0xff]  }
  0xb7   : > { %1233 = vmatpush1.bf16.msra.mxu0 %v3246_v21  ;;  %v520_v21 = vld [vmem:[#allocation2 + $0x22] sm:$0xff] }
  0xb8   : > { %1379 = vmatpush1.bf16.msra.mxu1 %v3247_v23  ;;  %1275 = vmatprep.subr.bf16.mxu0 %v3250_v24  ;;  %v3301_v23 = vld [vmem:[#allocation8 + $0x4] ss:$8 sps:$4 sm:$0xff]   ;;  %v3598_v24 = vmov 0   ;;  %v579_v27 = vpack.c.bf16 %v520_v21, %v3861_v20  ;;  %v3866_v33 = vpack.c.bf16 %v521_v32, %v520_v21  ;;  %v3352_v21 = vld [vmem:[#allocation4 + $0x94] ss:$8 sps:$4 sm:$0xff]  }
  0xb9   : > { %1421 = vmatprep.subr.bf16.mxu1 %v3253_v28  ;;  %v3299_v28 = vld [vmem:[#allocation8] ss:$8 sps:$4 sm:$0xff]   ;;  %v3367_v32 = vld [vmem:[#allocation8 + $0xb4] ss:$8 sps:$4 sm:$0xff]  }
  0xba   : > { %1235 = vmatmul.mubr.bf16.vlgmr.msra.gmra.mrb[0].mxu0 %v577_v31 }
  0xbb   : > { %1381 = vmatmul.mubr.bf16.vlgmr.msra.gmra.mrb[0].mxu1 %v577_v31  ;;  %1276 = vmatpush1.bf16.msra.mxu0 %v3248_v30  ;;  %v3304_v30 = vld [vmem:[#allocation4 + $0x14] ss:$8 sps:$4 sm:$0xff]  }
  0xbc   : > { %1422 = vmatpush1.bf16.msra.mxu1 %v3251_v34  ;;  %1277 = vmatprep.subr.bf16.mxu0 %v3256_v35  ;;  %v3307_v31 = vld [vmem:[#allocation8 + $0x14] ss:$8 sps:$4 sm:$0xff]   ;;  %v3302_v34 = vld [vmem:[#allocation4 + $0x10] ss:$8 sps:$4 sm:$0xff]  }
  0xbd   : > { %1423 = vmatprep.subr.bf16.mxu1 %v3259_v38  ;;  %1244 = vmatprep.mubr.bf16.mxu0 %v581_v39  ;;  %v3305_v35 = vld [vmem:[#allocation8 + $0x10] ss:$8 sps:$4 sm:$0xff]   ;;  %v3313_v38 = vld [vmem:[#allocation8 + $0x24] ss:$8 sps:$4 sm:$0xff]  }
  0xbe   : > { %1390 = vmatprep.mubr.bf16.mxu1 %v581_v39  ;;  %v3308_v39 = vld [vmem:[#allocation4 + $0x20] ss:$8 sps:$4 sm:$0xff]  }
  0xbf   : > { %1278 = vmatpush1.bf16.msra.mxu0 %v3254_v42  ;;  %v523_v42 = vld [vmem:[#allocation2 + $0x52] sm:$0xff] }
  0xc0   : > { %1424 = vmatpush1.bf16.msra.mxu1 %v3257_v43  ;;  %1279 = vmatprep.subr.bf16.mxu0 %v3262_v47  ;;  %v3311_v43 = vld [vmem:[#allocation8 + $0x20] ss:$8 sps:$4 sm:$0xff]   ;;  %v3870_v44 = vpack.c.bf16 %v523_v42, %v522_v37  ;;  %v3319_v47 = vld [vmem:[#allocation8 + $0x34] ss:$8 sps:$4 sm:$0xff]   ;;  %v3373_v37 = vld [vmem:[#allocation8 + $0xc4] ss:$8 sps:$4 sm:$0xff]  }
  0xc1   : > { %1425 = vmatprep.subr.bf16.mxu1 %v3265_v48  ;;  %v3314_v48 = vld [vmem:[#allocation4 + $0x30] ss:$8 sps:$4 sm:$0xff]  }
  0xc2   : > { %1245 = vmatmul.mubr.bf16.gmra.mrb[4].mxu0 %v580_v50 }
  0xc3   : > { %1391 = vmatmul.mubr.bf16.gmra.mrb[4].mxu1 %v580_v50  ;;  %1280 = vmatpush1.bf16.msra.mxu0 %v3260_v51  ;;  %v3317_v50 = vld [vmem:[#allocation8 + $0x30] ss:$8 sps:$4 sm:$0xff]   ;;  %v524_v51 = vld [vmem:[#allocation2 + $0x62] sm:$0xff] }
  0xc4   : > { %1426 = vmatpush1.bf16.msra.mxu1 %v3263_v52  ;;  %1281 = vmatprep.subr.bf16.mxu0 %v3268_v53  ;;  %v3322_v52 = vld [vmem:[#allocation4 + $0x44] ss:$8 sps:$4 sm:$0xff]   ;;  %v585_v57 = vpack.c.bf16 %v524_v51, %v523_v42  ;;  %v3379_v42 = vld [vmem:[#allocation8 + $0xd4] ss:$8 sps:$4 sm:$0xff]  }
  0xc5   : > { %1427 = vmatprep.subr.bf16.mxu1 %v3271_v54  ;;  %1254 = vmatprep.mubr.bf16.mxu0 %v584_v55  ;;  %v3325_v53 = vld [vmem:[#allocation8 + $0x44] ss:$8 sps:$4 sm:$0xff]   ;;  %v525_v54 = vld [vmem:[#allocation2 + $0x72] sm:$0xff] }
  0xc6   : > { %1400 = vmatprep.mubr.bf16.mxu1 %v584_v55  ;;  %v3874_v55 = vpack.c.bf16 %v525_v54, %v524_v51  ;;  %v3383_v51 = vld [vmem:[#allocation8 + $0xe0] ss:$8 sps:$4 sm:$0xff]  }
  0xc7   : > { %1282 = vmatpush1.bf16.msra.mxu0 %v3266_v56  ;;  %v3320_v56 = vld [vmem:[#allocation4 + $0x40] ss:$8 sps:$4 sm:$0xff]  }
  0xc8   : > { %1428 = vmatpush1.bf16.msra.mxu1 %v3269_v60  ;;  %1283 = vmatprep.subr.bf16.mxu0 %v3274_v62  ;;  %v3328_v60 = vld [vmem:[#allocation4 + $0x54] ss:$8 sps:$4 sm:$0xff]  }
  0xc9   : > { %1429 = vmatprep.subr.bf16.mxu1 %v3277_v63  ;;  %v3331_v62 = vld [vmem:[#allocation8 + $0x54] ss:$8 sps:$4 sm:$0xff]   ;;  %v3326_v63 = vld [vmem:[#allocation4 + $0x50] ss:$8 sps:$4 sm:$0xff]  }
  0xca   : > { %1255 = vmatmul.mubr.bf16.gmra.mrb[8].mxu0 %v583_v2 }
  0xcb   : > { %1401 = vmatmul.mubr.bf16.gmra.mrb[8].mxu1 %v583_v2  ;;  %1284 = vmatpush1.bf16.msra.mxu0 %v3272_v1  ;;  %v3329_v1 = vld [vmem:[#allocation8 + $0x50] ss:$8 sps:$4 sm:$0xff]   ;;  %v3334_v2 = vld [vmem:[#allocation4 + $0x64] ss:$8 sps:$4 sm:$0xff]  }
  0xcc   : > { %1430 = vmatpush1.bf16.msra.mxu1 %v3275_v3  ;;  %1285 = vmatprep.subr.bf16.mxu0 %v3280_v4  ;;  %v3876_v3 = vld [vmem:[#allocation2 + $0x82] sm:$0xff] }
  0xcd   : > { %1431 = vmatprep.subr.bf16.mxu1 %v3283_v5  ;;  %1264 = vmatprep.mubr.bf16.mxu0 %v587_v7  ;;  %v3337_v4 = vld [vmem:[#allocation8 + $0x64] ss:$8 sps:$4 sm:$0xff]  }
  0xce   : > { %1410 = vmatprep.mubr.bf16.mxu1 %v587_v7  ;;  %v498_v5 = vld [vmem:[#allocation2 + $0x1] sm:$0xff]  ;;  %v588_v7 = vpack.c.bf16 %v3876_v3, %v525_v54  ;;  %v3386_v54 = vld [vmem:[#allocation4 + $0xf0] ss:$8 sps:$4 sm:$0xff]  }
  0xcf   : > { %1286 = vmatpush1.bf16.msra.mxu0 %v3278_v6  ;;  %v3332_v6 = vld [vmem:[#allocation4 + $0x60] ss:$8 sps:$4 sm:$0xff]  }
  0xd0   : > { %1432 = vmatpush1.bf16.msra.mxu1 %v3281_v8  ;;  %1287 = vmatprep.subr.bf16.mxu0 %v3286_v10  ;;  %v3335_v8 = vld [vmem:[#allocation8 + $0x60] ss:$8 sps:$4 sm:$0xff]   ;;  %v3340_v10 = vld [vmem:[#allocation4 + $0x74] ss:$8 sps:$4 sm:$0xff]  }
  0xd1   : > { %1433 = vmatprep.subr.bf16.mxu1 %v3289_v11  ;;  %v3343_v11 = vld [vmem:[#allocation8 + $0x74] ss:$8 sps:$4 sm:$0xff]  }
  0xd2   : > { %1265 = vmatmul.mubr.bf16.gmra.mrb[12].mxu0 %v586_v13 }
  0xd3   : > { %1411 = vmatmul.mubr.bf16.gmra.mrb[12].mxu1 %v586_v13  ;;  %1288 = vmatpush1.bf16.msra.mxu0 %v3284_v12  ;;  %v563_v12 = vpack.c.bf16 %v3813_v59, %v498_v5  ;;  %v3338_v13 = vld [vmem:[#allocation4 + $0x70] ss:$8 sps:$4 sm:$0xff]   ;;  %v3355_v59 = vld [vmem:[#allocation8 + $0x94] ss:$8 sps:$4 sm:$0xff]  }
  0xd4   : > { %1434 = vmatpush1.bf16.msra.mxu1 %v3287_v14  ;;  %1289 = vmatprep.subr.bf16.mxu0 %v3292_v15  ;;  %v3341_v14 = vld [vmem:[#allocation8 + $0x70] ss:$8 sps:$4 sm:$0xff]   ;;  %v3346_v15 = vld [vmem:[#allocation4 + $0x84] ss:$8 sps:$4 sm:$0xff]  }
  0xd5   : > { %1435 = vmatprep.subr.bf16.mxu1 %v3295_v16  ;;  %1307 = vmatprep.mubr.bf16.mxu0 %v3598_v24  ;;  %v3349_v16 = vld [vmem:[#allocation8 + $0x84] ss:$8 sps:$4 sm:$0xff]   ;;  %v3398_v5 = vld [vmem:[#allocation4 + $0x110] ss:$8 sps:$4 sm:$0xff]  }
  0xd6   : > { %1453 = vmatprep.mubr.bf16.mxu1 %v3598_v24 }
  0xd7   : > { %1290 = vmatpush1.bf16.msra.mxu0 %v3290_v18  ;;  %v3344_v18 = vld [vmem:[#allocation4 + $0x80] ss:$8 sps:$4 sm:$0xff]  }
  0xd8   : > { %1436 = vmatpush1.bf16.msra.mxu1 %v3293_v19  ;;  %1782 = vmatprep.subr.bf16.mxu0 %v3298_v22  ;;  %v3347_v19 = vld [vmem:[#allocation8 + $0x80] ss:$8 sps:$4 sm:$0xff]   ;;  %v3350_v22 = vld [vmem:[#allocation4 + $0x90] ss:$8 sps:$4 sm:$0xff]  }
  0xd9   : > { %2327 = vmatprep.subr.bf16.mxu1 %v3301_v23  ;;  %v3353_v23 = vld [vmem:[#allocation8 + $0x90] ss:$8 sps:$4 sm:$0xff]  }
  0xda   : > { %1308 = vmatmul.mubr.bf16.vlgmr.msra.gmra.mrb[0].mxu0 %v579_v27 }
  0xdb   : > { %1454 = vmatmul.mubr.bf16.vlgmr.msra.gmra.mrb[0].mxu1 %v579_v27  ;;  %1783 = vmatpush1.bf16.msra.mxu0 %v3296_v25  ;;  %v3358_v25 = vld [vmem:[#allocation4 + $0xa4] ss:$8 sps:$4 sm:$0xff]  }
  0xdc   : > { %2328 = vmatpush1.bf16.msra.mxu1 %v3299_v28  ;;  %1784 = vmatprep.subr.bf16.mxu0 %v3304_v30  ;;  %v3361_v27 = vld [vmem:[#allocation8 + $0xa4] ss:$8 sps:$4 sm:$0xff]   ;;  %v3356_v28 = vld [vmem:[#allocation4 + $0xa0] ss:$8 sps:$4 sm:$0xff]  }
  0xdd   : > { %2329 = vmatprep.subr.bf16.mxu1 %v3307_v31  ;;  %1317 = vmatprep.mubr.bf16.mxu0 %v3598_v24  ;;  %v3359_v30 = vld [vmem:[#allocation8 + $0xa0] ss:$8 sps:$4 sm:$0xff]   ;;  %v3364_v31 = vld [vmem:[#allocation4 + $0xb4] ss:$8 sps:$4 sm:$0xff]  }
  0xde   : > { %1463 = vmatprep.mubr.bf16.mxu1 %v3598_v24 }
  0xdf   : > { %1785 = vmatpush1.bf16.msra.mxu0 %v3302_v34  ;;  %v3362_v34 = vld [vmem:[#allocation4 + $0xb0] ss:$8 sps:$4 sm:$0xff]  }
  0xe0   : > { %2330 = vmatpush1.bf16.msra.mxu1 %v3305_v35  ;;  %1786 = vmatprep.subr.bf16.mxu0 %v3310_v36  ;;  %v3365_v35 = vld [vmem:[#allocation8 + $0xb0] ss:$8 sps:$4 sm:$0xff]   ;;  %v3370_v36 = vld [vmem:[#allocation4 + $0xc4] ss:$8 sps:$4 sm:$0xff]  }
  0xe1   : > { %2331 = vmatprep.subr.bf16.mxu1 %v3313_v38  ;;  %v3368_v38 = vld [vmem:[#allocation4 + $0xc0] ss:$8 sps:$4 sm:$0xff]  }
  0xe2   : > { %1318 = vmatmul.mubr.bf16.gmra.mrb[4].mxu0 %v582_v40 }
  0xe3   : > { %1464 = vmatmul.mubr.bf16.gmra.mrb[4].mxu1 %v582_v40  ;;  %1787 = vmatpush1.bf16.msra.mxu0 %v3308_v39  ;;  %v3371_v39 = vld [vmem:[#allocation8 + $0xc0] ss:$8 sps:$4 sm:$0xff]   ;;  %v3376_v40 = vld [vmem:[#allocation4 + $0xd4] ss:$8 sps:$4 sm:$0xff]  }
  0xe4   : > { %2332 = vmatpush1.bf16.msra.mxu1 %v3311_v43  ;;  %1788 = vmatprep.subr.bf16.mxu0 %v3316_v45  ;;  %v3374_v43 = vld [vmem:[#allocation4 + $0xd0] ss:$8 sps:$4 sm:$0xff]  }
  0xe5   : > { %2333 = vmatprep.subr.bf16.mxu1 %v3319_v47  ;;  %1327 = vmatprep.mubr.bf16.mxu0 %v3598_v24  ;;  %v3377_v45 = vld [vmem:[#allocation8 + $0xd0] ss:$8 sps:$4 sm:$0xff]   ;;  %v3382_v47 = vld [vmem:[#allocation4 + $0xe4] ss:$8 sps:$4 sm:$0xff]  }
  0xe6   : > { %1473 = vmatprep.mubr.bf16.mxu1 %v3598_v24 }
  0xe7   : > { %1789 = vmatpush1.bf16.msra.mxu0 %v3314_v48  ;;  %v3385_v48 = vld [vmem:[#allocation8 + $0xe4] ss:$8 sps:$4 sm:$0xff]  }
  0xe8   : > { %2334 = vmatpush1.bf16.msra.mxu1 %v3317_v50  ;;  %1790 = vmatprep.subr.bf16.mxu0 %v3322_v52  ;;  %v3380_v50 = vld [vmem:[#allocation4 + $0xe0] ss:$8 sps:$4 sm:$0xff]   ;;  %v3388_v52 = vld [vmem:[#allocation4 + $0xf4] ss:$8 sps:$4 sm:$0xff]  }
  0xe9   : > { %2335 = vmatprep.subr.bf16.mxu1 %v3325_v53  ;;  %v3391_v53 = vld [vmem:[#allocation8 + $0xf4] ss:$8 sps:$4 sm:$0xff]  }
  0xea   : > { %1328 = vmatmul.mubr.bf16.gmra.mrb[8].mxu0 %v585_v57 }
  0xeb   : > { %1474 = vmatmul.mubr.bf16.gmra.mrb[8].mxu1 %v585_v57  ;;  %1791 = vmatpush1.bf16.msra.mxu0 %v3320_v56  ;;  %v3389_v56 = vld [vmem:[#allocation8 + $0xf0] ss:$8 sps:$4 sm:$0xff]   ;;  %v3394_v57 = vld [vmem:[#allocation4 + $0x104] ss:$8 sps:$4 sm:$0xff]  }
  0xec   : > { %2336 = vmatpush1.bf16.msra.mxu1 %v3323_v58  ;;  %1792 = vmatprep.subr.bf16.mxu0 %v3328_v60  ;;  %v3397_v58 = vld [vmem:[#allocation8 + $0x104] ss:$8 sps:$4 sm:$0xff]  }
  0xed   : > { %2337 = vmatprep.subr.bf16.mxu1 %v3331_v62  ;;  %1337 = vmatprep.mubr.bf16.mxu0 %v3598_v24  ;;  %v3883_v60 = vld [vmem:[#allocation2] sm:$0xff] }
  0xee   : > { %1483 = vmatprep.mubr.bf16.mxu1 %v3598_v24  ;;  %v562_v62 = vpack.c.bf16 %v3835_v26, %v3883_v60  ;;  %v3404_v26 = vld [vmem:[#allocation4 + $0x120] ss:$8 sps:$4 sm:$0xff]  }
  0xef   : > { %1793 = vmatpush1.bf16.msra.mxu0 %v3326_v63  ;;  %v3392_v63 = vld [vmem:[#allocation4 + $0x100] ss:$8 sps:$4 sm:$0xff]  }
  0xf0   : > { %2338 = vmatpush1.bf16.msra.mxu1 %v3329_v1  ;;  %1794 = vmatprep.subr.bf16.mxu0 %v3334_v2  ;;  %v3395_v1 = vld [vmem:[#allocation8 + $0x100] ss:$8 sps:$4 sm:$0xff]   ;;  %v3400_v2 = vld [vmem:[#allocation4 + $0x114] ss:$8 sps:$4 sm:$0xff]  }
  0xf1   : > { %2339 = vmatprep.subr.bf16.mxu1 %v3337_v4  ;;  %v3403_v4 = vld [vmem:[#allocation8 + $0x114] ss:$8 sps:$4 sm:$0xff]  }
  0xf2   : > { %1338 = vmatmul.mubr.bf16.gmra.mrb[12].mxu0 %v588_v7 }
  0xf3   : > { %1484 = vmatmul.mubr.bf16.gmra.mrb[12].mxu1 %v588_v7  ;;  %1795 = vmatpush1.bf16.msra.mxu0 %v3332_v6  ;;  %v3401_v6 = vld [vmem:[#allocation8 + $0x110] ss:$8 sps:$4 sm:$0xff]   ;;  %v3406_v7 = vld [vmem:[#allocation4 + $0x124] ss:$8 sps:$4 sm:$0xff]  }
  0xf4   : > { %2340 = vmatpush1.bf16.msra.mxu1 %v3335_v8  ;;  %1796 = vmatprep.subr.bf16.mxu0 %v3340_v10  ;;  %v3409_v8 = vld [vmem:[#allocation8 + $0x124] ss:$8 sps:$4 sm:$0xff]   ;;  %v3407_v10 = vld [vmem:[#allocation8 + $0x120] ss:$8 sps:$4 sm:$0xff]  }
  0xf5   : > { %2341 = vmatprep.subr.bf16.mxu1 %v3343_v11  ;;  %1814 = vmatprep.mubr.bf16.mxu0 %v563_v12  ;;  %v3412_v11 = vld [vmem:[#allocation4 + $0x134] ss:$8 sps:$4 sm:$0xff]  }
  0xf6   : > { %2359 = vmatprep.mubr.bf16.mxu1 %v3822_v0  ;;  %v3415_v12 = vld [vmem:[#allocation8 + $0x134] ss:$8 sps:$4 sm:$0xff]  }
  0xf7   : > { %1797 = vmatpush1.bf16.msra.mxu0 %v3338_v13  ;;  %v3410_v13 = vld [vmem:[#allocation4 + $0x130] ss:$8 sps:$4 sm:$0xff]  }
  0xf8   : > { %2342 = vmatpush1.bf16.msra.mxu1 %v3341_v14  ;;  %1798 = vmatprep.subr.bf16.mxu0 %v3346_v15  ;;  %v3413_v14 = vld [vmem:[#allocation8 + $0x130] ss:$8 sps:$4 sm:$0xff]   ;;  %v3421_v15 = vld [vmem:[#allocation8 + $0x144] ss:$8 sps:$4 sm:$0xff]  }
  0xf9   : > { %2343 = vmatprep.subr.bf16.mxu1 %v3349_v16  ;;  %v507_v16 = vld [vmem:[#allocation2 + $0x91] sm:$0xff] }
  0xfb   : > { %1799 = vmatpush1.bf16.msra.mxu0 %v3344_v18  ;;  %v3416_v18 = vld [vmem:[#allocation4 + $0x140] ss:$8 sps:$4 sm:$0xff]  }
  0xfc   : > { %2344 = vmatpush1.bf16.msra.mxu1 %v3347_v19  ;;  %1800 = vmatprep.subr.bf16.mxu0 %v3352_v21  ;;  %v3419_v19 = vld [vmem:[#allocation8 + $0x140] ss:$8 sps:$4 sm:$0xff]   ;;  %v3427_v21 = vld [vmem:[#allocation8 + $0x154] ss:$8 sps:$4 sm:$0xff]  }
  0xfd   : > { %2345 = vmatprep.subr.bf16.mxu1 %v3355_v59  ;;  %v623_v59 = vpack.c.bf16 %v507_v16, %v3848_v41  ;;  %v3428_v41 = vld [vmem:[#allocation4 + $0x160] ss:$8 sps:$4 sm:$0xff]  }
  0xff   : > { %1801 = vmatpush1.bf16.msra.mxu0 %v3350_v22  ;;  %v3425_v22 = vld [vmem:[#allocation8 + $0x150] ss:$8 sps:$4 sm:$0xff]  }
 0x100   : > { %2346 = vmatpush1.bf16.msra.mxu1 %v3353_v23  ;;  %1802 = vmatprep.subr.bf16.mxu0 %v3358_v25  ;;  %v3430_v23 = vld [vmem:[#allocation4 + $0x164] ss:$8 sps:$4 sm:$0xff]  }
 0x101   : > { %2347 = vmatprep.subr.bf16.mxu1 %v3361_v27  ;;  %v3433_v25 = vld [vmem:[#allocation8 + $0x164] ss:$8 sps:$4 sm:$0xff]   ;;  %v622_v27 = vpack.c.bf16 %v3883_v60, %v3858_v9 }
 0x103   : > { %1803 = vmatpush1.bf16.msra.mxu0 %v3356_v28  ;;  %v3436_v28 = vld [vmem:[#allocation4 + $0x174] ss:$8 sps:$4 sm:$0xff]  }
 0x104   : > { %2348 = vmatpush1.bf16.msra.mxu1 %v3359_v30  ;;  %1804 = vmatprep.subr.bf16.mxu0 %v3364_v31  ;;  %v3439_v30 = vld [vmem:[#allocation8 + $0x174] ss:$8 sps:$4 sm:$0xff]   ;;  %v3434_v31 = vld [vmem:[#allocation4 + $0x170] ss:$8 sps:$4 sm:$0xff]  }
 0x105   : > { %2349 = vmatprep.subr.bf16.mxu1 %v3367_v32  ;;  %v3437_v32 = vld [vmem:[#allocation8 + $0x170] ss:$8 sps:$4 sm:$0xff]  }
 0x107   : > { %1805 = vmatpush1.bf16.msra.mxu0 %v3362_v34 }
 0x108   : > { %2350 = vmatpush1.bf16.msra.mxu1 %v3365_v35  ;;  %1806 = vmatprep.subr.bf16.mxu0 %v3370_v36  ;;  %v625_v36 = vld [vmem:[#allocation9] sm:$0x3] }
 0x109   : > { %2351 = vmatprep.subr.bf16.mxu1 %v3373_v37 }
 0x10b   : > { %1807 = vmatpush1.bf16.msra.mxu0 %v3368_v38 }
 0x10c   : > { %2352 = vmatpush1.bf16.msra.mxu1 %v3371_v39  ;;  %1808 = vmatprep.subr.bf16.mxu0 %v3376_v40 }
 0x10d   : > { %2353 = vmatprep.subr.bf16.mxu1 %v3379_v42 }
 0x10f   : > { %1809 = vmatpush1.bf16.msra.mxu0 %v3374_v43 }
 0x110   : > { %2354 = vmatpush1.bf16.msra.mxu1 %v3377_v45  ;;  %1810 = vmatprep.subr.bf16.mxu0 %v3382_v47 }
 0x111   : > { %2355 = vmatprep.subr.bf16.mxu1 %v3385_v48 }
 0x113   : > { %1811 = vmatpush1.bf16.msra.mxu0 %v3380_v50 }
 0x114   : > { %2356 = vmatpush1.bf16.msra.mxu1 %v3383_v51  ;;  %1812 = vmatprep.subr.bf16.mxu0 %v3388_v52 }
 0x115   : > { %2357 = vmatprep.subr.bf16.mxu1 %v3391_v53 }
 0x117   : > { %1813 = vmatpush1.bf16.msra.mxu0 %v3386_v54 }
 0x118   : > { %2358 = vmatpush1.bf16.msra.mxu1 %v3389_v56  ;;  %1855 = vmatprep.subr.bf16.mxu0 %v3394_v57 }
 0x119   : > { %2400 = vmatprep.subr.bf16.mxu1 %v3397_v58 }
 0x11a   : > { %1815 = vmatmul.mubr.bf16.vlgmr.msra.gmra.mrb[0].mxu0 %v562_v62 }
 0x11b   : > { %2360 = vmatmul.mubr.bf16.vlgmr.msra.gmra.mrb[0].mxu1 %v3828_v17  ;;  %1856 = vmatpush1.bf16.msra.mxu0 %v3392_v63 }
 0x11c   : > { %2401 = vmatpush1.bf16.msra.mxu1 %v3395_v1  ;;  %1857 = vmatprep.subr.bf16.mxu0 %v3400_v2 }
 0x11d   : > { %2402 = vmatprep.subr.bf16.mxu1 %v3403_v4  ;;  %1824 = vmatprep.mubr.bf16.mxu0 %v3822_v0  ;;  %v3418_v0 = vld [vmem:[#allocation4 + $0x144] ss:$8 sps:$4 sm:$0xff]  }
 0x11e   : > { %2369 = vmatprep.mubr.bf16.mxu1 %v3838_v29 }
 0x11f   : > { %1858 = vmatpush1.bf16.msra.mxu0 %v3398_v5 }
 0x120   : > { %2403 = vmatpush1.bf16.msra.mxu1 %v3401_v6  ;;  %1859 = vmatprep.subr.bf16.mxu0 %v3406_v7 }
 0x121   : > { %2404 = vmatprep.subr.bf16.mxu1 %v3409_v8 }
 0x122   : > { %1825 = vmatmul.mubr.bf16.gmra.mrb[4].mxu0 %v3828_v17  ;;  %v3424_v17 = vld [vmem:[#allocation4 + $0x154] ss:$8 sps:$4 sm:$0xff]  }
 0x123   : > { %2370 = vmatmul.mubr.bf16.gmra.mrb[4].mxu1 %v3853_v49  ;;  %1860 = vmatpush1.bf16.msra.mxu0 %v3404_v26 }
 0x124   : > { %2405 = vmatpush1.bf16.msra.mxu1 %v3407_v10  ;;  %1861 = vmatprep.subr.bf16.mxu0 %v3412_v11 }
 0x125   : > { %2406 = vmatprep.subr.bf16.mxu1 %v3415_v12  ;;  %1834 = vmatprep.mubr.bf16.mxu0 %v3838_v29  ;;  %v3422_v29 = vld [vmem:[#allocation4 + $0x150] ss:$8 sps:$4 sm:$0xff]  }
 0x126   : > { %2379 = vmatprep.mubr.bf16.mxu1 %v3851_v46 }
 0x127   : > { %1862 = vmatpush1.bf16.msra.mxu0 %v3410_v13 }
 0x128   : > { %2407 = vmatpush1.bf16.msra.mxu1 %v3413_v14  ;;  %1863 = vmatprep.subr.bf16.mxu0 %v3418_v0 }
 0x129   : > { %2408 = vmatprep.subr.bf16.mxu1 %v3421_v15 }
 0x12a   : > { %1835 = vmatmul.mubr.bf16.gmra.mrb[8].mxu0 %v3853_v49  ;;  %v3431_v49 = vld [vmem:[#allocation8 + $0x160] ss:$8 sps:$4 sm:$0xff]  }
 0x12b   : > { %2380 = vmatmul.mubr.bf16.gmra.mrb[8].mxu1 %v3855_v61  ;;  %1864 = vmatpush1.bf16.msra.mxu0 %v3416_v18 }
 0x12c   : > { %2409 = vmatpush1.bf16.msra.mxu1 %v3419_v19  ;;  %1865 = vmatprep.subr.bf16.mxu0 %v3424_v17 }
 0x12d   : > { %2410 = vmatprep.subr.bf16.mxu1 %v3427_v21  ;;  %1844 = vmatprep.mubr.bf16.mxu0 %v3851_v46  ;;  %v518_v46 = vld [vmem:[#allocation2 + $0x2] sm:$0xff] }
 0x12e   : > { %2389 = vmatprep.mubr.bf16.mxu1 %v623_v59  ;;  %v564_v9 = vpack.c.bf16 %v3861_v20, %v518_v46 }
 0x12f   : > { %1866 = vmatpush1.bf16.msra.mxu0 %v3422_v29 }
 0x130   : > { %2411 = vmatpush1.bf16.msra.mxu1 %v3425_v22  ;;  %1867 = vmatprep.subr.bf16.mxu0 %v3430_v23 }
 0x131   : > { %2412 = vmatprep.subr.bf16.mxu1 %v3433_v25 }
 0x132   : > { %1845 = vmatmul.mubr.bf16.gmra.mrb[12].mxu0 %v3855_v61  ;;  %v527_v61 = vld [vmem:[#allocation2 + $0x92] sm:$0xff] }
 0x133   : > { %2390 = vmatmul.mubr.bf16.gmra.mrb[12].mxu1 %v622_v27  ;;  %1868 = vmatpush1.bf16.msra.mxu0 %v3428_v41  ;;  %v624_v20 = vpack.c.bf16 %v527_v61, %v3876_v3 }
 0x134   : > { %2413 = vmatpush1.bf16.msra.mxu1 %v3431_v49  ;;  %1869 = vmatprep.subr.bf16.mxu0 %v3436_v28 }
 0x135   : > { %2414 = vmatprep.subr.bf16.mxu1 %v3439_v30  ;;  %1887 = vmatprep.mubr.bf16.mxu0 %v3598_v24 }
 0x136   : > { %2432 = vmatprep.mubr.bf16.mxu1 %v3598_v24 }
 0x137   : > { %1870 = vmatpush1.bf16.msra.mxu0 %v3434_v31 }
 0x138   : > { %2415 = vmatpush1.bf16.msra.mxu1 %v3437_v32 }
 0x13a   : > { %1888 = vmatmul.mubr.bf16.vlgmr.msra.gmra.mrb[0].mxu0 %v564_v9 }
 0x13b   : > { %2433 = vmatmul.mubr.bf16.vlgmr.msra.gmra.mrb[0].mxu1 %v3866_v33  ;;  %1897 = vmatprep.mubr.bf16.mxu0 %v3598_v24 }
 0x13c   : > { %2442 = vmatprep.mubr.bf16.mxu1 %v3598_v24 }
 0x142   : > { %1898 = vmatmul.mubr.bf16.gmra.mrb[4].mxu0 %v3866_v33  ;;  %v1929_v33 = vlaneseq }
 0x143   : > { %2443 = vmatmul.mubr.bf16.gmra.mrb[4].mxu1 %v3870_v44  ;;  %1907 = vmatprep.mubr.bf16.mxu0 %v3598_v24 }
 0x144   : > { %2452 = vmatprep.mubr.bf16.mxu1 %v3598_v24  ;;  %v1930_v34 = vshrl.u32 %v1929_v33, 7 }
 0x146   : > { %v1931_v35 = vsub.s32 0, %v1930_v34  ;;  %v1935_v37 = vsub.s32 1, %v1930_v34 }
 0x148   : > { %v3918_v38 = vrot.slane %v625_v36, %v1931_v35 }
 0x14a   : > { %1908 = vmatmul.mubr.bf16.gmra.mrb[8].mxu0 %v3870_v44  ;;  %v3920_v44 = vrot.slane %v625_v36, %v1935_v37 }
 0x14b   : > { %2453 = vmatmul.mubr.bf16.gmra.mrb[8].mxu1 %v3874_v55  ;;  %1917 = vmatprep.mubr.bf16.mxu0 %v3598_v24 }
 0x14c   : > { %2462 = vmatprep.mubr.bf16.mxu1 %v3598_v24 }
 0x152   : > { %1918 = vmatmul.mubr.bf16.gmra.mrb[12].mxu0 %v3874_v55 }
 0x153   : > { %2463 = vmatmul.mubr.bf16.gmra.mrb[12].mxu1 %v624_v20 }
 0x20d   : > { %v1889_v24 = vpop.f32.mrb[0].mxu0 }
 0x20e   : > { %v2434_v55 = vpop.f32.mrb[0].mxu1  ;;  %v1939_v3 = vadd.f32 %v3918_v38, %v1889_v24  ;;  %v1891_v40 = vpop.f32.mrb[1].mxu0 }
 0x20f   : > { %v2473_v39 = vadd.f32 %v2434_v55, %v3918_v38  ;;  %v2436_v42 = vpop.f32.mrb[1].mxu1  ;;  %v1940_v43 = vadd.f32 %v3920_v44, %v1891_v40  ;;  %v1893_v47 = vpop.f32.mrb[2].mxu0 }
 0x210   : > { %v2474_v45 = vadd.f32 %v2436_v42, %v3920_v44  ;;  %v2438_v48 = vpop.f32.mrb[2].mxu1  ;;  %1955 = vst [vmem:[%s3925_s14] sm:$0xff] %v1939_v3  ;;  %v1997_v50 = vmul.f32 %v1939_v3, %v1939_v3  ;;  %v1941_v52 = vadd.f32 %v3918_v38, %v1893_v47  ;;  %v1895_v54 = vpop.f32.mrb[3].mxu0 }
 0x211   : > { %2965 = vst [vmem:[%s3925_s14 + $0x10] sm:$0xff] %v2473_v39  ;;  %v2534_v51 = vmul.f32 %v2473_v39, %v2473_v39  ;;  %v2475_v53 = vadd.f32 %v2438_v48, %v3918_v38  ;;  %v2440_v56 = vpop.f32.mrb[3].mxu1  ;;  %1956 = vst [vmem:[%s3925_s14 + $0x8] sm:$0xff] %v1940_v43  ;;  %v1998_v57 = vmul.f32 %v1940_v43, %v1940_v43 }
 0x212   : > { %2966 = vst [vmem:[%s3925_s14 + $0x18] sm:$0xff] %v2474_v45  ;;  %v2535_v58 = vmul.f32 %v2474_v45, %v2474_v45  ;;  %v1942_v60 = vadd.f32 %v3920_v44, %v1895_v54  ;;  %v2476_v62 = vadd.f32 %v2440_v56, %v3920_v44  ;;  %1957 = vst [vmem:[%s3925_s14 + $0x20] sm:$0xff] %v1941_v52 }
 0x213   : > { %v1971_v63 = vadd.f32 %v1941_v52, %v1939_v3  ;;  %v1999_v1 = vmul.f32 %v1941_v52, %v1941_v52  ;;  %2967 = vst [vmem:[%s3925_s14 + $0x30] sm:$0xff] %v2475_v53  ;;  %v2506_v2 = vadd.f32 %v2475_v53, %v2473_v39  ;;  %v2536_v4 = vmul.f32 %v2475_v53, %v2475_v53 }
 0x214   : > { %1958 = vst [vmem:[%s3925_s14 + $0x28] sm:$0xff] %v1942_v60  ;;  %v1984_v5 = vadd.f32 %v1942_v60, %v1940_v43  ;;  %v2000_v6 = vmul.f32 %v1942_v60, %v1942_v60  ;;  %2968 = vst [vmem:[%s3925_s14 + $0x38] sm:$0xff] %v2476_v62  ;;  %v2519_v7 = vadd.f32 %v2476_v62, %v2474_v45 }
 0x215   : > { %v2537_v8 = vmul.f32 %v2476_v62, %v2476_v62  ;;  %v2013_v26 = vadd.f32 %v1999_v1, %v1997_v50  ;;  %v2550_v10 = vadd.f32 %v2536_v4, %v2534_v51  ;;  %v1899_v13 = vpop.f32.mrb[4].mxu0 }
 0x216   : > { %v2026_v11 = vadd.f32 %v2000_v6, %v1998_v57  ;;  %v2444_v14 = vpop.f32.mrb[4].mxu1  ;;  %v1943_v0 = vadd.f32 %v3918_v38, %v1899_v13  ;;  %v1901_v16 = vpop.f32.mrb[5].mxu0 }
 0x217   : > { %v2563_v12 = vadd.f32 %v2537_v8, %v2535_v58  ;;  %v2477_v15 = vadd.f32 %v2444_v14, %v3918_v38  ;;  %v2446_v18 = vpop.f32.mrb[5].mxu1  ;;  %v1944_v19 = vadd.f32 %v3920_v44, %v1901_v16  ;;  %v1903_v21 = vpop.f32.mrb[6].mxu0 }
 0x218   : > { %v2478_v17 = vadd.f32 %v2446_v18, %v3920_v44  ;;  %v2448_v59 = vpop.f32.mrb[6].mxu1  ;;  %1959 = vst [vmem:[%s3925_s14 + $0x40] sm:$0xff] %v1943_v0  ;;  %v1972_v29 = vadd.f32 %v1971_v63, %v1943_v0  ;;  %v2001_v22 = vmul.f32 %v1943_v0, %v1943_v0  ;;  %v1905_v27 = vpop.f32.mrb[7].mxu0  ;;  %v1945_v9 = vadd.f32 %v3918_v38, %v1903_v21 }
 0x219   : > { %2969 = vst [vmem:[%s3925_s14 + $0x50] sm:$0xff] %v2477_v15  ;;  %v2507_v23 = vadd.f32 %v2506_v2, %v2477_v15  ;;  %v2538_v25 = vmul.f32 %v2477_v15, %v2477_v15  ;;  %v2450_v41 = vpop.f32.mrb[7].mxu1  ;;  %1960 = vst [vmem:[%s3925_s14 + $0x48] sm:$0xff] %v1944_v19  ;;  %v1985_v49 = vadd.f32 %v1984_v5, %v1944_v19 }
 0x21a   : > { %v2002_v28 = vmul.f32 %v1944_v19, %v1944_v19  ;;  %2970 = vst [vmem:[%s3925_s14 + $0x58] sm:$0xff] %v2478_v17  ;;  %v2520_v30 = vadd.f32 %v2519_v7, %v2478_v17  ;;  %v2539_v31 = vmul.f32 %v2478_v17, %v2478_v17  ;;  %v2014_v32 = vadd.f32 %v2013_v26, %v2001_v22 }
 0x21b   : > { %v2551_v46 = vadd.f32 %v2550_v10, %v2538_v25  ;;  %v2479_v61 = vadd.f32 %v2448_v59, %v3918_v38  ;;  %v1946_v34 = vadd.f32 %v3920_v44, %v1905_v27  ;;  %v2480_v35 = vadd.f32 %v2450_v41, %v3920_v44  ;;  %1961 = vst [vmem:[%s3925_s14 + $0x60] sm:$0xff] %v1945_v9 }
 0x21c   : > { %v2027_v20 = vadd.f32 %v2026_v11, %v2002_v28  ;;  %v2564_v33 = vadd.f32 %v2563_v12, %v2539_v31  ;;  %v1973_v36 = vadd.f32 %v1972_v29, %v1945_v9  ;;  %v2003_v37 = vmul.f32 %v1945_v9, %v1945_v9 }
 0x21d   : > { %2971 = vst [vmem:[%s3925_s14 + $0x70] sm:$0xff] %v2479_v61  ;;  %v2508_v24 = vadd.f32 %v2507_v23, %v2479_v61  ;;  %v2540_v55 = vmul.f32 %v2479_v61, %v2479_v61  ;;  %1962 = vst [vmem:[%s3925_s14 + $0x68] sm:$0xff] %v1946_v34  ;;  %v1986_v3 = vadd.f32 %v1985_v49, %v1946_v34  ;;  %v1909_v43 = vpop.f32.mrb[8].mxu0 }
 0x21e   : > { %v2004_v39 = vmul.f32 %v1946_v34, %v1946_v34  ;;  %2972 = vst [vmem:[%s3925_s14 + $0x78] sm:$0xff] %v2480_v35  ;;  %v2521_v40 = vadd.f32 %v2520_v30, %v2480_v35  ;;  %v2541_v42 = vmul.f32 %v2480_v35, %v2480_v35  ;;  %v2454_v45 = vpop.f32.mrb[8].mxu1  ;;  %v2015_v47 = vadd.f32 %v2014_v32, %v2003_v37  ;;  %v1911_v52 = vpop.f32.mrb[9].mxu0 }
 0x21f   : > { %v2552_v48 = vadd.f32 %v2551_v46, %v2540_v55  ;;  %v1947_v50 = vadd.f32 %v3918_v38, %v1909_v43  ;;  %v2481_v51 = vadd.f32 %v2454_v45, %v3918_v38  ;;  %v2456_v53 = vpop.f32.mrb[9].mxu1  ;;  %v1948_v57 = vadd.f32 %v3920_v44, %v1911_v52  ;;  %v1913_v60 = vpop.f32.mrb[10].mxu0 }
 0x220   : > { %v2028_v54 = vadd.f32 %v2027_v20, %v2004_v39  ;;  %v2565_v56 = vadd.f32 %v2564_v33, %v2541_v42  ;;  %v2482_v58 = vadd.f32 %v2456_v53, %v3920_v44  ;;  %v2458_v62 = vpop.f32.mrb[10].mxu1  ;;  %v1915_v5 = vpop.f32.mrb[11].mxu0  ;;  %v1949_v13 = vadd.f32 %v3918_v38, %v1913_v60 }
 0x221   : > { %1963 = vst [vmem:[%s3925_s14 + $0x80] sm:$0xff] %v1947_v50  ;;  %v1974_v63 = vadd.f32 %v1973_v36, %v1947_v50  ;;  %v2005_v1 = vmul.f32 %v1947_v50, %v1947_v50  ;;  %2973 = vst [vmem:[%s3925_s14 + $0x90] sm:$0xff] %v2481_v51  ;;  %v2509_v2 = vadd.f32 %v2508_v24, %v2481_v51  ;;  %v2460_v6 = vpop.f32.mrb[11].mxu1 }
 0x222   : > { %v2542_v4 = vmul.f32 %v2481_v51, %v2481_v51  ;;  %1964 = vst [vmem:[%s3925_s14 + $0x88] sm:$0xff] %v1948_v57  ;;  %v1987_v7 = vadd.f32 %v1986_v3, %v1948_v57  ;;  %v2006_v8 = vmul.f32 %v1948_v57, %v1948_v57  ;;  %2974 = vst [vmem:[%s3925_s14 + $0x98] sm:$0xff] %v2482_v58 }
 0x223   : > { %v2522_v26 = vadd.f32 %v2521_v40, %v2482_v58  ;;  %v2543_v10 = vmul.f32 %v2482_v58, %v2482_v58  ;;  %v2016_v11 = vadd.f32 %v2015_v47, %v2005_v1  ;;  %v2483_v14 = vadd.f32 %v2458_v62, %v3918_v38  ;;  %1965 = vst [vmem:[%s3925_s14 + $0xa0] sm:$0xff] %v1949_v13 }
 0x224   : > { %v2553_v12 = vadd.f32 %v2552_v48, %v2542_v4  ;;  %v2029_v0 = vadd.f32 %v2028_v54, %v2006_v8  ;;  %v1950_v16 = vadd.f32 %v3920_v44, %v1915_v5  ;;  %v2484_v18 = vadd.f32 %v2460_v6, %v3920_v44 }
 0x225   : > { %v2566_v15 = vadd.f32 %v2565_v56, %v2543_v10  ;;  %v1975_v19 = vadd.f32 %v1974_v63, %v1949_v13  ;;  %v2007_v17 = vmul.f32 %v1949_v13, %v1949_v13  ;;  %2975 = vst [vmem:[%s3925_s14 + $0xb0] sm:$0xff] %v2483_v14  ;;  %v2510_v21 = vadd.f32 %v2509_v2, %v2483_v14  ;;  %v1919_v27 = vpop.f32.mrb[12].mxu0 }
 0x226   : > { %v2544_v59 = vmul.f32 %v2483_v14, %v2483_v14  ;;  %1966 = vst [vmem:[%s3925_s14 + $0xa8] sm:$0xff] %v1950_v16  ;;  %v1988_v29 = vadd.f32 %v1987_v7, %v1950_v16  ;;  %v2008_v22 = vmul.f32 %v1950_v16, %v1950_v16  ;;  %2976 = vst [vmem:[%s3925_s14 + $0xb8] sm:$0xff] %v2484_v18  ;;  %v2464_v41 = vpop.f32.mrb[12].mxu1  ;;  %v1921_v32 = vpop.f32.mrb[13].mxu0 }
 0x227   : > { %v2523_v23 = vadd.f32 %v2522_v26, %v2484_v18  ;;  %v2545_v25 = vmul.f32 %v2484_v18, %v2484_v18  ;;  %v2017_v49 = vadd.f32 %v2016_v11, %v2007_v17  ;;  %v1951_v30 = vadd.f32 %v3918_v38, %v1919_v27  ;;  %v2466_v46 = vpop.f32.mrb[13].mxu1  ;;  %v1923_v34 = vpop.f32.mrb[14].mxu0 }
 0x228   : > { %v2554_v28 = vadd.f32 %v2553_v12, %v2544_v59  ;;  %v2485_v31 = vadd.f32 %v2464_v41, %v3918_v38  ;;  %v2030_v9 = vadd.f32 %v2029_v0, %v2008_v22  ;;  %v1952_v20 = vadd.f32 %v3920_v44, %v1921_v32  ;;  %v2468_v35 = vpop.f32.mrb[14].mxu1  ;;  %v1925_v3 = vpop.f32.mrb[15].mxu0 }
 0x229   : > { %v2567_v61 = vadd.f32 %v2566_v15, %v2545_v25  ;;  %v2486_v33 = vadd.f32 %v2466_v46, %v3920_v44  ;;  %1967 = vst [vmem:[%s3925_s14 + $0xc0] sm:$0xff] %v1951_v30  ;;  %v1976_v36 = vadd.f32 %v1975_v19, %v1951_v30  ;;  %v2009_v37 = vmul.f32 %v1951_v30, %v1951_v30  ;;  %v2470_v39 = vpop.f32.mrb[15].mxu1 }
 0x22a   : > { %2977 = vst [vmem:[%s3925_s14 + $0xd0] sm:$0xff] %v2485_v31  ;;  %v2511_v24 = vadd.f32 %v2510_v21, %v2485_v31  ;;  %v2546_v55 = vmul.f32 %v2485_v31, %v2485_v31  ;;  %1968 = vst [vmem:[%s3925_s14 + $0xc8] sm:$0xff] %v1952_v20  ;;  %v1989_v40 = vadd.f32 %v1988_v29, %v1952_v20 }
 0x22b   : > { %v2010_v42 = vmul.f32 %v1952_v20, %v1952_v20  ;;  %2978 = vst [vmem:[%s3925_s14 + $0xd8] sm:$0xff] %v2486_v33  ;;  %v2524_v43 = vadd.f32 %v2523_v23, %v2486_v33  ;;  %v2547_v45 = vmul.f32 %v2486_v33, %v2486_v33  ;;  %v2018_v47 = vadd.f32 %v2017_v49, %v2009_v37 }
 0x22c   : > { %v2555_v48 = vadd.f32 %v2554_v28, %v2546_v55  ;;  %v1953_v50 = vadd.f32 %v3918_v38, %v1923_v34  ;;  %v2487_v51 = vadd.f32 %v2468_v35, %v3918_v38  ;;  %v1954_v54 = vadd.f32 %v3920_v44, %v1925_v3 }
 0x22d   : > { %v2031_v52 = vadd.f32 %v2030_v9, %v2010_v42  ;;  %v2568_v53 = vadd.f32 %v2567_v61, %v2547_v45  ;;  %v2488_v56 = vadd.f32 %v2470_v39, %v3920_v44 }
 0x22e   : > { %1969 = vst [vmem:[%s3925_s14 + $0xe0] sm:$0xff] %v1953_v50  ;;  %v1977_v57 = vadd.f32 %v1976_v36, %v1953_v50  ;;  %v2011_v58 = vmul.f32 %v1953_v50, %v1953_v50  ;;  %2979 = vst [vmem:[%s3925_s14 + $0xf0] sm:$0xff] %v2487_v51  ;;  %v2512_v60 = vadd.f32 %v2511_v24, %v2487_v51 }
 0x22f   : > { %v2548_v62 = vmul.f32 %v2487_v51, %v2487_v51  ;;  %1970 = vst [vmem:[%s3925_s14 + $0xe8] sm:$0xff] %v1954_v54  ;;  %v1990_v63 = vadd.f32 %v1989_v40, %v1954_v54  ;;  %v2012_v1 = vmul.f32 %v1954_v54, %v1954_v54  ;;  %2980 = vst [vmem:[%s3925_s14 + $0xf8] sm:$0xff] %v2488_v56 }
 0x230   : > { %v2525_v2 = vadd.f32 %v2524_v43, %v2488_v56  ;;  %v2549_v4 = vmul.f32 %v2488_v56, %v2488_v56  ;;  %v1978_v5 = vrot.slane %v1977_v57, 4  ;;  %v2019_v38 = vadd.f32 %v2018_v47, %v2011_v58 }
 0x231   : > { %v2513_v6 = vrot.slane %v2512_v60, 4  ;;  %v2556_v7 = vadd.f32 %v2555_v48, %v2548_v62  ;;  %v1991_v8 = vrot.slane %v1990_v63, 4  ;;  %v2032_v26 = vadd.f32 %v2031_v52, %v2012_v1 }
 0x232   : > { %v2526_v10 = vrot.slane %v2525_v2, 4  ;;  %v2569_v44 = vadd.f32 %v2568_v53, %v2549_v4  ;;  %v1979_v11 = vadd.f32 %v1978_v5, %v1977_v57  ;;  %v2020_v12 = vrot.slane %v2019_v38, 4 }
 0x233   : > { %v2514_v13 = vadd.f32 %v2513_v6, %v2512_v60  ;;  %v2557_v14 = vrot.slane %v2556_v7, 4  ;;  %v1992_v0 = vadd.f32 %v1991_v8, %v1990_v63  ;;  %v2033_v15 = vrot.slane %v2032_v26, 4 }
 0x234   : > { %v2527_v16 = vadd.f32 %v2526_v10, %v2525_v2  ;;  %v2570_v18 = vrot.slane %v2569_v44, 4  ;;  %v1980_v19 = vrot.slane %v1979_v11, 2  ;;  %v2021_v17 = vadd.f32 %v2020_v12, %v2019_v38 }
 0x235   : > { %v2515_v21 = vrot.slane %v2514_v13, 2  ;;  %v2558_v59 = vadd.f32 %v2557_v14, %v2556_v7  ;;  %v1993_v29 = vrot.slane %v1992_v0, 2  ;;  %v2034_v22 = vadd.f32 %v2033_v15, %v2032_v26 }
 0x236   : > { %v2528_v23 = vrot.slane %v2527_v16, 2  ;;  %v2571_v25 = vadd.f32 %v2570_v18, %v2569_v44  ;;  %v1981_v27 = vadd.f32 %v1980_v19, %v1979_v11  ;;  %v2022_v41 = vrot.slane %v2021_v17, 2 }
 0x237   : > { %v2516_v49 = vadd.f32 %v2515_v21, %v2514_v13  ;;  %v2559_v28 = vrot.slane %v2558_v59, 2  ;;  %v1994_v30 = vadd.f32 %v1993_v29, %v1992_v0  ;;  %v2035_v31 = vrot.slane %v2034_v22, 2 }
 0x238   : > { %v2529_v32 = vadd.f32 %v2528_v23, %v2527_v16  ;;  %v2572_v46 = vrot.slane %v2571_v25, 2  ;;  %v1982_v9 = vrot.slane %v1981_v27, 1  ;;  %v2023_v61 = vadd.f32 %v2022_v41, %v2021_v17 }
 0x239   : > { %v2517_v20 = vrot.slane %v2516_v49, 1  ;;  %v2560_v33 = vadd.f32 %v2559_v28, %v2558_v59  ;;  %v1995_v34 = vrot.slane %v1994_v30, 1  ;;  %v2036_v35 = vadd.f32 %v2035_v31, %v2034_v22 }
 0x23a   : > { %v2530_v36 = vrot.slane %v2529_v32, 1  ;;  %v2573_v37 = vadd.f32 %v2572_v46, %v2571_v25  ;;  %v1983_v24 = vadd.f32 %v1982_v9, %v1981_v27  ;;  %v2024_v55 = vrot.slane %v2023_v61, 1 }
 0x23b   : > { %v2518_v3 = vadd.f32 %v2517_v20, %v2516_v49  ;;  %v2561_v39 = vrot.slane %v2560_v33, 1  ;;  %v1996_v40 = vadd.f32 %v1995_v34, %v1994_v30  ;;  %v2037_v42 = vrot.slane %v2036_v35, 1 }
 0x23c   : > { %v2531_v43 = vadd.f32 %v2530_v36, %v2529_v32  ;;  %v2574_v45 = vrot.slane %v2573_v37, 1  ;;  %v2025_v47 = vadd.f32 %v2024_v55, %v2023_v61 }
 0x23d   : > { %v2532_v48 = vadd.f32 %v2518_v3, %v1983_v24  ;;  %v2562_v50 = vadd.f32 %v2561_v39, %v2560_v33  ;;  %v2038_v51 = vadd.f32 %v2037_v42, %v2036_v35 }
 0x23e   : > { %v2533_v52 = vadd.f32 %v2531_v43, %v1996_v40  ;;  %v2575_v53 = vadd.f32 %v2574_v45, %v2573_v37 }
 0x23f   : > { %v2576_v54 = vadd.f32 %v2562_v50, %v2025_v47 }
 0x240   : > { %v2577_v56 = vadd.f32 %v2575_v53, %v2038_v51  ;;  %v2578_v57 = vadd.f32 %v2533_v52, %v2532_v48 }
 0x242   : > { %2579 = vst [vmem:[%s406_s24] sm:$0x1] %v2578_v57  ;;  %v2580_v58 = vadd.f32 %v2577_v56, %v2576_v54 }
 0x244   : > { %2581 = vst [vmem:[%s406_s24 + $0x1] sm:$0x1] %v2580_v58 }
 0x245 PF: > { %s22_s29 = sadd.s32 1, %s3587_s29   ;;  %s4026_s25 = sld [smem:[#allocation14_spill]] }
 0x246   : > { %p19_p8 = scmp.ge.s32.totalorder %s22_s29, 4   ;;  %s4027_s27 = smov %s3583_s28 }
 0x248   :  { %21 = sbr.rel (!%p19_p8) target bundleno = 6 (0x6), region = 110 }
 0x24b   : > { %s4028_s28 = smov %s4026_s25 }
 0x24f   :  { %2634 = vsyncpa [#allocation5], 1 }
 0x250   :  { %2636 = vsyncpa [#allocation5 + $0x1], 1 }
 0x251   :  { %2637 = vsyncpa [#allocation7], 1 }
 0x252   :  { %2638 = vsyncpa [#allocation10], 1 }

// kernel: generator_forward.6
= control target key start
LH: loop header
LB: loop body
LE: loop exit
PB: predicated region body
PF: predicated region fallthrough
CT: control target
= control target key end

     0   :  { %s4170_s27 = smov 0   ;;  %s4172_s28 = smov 0   ;;  %s5489_s0 = inlined_call_operand.vmem [shape: f32[2,16,16,128], index: 0, kind: input, shape index: {}]   ;;  %s5490_s1 = inlined_call_operand.vmem [shape: bf16[384,128], index: 1, kind: input, shape index: {}]   ;;  %s5491_s2 = inlined_call_operand.vmem [shape: bf16[384,256], index: 2, kind: input, shape index: {}]   ;;  %s5492_s3 = inlined_call_operand.vmem [shape: bf16[384,128], index: 3, kind: input, shape index: {}]   ;;  %s5493_s4 = inlined_call_operand.vmem [shape: f32[1,128], index: 4, kind: input, shape index: {}]   ;;  %s5494_s5 = inlined_call_operand.vmem [shape: f32[1,1,128], index: 5, kind: input, shape index: {}]   ;;  %s5495_s6 = inlined_call_operand.vmem [shape: f32[1,1,128], index: 6, kind: input, shape index: {}]   ;;  %s5496_s7 = inlined_call_operand.vmem [shape: f32[2,16,2,16,128], index: 7, kind: output, shape index: {0}]   ;;  %s5497_s8 = inlined_call_operand.vmem [shape: f32[2,1,2,64], index: 8, kind: output, shape index: {1}]  }
   0x1   :  { %s4174_s29 = smov 0  }
   0x2 LB: > { %s31_s30 = sadd.s32 1, %s4115_s28  ;;  %p3359_p0 = scmp.ge.s32.totalorder %s4119_s29, 1  ;;  %s4119_s29 = sphi %s4174_s29, %s19_s29   ;;  %s4115_s28 = sphi %s4172_s28, %s5523_s28   ;;  %s4111_s27 = sphi %s4170_s27, %s5522_s27  }
   0x3   : > { %p33_p1 = scmp.ge.s32.totalorder %s31_s30, 2  ;;  %p281_p2 = scmp.lt.s32.totalorder %s4119_s29, 3 }
   0x5   : > { %s5525_s30 = smov (%p33_p1, %s31_s30), 0  ;;  %p282_p3 = pnand %p3359_p0, %p281_p2 }
   0x7   : > { %285 = sbr.rel (%p282_p3) target bundleno = 752 (0x2f0), region = 48 }
   0xe   : > { %v3975_v0 = vld [vmem:[%s5491_s2 + $0x4] ss:$8 sps:$4 sm:$0xff]   ;;  %v4121_v2 = vmov 0.0   ;;  %v3978_v3 = vld [vmem:[%s5491_s2] ss:$8 sps:$4 sm:$0xff]   ;;  %v3987_v10 = vld [vmem:[%s5490_s1 + $0x50] sm:$0xff]  }
   0xf   : > { %v3977_v1 = vld [vmem:[%s5490_s1 + $0x40] sm:$0xff]   ;;  %352 = vst [vmem:[#allocation2] sm:$0xff] %v4121_v2  ;;  %353 = vst [vmem:[#allocation2 + $0x8] sm:$0xff] %v4121_v2  ;;  %1449 = vmatprep.subr.bf16.mxu0 %v3975_v0  ;;  %v3980_v5 = vld [vmem:[%s5491_s2 + $0x14] ss:$8 sps:$4 sm:$0xff]   ;;  %p327_p4 = scmp.lt.s32.totalorder %s4111_s27, 1 }
  0x10   : > { %354 = vst [vmem:[#allocation2 + $0x10] sm:$0x3] %v4121_v2  ;;  %355 = vst [vmem:[#allocation2 + $0x18] sm:$0xff] %v4121_v2  ;;  %3500 = vmatprep.subr.bf16.mxu1 %v3977_v1  ;;  %v3979_v4 = vld [vmem:[%s5490_s1] sm:$0xff]   ;;  %1450 = vmatpush1.bf16.msra.mxu0 %v3978_v3  ;;  %v3982_v6 = vld [vmem:[%s5490_s1 + $0x48] sm:$0xff]   ;;  %v4122_v51 = vmov 0.0|0.0  }
  0x11   : > { %356 = vst [vmem:[#allocation2 + $0x20] sm:$0xff] %v4121_v2  ;;  %357 = vst [vmem:[#allocation2 + $0x28] sm:$0x3] %v4121_v2  ;;  %3501 = vmatpush3.bf16.msra.mxu1 %v3979_v4  ;;  %v3983_v7 = vld [vmem:[%s5491_s2 + $0x10] ss:$8 sps:$4 sm:$0xff]   ;;  %1451 = vmatprep.subr.bf16.mxu0 %v3980_v5  ;;  %v3984_v8 = vld [vmem:[%s5490_s1 + $0x8] sm:$0xff]  }
  0x12   : > { %358 = vst [vmem:[#allocation2 + $0x30] sm:$0xff] %v4121_v2  ;;  %359 = vst [vmem:[#allocation2 + $0x38] sm:$0xff] %v4121_v2  ;;  %3502 = vmatprep.subr.bf16.mxu1 %v3982_v6  ;;  %v3985_v9 = vld [vmem:[%s5491_s2 + $0x24] ss:$8 sps:$4 sm:$0xff]   ;;  %v3988_v11 = vld [vmem:[%s5491_s2 + $0x20] ss:$8 sps:$4 sm:$0xff]  }
  0x13   : > { %360 = vst [vmem:[#allocation2 + $0x40] sm:$0x3] %v4121_v2  ;;  %361 = vst [vmem:[#allocation2 + $0x48] sm:$0xff] %v4121_v2  ;;  %v3989_v12 = vld [vmem:[%s5490_s1 + $0x10] sm:$0xff]   ;;  %v3992_v14 = vld [vmem:[%s5490_s1 + $0x58] sm:$0xff]   ;;  %s5527_s27 = smov (!%p327_p4, %s4111_s27), 1 }
  0x14   : > { %362 = vst [vmem:[#allocation2 + $0x50] sm:$0xff] %v4121_v2  ;;  %363 = vst [vmem:[#allocation2 + $0x58] sm:$0x3] %v4121_v2  ;;  %1452 = vmatpush1.bf16.msra.mxu0 %v3983_v7  ;;  %v3990_v13 = vld [vmem:[%s5491_s2 + $0x34] ss:$8 sps:$4 sm:$0xff]   ;;  %v3997_v18 = vld [vmem:[%s5490_s1 + $0x60] sm:$0xff]  }
  0x15   : > { %364 = vst [vmem:[#allocation2 + $0x60] sm:$0xff] %v4121_v2  ;;  %365 = vst [vmem:[#allocation2 + $0x68] sm:$0xff] %v4121_v2  ;;  %3503 = vmatpush3.bf16.msra.mxu1 %v3984_v8  ;;  %1453 = vmatprep.subr.bf16.mxu0 %v3985_v9  ;;  %v3993_v15 = vld [vmem:[%s5491_s2 + $0x30] ss:$8 sps:$4 sm:$0xff]   ;;  %v3995_v17 = vld [vmem:[%s5491_s2 + $0x44] ss:$8 sps:$4 sm:$0xff]  }
  0x16   : > { %366 = vst [vmem:[#allocation2 + $0x70] sm:$0x3] %v4121_v2  ;;  %367 = vst [vmem:[#allocation2 + $0x78] sm:$0xff] %v4121_v2  ;;  %3504 = vmatprep.subr.bf16.mxu1 %v3987_v10  ;;  %v3994_v16 = vld [vmem:[%s5490_s1 + $0x18] sm:$0xff]   ;;  %v3998_v19 = vld [vmem:[%s5491_s2 + $0x40] ss:$8 sps:$4 sm:$0xff]  }
  0x17   : > { %368 = vst [vmem:[#allocation2 + $0x80] sm:$0xff] %v4121_v2  ;;  %369 = vst [vmem:[#allocation2 + $0x88] sm:$0x3] %v4121_v2  ;;  %v3999_v20 = vld [vmem:[%s5490_s1 + $0x20] sm:$0xff]   ;;  %v4000_v21 = vld [vmem:[%s5491_s2 + $0x54] ss:$8 sps:$4 sm:$0xff]  }
  0x18   : > { %370 = vst [vmem:[#allocation2 + $0x90] sm:$0xff] %v4121_v2  ;;  %371 = vst [vmem:[#allocation2 + $0x98] sm:$0xff] %v4121_v2  ;;  %1454 = vmatpush1.bf16.msra.mxu0 %v3988_v11  ;;  %v4002_v22 = vld [vmem:[%s5490_s1 + $0x68] sm:$0xff]   ;;  %v4003_v23 = vld [vmem:[%s5491_s2 + $0x50] ss:$8 sps:$4 sm:$0xff]   ;;  %s3498_s25 = sshll.u32 %s5527_s27, 8 }
  0x19   : > { %372 = vst [vmem:[#allocation2 + $0xa0] sm:$0x3] %v4121_v2  ;;  %373 = vst [vmem:[#allocation2 + $0xa8] sm:$0xff] %v4121_v2  ;;  %3505 = vmatpush3.bf16.msra.mxu1 %v3989_v12  ;;  %1455 = vmatprep.subr.bf16.mxu0 %v3990_v13  ;;  %v4004_v24 = vld [vmem:[%s5490_s1 + $0x28] sm:$0xff]   ;;  %v4007_v26 = vld [vmem:[%s5490_s1 + $0x70] sm:$0xff]   ;;  %s4288_s18 = scalar_lea.vmem %s5489_s0, %s3498_s25  ;;  %s3499_s15 = sshll.u32 %s5527_s27, 9 }
  0x1a   : > { %374 = vst [vmem:[#allocation2 + $0xb0] sm:$0xff] %v4121_v2  ;;  %375 = vst [vmem:[#allocation2 + $0xb8] sm:$0x3] %v4121_v2  ;;  %3506 = vmatprep.subr.bf16.mxu1 %v3992_v14  ;;  %v4005_v25 = vld [vmem:[%s5491_s2 + $0x64] ss:$8 sps:$4 sm:$0xff]   ;;  %v4009_v28 = vld [vmem:[%s5490_s1 + $0x30] sm:$0xff]   ;;  %s5048_s21 = scalar_lea.vmem %s5496_s7, %s3499_s15 }
  0x1b   : > { %376 = vst [vmem:[#allocation2 + $0xc0] sm:$0xff] %v4121_v2  ;;  %377 = vst [vmem:[#allocation2 + $0xc8] sm:$0xff] %v4121_v2  ;;  %v4008_v27 = vld [vmem:[%s5491_s2 + $0x60] ss:$8 sps:$4 sm:$0xff]   ;;  %v4010_v29 = vld [vmem:[%s5491_s2 + $0x74] ss:$8 sps:$4 sm:$0xff]  }
  0x1c   : > { %378 = vst [vmem:[#allocation2 + $0xd0] sm:$0x3] %v4121_v2  ;;  %379 = vst [vmem:[#allocation2 + $0xd8] sm:$0xff] %v4121_v2  ;;  %1456 = vmatpush1.bf16.msra.mxu0 %v3993_v15  ;;  %v4012_v30 = vld [vmem:[%s5490_s1 + $0x78] sm:$0xff]   ;;  %v719_v31 = vld [vmem:[#allocation2 + $0x1] sm:$0xff]  ;;  %s3364_s24 = sshll.u32 %s5527_s27, 1 }
  0x1d   : > { %380 = vst [vmem:[#allocation2 + $0xe0] sm:$0xff] %v4121_v2  ;;  %381 = vst [vmem:[#allocation2 + $0xe8] sm:$0x3] %v4121_v2  ;;  %3507 = vmatpush3.bf16.msra.mxu1 %v3994_v16  ;;  %1457 = vmatprep.subr.bf16.mxu0 %v3995_v17  ;;  %v720_v32 = vld [vmem:[#allocation2 + $0x9] sm:$0xff]  ;;  %v4014_v35 = vld [vmem:[%s5490_s1 + $0x38] sm:$0xff]   ;;  %s349_s9 = scalar_lea.vmem %s5497_s8, %s3364_s24 }
  0x1e   : > { %382 = vst [vmem:[#allocation2 + $0xf0] sm:$0xff] %v4121_v2  ;;  %383 = vst [vmem:[#allocation2 + $0xf8] sm:$0xff] %v4121_v2  ;;  %3508 = vmatprep.subr.bf16.mxu1 %v3997_v18  ;;  %v4013_v33 = vld [vmem:[%s5491_s2 + $0x70] ss:$8 sps:$4 sm:$0xff]   ;;  %v960_v34 = vpack.c.bf16 %v720_v32, %v719_v31  ;;  %v4015_v36 = vld [vmem:[%s5491_s2 + $0x84] ss:$8 sps:$4 sm:$0xff]  }
  0x1f   : > { %384 = vst [vmem:[#allocation2 + $0x100] sm:$0x3] %v4121_v2  ;;  %385 = vst [vmem:[#allocation2 + $0x108] sm:$0xff] %v4121_v2  ;;  %v408_v37 = vld [vmem:[%s4288_s18] sm:$0xff]  ;;  %v409_v38 = vld [vmem:[%s4288_s18 + $0x8] sm:$0xff] }
  0x20   : > { %386 = vst [vmem:[#allocation2 + $0x110] sm:$0xff] %v4121_v2  ;;  %387 = vst [vmem:[#allocation2 + $0x118] sm:$0x3] %v4121_v2  ;;  %1458 = vmatpush1.bf16.msra.mxu0 %v3998_v19  ;;  %2059 = vmatprep.mubr.bf16.mxu1 %v960_v34  ;;  %v4304_v39 = vld [vmem:[%s5494_s5] ss:$0 sm:$0xff]  ;;  %v410_v47 = vld [vmem:[%s4288_s18 + $0x10] sm:$0xff] }
  0x21   : > { %388 = vst [vmem:[#allocation2 + $0x120] sm:$0xff] %v4121_v2  ;;  %389 = vst [vmem:[#allocation2 + $0x128] sm:$0xff] %v4121_v2  ;;  %3509 = vmatpush3.bf16.msra.mxu1 %v3999_v20  ;;  %1459 = vmatprep.subr.bf16.mxu0 %v4000_v21  ;;  %v447_v40 = vmul.f32 %v4304_v39, %v408_v37  ;;  %v448_v41 = vmul.f32 %v4304_v39, %v409_v38  ;;  %v4311_v42 = vld [vmem:[%s5495_s6] ss:$0 sm:$0xff]  ;;  %v4018_v44 = vld [vmem:[%s5491_s2 + $0x94] ss:$8 sps:$4 sm:$0xff]  }
  0x22   : > { %390 = vst [vmem:[#allocation2 + $0x130] sm:$0x3] %v4121_v2  ;;  %391 = vst [vmem:[#allocation2 + $0x138] sm:$0xff] %v4121_v2  ;;  %3510 = vmatprep.subr.bf16.mxu1 %v4002_v22  ;;  %v4017_v43 = vld [vmem:[%s5491_s2 + $0x80] ss:$8 sps:$4 sm:$0xff]   ;;  %v411_v48 = vld [vmem:[%s4288_s18 + $0x18] sm:$0xff]  ;;  %v449_v53 = vmul.f32 %v4304_v39, %v410_v47 }
  0x23   : > { %392 = vst [vmem:[#allocation2 + $0x140] sm:$0xff] %v4121_v2  ;;  %393 = vst [vmem:[#allocation2 + $0x148] sm:$0x3] %v4121_v2  ;;  %v486_v45 = vadd.f32 %v4311_v42, %v447_v40  ;;  %v487_v46 = vadd.f32 %v4311_v42, %v448_v41  ;;  %v4020_v52 = vld [vmem:[%s5491_s2 + $0x90] ss:$8 sps:$4 sm:$0xff]   ;;  %v450_v54 = vmul.f32 %v4304_v39, %v411_v48  ;;  %v4029_v58 = vld [vmem:[%s5490_s1 + $0x80] sm:$0xff]  }
  0x24   : > { %394 = vst [vmem:[#allocation2 + $0x150] sm:$0xff] %v4121_v2  ;;  %395 = vst [vmem:[#allocation2 + $0x158] sm:$0xff] %v4121_v2  ;;  %1460 = vmatpush1.bf16.msra.mxu0 %v4003_v23  ;;  %v4021_v57 = vld [vmem:[%s5491_s2 + $0xa4] ss:$8 sps:$4 sm:$0xff]   ;;  %v488_v60 = vadd.f32 %v4311_v42, %v449_v53  ;;  %v4023_v62 = vld [vmem:[%s5491_s2 + $0xa0] ss:$8 sps:$4 sm:$0xff]  }
  0x25   : > { %396 = vst [vmem:[#allocation2 + $0x160] sm:$0x3] %v4121_v2  ;;  %397 = vst [vmem:[#allocation2 + $0x168] sm:$0xff] %v4121_v2  ;;  %3511 = vmatpush3.bf16.msra.mxu1 %v4004_v24  ;;  %1461 = vmatprep.subr.bf16.mxu0 %v4005_v25  ;;  %vm518_vm0 = vcmp.gt.f32.partialorder %v486_v45, 0.0  ;;  %vm519_vm1 = vcmp.gt.f32.partialorder %v487_v46, 0.0  ;;  %v489_v61 = vadd.f32 %v4311_v42, %v450_v54  ;;  %v412_v63 = vld [vmem:[%s4288_s18 + $0x20] sm:$0xff] }
  0x26   : > { %398 = vst [vmem:[#allocation2 + $0x170] sm:$0xff] %v4121_v2  ;;  %399 = vst [vmem:[#allocation2 + $0x178] sm:$0x3] %v4121_v2  ;;  %3512 = vmatprep.subr.bf16.mxu1 %v4007_v26  ;;  %v550_v49 = vmul.f32 0.2, %v486_v45  ;;  %v413_v0 = vld [vmem:[%s4288_s18 + $0x28] sm:$0xff]  ;;  %v451_v4 = vmul.f32 %v4304_v39, %v412_v63 }
  0x27   : > { %400 = vst [vmem:[#allocation2 + $0x180] sm:$0xff] %v4121_v2  ;;  %401 = vst [vmem:[#allocation2 + $0x188] sm:$0xff] %v4121_v2  ;;  %v551_v50 = vmul.f32 0.2, %v487_v46  ;;  %vm520_vm2 = vcmp.gt.f32.partialorder %v488_v60, 0.0  ;;  %vm521_vm3 = vcmp.gt.f32.partialorder %v489_v61, 0.0  ;;  %v452_v5 = vmul.f32 %v4304_v39, %v413_v0 }
  0x28   : > { %402 = vst [vmem:[#allocation2 + $0x190] sm:$0x3] %v4121_v2  ;;  %403 = vst [vmem:[#allocation2 + $0x198] sm:$0xff] %v4121_v2  ;;  %1462 = vmatpush1.bf16.msra.mxu0 %v4008_v27  ;;  %v582_v55 = vsel %vm518_vm0, %v486_v45, %v550_v49  ;;  %v552_v1 = vmul.f32 0.2, %v488_v60  ;;  %v490_v10 = vadd.f32 %v4311_v42, %v451_v4  ;;  %v414_v12 = vld [vmem:[%s4288_s18 + $0x30] sm:$0xff] }
  0x29   : > { %404 = vst [vmem:[#allocation2 + $0x1a0] sm:$0xff] %v4121_v2  ;;  %405 = vst [vmem:[#allocation2 + $0x1a8] sm:$0x3] %v4121_v2  ;;  %3513 = vmatpush3.bf16.msra.mxu1 %v4009_v28  ;;  %1463 = vmatprep.subr.bf16.mxu0 %v4010_v29  ;;  %v583_v56 = vsel %vm519_vm1, %v487_v46, %v551_v50  ;;  %v553_v2 = vmul.f32 0.2, %v489_v61  ;;  %v491_v11 = vadd.f32 %v4311_v42, %v452_v5  ;;  %v415_v14 = vld [vmem:[%s4288_s18 + $0x38] sm:$0xff] }
  0x2a   : > { %3514 = vmatprep.subr.bf16.mxu1 %v4012_v30  ;;  %615 = vst [vmem:[#allocation2 + $0x19] sm:$0xff] %v582_v55  ;;  %616 = vst [vmem:[#allocation2 + $0x21] sm:$0xff] %v583_v56  ;;  %v963_v59 = vpack.c.bf16 %v583_v56, %v582_v55  ;;  %v4024_v3 = vld [vmem:[%s5491_s2 + $0xb4] ss:$8 sps:$4 sm:$0xff]   ;;  %v584_v6 = vsel %vm520_vm2, %v488_v60, %v552_v1  ;;  %v4026_v8 = vld [vmem:[%s5491_s2 + $0xb0] ss:$8 sps:$4 sm:$0xff]   ;;  %v453_v15 = vmul.f32 %v4304_v39, %v414_v12 }
  0x2b   : > { %v585_v7 = vsel %vm521_vm3, %v489_v61, %v553_v2  ;;  %617 = vst [vmem:[#allocation2 + $0x31] sm:$0xff] %v584_v6  ;;  %v4027_v9 = vld [vmem:[%s5491_s2 + $0xc4] ss:$8 sps:$4 sm:$0xff]   ;;  %vm522_vm4 = vcmp.gt.f32.partialorder %v490_v10, 0.0  ;;  %vm523_vm5 = vcmp.gt.f32.partialorder %v491_v11, 0.0  ;;  %v454_v19 = vmul.f32 %v4304_v39, %v415_v14  ;;  %v418_v32 = vld [vmem:[%s4288_s18 + $0x50] sm:$0xff] }
  0x2c   : > { %1464 = vmatpush1.bf16.msra.mxu0 %v4013_v33  ;;  %1481 = vmatprep.mubr.bf16.mxu0 %v963_v59  ;;  %618 = vst [vmem:[#allocation2 + $0x39] sm:$0xff] %v585_v7  ;;  %v4355_v13 = vpack.c.bf16 %v585_v7, %v584_v6  ;;  %v554_v18 = vmul.f32 0.2, %v490_v10  ;;  %v4030_v21 = vld [vmem:[%s5491_s2 + $0xc0] ss:$8 sps:$4 sm:$0xff]   ;;  %v492_v23 = vadd.f32 %v4311_v42, %v453_v15  ;;  %v4047_v53 = vld [vmem:[%s5490_s1 + $0x90] sm:$0xff]  }
  0x2d   : > { %3515 = vmatpush3.bf16.msra.mxu1 %v4014_v35  ;;  %1465 = vmatprep.subr.bf16.mxu0 %v4015_v36  ;;  %v555_v22 = vmul.f32 0.2, %v491_v11  ;;  %v4031_v24 = vld [vmem:[%s5491_s2 + $0xd4] ss:$8 sps:$4 sm:$0xff]   ;;  %v493_v26 = vadd.f32 %v4311_v42, %v454_v19  ;;  %v4043_v27 = vld [vmem:[%s5490_s1 + $0x88] sm:$0xff]   ;;  %v416_v30 = vld [vmem:[%s4288_s18 + $0x40] sm:$0xff] }
  0x2e   : > { %3772 = vmatprep.subr.bf16.mxu1 %v4029_v58  ;;  %v586_v25 = vsel %vm522_vm4, %v490_v10, %v554_v18  ;;  %vm524_vm6 = vcmp.gt.f32.partialorder %v492_v23, 0.0  ;;  %v556_v29 = vmul.f32 0.2, %v492_v23  ;;  %v417_v31 = vld [vmem:[%s4288_s18 + $0x48] sm:$0xff]  ;;  %v455_v34 = vmul.f32 %v4304_v39, %v416_v30  ;;  %v419_v35 = vld [vmem:[%s4288_s18 + $0x58] sm:$0xff]  ;;  %v420_v54 = vld [vmem:[%s4288_s18 + $0x60] sm:$0xff] }
  0x2f   : > { %v587_v28 = vsel %vm523_vm5, %v491_v11, %v555_v22  ;;  %619 = vst [vmem:[#allocation2 + $0x49] sm:$0xff] %v586_v25  ;;  %vm525_vm7 = vcmp.gt.f32.partialorder %v493_v26, 0.0  ;;  %v557_v33 = vmul.f32 0.2, %v493_v26  ;;  %v4033_v38 = vld [vmem:[%s5491_s2 + $0xd0] ss:$8 sps:$4 sm:$0xff]   ;;  %v456_v41 = vmul.f32 %v4304_v39, %v417_v31 }
  0x30   : > { %2060 = vmatmul.mubr.bf16.vlgmr.msra.gmra.mrb[0].mxu1 %v4122_v51  ;;  %1466 = vmatpush1.bf16.msra.mxu0 %v4017_v43  ;;  %620 = vst [vmem:[#allocation2 + $0x51] sm:$0xff] %v587_v28  ;;  %v4383_v40 = vsel %vm524_vm6, %v492_v23, %v556_v29  ;;  %v457_v43 = vmul.f32 %v4304_v39, %v418_v32  ;;  %v4034_v46 = vld [vmem:[%s5491_s2 + $0xe4] ss:$8 sps:$4 sm:$0xff]   ;;  %v4036_v60 = vld [vmem:[%s5491_s2 + $0xe0] ss:$8 sps:$4 sm:$0xff]   ;;  %v426_v22 = vld [vmem:[%s4288_s18 + $0x90] sm:$0xff] }
  0x31   : > { %1467 = vmatprep.subr.bf16.mxu0 %v4018_v44  ;;  %2067 = vmatprep.mubr.bf16.mxu1 %v963_v59  ;;  %v649_v16 = vld [vmem:[#allocation2 + $0x18] sm:$0xff]  ;;  %v650_v17 = vld [vmem:[#allocation2 + $0x20] sm:$0xff]  ;;  %v458_v44 = vmul.f32 %v4304_v39, %v419_v35  ;;  %v4388_v45 = vpack.c.bf16 %v587_v28, %v586_v25  ;;  %v4393_v47 = vsel %vm525_vm7, %v493_v26, %v557_v33  ;;  %v421_v55 = vld [vmem:[%s4288_s18 + $0x68] sm:$0xff] }
  0x32   : > { %3773 = vmatpush3.bf16.msra.mxu1 %v4029_v58  ;;  %v4360_v20 = vpack.c.bf16 %v650_v17, %v649_v16  ;;  %v651_v36 = vld [vmem:[#allocation2 + $0x30] sm:$0xff]  ;;  %621 = vst [vmem:[#allocation2 + $0x61] sm:$0xff] %v4383_v40  ;;  %v494_v48 = vadd.f32 %v4311_v42, %v455_v34  ;;  %622 = vst [vmem:[#allocation2 + $0x69] sm:$0xff] %v4393_v47  ;;  %v495_v50 = vadd.f32 %v4311_v42, %v456_v41  ;;  %v424_v11 = vld [vmem:[%s4288_s18 + $0x80] sm:$0xff] }
  0x33   : > { %v652_v37 = vld [vmem:[#allocation2 + $0x38] sm:$0xff]  ;;  %3774 = vmatprep.subr.bf16.mxu1 %v4043_v27  ;;  %v496_v51 = vadd.f32 %v4311_v42, %v457_v43  ;;  %v460_v58 = vmul.f32 %v4304_v39, %v421_v55  ;;  %v422_v59 = vld [vmem:[%s4288_s18 + $0x70] sm:$0xff]  ;;  %v425_v19 = vld [vmem:[%s4288_s18 + $0x88] sm:$0xff]  ;;  %v4461_v28 = vpack.c.bf16 %v4393_v47, %v4383_v40 }
  0x34   : > { %1468 = vmatpush1.bf16.msra.mxu0 %v4020_v52  ;;  %v4397_v49 = vpack.c.bf16 %v652_v37, %v651_v36  ;;  %v497_v52 = vadd.f32 %v4311_v42, %v458_v44  ;;  %vm526_vm8 = vcmp.gt.f32.partialorder %v494_v48, 0.0  ;;  %v558_v56 = vmul.f32 0.2, %v494_v48  ;;  %v4039_v16 = vld [vmem:[%s5491_s2 + $0xf0] ss:$8 sps:$4 sm:$0xff]   ;;  %v4055_v32 = vld [vmem:[%s5490_s1 + $0xa0] sm:$0xff]  }
  0x35   : > { %1469 = vmatprep.subr.bf16.mxu0 %v4021_v57  ;;  %v459_v57 = vmul.f32 %v4304_v39, %v420_v54  ;;  %vm527_vm9 = vcmp.gt.f32.partialorder %v495_v50, 0.0  ;;  %v559_v61 = vmul.f32 0.2, %v495_v50  ;;  %vm528_vm10 = vcmp.gt.f32.partialorder %v496_v51, 0.0  ;;  %v4042_v29 = vld [vmem:[%s5491_s2 + $0x104] ss:$8 sps:$4 sm:$0xff]  }
  0x36   : > { %3775 = vmatpush3.bf16.msra.mxu1 %v4043_v27  ;;  %vm529_vm11 = vcmp.gt.f32.partialorder %v497_v52, 0.0  ;;  %v4417_v63 = vsel %vm526_vm8, %v494_v48, %v558_v56  ;;  %v560_v0 = vmul.f32 0.2, %v496_v51  ;;  %v561_v1 = vmul.f32 0.2, %v497_v52  ;;  %v653_v4 = vld [vmem:[#allocation2 + $0x48] sm:$0xff] }
  0x37   : > { %3776 = vmatprep.subr.bf16.mxu1 %v4047_v53  ;;  %v498_v2 = vadd.f32 %v4311_v42, %v459_v57  ;;  %v654_v5 = vld [vmem:[#allocation2 + $0x50] sm:$0xff]  ;;  %v4425_v6 = vsel %vm527_vm9, %v495_v50, %v559_v61  ;;  %623 = vst [vmem:[#allocation2 + $0x79] sm:$0xff] %v4417_v63  ;;  %v499_v7 = vadd.f32 %v4311_v42, %v460_v58  ;;  %v427_v27 = vld [vmem:[%s4288_s18 + $0x98] sm:$0xff]  ;;  %v4040_v33 = vld [vmem:[%s5491_s2 + $0x100] ss:$8 sps:$4 sm:$0xff]  }
  0x38   : > { %1470 = vmatpush1.bf16.msra.mxu0 %v4023_v62  ;;  %2068 = vmatmul.mubr.bf16.gmra.mrb[4].mxu1 %v4360_v20  ;;  %v4037_v62 = vld [vmem:[%s5491_s2 + $0xf4] ss:$8 sps:$4 sm:$0xff]   ;;  %624 = vst [vmem:[#allocation2 + $0x81] sm:$0xff] %v4425_v6  ;;  %v4434_v10 = vsel %vm528_vm10, %v496_v51, %v560_v0  ;;  %v4438_v12 = vsel %vm529_vm11, %v497_v52, %v561_v1  ;;  %v428_v52 = vld [vmem:[%s4288_s18 + $0xa0] sm:$0xff]  ;;  %v4059_v57 = vld [vmem:[%s5490_s1 + $0xa8] sm:$0xff]  }
  0x39   : > { %1471 = vmatprep.subr.bf16.mxu0 %v4024_v3  ;;  %2075 = vmatprep.mubr.bf16.mxu1 %v4355_v13  ;;  %v4051_v3 = vld [vmem:[%s5490_s1 + $0x98] sm:$0xff]   ;;  %vm530_vm12 = vcmp.gt.f32.partialorder %v498_v2, 0.0  ;;  %625 = vst [vmem:[#allocation2 + $0x91] sm:$0xff] %v4434_v10  ;;  %vm531_vm13 = vcmp.gt.f32.partialorder %v499_v7, 0.0  ;;  %v562_v14 = vmul.f32 0.2, %v498_v2  ;;  %v4450_v23 = vpack.c.bf16 %v654_v5, %v653_v4 }
  0x3a   : > { %3777 = vmatpush3.bf16.msra.mxu1 %v4047_v53  ;;  %v563_v15 = vmul.f32 0.2, %v499_v7  ;;  %626 = vst [vmem:[#allocation2 + $0x99] sm:$0xff] %v4438_v12  ;;  %v464_v26 = vmul.f32 %v4304_v39, %v425_v19  ;;  %v465_v36 = vmul.f32 %v4304_v39, %v426_v22  ;;  %v466_v37 = vmul.f32 %v4304_v39, %v427_v27  ;;  %v655_v43 = vld [vmem:[#allocation2 + $0x60] sm:$0xff]  ;;  %v656_v44 = vld [vmem:[#allocation2 + $0x68] sm:$0xff]  ;;  %v430_v56 = vld [vmem:[%s4288_s18 + $0xb0] sm:$0xff] }
  0x3b   : > { %3778 = vmatprep.subr.bf16.mxu1 %v4051_v3  ;;  %v429_v53 = vld [vmem:[%s4288_s18 + $0xa8] sm:$0xff]  ;;  %v432_v61 = vld [vmem:[%s4288_s18 + $0xc0] sm:$0xff]  ;;  %v4044_v0 = vld [vmem:[%s5491_s2 + $0x110] ss:$8 sps:$4 sm:$0xff]  }
  0x3c   : > { %1472 = vmatpush1.bf16.msra.mxu0 %v4026_v8  ;;  %v423_v8 = vld [vmem:[%s4288_s18 + $0x78] sm:$0xff]  ;;  %v4455_v25 = vsel %vm531_vm13, %v499_v7, %v563_v15  ;;  %v503_v35 = vadd.f32 %v4311_v42, %v464_v26  ;;  %v504_v47 = vadd.f32 %v4311_v42, %v465_v36  ;;  %v505_v51 = vadd.f32 %v4311_v42, %v466_v37  ;;  %v4063_v27 = vld [vmem:[%s5490_s1 + $0xb0] sm:$0xff]  }
  0x3d   : > { %1473 = vmatprep.subr.bf16.mxu0 %v4027_v9  ;;  %v461_v9 = vmul.f32 %v4304_v39, %v422_v59  ;;  %v462_v17 = vmul.f32 %v4304_v39, %v423_v8  ;;  %628 = vst [vmem:[#allocation2 + $0xb1] sm:$0xff] %v4455_v25  ;;  %v468_v5 = vmul.f32 %v4304_v39, %v429_v53  ;;  %v433_v8 = vld [vmem:[%s4288_s18 + $0xc8] sm:$0xff]  ;;  %v4054_v19 = vld [vmem:[%s5491_s2 + $0x134] ss:$8 sps:$4 sm:$0xff]  }
  0x3e   : > { %3779 = vmatpush3.bf16.msra.mxu1 %v4051_v3  ;;  %vm535_vm1 = vcmp.gt.f32.partialorder %v503_v35, 0.0  ;;  %v567_v50 = vmul.f32 0.2, %v503_v35  ;;  %vm536_vm2 = vcmp.gt.f32.partialorder %v504_v47, 0.0  ;;  %v568_v55 = vmul.f32 0.2, %v504_v47 }
  0x3f   : > { %v500_v18 = vadd.f32 %v4311_v42, %v461_v9  ;;  %v501_v30 = vadd.f32 %v4311_v42, %v462_v17  ;;  %3780 = vmatprep.subr.bf16.mxu1 %v4055_v32  ;;  %vm537_vm3 = vcmp.gt.f32.partialorder %v505_v51, 0.0  ;;  %v569_v59 = vmul.f32 0.2, %v505_v51  ;;  %v435_v36 = vld [vmem:[%s4288_s18 + $0xd8] sm:$0xff] }
  0x40   : > { %1474 = vmatpush1.bf16.msra.mxu0 %v4030_v21  ;;  %2076 = vmatmul.mubr.bf16.gmra.mrb[8].mxu1 %v4397_v49  ;;  %v463_v21 = vmul.f32 %v4304_v39, %v424_v11  ;;  %v4502_v58 = vsel %vm535_vm1, %v503_v35, %v567_v50  ;;  %v4518_v1 = vsel %vm536_vm2, %v504_v47, %v568_v55  ;;  %v4064_v47 = vld [vmem:[%s5490_s1 + $0xb8] sm:$0xff]   ;;  %v437_v55 = vld [vmem:[%s4288_s18 + $0xe8] sm:$0xff] }
  0x41   : > { %1475 = vmatprep.subr.bf16.mxu0 %v4031_v24  ;;  %2083 = vmatprep.mubr.bf16.mxu1 %v4388_v45  ;;  %v4453_v24 = vsel %vm530_vm12, %v498_v2, %v562_v14  ;;  %vm532_vm14 = vcmp.gt.f32.partialorder %v500_v18, 0.0  ;;  %v564_v31 = vmul.f32 0.2, %v500_v18  ;;  %vm533_vm15 = vcmp.gt.f32.partialorder %v501_v30, 0.0  ;;  %632 = vst [vmem:[#allocation2 + $0xe1] sm:$0xff] %v4502_v58  ;;  %633 = vst [vmem:[#allocation2 + $0xf1] sm:$0xff] %v4518_v1 }
  0x42   : > { %627 = vst [vmem:[#allocation2 + $0xa9] sm:$0xff] %v4453_v24  ;;  %v502_v34 = vadd.f32 %v4311_v42, %v463_v21  ;;  %v565_v40 = vmul.f32 0.2, %v501_v30  ;;  %3781 = vmatpush3.bf16.msra.mxu1 %v4055_v32  ;;  %v467_v2 = vmul.f32 %v4304_v39, %v428_v52  ;;  %v4523_v3 = vpack.c.bf16 %v4425_v6, %v4417_v63  ;;  %v434_v6 = vld [vmem:[%s4288_s18 + $0xd0] sm:$0xff]  ;;  %v4048_v14 = vld [vmem:[%s5491_s2 + $0x120] ss:$8 sps:$4 sm:$0xff]  }
  0x43   : > { %v4482_v41 = vsel %vm532_vm14, %v500_v18, %v564_v31  ;;  %v4525_v4 = vsel %vm537_vm3, %v505_v51, %v569_v59  ;;  %v469_v7 = vmul.f32 %v4304_v39, %v430_v56  ;;  %3782 = vmatprep.subr.bf16.mxu1 %v4059_v57  ;;  %v471_v63 = vmul.f32 %v4304_v39, %v432_v61 }
  0x44   : > { %1476 = vmatpush1.bf16.msra.mxu0 %v4033_v38  ;;  %v4046_v38 = vld [vmem:[%s5491_s2 + $0x114] ss:$8 sps:$4 sm:$0xff]   ;;  %629 = vst [vmem:[#allocation2 + $0xc1] sm:$0xff] %v4482_v41  ;;  %vm534_vm0 = vcmp.gt.f32.partialorder %v502_v34, 0.0  ;;  %v4488_v48 = vsel %vm533_vm15, %v501_v30, %v565_v40  ;;  %634 = vst [vmem:[#allocation2 + $0xf9] sm:$0xff] %v4525_v4  ;;  %v506_v9 = vadd.f32 %v4311_v42, %v467_v2  ;;  %v658_v30 = vld [vmem:[#allocation2 + $0x80] sm:$0xff] }
  0x45   : > { %1477 = vmatprep.subr.bf16.mxu0 %v4034_v46  ;;  %v566_v46 = vmul.f32 0.2, %v502_v34  ;;  %630 = vst [vmem:[#allocation2 + $0xc9] sm:$0xff] %v4488_v48  ;;  %v507_v15 = vadd.f32 %v4311_v42, %v468_v5  ;;  %v472_v17 = vmul.f32 %v4304_v39, %v433_v8  ;;  %v473_v18 = vmul.f32 %v4304_v39, %v434_v6 }
  0x46   : > { %3783 = vmatpush3.bf16.msra.mxu1 %v4059_v57  ;;  %vm538_vm4 = vcmp.gt.f32.partialorder %v506_v9, 0.0  ;;  %v570_v21 = vmul.f32 0.2, %v506_v9  ;;  %v510_v26 = vadd.f32 %v4311_v42, %v471_v63  ;;  %v4563_v37 = vpack.c.bf16 %v4438_v12, %v4434_v10 }
  0x47   : > { %v4494_v54 = vsel %vm534_vm0, %v502_v34, %v566_v46  ;;  %vm539_vm5 = vcmp.gt.f32.partialorder %v507_v15, 0.0  ;;  %v571_v31 = vmul.f32 0.2, %v507_v15  ;;  %v511_v32 = vadd.f32 %v4311_v42, %v472_v17  ;;  %3784 = vmatprep.subr.bf16.mxu1 %v4063_v27 }
  0x48   : > { %1478 = vmatpush1.bf16.msra.mxu0 %v4036_v60  ;;  %2084 = vmatmul.mubr.bf16.gmra.mrb[12].mxu1 %v4450_v23  ;;  %631 = vst [vmem:[#allocation2 + $0xd9] sm:$0xff] %v4494_v54  ;;  %v431_v60 = vld [vmem:[%s4288_s18 + $0xb8] sm:$0xff]  ;;  %v4557_v34 = vsel %vm538_vm4, %v506_v9, %v570_v21  ;;  %vm542_vm8 = vcmp.gt.f32.partialorder %v510_v26, 0.0  ;;  %v574_v12 = vmul.f32 0.2, %v510_v26  ;;  %v474_v52 = vmul.f32 %v4304_v39, %v435_v36 }
  0x49   : > { %1479 = vmatprep.subr.bf16.mxu0 %v4037_v62  ;;  %2091 = vmatprep.mubr.bf16.mxu1 %v4461_v28  ;;  %v4507_v62 = vpack.c.bf16 %v656_v44, %v655_v43  ;;  %v470_v11 = vmul.f32 %v4304_v39, %v431_v60  ;;  %635 = vst [vmem:[#allocation2 + $0x109] sm:$0xff] %v4557_v34  ;;  %v4058_v43 = vld [vmem:[%s5491_s2 + $0x144] ss:$8 sps:$4 sm:$0xff]   ;;  %vm543_vm9 = vcmp.gt.f32.partialorder %v511_v32, 0.0  ;;  %v575_v51 = vmul.f32 0.2, %v511_v32 }
  0x4a   : > { %3785 = vmatpush3.bf16.msra.mxu1 %v4063_v27  ;;  %v436_v44 = vld [vmem:[%s4288_s18 + $0xe0] sm:$0xff]  ;;  %v512_v53 = vadd.f32 %v4311_v42, %v473_v18  ;;  %v4591_v56 = vsel %vm542_vm8, %v510_v26, %v574_v12  ;;  %v513_v60 = vadd.f32 %v4311_v42, %v474_v52  ;;  %v476_v2 = vmul.f32 %v4304_v39, %v437_v55  ;;  %v661_v26 = vld [vmem:[#allocation2 + $0xa8] sm:$0xff]  ;;  %v662_v27 = vld [vmem:[#allocation2 + $0xb0] sm:$0xff] }
  0x4b   : > { %v509_v22 = vadd.f32 %v4311_v42, %v470_v11  ;;  %v475_v57 = vmul.f32 %v4304_v39, %v436_v44  ;;  %3786 = vmatprep.subr.bf16.mxu1 %v4064_v47  ;;  %v4594_v59 = vsel %vm543_vm9, %v511_v32, %v575_v51  ;;  %639 = vst [vmem:[#allocation2 + $0x139] sm:$0xff] %v4591_v56  ;;  %v4062_v11 = vld [vmem:[%s5491_s2 + $0x154] ss:$8 sps:$4 sm:$0xff]   ;;  %v4067_v21 = vld [vmem:[%s5491_s2 + $0x164] ss:$8 sps:$4 sm:$0xff]   ;;  %vm3217_vm0 = vcmask 516096  }
  0x4c   : > { %1480 = vmatpush1.bf16.msra.mxu0 %v4039_v16  ;;  %v508_v16 = vadd.f32 %v4311_v42, %v469_v7  ;;  %vm544_vm10 = vcmp.gt.f32.partialorder %v512_v53, 0.0  ;;  %v576_v61 = vmul.f32 0.2, %v512_v53  ;;  %640 = vst [vmem:[#allocation2 + $0x141] sm:$0xff] %v4594_v59  ;;  %v660_v7 = vld [vmem:[#allocation2 + $0x98] sm:$0xff]  ;;  %vm545_vm11 = vcmp.gt.f32.partialorder %v513_v60, 0.0 }
  0x4d   : > { %1642 = vmatprep.subr.bf16.mxu0 %v4042_v29  ;;  %v657_v29 = vld [vmem:[#allocation2 + $0x78] sm:$0xff]  ;;  %vm541_vm7 = vcmp.gt.f32.partialorder %v509_v22, 0.0  ;;  %v573_v40 = vmul.f32 0.2, %v509_v22  ;;  %v514_v5 = vadd.f32 %v4311_v42, %v475_v57  ;;  %v577_v8 = vmul.f32 0.2, %v513_v60 }
  0x4e   : > { %vm540_vm6 = vcmp.gt.f32.partialorder %v508_v16, 0.0  ;;  %v572_v35 = vmul.f32 0.2, %v508_v16  ;;  %v4572_v46 = vpack.c.bf16 %v658_v30, %v657_v29  ;;  %3787 = vmatpush3.bf16.msra.mxu1 %v4064_v47  ;;  %v4606_v9 = vsel %vm544_vm10, %v512_v53, %v576_v61  ;;  %v4070_v30 = vld [vmem:[%s5491_s2 + $0x174] ss:$8 sps:$4 sm:$0xff]   ;;  %v663_v47 = vld [vmem:[#allocation2 + $0xc0] sm:$0xff] }
  0x4f   : > { %1482 = vmatmul.mubr.bf16.vlgmr.msra.gmra.mrb[0].mxu0 %v4360_v20  ;;  %v4050_v20 = vld [vmem:[%s5491_s2 + $0x124] ss:$8 sps:$4 sm:$0xff]   ;;  %v4583_v50 = vsel %vm541_vm7, %v509_v22, %v573_v40  ;;  %641 = vst [vmem:[#allocation2 + $0x151] sm:$0xff] %v4606_v9  ;;  %v515_v63 = vadd.f32 %v4311_v42, %v476_v2  ;;  %vm546_vm12 = vcmp.gt.f32.partialorder %v514_v5, 0.0  ;;  %v578_v6 = vmul.f32 0.2, %v514_v5 }
  0x50   : > { %1643 = vmatpush1.bf16.msra.mxu0 %v4040_v33  ;;  %1491 = vmatprep.mubr.bf16.mxu0 %v4355_v13  ;;  %v4052_v33 = vld [vmem:[%s5491_s2 + $0x130] ss:$8 sps:$4 sm:$0xff]   ;;  %v4577_v10 = vsel %vm540_vm6, %v508_v16, %v572_v35  ;;  %638 = vst [vmem:[#allocation2 + $0x129] sm:$0xff] %v4583_v50  ;;  %v4625_v18 = vpack.c.bf16 %v4455_v25, %v4453_v24  ;;  %v4071_v24 = vld [vmem:[%s5492_s3 + $0x40] sm:$0xff]   ;;  %v664_v52 = vld [vmem:[#allocation2 + $0xc8] sm:$0xff] }
  0x51   : > { %1644 = vmatprep.subr.bf16.mxu0 %v4046_v38  ;;  %2092 = vmatmul.mubr.bf16.gmra.mrb[16].mxu1 %v4507_v62  ;;  %v4565_v38 = vsel %vm539_vm5, %v507_v15, %v571_v31  ;;  %637 = vst [vmem:[#allocation2 + $0x121] sm:$0xff] %v4577_v10  ;;  %v4060_v16 = vld [vmem:[%s5491_s2 + $0x150] ss:$8 sps:$4 sm:$0xff]   ;;  %vm547_vm13 = vcmp.gt.f32.partialorder %v515_v63, 0.0  ;;  %v579_v17 = vmul.f32 0.2, %v515_v63  ;;  %v4648_v36 = vpack.c.bf16 %v662_v27, %v661_v26 }
  0x52   : > { %2099 = vmatprep.mubr.bf16.mxu1 %v4523_v3  ;;  %636 = vst [vmem:[#allocation2 + $0x111] sm:$0xff] %v4565_v38  ;;  %v4065_v25 = vld [vmem:[%s5491_s2 + $0x160] ss:$8 sps:$4 sm:$0xff]   ;;  %v438_v31 = vld [vmem:[%s4288_s18 + $0xf0] sm:$0xff]  ;;  %v439_v32 = vld [vmem:[%s4288_s18 + $0xf8] sm:$0xff]  ;;  %3636 = vmatprep.subr.bf16.mxu1 %v4071_v24  ;;  %v4658_v12 = vpack.c.bf16 %v4488_v48, %v4482_v41  ;;  %v4671_v48 = vpack.c.bf16 %v664_v52, %v663_v47  ;;  %s4124_s18 = smov 64  }
  0x53   : > { %v611_v22 = vsel %vm547_vm13, %v515_v63, %v579_v17  ;;  %v478_v35 = vmul.f32 %v4304_v39, %v439_v32  ;;  %v4068_v40 = vld [vmem:[%s5491_s2 + $0x170] ss:$8 sps:$4 sm:$0xff]   ;;  %v4676_v57 = vpack.c.bf16 %v4502_v58, %v4494_v54  ;;  %v666_v61 = vld [vmem:[#allocation2 + $0xe0] sm:$0xff]  ;;  %v4716_v63 = vpack.c.bf16 %v4594_v59, %v4591_v56 }
  0x54   : > { %1645 = vmatpush1.bf16.msra.mxu0 %v4044_v0  ;;  %v659_v0 = vld [vmem:[#allocation2 + $0x90] sm:$0xff]  ;;  %644 = vst [vmem:[#allocation2 + $0x171] sm:$0xff] %v611_v22  ;;  %v668_v58 = vld [vmem:[#allocation2 + $0xf8] sm:$0xff]  ;;  %v794_v24 = vld [vmem:[#allocation2 + $0x22] sm:$0xff] }
  0x55   : > { %1646 = vmatprep.subr.bf16.mxu0 %v4050_v20  ;;  %v4056_v20 = vld [vmem:[%s5491_s2 + $0x140] ss:$8 sps:$4 sm:$0xff]   ;;  %v4616_v15 = vpack.c.bf16 %v660_v7, %v659_v0  ;;  %v517_v44 = vadd.f32 %v4311_v42, %v478_v35  ;;  %v667_v54 = vld [vmem:[#allocation2 + $0xf0] sm:$0xff] }
  0x56   : > { %v4691_v2 = vpack.c.bf16 %v668_v58, %v667_v54  ;;  %v675_v56 = vld [vmem:[#allocation2 + $0x150] sm:$0xff]  ;;  %v793_v27 = vld [vmem:[#allocation2 + $0x1a] sm:$0xff]  ;;  %v4073_v35 = vld [vmem:[%s5492_s3 + $0x48] sm:$0xff]  }
  0x57   : > { %1492 = vmatmul.mubr.bf16.gmra.mrb[4].mxu0 %v4397_v49  ;;  %vm549_vm15 = vcmp.gt.f32.partialorder %v517_v44, 0.0  ;;  %v581_v51 = vmul.f32 0.2, %v517_v44  ;;  %v800_v47 = vld [vmem:[#allocation2 + $0x6a] sm:$0xff]  ;;  %v802_v54 = vld [vmem:[#allocation2 + $0x82] sm:$0xff]  ;;  %v4079_v58 = vld [vmem:[%s5492_s3 + $0x18] sm:$0xff]  }
  0x58   : > { %1501 = vmatprep.mubr.bf16.mxu0 %v4388_v45  ;;  %1647 = vmatpush1.bf16.msra.mxu0 %v4048_v14  ;;  %v4614_v14 = vsel %vm545_vm11, %v513_v60, %v577_v8  ;;  %v665_v60 = vld [vmem:[#allocation2 + $0xd8] sm:$0xff]  ;;  %v4706_v8 = vpack.c.bf16 %v4583_v50, %v4577_v10  ;;  %v674_v50 = vld [vmem:[#allocation2 + $0x140] sm:$0xff] }
  0x59   : > { %1648 = vmatprep.subr.bf16.mxu0 %v4054_v19  ;;  %2100 = vmatmul.mubr.bf16.gmra.mrb[20].mxu1 %v4572_v46  ;;  %642 = vst [vmem:[#allocation2 + $0x159] sm:$0xff] %v4614_v14  ;;  %v610_v19 = vsel %vm546_vm12, %v514_v5, %v578_v6  ;;  %v613_v55 = vsel %vm549_vm15, %v517_v44, %v581_v51  ;;  %v673_v10 = vld [vmem:[#allocation2 + $0x138] sm:$0xff]  ;;  %v4074_v44 = vld [vmem:[%s5492_s3 + $0x8] sm:$0xff]   ;;  %v4075_v51 = vld [vmem:[%s5492_s3 + $0x50] sm:$0xff]  }
  0x5a   : > { %2107 = vmatprep.mubr.bf16.mxu1 %v4563_v37  ;;  %643 = vst [vmem:[#allocation2 + $0x169] sm:$0xff] %v610_v19  ;;  %v4630_v29 = vpack.c.bf16 %v611_v22, %v610_v19  ;;  %646 = vst [vmem:[#allocation2 + $0x189] sm:$0xff] %v613_v55  ;;  %v4681_v0 = vpack.c.bf16 %v666_v61, %v665_v60  ;;  %v4696_v5 = vpack.c.bf16 %v4565_v38, %v4557_v34  ;;  %v671_v34 = vld [vmem:[#allocation2 + $0x120] sm:$0xff]  ;;  %v672_v38 = vld [vmem:[#allocation2 + $0x128] sm:$0xff] }
  0x5b   : > { %v4721_v6 = vpack.c.bf16 %v674_v50, %v673_v10  ;;  %v4078_v60 = vld [vmem:[%s5492_s3 + $0x58] sm:$0xff]  }
  0x5c   : > { %1649 = vmatpush1.bf16.msra.mxu0 %v4052_v33  ;;  %v477_v33 = vmul.f32 %v4304_v39, %v438_v31  ;;  %v4742_v31 = vpack.c.bf16 %v794_v24, %v793_v27  ;;  %v801_v61 = vld [vmem:[#allocation2 + $0x7a] sm:$0xff]  ;;  %v807_v27 = vld [vmem:[#allocation2 + $0xc2] sm:$0xff]  ;;  %v808_v24 = vld [vmem:[#allocation2 + $0xca] sm:$0xff] }
  0x5d   : > { %1650 = vmatprep.subr.bf16.mxu0 %v4058_v43 }
  0x5e   : > { %v516_v43 = vadd.f32 %v4311_v42, %v477_v33  ;;  %v4665_v42 = vld [vmem:[%s5492_s3 + $0x80] sm:$0xff]  }
  0x5f   : > { %1502 = vmatmul.mubr.bf16.gmra.mrb[8].mxu0 %v4450_v23  ;;  %v4072_v33 = vld [vmem:[%s5492_s3] sm:$0xff]  }
  0x60   : > { %1511 = vmatprep.mubr.bf16.mxu0 %v4461_v28  ;;  %1651 = vmatpush1.bf16.msra.mxu0 %v4056_v20  ;;  %vm548_vm14 = vcmp.gt.f32.partialorder %v516_v43, 0.0  ;;  %v580_v39 = vmul.f32 0.2, %v516_v43  ;;  %v4686_v20 = vpack.c.bf16 %v4525_v4, %v4518_v1  ;;  %v669_v1 = vld [vmem:[#allocation2 + $0x108] sm:$0xff]  ;;  %v670_v4 = vld [vmem:[#allocation2 + $0x110] sm:$0xff]  ;;  %v676_v59 = vld [vmem:[#allocation2 + $0x158] sm:$0xff] }
  0x61   : > { %1652 = vmatprep.subr.bf16.mxu0 %v4062_v11  ;;  %2108 = vmatmul.mubr.bf16.gmra.mrb[24].mxu1 %v4616_v15  ;;  %v4701_v7 = vpack.c.bf16 %v670_v4, %v669_v1  ;;  %v4711_v11 = vpack.c.bf16 %v672_v38, %v671_v34  ;;  %v4731_v17 = vpack.c.bf16 %v676_v59, %v675_v56  ;;  %v677_v19 = vld [vmem:[#allocation2 + $0x168] sm:$0xff]  ;;  %v803_v1 = vld [vmem:[#allocation2 + $0x92] sm:$0xff]  ;;  %v804_v4 = vld [vmem:[#allocation2 + $0x9a] sm:$0xff] }
  0x62   : > { %2115 = vmatprep.mubr.bf16.mxu1 %v4625_v18  ;;  %v612_v53 = vsel %vm548_vm14, %v516_v43, %v580_v39  ;;  %v798_v43 = vld [vmem:[#allocation2 + $0x52] sm:$0xff]  ;;  %v799_v39 = vld [vmem:[#allocation2 + $0x62] sm:$0xff]  ;;  %v4782_v38 = vpack.c.bf16 %v802_v54, %v801_v61  ;;  %v4785_v56 = vpack.c.bf16 %v804_v4, %v803_v1 }
  0x63   : > { %645 = vst [vmem:[#allocation2 + $0x181] sm:$0xff] %v612_v53  ;;  %v4667_v41 = vpack.c.bf16 %v613_v55, %v612_v53  ;;  %v4765_v53 = vpack.c.bf16 %v800_v47, %v799_v39  ;;  %v4077_v55 = vld [vmem:[%s5492_s3 + $0x10] sm:$0xff]   ;;  %v4080_v34 = vld [vmem:[%s5492_s3 + $0x60] sm:$0xff]   ;;  %v4820_v47 = vld [vmem:[%s5492_s3 + $0x88] sm:$0xff]  }
  0x64   : > { %1653 = vmatpush1.bf16.msra.mxu0 %v4060_v16  ;;  %v4726_v16 = vpack.c.bf16 %v4614_v14, %v4606_v9  ;;  %v791_v9 = vld [vmem:[#allocation2 + $0x2] sm:$0xff]  ;;  %v792_v14 = vld [vmem:[#allocation2 + $0xa] sm:$0xff]  ;;  %v814_v1 = vld [vmem:[#allocation2 + $0x112] sm:$0xff] }
  0x65   : > { %1654 = vmatprep.subr.bf16.mxu0 %v4067_v21  ;;  %v678_v21 = vld [vmem:[#allocation2 + $0x170] sm:$0xff]  ;;  %v961_v26 = vpack.c.bf16 %v792_v14, %v791_v9  ;;  %v4082_v59 = vld [vmem:[%s5492_s3 + $0x20] sm:$0xff]   ;;  %v4090_v4 = vld [vmem:[%s5492_s3 + $0x98] sm:$0xff]  }
  0x66   : > { %v4737_v22 = vpack.c.bf16 %v678_v21, %v677_v19  ;;  %v4083_v19 = vld [vmem:[%s5492_s3 + $0x68] sm:$0xff]   ;;  %v806_v14 = vld [vmem:[#allocation2 + $0xb2] sm:$0xff] }
  0x67   : > { %1512 = vmatmul.mubr.bf16.gmra.mrb[12].mxu0 %v4507_v62  ;;  %v805_v9 = vld [vmem:[#allocation2 + $0xaa] sm:$0xff]  ;;  %v810_v39 = vld [vmem:[#allocation2 + $0xe2] sm:$0xff] }
  0x68   : > { %1521 = vmatprep.mubr.bf16.mxu0 %v4523_v3  ;;  %1655 = vmatpush1.bf16.msra.mxu0 %v4065_v25  ;;  %v795_v25 = vld [vmem:[#allocation2 + $0x32] sm:$0xff] }
  0x69   : > { %1656 = vmatprep.subr.bf16.mxu0 %v4070_v30  ;;  %2116 = vmatmul.mubr.bf16.gmra.mrb[28].mxu1 %v4648_v36  ;;  %v796_v30 = vld [vmem:[#allocation2 + $0x3a] sm:$0xff] }
  0x6a   : > { %2123 = vmatprep.mubr.bf16.mxu1 %v4658_v12  ;;  %v4745_v32 = vpack.c.bf16 %v796_v30, %v795_v25  ;;  %v679_v10 = vld [vmem:[#allocation2 + $0x180] sm:$0xff]  ;;  %v680_v50 = vld [vmem:[#allocation2 + $0x188] sm:$0xff]  ;;  %v4085_v25 = vld [vmem:[%s5492_s3 + $0x70] sm:$0xff]   ;;  %v4804_v30 = vpack.c.bf16 %v806_v14, %v805_v9 }
  0x6b   : > { %v4793_v21 = vpack.c.bf16 %v680_v50, %v679_v10  ;;  %v816_v10 = vld [vmem:[#allocation2 + $0x12a] sm:$0xff]  ;;  %v817_v9 = vld [vmem:[#allocation2 + $0x13a] sm:$0xff]  ;;  %v818_v14 = vld [vmem:[#allocation2 + $0x142] sm:$0xff] }
  0x6c   : > { %1657 = vmatpush1.bf16.msra.mxu0 %v4068_v40  ;;  %v797_v40 = vld [vmem:[#allocation2 + $0x4a] sm:$0xff] }
  0x6d   : > { %3820 = vmatprep.subr.bf16.mxu0 %v4665_v42  ;;  %v4762_v52 = vpack.c.bf16 %v798_v43, %v797_v40  ;;  %v4086_v40 = vld [vmem:[%s5492_s3 + $0x30] sm:$0xff]   ;;  %v4087_v43 = vld [vmem:[%s5492_s3 + $0x78] sm:$0xff]  }
  0x6f   : > { %1522 = vmatmul.mubr.bf16.gmra.mrb[16].mxu0 %v4572_v46 }
  0x70   : > { %1531 = vmatprep.mubr.bf16.mxu0 %v4563_v37 }
  0x71   : > { %2124 = vmatmul.mubr.bf16.gmra.mrb[32].mxu1 %v4671_v48 }
  0x72   : > { %2131 = vmatprep.mubr.bf16.mxu1 %v4676_v57 }
  0x77   : > { %1532 = vmatmul.mubr.bf16.gmra.mrb[20].mxu0 %v4616_v15 }
  0x78   : > { %1541 = vmatprep.mubr.bf16.mxu0 %v4625_v18 }
  0x79   : > { %2132 = vmatmul.mubr.bf16.gmra.mrb[36].mxu1 %v4681_v0 }
  0x7a   : > { %2139 = vmatprep.mubr.bf16.mxu1 %v4686_v20 }
  0x7f   : > { %1542 = vmatmul.mubr.bf16.gmra.mrb[24].mxu0 %v4648_v36 }
  0x80   : > { %1551 = vmatprep.mubr.bf16.mxu0 %v4658_v12 }
  0x81   : > { %2140 = vmatmul.mubr.bf16.gmra.mrb[40].mxu1 %v4691_v2 }
  0x82   : > { %2147 = vmatprep.mubr.bf16.mxu1 %v4696_v5 }
  0x87   : > { %1552 = vmatmul.mubr.bf16.gmra.mrb[28].mxu0 %v4671_v48 }
  0x88   : > { %1561 = vmatprep.mubr.bf16.mxu0 %v4676_v57 }
  0x89   : > { %2148 = vmatmul.mubr.bf16.gmra.mrb[44].mxu1 %v4701_v7 }
  0x8a   : > { %2155 = vmatprep.mubr.bf16.mxu1 %v4706_v8 }
  0x8f   : > { %1562 = vmatmul.mubr.bf16.gmra.mrb[32].mxu0 %v4681_v0 }
  0x90   : > { %1571 = vmatprep.mubr.bf16.mxu0 %v4686_v20 }
  0x91   : > { %2156 = vmatmul.mubr.bf16.gmra.mrb[48].mxu1 %v4711_v11 }
  0x92   : > { %2163 = vmatprep.mubr.bf16.mxu1 %v4716_v63 }
  0x97   : > { %1572 = vmatmul.mubr.bf16.gmra.mrb[36].mxu0 %v4691_v2 }
  0x98   : > { %1581 = vmatprep.mubr.bf16.mxu0 %v4696_v5 }
  0x99   : > { %2164 = vmatmul.mubr.bf16.gmra.mrb[52].mxu1 %v4721_v6 }
  0x9a   : > { %2171 = vmatprep.mubr.bf16.mxu1 %v4726_v16 }
  0x9f   : > { %1582 = vmatmul.mubr.bf16.gmra.mrb[40].mxu0 %v4701_v7 }
  0xa0   : > { %1591 = vmatprep.mubr.bf16.mxu0 %v4706_v8 }
  0xa1   : > { %2172 = vmatmul.mubr.bf16.gmra.mrb[56].mxu1 %v4731_v17 }
  0xa2   : > { %2179 = vmatprep.mubr.bf16.mxu1 %v4630_v29 }
  0xa7   : > { %1592 = vmatmul.mubr.bf16.gmra.mrb[44].mxu0 %v4711_v11 }
  0xa8   : > { %1601 = vmatprep.mubr.bf16.mxu0 %v4716_v63 }
  0xa9   : > { %2180 = vmatmul.mubr.bf16.gmra.mrb[60].mxu1 %v4737_v22 }
  0xaa   : > { %3788 = vmatprep.mubr.bf16.mxu1 %v961_v26  ;;  %v4084_v26 = vld [vmem:[%s5492_s3 + $0x28] sm:$0xff]  }
  0xaf   : > { %1602 = vmatmul.mubr.bf16.gmra.mrb[48].mxu0 %v4721_v6 }
  0xb0   : > { %1611 = vmatprep.mubr.bf16.mxu0 %v4726_v16 }
  0xb1   : > { %3789 = vmatmul.mubr.bf16.vlgmr.msra.gmra.mrb[64].mxu1 %v4742_v31 }
  0xb2   : > { %3792 = vmatprep.mubr.bf16.mxu1 %v4745_v32  ;;  %3637 = vmatpush3.bf16.msra.mxu1 %v4072_v33  ;;  %v4123_v33 = vmov 0  }
  0xb3   : > { %3638 = vmatprep.subr.bf16.mxu1 %v4073_v35  ;;  %v4807_v35 = vpack.c.bf16 %v808_v24, %v807_v27  ;;  %v819_v27 = vld [vmem:[#allocation2 + $0x152] sm:$0xff]  ;;  %v820_v24 = vld [vmem:[#allocation2 + $0x15a] sm:$0xff] }
  0xb6   : > { %3639 = vmatpush3.bf16.msra.mxu1 %v4074_v44  ;;  %v809_v44 = vld [vmem:[#allocation2 + $0xda] sm:$0xff] }
  0xb7   : > { %1612 = vmatmul.mubr.bf16.gmra.mrb[52].mxu0 %v4731_v17  ;;  %3640 = vmatprep.subr.bf16.mxu1 %v4075_v51  ;;  %v4088_v51 = vld [vmem:[%s5492_s3 + $0x38] sm:$0xff]   ;;  %v4826_v61 = vpack.c.bf16 %v810_v39, %v809_v44  ;;  %v821_v44 = vld [vmem:[#allocation2 + $0x16a] sm:$0xff] }
  0xb8   : > { %1621 = vmatprep.mubr.bf16.mxu0 %v4630_v29  ;;  %v822_v39 = vld [vmem:[#allocation2 + $0x172] sm:$0xff] }
  0xb9   : > { %3793 = vmatmul.mubr.bf16.gmra.mrb[68].mxu1 %v4762_v52 }
  0xba   : > { %3796 = vmatprep.mubr.bf16.mxu1 %v4765_v53  ;;  %3641 = vmatpush3.bf16.msra.mxu1 %v4077_v55  ;;  %v811_v55 = vld [vmem:[#allocation2 + $0xf2] sm:$0xff] }
  0xbb   : > { %3642 = vmatprep.subr.bf16.mxu1 %v4078_v60  ;;  %v812_v60 = vld [vmem:[#allocation2 + $0xfa] sm:$0xff] }
  0xbc   : > { %v4830_v54 = vpack.c.bf16 %v812_v60, %v811_v55  ;;  %v4872_v55 = vpack.c.bf16 %v822_v39, %v821_v44 }
  0xbe   : > { %3643 = vmatpush3.bf16.msra.mxu1 %v4079_v58  ;;  %v4089_v58 = vld [vmem:[%s5492_s3 + $0x90] sm:$0xff]  }
  0xbf   : > { %1622 = vmatmul.mubr.bf16.gmra.mrb[56].mxu0 %v4737_v22  ;;  %3644 = vmatprep.subr.bf16.mxu1 %v4080_v34  ;;  %v815_v34 = vld [vmem:[#allocation2 + $0x122] sm:$0xff] }
  0xc0   : > { %1631 = vmatprep.mubr.bf16.mxu0 %v4667_v41 }
  0xc1   : > { %3797 = vmatmul.mubr.bf16.gmra.mrb[72].mxu1 %v4782_v38 }
  0xc2   : > { %3800 = vmatprep.mubr.bf16.mxu1 %v4785_v56  ;;  %3645 = vmatpush3.bf16.msra.mxu1 %v4082_v59  ;;  %v4847_v59 = vpack.c.bf16 %v816_v10, %v815_v34 }
  0xc3   : > { %3646 = vmatprep.subr.bf16.mxu1 %v4083_v19  ;;  %v4091_v19 = vld [vmem:[%s5492_s3 + $0xa0] sm:$0xff]  }
  0xc6   : > { %3647 = vmatpush3.bf16.msra.mxu1 %v4084_v26  ;;  %v4092_v26 = vld [vmem:[%s5492_s3 + $0xa8] sm:$0xff]  }
  0xc7   : > { %1632 = vmatmul.mubr.bf16.gmra.mrb[60].mxu0 %v4793_v21  ;;  %3648 = vmatprep.subr.bf16.mxu1 %v4085_v25  ;;  %v4858_v25 = vpack.c.bf16 %v818_v14, %v817_v9 }
  0xc8   : > { %1674 = vmatprep.mubr.bf16.mxu0 %v4123_v33 }
  0xc9   : > { %3801 = vmatmul.mubr.bf16.gmra.mrb[76].mxu1 %v4804_v30 }
  0xca   : > { %3804 = vmatprep.mubr.bf16.mxu1 %v4807_v35  ;;  %3649 = vmatpush3.bf16.msra.mxu1 %v4086_v40  ;;  %v4861_v40 = vpack.c.bf16 %v820_v24, %v819_v27 }
  0xcb   : > { %3650 = vmatprep.subr.bf16.mxu1 %v4087_v43  ;;  %v4093_v43 = vld [vmem:[%s5492_s3 + $0xb0] sm:$0xff]  }
  0xce   : > { %3651 = vmatpush3.bf16.msra.mxu1 %v4088_v51  ;;  %v4094_v51 = vld [vmem:[%s5492_s3 + $0xb8] sm:$0xff]  }
  0xcf   : > { %1675 = vmatmul.mubr.bf16.vlgmr.msra.gmra.mrb[0].mxu0 %v4742_v31  ;;  %3868 = vmatprep.subr.bf16.mxu1 %v4665_v42  ;;  %v813_v31 = vld [vmem:[#allocation2 + $0x10a] sm:$0xff] }
  0xd0   : > { %3821 = vmatpush3.bf16.msra.mxu0 %v4665_v42  ;;  %1684 = vmatprep.mubr.bf16.mxu0 %v4123_v33  ;;  %v4844_v50 = vpack.c.bf16 %v814_v1, %v813_v31 }
  0xd1   : > { %3822 = vmatprep.subr.bf16.mxu0 %v4820_v47  ;;  %3805 = vmatmul.mubr.bf16.gmra.mrb[80].mxu1 %v4826_v61 }
  0xd2   : > { %3808 = vmatprep.mubr.bf16.mxu1 %v4830_v54 }
  0xd4   : > { %3823 = vmatpush3.bf16.msra.mxu0 %v4820_v47 }
  0xd5   : > { %3824 = vmatprep.subr.bf16.mxu0 %v4089_v58 }
  0xd7   : > { %1685 = vmatmul.mubr.bf16.gmra.mrb[4].mxu0 %v4745_v32 }
  0xd8   : > { %1694 = vmatprep.mubr.bf16.mxu0 %v4123_v33  ;;  %3825 = vmatpush3.bf16.msra.mxu0 %v4089_v58 }
  0xd9   : > { %3826 = vmatprep.subr.bf16.mxu0 %v4090_v4  ;;  %3809 = vmatmul.mubr.bf16.gmra.mrb[84].mxu1 %v4844_v50 }
  0xda   : > { %3812 = vmatprep.mubr.bf16.mxu1 %v4847_v59 }
  0xdc   : > { %3827 = vmatpush3.bf16.msra.mxu0 %v4090_v4 }
  0xdd   : > { %3828 = vmatprep.subr.bf16.mxu0 %v4091_v19 }
  0xdf   : > { %1695 = vmatmul.mubr.bf16.gmra.mrb[8].mxu0 %v4762_v52 }
  0xe0   : > { %1704 = vmatprep.mubr.bf16.mxu0 %v4123_v33  ;;  %3829 = vmatpush3.bf16.msra.mxu0 %v4091_v19 }
  0xe1   : > { %3830 = vmatprep.subr.bf16.mxu0 %v4092_v26  ;;  %3813 = vmatmul.mubr.bf16.gmra.mrb[88].mxu1 %v4858_v25 }
  0xe2   : > { %3816 = vmatprep.mubr.bf16.mxu1 %v4861_v40 }
  0xe4   : > { %3831 = vmatpush3.bf16.msra.mxu0 %v4092_v26 }
  0xe5   : > { %3832 = vmatprep.subr.bf16.mxu0 %v4093_v43 }
  0xe7   : > { %1705 = vmatmul.mubr.bf16.gmra.mrb[12].mxu0 %v4765_v53 }
  0xe8   : > { %1714 = vmatprep.mubr.bf16.mxu0 %v4123_v33  ;;  %3833 = vmatpush3.bf16.msra.mxu0 %v4093_v43 }
  0xe9   : > { %3834 = vmatprep.subr.bf16.mxu0 %v4094_v51  ;;  %3817 = vmatmul.mubr.bf16.gmra.mrb[92].mxu1 %v4872_v55 }
  0xea   : > { %2749 = vmatprep.mubr.bf16.mxu1 %v4355_v13 }
  0xec   : > { %3835 = vmatpush3.bf16.msra.mxu0 %v4094_v51 }
  0xef   : > { %1715 = vmatmul.mubr.bf16.gmra.mrb[16].mxu0 %v4782_v38 }
  0xf0   : > { %1724 = vmatprep.mubr.bf16.mxu0 %v4123_v33 }
  0xf1   : > { %2750 = vmatmul.mubr.bf16.vlgmr.msra.gmra.mrb[96].mxu1 %v4397_v49 }
  0xf2   : > { %2757 = vmatprep.mubr.bf16.mxu1 %v4388_v45  ;;  %3876 = vmatpush3.bf16.msra.mxu1 %v4665_v42 }
  0xf3   : > { %3869 = vmatprep.subr.bf16.mxu1 %v4820_v47 }
  0xf6   : > { %3877 = vmatpush3.bf16.msra.mxu1 %v4820_v47 }
  0xf7   : > { %1725 = vmatmul.mubr.bf16.gmra.mrb[20].mxu0 %v4785_v56  ;;  %3870 = vmatprep.subr.bf16.mxu1 %v4089_v58 }
  0xf8   : > { %1734 = vmatprep.mubr.bf16.mxu0 %v4123_v33 }
  0xf9   : > { %2758 = vmatmul.mubr.bf16.gmra.mrb[100].mxu1 %v4450_v23 }
  0xfa   : > { %2765 = vmatprep.mubr.bf16.mxu1 %v4461_v28  ;;  %3878 = vmatpush3.bf16.msra.mxu1 %v4089_v58 }
  0xfb   : > { %3871 = vmatprep.subr.bf16.mxu1 %v4090_v4 }
  0xfe   : > { %3879 = vmatpush3.bf16.msra.mxu1 %v4090_v4 }
  0xff   : > { %1735 = vmatmul.mubr.bf16.gmra.mrb[24].mxu0 %v4804_v30  ;;  %3872 = vmatprep.subr.bf16.mxu1 %v4091_v19 }
 0x100   : > { %1744 = vmatprep.mubr.bf16.mxu0 %v4123_v33 }
 0x101   : > { %2766 = vmatmul.mubr.bf16.gmra.mrb[104].mxu1 %v4507_v62 }
 0x102   : > { %2773 = vmatprep.mubr.bf16.mxu1 %v4523_v3  ;;  %3880 = vmatpush3.bf16.msra.mxu1 %v4091_v19 }
 0x103   : > { %v3516_v13 = vpop.f32.mrb[0].mxu1  ;;  %3873 = vmatprep.subr.bf16.mxu1 %v4092_v26 }
 0x104   : > { %v3517_v45 = vpop.f32.mrb[1].mxu1 }
 0x105   : > { %v4892_v49 = vadd.f32 %v3517_v45, %v3516_v13  ;;  %v3519_v42 = vpop.f32.mrb[2].mxu1 }
 0x106   : > { %v3520_v23 = vpop.f32.mrb[3].mxu1  ;;  %3881 = vmatpush3.bf16.msra.mxu1 %v4092_v26 }
 0x107   : > { %1745 = vmatmul.mubr.bf16.gmra.mrb[28].mxu0 %v4807_v35  ;;  %v4895_v28 = vadd.f32 %v3520_v23, %v3519_v42  ;;  %3874 = vmatprep.subr.bf16.mxu1 %v4093_v43 }
 0x108   : > { %1754 = vmatprep.mubr.bf16.mxu0 %v4123_v33 }
 0x109   : > { %2774 = vmatmul.mubr.bf16.gmra.mrb[108].mxu1 %v4572_v46 }
 0x10a   : > { %2781 = vmatprep.mubr.bf16.mxu1 %v4563_v37  ;;  %3882 = vmatpush3.bf16.msra.mxu1 %v4093_v43 }
 0x10b   : > { %3875 = vmatprep.subr.bf16.mxu1 %v4094_v51  ;;  %v3522_v62 = vpop.f32.mrb[4].mxu1 }
 0x10c   : > { %v3523_v3 = vpop.f32.mrb[5].mxu1 }
 0x10d   : > { %v4902_v47 = vadd.f32 %v3523_v3, %v3522_v62  ;;  %v3525_v60 = vpop.f32.mrb[6].mxu1 }
 0x10e   : > { %3883 = vmatpush3.bf16.msra.mxu1 %v4094_v51  ;;  %v3526_v58 = vpop.f32.mrb[7].mxu1 }
 0x10f   : > { %1755 = vmatmul.mubr.bf16.gmra.mrb[32].mxu0 %v4826_v61  ;;  %v4904_v31 = vadd.f32 %v3526_v58, %v3525_v60  ;;  %v824_v60 = vld [vmem:[#allocation2 + $0x18a] sm:$0xff] }
 0x110   : > { %1764 = vmatprep.mubr.bf16.mxu0 %v4123_v33 }
 0x111   : > { %2782 = vmatmul.mubr.bf16.gmra.mrb[112].mxu1 %v4616_v15 }
 0x112   : > { %2789 = vmatprep.mubr.bf16.mxu1 %v4625_v18 }
 0x113   : > { %v3528_v37 = vpop.f32.mrb[8].mxu1 }
 0x114   : > { %v3529_v46 = vpop.f32.mrb[9].mxu1 }
 0x115   : > { %v4910_v1 = vadd.f32 %v3529_v46, %v3528_v37  ;;  %v3531_v4 = vpop.f32.mrb[10].mxu1 }
 0x116   : > { %v3532_v34 = vpop.f32.mrb[11].mxu1 }
 0x117   : > { %1765 = vmatmul.mubr.bf16.gmra.mrb[36].mxu0 %v4830_v54  ;;  %v4912_v10 = vadd.f32 %v3532_v34, %v3531_v4 }
 0x118   : > { %1774 = vmatprep.mubr.bf16.mxu0 %v4123_v33 }
 0x119   : > { %2790 = vmatmul.mubr.bf16.gmra.mrb[116].mxu1 %v4648_v36 }
 0x11a   : > { %2797 = vmatprep.mubr.bf16.mxu1 %v4658_v12 }
 0x11b   : > { %v3534_v15 = vpop.f32.mrb[12].mxu1 }
 0x11c   : > { %v3535_v18 = vpop.f32.mrb[13].mxu1 }
 0x11d   : > { %v4918_v19 = vadd.f32 %v3535_v18, %v3534_v15  ;;  %v3537_v9 = vpop.f32.mrb[14].mxu1 }
 0x11e   : > { %v3538_v14 = vpop.f32.mrb[15].mxu1 }
 0x11f   : > { %1775 = vmatmul.mubr.bf16.gmra.mrb[40].mxu0 %v4844_v50  ;;  %v4920_v26 = vadd.f32 %v3538_v14, %v3537_v9 }
 0x120   : > { %1784 = vmatprep.mubr.bf16.mxu0 %v4123_v33 }
 0x121   : > { %2798 = vmatmul.mubr.bf16.gmra.mrb[120].mxu1 %v4671_v48 }
 0x122   : > { %2805 = vmatprep.mubr.bf16.mxu1 %v4676_v57 }
 0x124   : > { %v3540_v36 = vpop.f32.mrb[16].mxu1 }
 0x125   : > { %v3541_v12 = vpop.f32.mrb[17].mxu1 }
 0x126   : > { %v4926_v27 = vadd.f32 %v3541_v12, %v3540_v36  ;;  %v3543_v24 = vpop.f32.mrb[18].mxu1 }
 0x127   : > { %1785 = vmatmul.mubr.bf16.gmra.mrb[44].mxu0 %v4847_v59  ;;  %v3544_v43 = vpop.f32.mrb[19].mxu1 }
 0x128   : > { %1794 = vmatprep.mubr.bf16.mxu0 %v4123_v33  ;;  %v4928_v44 = vadd.f32 %v3544_v43, %v3543_v24 }
 0x129   : > { %2806 = vmatmul.mubr.bf16.gmra.mrb[124].mxu1 %v4681_v0 }
 0x12a   : > { %2813 = vmatprep.mubr.bf16.mxu1 %v4686_v20 }
 0x12c   : > { %v3546_v48 = vpop.f32.mrb[20].mxu1 }
 0x12d   : > { %v3547_v57 = vpop.f32.mrb[21].mxu1 }
 0x12e   : > { %v4934_v39 = vadd.f32 %v3547_v57, %v3546_v48  ;;  %v3549_v51 = vpop.f32.mrb[22].mxu1  ;;  %v753_v57 = vld [vmem:[#allocation2 + $0x199] sm:$0xff] }
 0x12f   : > { %1795 = vmatmul.mubr.bf16.gmra.mrb[48].mxu0 %v4858_v25  ;;  %v3550_v13 = vpop.f32.mrb[23].mxu1 }
 0x130   : > { %1804 = vmatprep.mubr.bf16.mxu0 %v4123_v33  ;;  %v4936_v45 = vadd.f32 %v3550_v13, %v3549_v51 }
 0x131   : > { %2814 = vmatmul.mubr.bf16.gmra.mrb[128].mxu1 %v4691_v2 }
 0x132   : > { %2821 = vmatprep.mubr.bf16.mxu1 %v4696_v5  ;;  %v823_v5 = vld [vmem:[#allocation2 + $0x182] sm:$0xff] }
 0x133   : > { %v4952_v34 = vpack.c.bf16 %v824_v60, %v823_v5 }
 0x134   : > { %v3552_v0 = vpop.f32.mrb[24].mxu1 }
 0x135   : > { %v3553_v20 = vpop.f32.mrb[25].mxu1 }
 0x136   : > { %v4942_v42 = vadd.f32 %v3553_v20, %v3552_v0  ;;  %v3555_v23 = vpop.f32.mrb[26].mxu1 }
 0x137   : > { %1805 = vmatmul.mubr.bf16.gmra.mrb[52].mxu0 %v4861_v40  ;;  %v3556_v62 = vpop.f32.mrb[27].mxu1 }
 0x138   : > { %1814 = vmatprep.mubr.bf16.mxu0 %v4123_v33  ;;  %v4944_v3 = vadd.f32 %v3556_v62, %v3555_v23 }
 0x139   : > { %2822 = vmatmul.mubr.bf16.gmra.mrb[132].mxu1 %v4701_v7 }
 0x13a   : > { %2829 = vmatprep.mubr.bf16.mxu1 %v4706_v8 }
 0x13c   : > { %v3558_v2 = vpop.f32.mrb[28].mxu1 }
 0x13d   : > { %v3559_v58 = vpop.f32.mrb[29].mxu1 }
 0x13e   : > { %v4950_v37 = vadd.f32 %v3559_v58, %v3558_v2  ;;  %v3561_v46 = vpop.f32.mrb[30].mxu1 }
 0x13f   : > { %1815 = vmatmul.mubr.bf16.gmra.mrb[56].mxu0 %v4872_v55  ;;  %v3562_v4 = vpop.f32.mrb[31].mxu1 }
 0x140   : > { %1824 = vmatprep.mubr.bf16.mxu0 %v4123_v33  ;;  %v4954_v15 = vadd.f32 %v3562_v4, %v3561_v46  ;;  %v825_v4 = vld [vmem:[#allocation2 + $0x19a] sm:$0xff] }
 0x141   : > { %2830 = vmatmul.mubr.bf16.gmra.mrb[136].mxu1 %v4711_v11 }
 0x142   : > { %2837 = vmatprep.mubr.bf16.mxu1 %v4716_v63 }
 0x144   : > { %v3564_v7 = vpop.f32.mrb[32].mxu1 }
 0x145   : > { %v3565_v8 = vpop.f32.mrb[33].mxu1 }
 0x146   : > { %v4960_v33 = vadd.f32 %v3565_v8, %v3564_v7  ;;  %v3567_v18 = vpop.f32.mrb[34].mxu1  ;;  %v826_v7 = vld [vmem:[#allocation2 + $0x1a2] sm:$0xff] }
 0x147   : > { %1825 = vmatmul.mubr.bf16.gmra.mrb[60].mxu0 %v4952_v34  ;;  %v3568_v9 = vpop.f32.mrb[35].mxu1 }
 0x148   : > { %3836 = vmatprep.mubr.bf16.mxu0 %v4745_v32  ;;  %v4962_v14 = vadd.f32 %v3568_v9, %v3567_v18 }
 0x149   : > { %2838 = vmatmul.mubr.bf16.gmra.mrb[140].mxu1 %v4721_v6 }
 0x14a   : > { %2845 = vmatprep.mubr.bf16.mxu1 %v4726_v16 }
 0x14c   : > { %v3570_v11 = vpop.f32.mrb[36].mxu1 }
 0x14d   : > { %v3571_v63 = vpop.f32.mrb[37].mxu1 }
 0x14e   : > { %v4968_v36 = vadd.f32 %v3571_v63, %v3570_v11  ;;  %v3573_v32 = vpop.f32.mrb[38].mxu1 }
 0x14f   : > { %3837 = vmatmul.mubr.bf16.vlgmr.msra.gmra.mrb[64].mxu0 %v4762_v52  ;;  %v3574_v12 = vpop.f32.mrb[39].mxu1 }
 0x150   : > { %3840 = vmatprep.mubr.bf16.mxu0 %v4765_v53  ;;  %v4970_v24 = vadd.f32 %v3574_v12, %v3573_v32 }
 0x151   : > { %2846 = vmatmul.mubr.bf16.gmra.mrb[144].mxu1 %v4731_v17  ;;  %v754_v17 = vld [vmem:[#allocation2 + $0x1a1] sm:$0xff] }
 0x152   : > { %2853 = vmatprep.mubr.bf16.mxu1 %v4630_v29 }
 0x154   : > { %v3576_v6 = vpop.f32.mrb[40].mxu1 }
 0x155   : > { %v3577_v16 = vpop.f32.mrb[41].mxu1 }
 0x156   : > { %v4976_v52 = vadd.f32 %v3577_v16, %v3576_v6  ;;  %v3579_v53 = vpop.f32.mrb[42].mxu1 }
 0x157   : > { %3841 = vmatmul.mubr.bf16.gmra.mrb[68].mxu0 %v4782_v38  ;;  %v3580_v43 = vpop.f32.mrb[43].mxu1 }
 0x158   : > { %3844 = vmatprep.mubr.bf16.mxu0 %v4785_v56  ;;  %v4978_v48 = vadd.f32 %v3580_v43, %v3579_v53  ;;  %v1158_v56 = vpack.c.bf16 %v754_v17, %v753_v57 }
 0x159   : > { %2854 = vmatmul.mubr.bf16.gmra.mrb[148].mxu1 %v4737_v22  ;;  %v4095_v22 = vld [vmem:[#allocation2] sm:$0xff] }
 0x15a   : > { %2861 = vmatprep.mubr.bf16.mxu1 %v4667_v41  ;;  %v1157_v23 = vpack.c.bf16 %v4095_v22, %v4095_v22 }
 0x15c   : > { %v3582_v29 = vpop.f32.mrb[44].mxu1 }
 0x15d   : > { %v3583_v38 = vpop.f32.mrb[45].mxu1 }
 0x15e   : > { %v4984_v51 = vadd.f32 %v3583_v38, %v3582_v29  ;;  %v3585_v13 = vpop.f32.mrb[46].mxu1 }
 0x15f   : > { %3845 = vmatmul.mubr.bf16.gmra.mrb[72].mxu0 %v4804_v30  ;;  %v3586_v0 = vpop.f32.mrb[47].mxu1 }
 0x160   : > { %3848 = vmatprep.mubr.bf16.mxu0 %v4807_v35  ;;  %v4986_v20 = vadd.f32 %v3586_v0, %v3585_v13 }
 0x161   : > { %2862 = vmatmul.mubr.bf16.gmra.mrb[152].mxu1 %v4793_v21 }
 0x162   : > { %2869 = vmatprep.mubr.bf16.mxu1 %v1158_v56 }
 0x164   : > { %v3588_v41 = vpop.f32.mrb[48].mxu1 }
 0x165   : > { %v3589_v30 = vpop.f32.mrb[49].mxu1 }
 0x166   : > { %v4991_v35 = vadd.f32 %v3589_v30, %v3588_v41  ;;  %v3591_v62 = vpop.f32.mrb[50].mxu1 }
 0x167   : > { %3849 = vmatmul.mubr.bf16.gmra.mrb[76].mxu0 %v4826_v61  ;;  %v3592_v2 = vpop.f32.mrb[51].mxu1 }
 0x168   : > { %3852 = vmatprep.mubr.bf16.mxu0 %v4830_v54  ;;  %v4993_v5 = vadd.f32 %v3592_v2, %v3591_v62 }
 0x169   : > { %2870 = vmatmul.mubr.bf16.gmra.mrb[156].mxu1 %v1157_v23 }
 0x16a   : > { %5498 = vst [vmem:[#allocation4_spill] sm:$0xff] %v4993_v5  ;;  %3860 = vmatprep.mubr.bf16.mxu1 %v4861_v40 }
 0x16c   : > { %v3594_v21 = vpop.f32.mrb[52].mxu1 }
 0x16d   : > { %v3595_v61 = vpop.f32.mrb[53].mxu1 }
 0x16e   : > { %v4998_v60 = vadd.f32 %v3595_v61, %v3594_v21  ;;  %v3597_v58 = vpop.f32.mrb[54].mxu1 }
 0x16f   : > { %3853 = vmatmul.mubr.bf16.gmra.mrb[80].mxu0 %v4844_v50  ;;  %v3598_v54 = vpop.f32.mrb[55].mxu1  ;;  %v1159_v50 = vpack.c.bf16 %v826_v7, %v825_v4 }
 0x170   : > { %3856 = vmatprep.mubr.bf16.mxu0 %v4847_v59  ;;  %5499 = vst [vmem:[#allocation5_spill] sm:$0xff] %v4998_v60  ;;  %v5000_v46 = vadd.f32 %v3598_v54, %v3597_v58  ;;  %v5040_v58 = vld [vmem:[%s5493_s4] ss:$0 sm:$0xff] }
 0x171   : > { %3861 = vmatmul.mubr.bf16.vlgmr.msra.gmra.mrb[160].mxu1 %v4872_v55 }
 0x172   : > { %5500 = vst [vmem:[#allocation6_spill] sm:$0xff] %v5000_v46  ;;  %3864 = vmatprep.mubr.bf16.mxu1 %v4952_v34 }
 0x174   : > { %v3600_v40 = vpop.f32.mrb[56].mxu1 }
 0x175   : > { %v3601_v8 = vpop.f32.mrb[57].mxu1 }
 0x176   : > { %v5005_v18 = vadd.f32 %v3601_v8, %v3600_v40  ;;  %v3603_v59 = vpop.f32.mrb[58].mxu1 }
 0x177   : > { %3857 = vmatmul.mubr.bf16.gmra.mrb[84].mxu0 %v4858_v25  ;;  %v3604_v9 = vpop.f32.mrb[59].mxu1 }
 0x178   : > { %5501 = vst [vmem:[#allocation7_spill] sm:$0xff] %v5005_v18  ;;  %v5007_v11 = vadd.f32 %v3604_v9, %v3603_v59 }
 0x179   : > { %3865 = vmatmul.mubr.bf16.gmra.mrb[164].mxu1 %v1159_v50 }
 0x17a   : > { %5502 = vst [vmem:[#allocation8_spill] sm:$0xff] %v5007_v11 }
 0x17c   : > { %v3606_v63 = vpop.f32.mrb[60].mxu1 }
 0x17d   : > { %v3607_v32 = vpop.f32.mrb[61].mxu1 }
 0x17e   : > { %v5009_v12 = vadd.f32 %v3607_v32, %v3606_v63  ;;  %v3609_v55 = vpop.f32.mrb[62].mxu1 }
 0x17f   : > { %v3610_v34 = vpop.f32.mrb[63].mxu1 }
 0x180   : > { %5503 = vst [vmem:[#allocation9_spill] sm:$0xff] %v5009_v12  ;;  %v5011_v6 = vadd.f32 %v3610_v34, %v3609_v55 }
 0x182   : > { %5504 = vst [vmem:[#allocation10_spill] sm:$0xff] %v5011_v6 }
 0x184   : > { %v3790_v16 = vpop.f32.mrb[64].mxu1 }
 0x185   : > { %v2222_v25 = vpop.f32.mrb[65].mxu1 }
 0x186   : > { %v3791_v53 = vpop.f32.mrb[66].mxu1 }
 0x187   : > { %v2225_v43 = vpop.f32.mrb[67].mxu1 }
 0x18c   : > { %v5013_v57 = vpop.f32.mrb[68].mxu1 }
 0x18d   : > { %v2238_v17 = vpop.f32.mrb[69].mxu1 }
 0x18e   : > { %v5015_v29 = vpop.f32.mrb[70].mxu1 }
 0x18f   : > { %v2241_v38 = vpop.f32.mrb[71].mxu1 }
 0x194   : > { %v5017_v56 = vpop.f32.mrb[72].mxu1 }
 0x195   : > { %v5019_v13 = vpop.f32.mrb[73].mxu1 }
 0x196   : > { %v5021_v0 = vpop.f32.mrb[74].mxu1 }
 0x197   : > { %v5023_v41 = vpop.f32.mrb[75].mxu1 }
 0x19c   : > { %v5025_v22 = vpop.f32.mrb[76].mxu1 }
 0x19d   : > { %v5027_v23 = vpop.f32.mrb[77].mxu1 }
 0x19e   : > { %v5029_v30 = vpop.f32.mrb[78].mxu1 }
 0x19f   : > { %v5031_v2 = vpop.f32.mrb[79].mxu1 }
 0x1a2   : > { %v1676_v62 = vpop.f32.mrb[0].mxu0 }
 0x1a3   : > { %v2062_v21 = vadd.f32 %v4892_v49, %v1676_v62  ;;  %v5035_v61 = vpop.f32.mrb[1].mxu0 }
 0x1a4   : > { %v1680_v54 = vpop.f32.mrb[2].mxu0  ;;  %v5051_v8 = vpop.f32.mrb[80].mxu1 }
 0x1a5   : > { %v2223_v4 = vadd.f32 %v2222_v25, %v2062_v21  ;;  %v2065_v7 = vadd.f32 %v4895_v28, %v1680_v54  ;;  %v5043_v40 = vpop.f32.mrb[3].mxu0  ;;  %v5053_v59 = vpop.f32.mrb[81].mxu1 }
 0x1a6   : > { %v5057_v28 = vpop.f32.mrb[82].mxu1 }
 0x1a7   : > { %v2355_v49 = vadd.f32 %v5040_v58, %v2223_v4  ;;  %v2226_v50 = vadd.f32 %v2225_v43, %v2065_v7  ;;  %v5059_v32 = vpop.f32.mrb[83].mxu1 }
 0x1a9   : > { %2387 = vst [vmem:[%s5048_s21] sm:$0xff] %v2355_v49  ;;  %v2356_v9 = vadd.f32 %v5040_v58, %v2226_v50  ;;  %v2456_v55 = vmul.f32 %v2355_v49, %v2355_v49 }
 0x1aa   : > { %v1686_v63 = vpop.f32.mrb[4].mxu0 }
 0x1ab   : > { %2388 = vst [vmem:[%s5048_s21 + $0x8] sm:$0xff] %v2356_v9  ;;  %v2419_v34 = vadd.f32 %v2356_v9, %v2355_v49  ;;  %v2457_v25 = vmul.f32 %v2356_v9, %v2356_v9  ;;  %v2070_v62 = vadd.f32 %v4902_v47, %v1686_v63  ;;  %v5063_v43 = vpop.f32.mrb[5].mxu0 }
 0x1ac   : > { %v1690_v21 = vpop.f32.mrb[6].mxu0  ;;  %v5069_v11 = vpop.f32.mrb[84].mxu1 }
 0x1ad   : > { %v2488_v54 = vadd.f32 %v2457_v25, %v2456_v55  ;;  %v2231_v4 = vadd.f32 %v3790_v16, %v2070_v62  ;;  %v2073_v7 = vadd.f32 %v4904_v31, %v1690_v21  ;;  %v5066_v50 = vpop.f32.mrb[7].mxu0  ;;  %v5071_v18 = vpop.f32.mrb[85].mxu1 }
 0x1ae   : > { %v5075_v63 = vpop.f32.mrb[86].mxu1 }
 0x1af   : > { %v2357_v6 = vadd.f32 %v5040_v58, %v2231_v4  ;;  %v2234_v12 = vadd.f32 %v3791_v53, %v2073_v7  ;;  %v5077_v16 = vpop.f32.mrb[87].mxu1 }
 0x1b1   : > { %2389 = vst [vmem:[%s5048_s21 + $0x20] sm:$0xff] %v2357_v6  ;;  %v2420_v49 = vadd.f32 %v2419_v34, %v2357_v6  ;;  %v2458_v47 = vmul.f32 %v2357_v6, %v2357_v6  ;;  %v2358_v9 = vadd.f32 %v5040_v58, %v2234_v12 }
 0x1b2   : > { %v1696_v55 = vpop.f32.mrb[8].mxu0 }
 0x1b3   : > { %v2489_v31 = vadd.f32 %v2488_v54, %v2458_v47  ;;  %2390 = vst [vmem:[%s5048_s21 + $0x28] sm:$0xff] %v2358_v9  ;;  %v2421_v25 = vadd.f32 %v2420_v49, %v2358_v9  ;;  %v2459_v62 = vmul.f32 %v2358_v9, %v2358_v9  ;;  %v2078_v53 = vadd.f32 %v4910_v1, %v1696_v55  ;;  %v5081_v21 = vpop.f32.mrb[9].mxu0 }
 0x1b4   : > { %v1700_v4 = vpop.f32.mrb[10].mxu0  ;;  %v5087_v5 = vpop.f32.mrb[88].mxu1 }
 0x1b5   : > { %v2490_v7 = vadd.f32 %v2489_v31, %v2459_v62  ;;  %v2239_v6 = vadd.f32 %v2238_v17, %v2078_v53  ;;  %v2081_v12 = vadd.f32 %v4912_v10, %v1700_v4  ;;  %v5084_v34 = vpop.f32.mrb[11].mxu0  ;;  %v5089_v54 = vpop.f32.mrb[89].mxu1 }
 0x1b6   : > { %v5093_v9 = vpop.f32.mrb[90].mxu1 }
 0x1b7   : > { %v2359_v46 = vadd.f32 %v5040_v58, %v2239_v6  ;;  %v2242_v60 = vadd.f32 %v2241_v38, %v2081_v12  ;;  %5505 = vst [vmem:[#allocation11_spill] sm:$0xff] %v5093_v9  ;;  %v5095_v17 = vpop.f32.mrb[91].mxu1 }
 0x1b9   : > { %2391 = vst [vmem:[%s5048_s21 + $0x40] sm:$0xff] %v2359_v46  ;;  %v2422_v49 = vadd.f32 %v2421_v25, %v2359_v46  ;;  %v2460_v1 = vmul.f32 %v2359_v46, %v2359_v46  ;;  %v2360_v47 = vadd.f32 %v5040_v58, %v2242_v60 }
 0x1ba   : > { %v1706_v55 = vpop.f32.mrb[12].mxu0 }
 0x1bb   : > { %v2491_v10 = vadd.f32 %v2490_v7, %v2460_v1  ;;  %2392 = vst [vmem:[%s5048_s21 + $0x48] sm:$0xff] %v2360_v47  ;;  %v2423_v31 = vadd.f32 %v2422_v49, %v2360_v47  ;;  %v2461_v62 = vmul.f32 %v2360_v47, %v2360_v47  ;;  %v2086_v38 = vadd.f32 %v4918_v19, %v1706_v55  ;;  %v5099_v53 = vpop.f32.mrb[13].mxu0 }
 0x1bc   : > { %v1710_v4 = vpop.f32.mrb[14].mxu0  ;;  %v5107_v1 = vpop.f32.mrb[92].mxu1 }
 0x1bd   : > { %v2492_v6 = vadd.f32 %v2491_v10, %v2461_v62  ;;  %v2247_v46 = vadd.f32 %v5013_v57, %v2086_v38  ;;  %v2089_v60 = vadd.f32 %v4920_v26, %v1710_v4  ;;  %v5103_v25 = vpop.f32.mrb[15].mxu0  ;;  %5506 = vst [vmem:[#allocation12_spill] sm:$0xff] %v5107_v1  ;;  %v5109_v49 = vpop.f32.mrb[93].mxu1 }
 0x1be   : > { %5507 = vst [vmem:[#allocation13_spill] sm:$0xff] %v5109_v49  ;;  %v5113_v10 = vpop.f32.mrb[94].mxu1 }
 0x1bf   : > { %v2361_v12 = vadd.f32 %v5040_v58, %v2247_v46  ;;  %v2250_v7 = vadd.f32 %v5015_v29, %v2089_v60  ;;  %5508 = vst [vmem:[#allocation14_spill] sm:$0xff] %v5113_v10  ;;  %v5115_v57 = vpop.f32.mrb[95].mxu1 }
 0x1c0   : > { %5509 = vst [vmem:[#allocation15_spill] sm:$0xff] %v5115_v57 }
 0x1c1   : > { %2393 = vst [vmem:[%s5048_s21 + $0x60] sm:$0xff] %v2361_v12  ;;  %v2424_v19 = vadd.f32 %v2423_v31, %v2361_v12  ;;  %v2462_v47 = vmul.f32 %v2361_v12, %v2361_v12  ;;  %v2362_v55 = vadd.f32 %v5040_v58, %v2250_v7 }
 0x1c2   : > { %v1716_v26 = vpop.f32.mrb[16].mxu0 }
 0x1c3   : > { %v2493_v62 = vadd.f32 %v2492_v6, %v2462_v47  ;;  %2394 = vst [vmem:[%s5048_s21 + $0x68] sm:$0xff] %v2362_v55  ;;  %v2425_v38 = vadd.f32 %v2424_v19, %v2362_v55  ;;  %v2463_v4 = vmul.f32 %v2362_v55, %v2362_v55  ;;  %v2094_v29 = vadd.f32 %v4926_v27, %v1716_v26  ;;  %v5119_v46 = vpop.f32.mrb[17].mxu0 }
 0x1c4   : > { %v1720_v60 = vpop.f32.mrb[18].mxu0  ;;  %v3652_v57 = vpop.f32.mrb[96].mxu1 }
 0x1c5   : > { %v2494_v1 = vadd.f32 %v2493_v62, %v2463_v4  ;;  %v2255_v31 = vadd.f32 %v5019_v13, %v2094_v29  ;;  %v2097_v12 = vadd.f32 %v4928_v44, %v1720_v60  ;;  %v5123_v7 = vpop.f32.mrb[19].mxu0  ;;  %v3653_v19 = vpop.f32.mrb[97].mxu1 }
 0x1c6   : > { %v3654_v55 = vadd.f32 %v3653_v19, %v3652_v57  ;;  %v3655_v62 = vpop.f32.mrb[98].mxu1 }
 0x1c7   : > { %v2363_v10 = vadd.f32 %v5040_v58, %v2255_v31  ;;  %v2258_v6 = vadd.f32 %v5023_v41, %v2097_v12  ;;  %v3656_v4 = vpop.f32.mrb[99].mxu1 }
 0x1c8   : > { %v3657_v49 = vadd.f32 %v3656_v4, %v3655_v62 }
 0x1c9   : > { %2395 = vst [vmem:[%s5048_s21 + $0x80] sm:$0xff] %v2363_v10  ;;  %v2426_v47 = vadd.f32 %v2425_v38, %v2363_v10  ;;  %v2464_v27 = vmul.f32 %v2363_v10, %v2363_v10  ;;  %v2364_v26 = vadd.f32 %v5040_v58, %v2258_v6  ;;  %v5134_v38 = vadd.f32 %v3654_v55, %v5035_v61 }
 0x1ca   : > { %v1726_v13 = vpop.f32.mrb[20].mxu0 }
 0x1cb   : > { %v2495_v29 = vadd.f32 %v2494_v1, %v2464_v27  ;;  %2396 = vst [vmem:[%s5048_s21 + $0x88] sm:$0xff] %v2364_v26  ;;  %v2427_v44 = vadd.f32 %v2426_v47, %v2364_v26  ;;  %v2465_v60 = vmul.f32 %v2364_v26, %v2364_v26  ;;  %v5130_v9 = vpop.f32.mrb[21].mxu0  ;;  %v2102_v41 = vadd.f32 %v4934_v39, %v1726_v13 }
 0x1cc   : > { %v1730_v31 = vpop.f32.mrb[22].mxu0  ;;  %v5140_v1 = vadd.f32 %v3657_v49, %v5043_v40  ;;  %v3658_v19 = vpop.f32.mrb[100].mxu1 }
 0x1cd   : > { %v2496_v10 = vadd.f32 %v2495_v29, %v2465_v60  ;;  %v2105_v57 = vadd.f32 %v4936_v45, %v1730_v31  ;;  %v5137_v12 = vpop.f32.mrb[23].mxu0  ;;  %v2263_v6 = vadd.f32 %v5017_v56, %v2102_v41  ;;  %v3659_v27 = vpop.f32.mrb[101].mxu1 }
 0x1ce   : > { %v3660_v26 = vadd.f32 %v3659_v27, %v3658_v19  ;;  %v3661_v55 = vpop.f32.mrb[102].mxu1 }
 0x1cf   : > { %v2266_v47 = vadd.f32 %v5021_v0, %v2105_v57  ;;  %v2365_v39 = vadd.f32 %v5040_v58, %v2263_v6  ;;  %v3662_v4 = vpop.f32.mrb[103].mxu1 }
 0x1d0   : > { %v3663_v49 = vadd.f32 %v3662_v4, %v3661_v55  ;;  %v5152_v0 = vadd.f32 %v3660_v26, %v5063_v43 }
 0x1d1   : > { %v2366_v61 = vadd.f32 %v5040_v58, %v2266_v47  ;;  %2397 = vst [vmem:[%s5048_s21 + $0xa0] sm:$0xff] %v2365_v39  ;;  %v2428_v45 = vadd.f32 %v2427_v44, %v2365_v39  ;;  %v2466_v62 = vmul.f32 %v2365_v39, %v2365_v39 }
 0x1d2   : > { %v1736_v13 = vpop.f32.mrb[24].mxu0  ;;  %v5159_v19 = vadd.f32 %v3663_v49, %v5066_v50 }
 0x1d3   : > { %2398 = vst [vmem:[%s5048_s21 + $0xa8] sm:$0xff] %v2366_v61  ;;  %v2467_v40 = vmul.f32 %v2366_v61, %v2366_v61  ;;  %v2110_v56 = vadd.f32 %v4942_v42, %v1736_v13  ;;  %v5149_v29 = vpop.f32.mrb[25].mxu0  ;;  %v2497_v60 = vadd.f32 %v2496_v10, %v2466_v62  ;;  %v2429_v41 = vadd.f32 %v2428_v45, %v2366_v61 }
 0x1d4   : > { %v1740_v31 = vpop.f32.mrb[26].mxu0  ;;  %v3664_v39 = vpop.f32.mrb[104].mxu1 }
 0x1d5   : > { %v2271_v57 = vadd.f32 %v5027_v23, %v2110_v56  ;;  %v2113_v44 = vadd.f32 %v4944_v3, %v1740_v31  ;;  %v5156_v6 = vpop.f32.mrb[27].mxu0  ;;  %v2498_v47 = vadd.f32 %v2497_v60, %v2467_v40  ;;  %v3665_v27 = vpop.f32.mrb[105].mxu1 }
 0x1d6   : > { %v3666_v61 = vadd.f32 %v3665_v27, %v3664_v39  ;;  %v3667_v3 = vpop.f32.mrb[106].mxu1 }
 0x1d7   : > { %v2367_v42 = vadd.f32 %v5040_v58, %v2271_v57  ;;  %v2274_v43 = vadd.f32 %v5031_v2, %v2113_v44  ;;  %v3668_v55 = vpop.f32.mrb[107].mxu1 }
 0x1d8   : > { %v3669_v13 = vadd.f32 %v3668_v55, %v3667_v3  ;;  %v5170_v56 = vadd.f32 %v3666_v61, %v5081_v21 }
 0x1d9   : > { %2399 = vst [vmem:[%s5048_s21 + $0xc0] sm:$0xff] %v2367_v42  ;;  %v2430_v10 = vadd.f32 %v2429_v41, %v2367_v42  ;;  %v2468_v26 = vmul.f32 %v2367_v42, %v2367_v42  ;;  %v2368_v23 = vadd.f32 %v5040_v58, %v2274_v43 }
 0x1da   : > { %v1746_v45 = vpop.f32.mrb[28].mxu0  ;;  %v5176_v57 = vadd.f32 %v3669_v13, %v5084_v34 }
 0x1db   : > { %v2499_v62 = vadd.f32 %v2498_v47, %v2468_v26  ;;  %2400 = vst [vmem:[%s5048_s21 + $0xc8] sm:$0xff] %v2368_v23  ;;  %v2431_v50 = vadd.f32 %v2430_v10, %v2368_v23  ;;  %v2469_v4 = vmul.f32 %v2368_v23, %v2368_v23  ;;  %v5166_v40 = vpop.f32.mrb[29].mxu0  ;;  %v2118_v2 = vadd.f32 %v4950_v37, %v1746_v45 }
 0x1dc   : > { %v1750_v49 = vpop.f32.mrb[30].mxu0  ;;  %v3670_v47 = vpop.f32.mrb[108].mxu1 }
 0x1dd   : > { %v2500_v60 = vadd.f32 %v2499_v62, %v2469_v4  ;;  %v2121_v41 = vadd.f32 %v4954_v15, %v1750_v49  ;;  %v5173_v31 = vpop.f32.mrb[31].mxu0  ;;  %v2279_v44 = vadd.f32 %v5025_v22, %v2118_v2  ;;  %v3671_v39 = vpop.f32.mrb[109].mxu1 }
 0x1de   : > { %v3672_v43 = vadd.f32 %v3671_v39, %v3670_v47  ;;  %v3673_v27 = vpop.f32.mrb[110].mxu1 }
 0x1df   : > { %v2282_v42 = vadd.f32 %v5029_v30, %v2121_v41  ;;  %v2369_v37 = vadd.f32 %v5040_v58, %v2279_v44  ;;  %v3674_v26 = vpop.f32.mrb[111].mxu1 }
 0x1e0   : > { %v3675_v23 = vadd.f32 %v3674_v26, %v3673_v27  ;;  %v5188_v30 = vadd.f32 %v3672_v43, %v5099_v53 }
 0x1e1   : > { %v2370_v21 = vadd.f32 %v5040_v58, %v2282_v42  ;;  %2401 = vst [vmem:[%s5048_s21 + $0xe0] sm:$0xff] %v2369_v37  ;;  %v2432_v15 = vadd.f32 %v2431_v50, %v2369_v37  ;;  %v2470_v10 = vmul.f32 %v2369_v37, %v2369_v37 }
 0x1e2   : > { %v1756_v61 = vpop.f32.mrb[32].mxu0  ;;  %v5195_v2 = vadd.f32 %v3675_v23, %v5103_v25 }
 0x1e3   : > { %2402 = vst [vmem:[%s5048_s21 + $0xe8] sm:$0xff] %v2370_v21  ;;  %v2471_v34 = vmul.f32 %v2370_v21, %v2370_v21  ;;  %v2126_v22 = vadd.f32 %v4960_v33, %v1756_v61  ;;  %v5185_v3 = vpop.f32.mrb[33].mxu0  ;;  %v2501_v55 = vadd.f32 %v2500_v60, %v2470_v10  ;;  %v2433_v45 = vadd.f32 %v2432_v15, %v2370_v21 }
 0x1e4   : > { %v1760_v62 = vpop.f32.mrb[34].mxu0  ;;  %v3676_v41 = vpop.f32.mrb[112].mxu1 }
 0x1e5   : > { %v2287_v4 = vadd.f32 %v5053_v59, %v2126_v22  ;;  %v2129_v50 = vadd.f32 %v4962_v14, %v1760_v62  ;;  %v5192_v13 = vpop.f32.mrb[35].mxu0  ;;  %v2502_v49 = vadd.f32 %v2501_v55, %v2471_v34  ;;  %v3677_v44 = vpop.f32.mrb[113].mxu1 }
 0x1e6   : > { %v3678_v42 = vadd.f32 %v3677_v44, %v3676_v41  ;;  %v3679_v14 = vpop.f32.mrb[114].mxu1 }
 0x1e7   : > { %v2371_v33 = vadd.f32 %v5040_v58, %v2287_v4  ;;  %v2290_v53 = vadd.f32 %v5059_v32, %v2129_v50  ;;  %v3680_v37 = vpop.f32.mrb[115].mxu1 }
 0x1e8   : > { %v3681_v27 = vadd.f32 %v3680_v37, %v3679_v14  ;;  %v5206_v26 = vadd.f32 %v3678_v42, %v5119_v46 }
 0x1e9   : > { %2403 = vst [vmem:[%s5048_s21 + $0x100] sm:$0xff] %v2371_v33  ;;  %v2434_v60 = vadd.f32 %v2433_v45, %v2371_v33  ;;  %v2472_v47 = vmul.f32 %v2371_v33, %v2371_v33  ;;  %v2372_v59 = vadd.f32 %v5040_v58, %v2290_v53 }
 0x1ea   : > { %v1766_v39 = vpop.f32.mrb[36].mxu0  ;;  %v5212_v22 = vadd.f32 %v3681_v27, %v5123_v7 }
 0x1eb   : > { %v2503_v43 = vadd.f32 %v2502_v49, %v2472_v47  ;;  %2404 = vst [vmem:[%s5048_s21 + $0x108] sm:$0xff] %v2372_v59  ;;  %v2435_v25 = vadd.f32 %v2434_v60, %v2372_v59  ;;  %v2473_v21 = vmul.f32 %v2372_v59, %v2372_v59  ;;  %v5202_v15 = vpop.f32.mrb[37].mxu0  ;;  %v2134_v32 = vadd.f32 %v4968_v36, %v1766_v39 }
 0x1ec   : > { %v1770_v10 = vpop.f32.mrb[38].mxu0  ;;  %v3682_v45 = vpop.f32.mrb[116].mxu1 }
 0x1ed   : > { %v2504_v61 = vadd.f32 %v2503_v43, %v2473_v21  ;;  %v2137_v34 = vadd.f32 %v4970_v24, %v1770_v10  ;;  %v5209_v23 = vpop.f32.mrb[39].mxu0  ;;  %v2295_v55 = vadd.f32 %v5051_v8, %v2134_v32  ;;  %v3683_v4 = vpop.f32.mrb[117].mxu1 }
 0x1ee   : > { %v3684_v50 = vadd.f32 %v3683_v4, %v3682_v45  ;;  %v3685_v49 = vpop.f32.mrb[118].mxu1 }
 0x1ef   : > { %v2298_v62 = vadd.f32 %v5057_v28, %v2137_v34  ;;  %v2373_v36 = vadd.f32 %v5040_v58, %v2295_v55  ;;  %v3686_v41 = vpop.f32.mrb[119].mxu1 }
 0x1f0   : > { %v3687_v44 = vadd.f32 %v3686_v41, %v3685_v49  ;;  %v5224_v28 = vadd.f32 %v3684_v50, %v5130_v9 }
 0x1f1   : > { %v2374_v46 = vadd.f32 %v5040_v58, %v2298_v62  ;;  %2405 = vst [vmem:[%s5048_s21 + $0x120] sm:$0xff] %v2373_v36  ;;  %v2436_v24 = vadd.f32 %v2435_v25, %v2373_v36  ;;  %v2474_v33 = vmul.f32 %v2373_v36, %v2373_v36 }
 0x1f2   : > { %v1776_v53 = vpop.f32.mrb[40].mxu0  ;;  %v5231_v43 = vadd.f32 %v3687_v44, %v5137_v12 }
 0x1f3   : > { %2406 = vst [vmem:[%s5048_s21 + $0x128] sm:$0xff] %v2374_v46  ;;  %v2475_v7 = vmul.f32 %v2374_v46, %v2374_v46  ;;  %v2142_v8 = vadd.f32 %v4976_v52, %v1776_v53  ;;  %v5221_v60 = vpop.f32.mrb[41].mxu0  ;;  %v2505_v47 = vadd.f32 %v2504_v61, %v2474_v33  ;;  %v2437_v42 = vadd.f32 %v2436_v24, %v2374_v46 }
 0x1f4   : > { %v1780_v59 = vpop.f32.mrb[42].mxu0  ;;  %v3688_v21 = vpop.f32.mrb[120].mxu1 }
 0x1f5   : > { %v2303_v14 = vadd.f32 %v5071_v18, %v2142_v8  ;;  %v2145_v37 = vadd.f32 %v4978_v48, %v1780_v59  ;;  %v5228_v39 = vpop.f32.mrb[43].mxu0  ;;  %v2506_v25 = vadd.f32 %v2505_v47, %v2475_v7  ;;  %v3689_v27 = vpop.f32.mrb[121].mxu1 }
 0x1f6   : > { %v3690_v61 = vadd.f32 %v3689_v27, %v3688_v21  ;;  %v3691_v48 = vpop.f32.mrb[122].mxu1 }
 0x1f7   : > { %v2375_v52 = vadd.f32 %v5040_v58, %v2303_v14  ;;  %v2306_v9 = vadd.f32 %v5077_v16, %v2145_v37  ;;  %v3692_v34 = vpop.f32.mrb[123].mxu1 }
 0x1f8   : > { %v3693_v36 = vadd.f32 %v3692_v34, %v3691_v48  ;;  %v5242_v46 = vadd.f32 %v3690_v61, %v5149_v29 }
 0x1f9   : > { %2407 = vst [vmem:[%s5048_s21 + $0x140] sm:$0xff] %v2375_v52  ;;  %v2438_v32 = vadd.f32 %v2437_v42, %v2375_v52  ;;  %v2476_v10 = vmul.f32 %v2375_v52, %v2375_v52  ;;  %v2376_v18 = vadd.f32 %v5040_v58, %v2306_v9 }
 0x1fa   : > { %v1786_v55 = vpop.f32.mrb[44].mxu0  ;;  %v5248_v41 = vadd.f32 %v3693_v36, %v5156_v6 }
 0x1fb   : > { %v2507_v45 = vadd.f32 %v2506_v25, %v2476_v10  ;;  %2408 = vst [vmem:[%s5048_s21 + $0x148] sm:$0xff] %v2376_v18  ;;  %v2439_v12 = vadd.f32 %v2438_v32, %v2376_v18  ;;  %v2477_v62 = vmul.f32 %v2376_v18, %v2376_v18  ;;  %v5238_v4 = vpop.f32.mrb[45].mxu0  ;;  %v2150_v16 = vadd.f32 %v4984_v51, %v1786_v55  ;;  %v5510_v10 = vld [vmem:[#allocation4_spill] sm:$0xff] }
 0x1fc   : > { %v1790_v50 = vpop.f32.mrb[46].mxu0  ;;  %v3694_v7 = vpop.f32.mrb[124].mxu1 }
 0x1fd   : > { %v2508_v49 = vadd.f32 %v2507_v45, %v2477_v62  ;;  %v2153_v24 = vadd.f32 %v4986_v20, %v1790_v50  ;;  %v5245_v33 = vpop.f32.mrb[47].mxu0  ;;  %v2311_v53 = vadd.f32 %v5069_v11, %v2150_v16  ;;  %v3695_v8 = vpop.f32.mrb[125].mxu1 }
 0x1fe   : > { %v3696_v47 = vadd.f32 %v3695_v8, %v3694_v7  ;;  %v3697_v42 = vpop.f32.mrb[126].mxu1 }
 0x1ff   : > { %v2314_v44 = vadd.f32 %v5075_v63, %v2153_v24  ;;  %v2377_v51 = vadd.f32 %v5040_v58, %v2311_v53  ;;  %v3698_v14 = vpop.f32.mrb[127].mxu1 }
 0x200   : > { %v3699_v25 = vadd.f32 %v3698_v14, %v3697_v42  ;;  %v5260_v63 = vadd.f32 %v3696_v47, %v5166_v40  ;;  %v5512_v42 = vld [vmem:[#allocation6_spill] sm:$0xff] }
 0x201   : > { %v2378_v29 = vadd.f32 %v5040_v58, %v2314_v44  ;;  %2409 = vst [vmem:[%s5048_s21 + $0x160] sm:$0xff] %v2377_v51  ;;  %v2440_v20 = vadd.f32 %v2439_v12, %v2377_v51  ;;  %v2478_v59 = vmul.f32 %v2377_v51, %v2377_v51  ;;  %v5511_v51 = vld [vmem:[#allocation5_spill] sm:$0xff] }
 0x202   : > { %v1796_v37 = vpop.f32.mrb[48].mxu0  ;;  %v5267_v48 = vadd.f32 %v3699_v25, %v5173_v31  ;;  %v5513_v25 = vld [vmem:[#allocation11_spill] sm:$0xff] }
 0x203   : > { %2410 = vst [vmem:[%s5048_s21 + $0x168] sm:$0xff] %v2378_v29  ;;  %v2479_v6 = vmul.f32 %v2378_v29, %v2378_v29  ;;  %v2158_v11 = vadd.f32 %v4991_v35, %v1796_v37  ;;  %v5257_v52 = vpop.f32.mrb[49].mxu0  ;;  %v2509_v21 = vadd.f32 %v2508_v49, %v2478_v59  ;;  %v2441_v9 = vadd.f32 %v2440_v20, %v2378_v29 }
 0x204   : > { %v1800_v27 = vpop.f32.mrb[50].mxu0  ;;  %v3700_v55 = vpop.f32.mrb[128].mxu1 }
 0x205   : > { %v2319_v32 = vadd.f32 %v5089_v54, %v2158_v11  ;;  %v2161_v61 = vadd.f32 %v5510_v10, %v1800_v27  ;;  %v5264_v18 = vpop.f32.mrb[51].mxu0  ;;  %v2510_v34 = vadd.f32 %v2509_v21, %v2479_v6  ;;  %v3701_v45 = vpop.f32.mrb[129].mxu1 }
 0x206   : > { %v3702_v36 = vadd.f32 %v3701_v45, %v3700_v55  ;;  %v3703_v16 = vpop.f32.mrb[130].mxu1 }
 0x207   : > { %v2379_v35 = vadd.f32 %v5040_v58, %v2319_v32  ;;  %v2322_v40 = vadd.f32 %v5095_v17, %v2161_v61  ;;  %v3704_v50 = vpop.f32.mrb[131].mxu1 }
 0x208   : > { %v3705_v7 = vadd.f32 %v3704_v50, %v3703_v16  ;;  %v5278_v47 = vadd.f32 %v3702_v36, %v5185_v3  ;;  %v5515_v16 = vld [vmem:[#allocation13_spill] sm:$0xff] }
 0x209   : > { %2411 = vst [vmem:[%s5048_s21 + $0x180] sm:$0xff] %v2379_v35  ;;  %v2442_v12 = vadd.f32 %v2441_v9, %v2379_v35  ;;  %v2480_v62 = vmul.f32 %v2379_v35, %v2379_v35  ;;  %v2380_v54 = vadd.f32 %v5040_v58, %v2322_v40  ;;  %v5514_v40 = vld [vmem:[#allocation7_spill] sm:$0xff] }
 0x20a   : > { %v1806_v49 = vpop.f32.mrb[52].mxu0  ;;  %v5284_v14 = vadd.f32 %v3705_v7, %v5192_v13 }
 0x20b   : > { %v2511_v24 = vadd.f32 %v2510_v34, %v2480_v62  ;;  %2412 = vst [vmem:[%s5048_s21 + $0x188] sm:$0xff] %v2380_v54  ;;  %v2443_v31 = vadd.f32 %v2442_v12, %v2380_v54  ;;  %v2481_v53 = vmul.f32 %v2380_v54, %v2380_v54  ;;  %v5274_v44 = vpop.f32.mrb[53].mxu0  ;;  %v2166_v17 = vadd.f32 %v5511_v51, %v1806_v49  ;;  %v5516_v49 = vld [vmem:[#allocation8_spill] sm:$0xff] }
 0x20c   : > { %v1810_v8 = vpop.f32.mrb[54].mxu0  ;;  %v3706_v6 = vpop.f32.mrb[132].mxu1 }
 0x20d   : > { %v2512_v29 = vadd.f32 %v2511_v24, %v2481_v53  ;;  %v2169_v20 = vadd.f32 %v5512_v42, %v1810_v8  ;;  %v5281_v59 = vpop.f32.mrb[55].mxu0  ;;  %v2327_v37 = vadd.f32 %v5087_v5, %v2166_v17  ;;  %v3707_v9 = vpop.f32.mrb[133].mxu1  ;;  %v5517_v8 = vld [vmem:[#allocation15_spill] sm:$0xff] }
 0x20e   : > { %v3708_v27 = vadd.f32 %v3707_v9, %v3706_v6  ;;  %v3709_v32 = vpop.f32.mrb[134].mxu1 }
 0x20f   : > { %v2330_v11 = vadd.f32 %v5513_v25, %v2169_v20  ;;  %v2381_v21 = vadd.f32 %v5040_v58, %v2327_v37  ;;  %v3710_v34 = vpop.f32.mrb[135].mxu1 }
 0x210   : > { %v3711_v55 = vadd.f32 %v3710_v34, %v3709_v32  ;;  %v5296_v12 = vadd.f32 %v3708_v27, %v5202_v15 }
 0x211   : > { %v2382_v3 = vadd.f32 %v5040_v58, %v2330_v11  ;;  %2413 = vst [vmem:[%s5048_s21 + $0x1a0] sm:$0xff] %v2381_v21  ;;  %v2444_v10 = vadd.f32 %v2443_v31, %v2381_v21  ;;  %v2482_v61 = vmul.f32 %v2381_v21, %v2381_v21 }
 0x212   : > { %v1816_v35 = vpop.f32.mrb[56].mxu0  ;;  %v5303_v53 = vadd.f32 %v3711_v55, %v5209_v23  ;;  %v5519_v55 = vld [vmem:[#allocation10_spill] sm:$0xff] }
 0x213   : > { %2414 = vst [vmem:[%s5048_s21 + $0x1a8] sm:$0xff] %v2382_v3  ;;  %v2483_v13 = vmul.f32 %v2382_v3, %v2382_v3  ;;  %v2174_v5 = vadd.f32 %v5514_v40, %v1816_v35  ;;  %v5293_v45 = vpop.f32.mrb[57].mxu0  ;;  %v2513_v62 = vadd.f32 %v2512_v29, %v2482_v61  ;;  %v2445_v36 = vadd.f32 %v2444_v10, %v2382_v3  ;;  %v5518_v10 = vld [vmem:[#allocation9_spill] sm:$0xff] }
 0x214   : > { %v1820_v54 = vpop.f32.mrb[58].mxu0  ;;  %v3712_v17 = vpop.f32.mrb[136].mxu1 }
 0x215   : > { %v2335_v50 = vadd.f32 %v5515_v16, %v2174_v5  ;;  %v2177_v24 = vadd.f32 %v5516_v49, %v1820_v54  ;;  %v5300_v31 = vpop.f32.mrb[59].mxu0  ;;  %v2514_v7 = vadd.f32 %v2513_v62, %v2483_v13  ;;  %v3713_v42 = vpop.f32.mrb[137].mxu1 }
 0x216   : > { %v3714_v37 = vadd.f32 %v3713_v42, %v3712_v17  ;;  %v3715_v25 = vpop.f32.mrb[138].mxu1 }
 0x217   : > { %v2383_v51 = vadd.f32 %v5040_v58, %v2335_v50  ;;  %v2338_v15 = vadd.f32 %v5517_v8, %v2177_v24  ;;  %v3716_v11 = vpop.f32.mrb[139].mxu1  ;;  %v5521_v50 = vld [vmem:[#allocation14_spill] sm:$0xff] }
 0x218   : > { %v3717_v3 = vadd.f32 %v3716_v11, %v3715_v25  ;;  %v5314_v35 = vadd.f32 %v3714_v37, %v5221_v60 }
 0x219   : > { %2415 = vst [vmem:[%s5048_s21 + $0x1c0] sm:$0xff] %v2383_v51  ;;  %v2446_v29 = vadd.f32 %v2445_v36, %v2383_v51  ;;  %v2484_v20 = vmul.f32 %v2383_v51, %v2383_v51  ;;  %v2384_v6 = vadd.f32 %v5040_v58, %v2338_v15  ;;  %v5520_v36 = vld [vmem:[#allocation12_spill] sm:$0xff] }
 0x21a   : > { %v1826_v21 = vpop.f32.mrb[60].mxu0  ;;  %v5320_v62 = vadd.f32 %v3717_v3, %v5228_v39 }
 0x21b   : > { %v2515_v9 = vadd.f32 %v2514_v7, %v2484_v20  ;;  %2416 = vst [vmem:[%s5048_s21 + $0x1c8] sm:$0xff] %v2384_v6  ;;  %v2447_v23 = vadd.f32 %v2446_v29, %v2384_v6  ;;  %v2485_v27 = vmul.f32 %v2384_v6, %v2384_v6  ;;  %v5310_v32 = vpop.f32.mrb[61].mxu0  ;;  %v2182_v61 = vadd.f32 %v5518_v10, %v1826_v21 }
 0x21c   : > { %v1830_v34 = vpop.f32.mrb[62].mxu0  ;;  %v3718_v16 = vpop.f32.mrb[140].mxu1 }
 0x21d   : > { %v2516_v13 = vadd.f32 %v2515_v9, %v2485_v27  ;;  %v2185_v40 = vadd.f32 %v5519_v55, %v1830_v34  ;;  %v5317_v5 = vpop.f32.mrb[63].mxu0  ;;  %v2343_v54 = vadd.f32 %v5520_v36, %v2182_v61  ;;  %v3719_v7 = vpop.f32.mrb[141].mxu1 }
 0x21e   : > { %v3720_v51 = vadd.f32 %v3719_v7, %v3718_v16  ;;  %v3721_v17 = vpop.f32.mrb[142].mxu1 }
 0x21f   : > { %v2346_v49 = vadd.f32 %v5521_v50, %v2185_v40  ;;  %v2385_v24 = vadd.f32 %v5040_v58, %v2343_v54  ;;  %v3722_v42 = vpop.f32.mrb[143].mxu1 }
 0x220   : > { %v3723_v20 = vadd.f32 %v3722_v42, %v3721_v17  ;;  %v5330_v25 = vadd.f32 %v3720_v51, %v5238_v4 }
 0x221   : > { %v2386_v60 = vadd.f32 %v5040_v58, %v2346_v49  ;;  %2417 = vst [vmem:[%s5048_s21 + $0x1e0] sm:$0xff] %v2385_v24  ;;  %v2448_v8 = vadd.f32 %v2447_v23, %v2385_v24  ;;  %v2486_v15 = vmul.f32 %v2385_v24, %v2385_v24 }
 0x222   : > { %v3838_v29 = vpop.f32.mrb[64].mxu0 }
 0x223   : > { %2418 = vst [vmem:[%s5048_s21 + $0x1e8] sm:$0xff] %v2386_v60  ;;  %v2487_v39 = vmul.f32 %v2386_v60, %v2386_v60  ;;  %v2921_v37 = vadd.f32 %v3838_v29, %v5152_v0  ;;  %v2912_v6 = vpop.f32.mrb[65].mxu0  ;;  %v2517_v11 = vadd.f32 %v2516_v13, %v2486_v15  ;;  %v5332_v21 = vadd.f32 %v2448_v8, %v2386_v60 }
 0x224   : > { %v2913_v9 = vadd.f32 %v2912_v6, %v5134_v38  ;;  %v3839_v23 = vpop.f32.mrb[66].mxu0  ;;  %v5338_v0 = vadd.f32 %v3723_v20, %v5245_v33  ;;  %v3724_v13 = vpop.f32.mrb[144].mxu1 }
 0x225   : > { %v3041_v27 = vadd.f32 %v5040_v58, %v2921_v37  ;;  %v2924_v3 = vadd.f32 %v3839_v23, %v5159_v19  ;;  %v2915_v10 = vpop.f32.mrb[67].mxu0  ;;  %v5340_v61 = vadd.f32 %v2517_v11, %v2487_v39  ;;  %v3725_v55 = vpop.f32.mrb[145].mxu1 }
 0x226   : > { %v3039_v4 = vadd.f32 %v5040_v58, %v2913_v9  ;;  %v2916_v34 = vadd.f32 %v2915_v10, %v5140_v1  ;;  %v3726_v19 = vadd.f32 %v3725_v55, %v3724_v13  ;;  %v3727_v36 = vpop.f32.mrb[146].mxu1 }
 0x227   : > { %3466 = vst [vmem:[%s5048_s21 + $0x30] sm:$0xff] %v3041_v27  ;;  %v3042_v38 = vadd.f32 %v5040_v58, %v2924_v3  ;;  %v3728_v33 = vpop.f32.mrb[147].mxu1  ;;  %v3144_v60 = vmul.f32 %v3041_v27, %v3041_v27 }
 0x228   : > { %3464 = vst [vmem:[%s5048_s21 + $0x10] sm:$0xff] %v3039_v4  ;;  %v3040_v40 = vadd.f32 %v5040_v58, %v2916_v34  ;;  %v3142_v54 = vmul.f32 %v3039_v4, %v3039_v4  ;;  %v3729_v24 = vadd.f32 %v3728_v33, %v3727_v36  ;;  %v5352_v51 = vadd.f32 %v3726_v19, %v5257_v52 }
 0x229   : > { %3467 = vst [vmem:[%s5048_s21 + $0x38] sm:$0xff] %v3042_v38  ;;  %v3145_v29 = vmul.f32 %v3042_v38, %v3042_v38 }
 0x22a   : > { %3465 = vst [vmem:[%s5048_s21 + $0x18] sm:$0xff] %v3040_v40  ;;  %v3104_v16 = vadd.f32 %v3040_v40, %v3039_v4  ;;  %v3143_v50 = vmul.f32 %v3040_v40, %v3040_v40  ;;  %v3842_v49 = vpop.f32.mrb[68].mxu0 }
 0x22b   : > { %v2937_v1 = vadd.f32 %v3842_v49, %v5188_v30  ;;  %v2928_v7 = vpop.f32.mrb[69].mxu0  ;;  %v5358_v30 = vadd.f32 %v3729_v24, %v5264_v18 }
 0x22c   : > { %v3105_v17 = vadd.f32 %v3104_v16, %v3041_v27  ;;  %v3174_v8 = vadd.f32 %v3143_v50, %v3142_v54  ;;  %v2929_v15 = vadd.f32 %v2928_v7, %v5170_v56  ;;  %v3843_v42 = vpop.f32.mrb[70].mxu0  ;;  %v3730_v23 = vpop.f32.mrb[148].mxu1 }
 0x22d   : > { %v3045_v39 = vadd.f32 %v5040_v58, %v2937_v1  ;;  %v2940_v20 = vadd.f32 %v3843_v42, %v5195_v2  ;;  %v2931_v37 = vpop.f32.mrb[71].mxu0  ;;  %v3731_v27 = vpop.f32.mrb[149].mxu1 }
 0x22e   : > { %v3175_v52 = vadd.f32 %v3174_v8, %v3144_v60  ;;  %v3043_v6 = vadd.f32 %v5040_v58, %v2929_v15  ;;  %v3106_v11 = vadd.f32 %v3105_v17, %v3042_v38  ;;  %v2932_v9 = vadd.f32 %v2931_v37, %v5176_v57  ;;  %v3733_v34 = vpop.f32.mrb[150].mxu1 }
 0x22f   : > { %3470 = vst [vmem:[%s5048_s21 + $0x70] sm:$0xff] %v3045_v39  ;;  %v3046_v56 = vadd.f32 %v5040_v58, %v2940_v20  ;;  %v3732_v4 = vadd.f32 %v3731_v27, %v3730_v23  ;;  %v3734_v55 = vpop.f32.mrb[151].mxu1  ;;  %v3148_v16 = vmul.f32 %v3045_v39, %v3045_v39 }
 0x230   : > { %3468 = vst [vmem:[%s5048_s21 + $0x50] sm:$0xff] %v3043_v6  ;;  %v3107_v3 = vadd.f32 %v3106_v11, %v3043_v6  ;;  %v3146_v2 = vmul.f32 %v3043_v6, %v3043_v6  ;;  %v3176_v10 = vadd.f32 %v3175_v52, %v3145_v29  ;;  %v3044_v18 = vadd.f32 %v5040_v58, %v2932_v9 }
 0x231   : > { %3471 = vst [vmem:[%s5048_s21 + $0x78] sm:$0xff] %v3046_v56  ;;  %v3735_v19 = vadd.f32 %v3734_v55, %v3733_v34  ;;  %v5370_v33 = vadd.f32 %v3732_v4, %v5274_v44  ;;  %v3149_v7 = vmul.f32 %v3046_v56, %v3046_v56 }
 0x232   : > { %v3177_v13 = vadd.f32 %v3176_v10, %v3146_v2  ;;  %3469 = vst [vmem:[%s5048_s21 + $0x58] sm:$0xff] %v3044_v18  ;;  %v3108_v38 = vadd.f32 %v3107_v3, %v3044_v18  ;;  %v3147_v40 = vmul.f32 %v3044_v18, %v3044_v18  ;;  %v3846_v57 = vpop.f32.mrb[72].mxu0 }
 0x233   : > { %v2953_v36 = vadd.f32 %v3846_v57, %v5224_v28  ;;  %v2944_v54 = vpop.f32.mrb[73].mxu0  ;;  %v5376_v28 = vadd.f32 %v3735_v19, %v5281_v59 }
 0x234   : > { %v3109_v50 = vadd.f32 %v3108_v38, %v3045_v39  ;;  %v3178_v49 = vadd.f32 %v3177_v13, %v3147_v40  ;;  %v2945_v24 = vadd.f32 %v2944_v54, %v5206_v26  ;;  %v3847_v1 = vpop.f32.mrb[74].mxu0  ;;  %v3736_v39 = vpop.f32.mrb[152].mxu1 }
 0x235   : > { %v3049_v60 = vadd.f32 %v5040_v58, %v2953_v36  ;;  %v2956_v17 = vadd.f32 %v3847_v1, %v5231_v43  ;;  %v2947_v8 = vpop.f32.mrb[75].mxu0  ;;  %v3737_v20 = vpop.f32.mrb[153].mxu1 }
 0x236   : > { %v3179_v44 = vadd.f32 %v3178_v49, %v3148_v16  ;;  %v3047_v15 = vadd.f32 %v5040_v58, %v2945_v24  ;;  %v3110_v42 = vadd.f32 %v3109_v50, %v3046_v56  ;;  %v2948_v29 = vadd.f32 %v2947_v8, %v5212_v22  ;;  %v3739_v11 = vpop.f32.mrb[154].mxu1  ;;  %v5402_v49 = vld [vmem:[%s5493_s4] ss:$0 sm:$0xff] }
 0x237   : > { %3474 = vst [vmem:[%s5048_s21 + $0xb0] sm:$0xff] %v3049_v60  ;;  %v3050_v26 = vadd.f32 %v5040_v58, %v2956_v17  ;;  %v3738_v6 = vadd.f32 %v3737_v20, %v3736_v39  ;;  %v3740_v23 = vpop.f32.mrb[155].mxu1  ;;  %v3152_v4 = vmul.f32 %v3049_v60, %v3049_v60 }
 0x238   : > { %3472 = vst [vmem:[%s5048_s21 + $0x90] sm:$0xff] %v3047_v15  ;;  %v3111_v37 = vadd.f32 %v3110_v42, %v3047_v15  ;;  %v3150_v43 = vmul.f32 %v3047_v15, %v3047_v15  ;;  %v3180_v52 = vadd.f32 %v3179_v44, %v3149_v7  ;;  %v3048_v59 = vadd.f32 %v5040_v58, %v2948_v29 }
 0x239   : > { %3475 = vst [vmem:[%s5048_s21 + $0xb8] sm:$0xff] %v3050_v26  ;;  %v3741_v3 = vadd.f32 %v3740_v23, %v3739_v11  ;;  %v5388_v18 = vadd.f32 %v3738_v6, %v5293_v45  ;;  %v3153_v40 = vmul.f32 %v3050_v26, %v3050_v26 }
 0x23a   : > { %v3181_v9 = vadd.f32 %v3180_v52, %v3150_v43  ;;  %3473 = vst [vmem:[%s5048_s21 + $0x98] sm:$0xff] %v3048_v59  ;;  %v3112_v56 = vadd.f32 %v3111_v37, %v3048_v59  ;;  %v3151_v27 = vmul.f32 %v3048_v59, %v3048_v59  ;;  %v3850_v22 = vpop.f32.mrb[76].mxu0 }
 0x23b   : > { %v2969_v2 = vadd.f32 %v3850_v22, %v5260_v63  ;;  %v2960_v10 = vpop.f32.mrb[77].mxu0  ;;  %v5394_v63 = vadd.f32 %v3741_v3, %v5300_v31 }
 0x23c   : > { %v3113_v34 = vadd.f32 %v3112_v56, %v3049_v60  ;;  %v3182_v13 = vadd.f32 %v3181_v9, %v3151_v27  ;;  %v2961_v55 = vadd.f32 %v2960_v10, %v5242_v46  ;;  %v3851_v38 = vpop.f32.mrb[78].mxu0  ;;  %v3742_v46 = vpop.f32.mrb[156].mxu1 }
 0x23d   : > { %v3053_v57 = vadd.f32 %v5040_v58, %v2969_v2  ;;  %v2972_v19 = vadd.f32 %v3851_v38, %v5267_v48  ;;  %v2963_v36 = vpop.f32.mrb[79].mxu0  ;;  %v3743_v24 = vpop.f32.mrb[157].mxu1 }
 0x23e   : > { %v3183_v54 = vadd.f32 %v3182_v13, %v3152_v4  ;;  %v3051_v45 = vadd.f32 %v5040_v58, %v2961_v55  ;;  %v3114_v16 = vadd.f32 %v3113_v34, %v3050_v26  ;;  %v2964_v50 = vadd.f32 %v2963_v36, %v5248_v41  ;;  %v3745_v17 = vpop.f32.mrb[158].mxu1 }
 0x23f   : > { %3478 = vst [vmem:[%s5048_s21 + $0xf0] sm:$0xff] %v3053_v57  ;;  %v3054_v48 = vadd.f32 %v5402_v49, %v2972_v19  ;;  %v3744_v60 = vadd.f32 %v3743_v24, %v3742_v46  ;;  %v3746_v8 = vpop.f32.mrb[159].mxu1  ;;  %v3156_v37 = vmul.f32 %v3053_v57, %v3053_v57 }
 0x240   : > { %3476 = vst [vmem:[%s5048_s21 + $0xd0] sm:$0xff] %v3051_v45  ;;  %v3115_v31 = vadd.f32 %v3114_v16, %v3051_v45  ;;  %v3154_v1 = vmul.f32 %v3051_v45, %v3051_v45  ;;  %v3184_v7 = vadd.f32 %v3183_v54, %v3153_v40  ;;  %v3052_v58 = vadd.f32 %v5402_v49, %v2964_v50 }
 0x241   : > { %3479 = vst [vmem:[%s5048_s21 + $0xf8] sm:$0xff] %v3054_v48  ;;  %v3747_v29 = vadd.f32 %v3746_v8, %v3745_v17  ;;  %v2872_v20 = vadd.f32 %v3744_v60, %v5310_v32  ;;  %v3157_v11 = vmul.f32 %v3054_v48, %v3054_v48 }
 0x242   : > { %v3185_v41 = vadd.f32 %v3184_v7, %v3154_v1  ;;  %3477 = vst [vmem:[%s5048_s21 + $0xd8] sm:$0xff] %v3052_v58  ;;  %v3116_v44 = vadd.f32 %v3115_v31, %v3052_v58  ;;  %v3155_v15 = vmul.f32 %v3052_v58, %v3052_v58  ;;  %v3854_v42 = vpop.f32.mrb[80].mxu0 }
 0x243   : > { %v2985_v39 = vadd.f32 %v3854_v42, %v5296_v12  ;;  %v2976_v26 = vpop.f32.mrb[81].mxu0  ;;  %v5415_v12 = vadd.f32 %v3747_v29, %v5317_v5 }
 0x244   : > { %v3117_v43 = vadd.f32 %v3116_v44, %v3053_v57  ;;  %v3186_v52 = vadd.f32 %v3185_v41, %v3155_v15  ;;  %v2977_v59 = vadd.f32 %v2976_v26, %v5278_v47  ;;  %v3855_v6 = vpop.f32.mrb[82].mxu0  ;;  %v3862_v2 = vpop.f32.mrb[160].mxu1 }
 0x245   : > { %v3057_v9 = vadd.f32 %v5402_v49, %v2985_v39  ;;  %v2988_v23 = vadd.f32 %v3855_v6, %v5303_v53  ;;  %v2979_v56 = vpop.f32.mrb[83].mxu0  ;;  %v3017_v10 = vadd.f32 %v3862_v2, %v5370_v33  ;;  %v3008_v13 = vpop.f32.mrb[161].mxu1 }
 0x246   : > { %v3187_v27 = vadd.f32 %v3186_v52, %v3156_v37  ;;  %v3055_v32 = vadd.f32 %v5402_v49, %v2977_v59  ;;  %v3118_v22 = vadd.f32 %v3117_v43, %v3054_v48  ;;  %v2980_v3 = vadd.f32 %v2979_v56, %v5284_v14  ;;  %v3863_v55 = vpop.f32.mrb[162].mxu1 }
 0x247   : > { %3482 = vst [vmem:[%s5048_s21 + $0x130] sm:$0xff] %v3057_v9  ;;  %v3058_v47 = vadd.f32 %v5402_v49, %v2988_v23  ;;  %v3009_v5 = vadd.f32 %v3008_v13, %v5352_v51  ;;  %v5427_v14 = vadd.f32 %v5402_v49, %v3017_v10  ;;  %v3020_v33 = vadd.f32 %v3863_v55, %v5376_v28  ;;  %v3011_v57 = vpop.f32.mrb[163].mxu1 }
 0x248   : > { %3480 = vst [vmem:[%s5048_s21 + $0x110] sm:$0xff] %v3055_v32  ;;  %v3119_v53 = vadd.f32 %v3118_v22, %v3055_v32  ;;  %v3158_v4 = vmul.f32 %v3055_v32, %v3055_v32  ;;  %v3188_v34 = vadd.f32 %v3187_v27, %v3157_v11  ;;  %v3056_v38 = vadd.f32 %v5402_v49, %v2980_v3 }
 0x249   : > { %3483 = vst [vmem:[%s5048_s21 + $0x138] sm:$0xff] %v3058_v47  ;;  %v3063_v36 = vadd.f32 %v5402_v49, %v3009_v5  ;;  %v3012_v51 = vadd.f32 %v3011_v57, %v5358_v30  ;;  %3490 = vst [vmem:[%s5048_s21 + $0x1b0] sm:$0xff] %v5427_v14  ;;  %v5436_v50 = vadd.f32 %v5402_v49, %v3020_v33  ;;  %v2450_v57 = vrot.slane %v5332_v21, 4 }
 0x24a   : > { %v3189_v40 = vadd.f32 %v3188_v34, %v3158_v4  ;;  %v3858_v19 = vpop.f32.mrb[84].mxu0  ;;  %3481 = vst [vmem:[%s5048_s21 + $0x118] sm:$0xff] %v3056_v38  ;;  %v3120_v54 = vadd.f32 %v3119_v53, %v3056_v38  ;;  %v3159_v45 = vmul.f32 %v3056_v38, %v3056_v38  ;;  %v3160_v24 = vmul.f32 %v3057_v9, %v3057_v9 }
 0x24b   : > { %v2992_v16 = vpop.f32.mrb[85].mxu0  ;;  %v3001_v46 = vadd.f32 %v3858_v19, %v5330_v25  ;;  %3488 = vst [vmem:[%s5048_s21 + $0x190] sm:$0xff] %v3063_v36  ;;  %v3064_v30 = vadd.f32 %v5402_v49, %v3012_v51  ;;  %3491 = vst [vmem:[%s5048_s21 + $0x1b8] sm:$0xff] %v5436_v50  ;;  %v3161_v17 = vmul.f32 %v3058_v47, %v3058_v47 }
 0x24c   : > { %v2993_v28 = vadd.f32 %v2992_v16, %v5314_v35  ;;  %v3859_v48 = vpop.f32.mrb[86].mxu0  ;;  %v3121_v31 = vadd.f32 %v3120_v54, %v3057_v9  ;;  %v3190_v1 = vadd.f32 %v3189_v40, %v3159_v45  ;;  %v3866_v41 = vpop.f32.mrb[164].mxu1  ;;  %v3166_v10 = vmul.f32 %v3063_v36, %v3063_v36 }
 0x24d   : > { %v2995_v7 = vpop.f32.mrb[87].mxu0  ;;  %v3061_v58 = vadd.f32 %v5402_v49, %v3001_v46  ;;  %v3004_v25 = vadd.f32 %v3859_v48, %v5338_v0  ;;  %3489 = vst [vmem:[%s5048_s21 + $0x198] sm:$0xff] %v3064_v30  ;;  %v3033_v15 = vadd.f32 %v3866_v41, %v2872_v20  ;;  %v3024_v29 = vpop.f32.mrb[165].mxu1  ;;  %v3167_v34 = vmul.f32 %v3064_v30, %v3064_v30 }
 0x24e   : > { %v3059_v60 = vadd.f32 %v5402_v49, %v2993_v28  ;;  %v3191_v35 = vadd.f32 %v3190_v1, %v3160_v24  ;;  %v3122_v8 = vadd.f32 %v3121_v31, %v3058_v47  ;;  %v2996_v44 = vadd.f32 %v2995_v7, %v5320_v62  ;;  %v3867_v43 = vpop.f32.mrb[166].mxu1 }
 0x24f   : > { %3486 = vst [vmem:[%s5048_s21 + $0x170] sm:$0xff] %v3061_v58  ;;  %v3062_v39 = vadd.f32 %v5402_v49, %v3004_v25  ;;  %v3025_v0 = vadd.f32 %v3024_v29, %v5388_v18  ;;  %v3069_v59 = vadd.f32 %v5402_v49, %v3033_v15  ;;  %v3036_v62 = vadd.f32 %v3867_v43, %v5415_v12  ;;  %v3027_v20 = vpop.f32.mrb[167].mxu1 }
 0x250   : > { %3484 = vst [vmem:[%s5048_s21 + $0x150] sm:$0xff] %v3059_v60  ;;  %v3162_v42 = vmul.f32 %v3059_v60, %v3059_v60  ;;  %v3123_v26 = vadd.f32 %v3122_v8, %v3059_v60  ;;  %v3192_v37 = vadd.f32 %v3191_v35, %v3161_v17  ;;  %v3060_v52 = vadd.f32 %v5402_v49, %v2996_v44 }
 0x251   : > { %3487 = vst [vmem:[%s5048_s21 + $0x178] sm:$0xff] %v3062_v39  ;;  %v3067_v11 = vadd.f32 %v5402_v49, %v3025_v0  ;;  %3494 = vst [vmem:[%s5048_s21 + $0x1f0] sm:$0xff] %v3069_v59  ;;  %v3070_v18 = vadd.f32 %v5402_v49, %v3036_v62  ;;  %v3028_v56 = vadd.f32 %v3027_v20, %v5394_v63  ;;  %v2519_v45 = vrot.slane %v5340_v61, 4 }
 0x252   : > { %v3193_v6 = vadd.f32 %v3192_v37, %v3162_v42  ;;  %3485 = vst [vmem:[%s5048_s21 + $0x158] sm:$0xff] %v3060_v52  ;;  %v3124_v9 = vadd.f32 %v3123_v26, %v3060_v52  ;;  %v3163_v23 = vmul.f32 %v3060_v52, %v3060_v52  ;;  %v3164_v27 = vmul.f32 %v3061_v58, %v3061_v58 }
 0x253   : > { %3492 = vst [vmem:[%s5048_s21 + $0x1d0] sm:$0xff] %v3067_v11  ;;  %3495 = vst [vmem:[%s5048_s21 + $0x1f8] sm:$0xff] %v3070_v18  ;;  %v3068_v12 = vadd.f32 %v5402_v49, %v3028_v56  ;;  %v3165_v3 = vmul.f32 %v3062_v39, %v3062_v39  ;;  %v3168_v63 = vmul.f32 %v5427_v14, %v5427_v14 }
 0x254   : > { %v3125_v32 = vadd.f32 %v3124_v9, %v3061_v58  ;;  %v3194_v22 = vadd.f32 %v3193_v6, %v3163_v23  ;;  %v3169_v40 = vmul.f32 %v5436_v50, %v5436_v50  ;;  %v3170_v19 = vmul.f32 %v3067_v11, %v3067_v11 }
 0x255   : > { %3493 = vst [vmem:[%s5048_s21 + $0x1d8] sm:$0xff] %v3068_v12  ;;  %v3171_v16 = vmul.f32 %v3068_v12, %v3068_v12  ;;  %v2451_v28 = vadd.f32 %v2450_v57, %v5332_v21  ;;  %v2520_v31 = vadd.f32 %v2519_v45, %v5340_v61  ;;  %v3173_v1 = vmul.f32 %v3070_v18, %v3070_v18 }
 0x256   : > { %v3126_v2 = vadd.f32 %v3125_v32, %v3062_v39  ;;  %v3195_v47 = vadd.f32 %v3194_v22, %v3164_v27 }
 0x257   : > { %v2521_v60 = vrot.slane %v2520_v31, 2 }
 0x258   : > { %v3127_v53 = vadd.f32 %v3126_v2, %v3063_v36  ;;  %v3196_v4 = vadd.f32 %v3195_v47, %v3165_v3 }
 0x259   : > { %v2522_v44 = vadd.f32 %v2521_v60, %v2520_v31 }
 0x25a   : > { %v3197_v13 = vadd.f32 %v3196_v4, %v3166_v10  ;;  %v3128_v5 = vadd.f32 %v3127_v53, %v3064_v30  ;;  %v2452_v30 = vrot.slane %v2451_v28, 2 }
 0x25b   : > { %v2523_v26 = vrot.slane %v2522_v44, 1 }
 0x25c   : > { %v3129_v55 = vadd.f32 %v3128_v5, %v5427_v14  ;;  %v3198_v38 = vadd.f32 %v3197_v13, %v3167_v34  ;;  %v3172_v14 = vmul.f32 %v3069_v59, %v3069_v59  ;;  %v2453_v17 = vadd.f32 %v2452_v30, %v2451_v28 }
 0x25e   : > { %v3130_v49 = vadd.f32 %v3129_v55, %v5436_v50  ;;  %v3199_v33 = vadd.f32 %v3198_v38, %v3168_v63  ;;  %v2454_v42 = vrot.slane %v2453_v17, 1 }
 0x260   : > { %v3131_v36 = vadd.f32 %v3130_v49, %v3067_v11  ;;  %v3200_v54 = vadd.f32 %v3199_v33, %v3169_v40  ;;  %v2455_v37 = vadd.f32 %v2454_v42, %v2453_v17 }
 0x262   : > { %v3132_v51 = vadd.f32 %v3131_v36, %v3068_v12  ;;  %v3201_v46 = vadd.f32 %v3200_v54, %v3170_v19 }
 0x264   : > { %v3133_v48 = vadd.f32 %v3132_v51, %v3069_v59  ;;  %v3202_v24 = vadd.f32 %v3201_v46, %v3171_v16  ;;  %v2524_v59 = vadd.f32 %v2523_v26, %v2522_v44 }
 0x266   : > { %v3203_v50 = vadd.f32 %v3202_v24, %v3172_v14  ;;  %v3134_v7 = vadd.f32 %v3133_v48, %v3070_v18 }
 0x268   : > { %v3135_v58 = vrot.slane %v3134_v7, 4  ;;  %v3204_v25 = vadd.f32 %v3203_v50, %v3173_v1 }
 0x26a   : > { %v3136_v35 = vadd.f32 %v3135_v58, %v3134_v7  ;;  %v3205_v41 = vrot.slane %v3204_v25, 4 }
 0x26c   : > { %v3137_v8 = vrot.slane %v3136_v35, 2  ;;  %v3206_v15 = vadd.f32 %v3205_v41, %v3204_v25 }
 0x26e   : > { %v3138_v21 = vadd.f32 %v3137_v8, %v3136_v35  ;;  %v3207_v29 = vrot.slane %v3206_v15, 2 }
 0x270   : > { %v3139_v39 = vrot.slane %v3138_v21, 1  ;;  %v3208_v61 = vadd.f32 %v3207_v29, %v3206_v15 }
 0x272   : > { %v3140_v0 = vadd.f32 %v3139_v39, %v3138_v21  ;;  %v3209_v43 = vrot.slane %v3208_v61, 1 }
 0x274   : > { %v3141_v52 = vadd.f32 %v3140_v0, %v2455_v37  ;;  %v3210_v62 = vadd.f32 %v3209_v43, %v3208_v61 }
 0x276   : > { %3213 = vrot.lane.b32.xlu0 %v3141_v52, %s4124_s18  ;;  %v3211_v20 = vadd.f32 %v3210_v62, %v2524_v59 }
 0x27a   : > { %3220 = vrot.lane.b32.xlu0 %v3211_v20, %s4124_s18 }
 0x2e8   : > { %v3214_v6 = vpop.permute.xlu0 %3213 }
 0x2e9   : > { %v3216_v11 = vadd.f32 %v3214_v6, %v3141_v52 }
 0x2eb   : > { %3218 = vst.msk [vmem:[%s349_s9] sm:$0x1] %vm3217_vm0, %v3216_v11 }
 0x2ec   : > { %v3221_v9 = vpop.permute.xlu0 %3220 }
 0x2ed   : > { %v3223_v23 = vadd.f32 %v3221_v9, %v3211_v20 }
 0x2ef   : > { %3224 = vst.msk [vmem:[%s349_s9 + $0x1] sm:$0x1] %vm3217_vm0, %v3223_v23 }
 0x2f0 PF: > { %s19_s29 = sadd.s32 1, %s4119_s29   ;;  %s5522_s27 = smov %s4115_s28 }
 0x2f1   : > { %p16_p5 = scmp.ge.s32.totalorder %s19_s29, 4   ;;  %s5523_s28 = smov %s5525_s30 }
 0x2f3   :  { %18 = sbr.rel (!%p16_p5) target bundleno = 2 (0x2), region = 93 }

// kernel: generator_forward.7
= control target key start
LH: loop header
LB: loop body
LE: loop exit
PB: predicated region body
PF: predicated region fallthrough
CT: control target
= control target key end

     0   :  { %s9190_s20 = smov 0   ;;  %s11790_s0 = inlined_call_operand.vmem [shape: f32[2,32,2048], index: 0, kind: input, shape index: {}]   ;;  %s11791_s1 = inlined_call_operand.vmem [shape: bf16[3,2176,32], index: 1, kind: input, shape index: {}]   ;;  %s11792_s2 = inlined_call_operand.<no memory space> [shape: f32[1,1], index: 2, kind: input, shape index: {}]   ;;  %s11793_s3 = inlined_call_operand.vmem [shape: f32[1,2048], index: 3, kind: input, shape index: {}]   ;;  %s11794_s4 = inlined_call_operand.vmem [shape: f32[1,2048], index: 4, kind: input, shape index: {}]   ;;  %s11795_s5 = inlined_call_operand.vmem [shape: f32[2,32,32], index: 5, kind: output, shape index: {}]  }
   0x1   :  { %v10_v0 = vstv %s11792_s2 }
   0x2   :  { %11 = vst [vmem:[#allocation3] sm:$0x1] %v10_v0 }
   0x3 LB: > { %s6908_s21 = sadd.s32 4294967295, %s9152_s20   ;;  %p6912_p0 = scmp.ge.s32.totalorder %s9152_s20, 1  ;;  %s9152_s20 = sphi %s9190_s20, %s17_s20  }
   0x4   : > { %p189_p1 = scmp.lt.s32.totalorder %s9152_s20, 3 }
   0x6   : > { %p190_p2 = pnand %p6912_p0, %p189_p1 }
   0x7   : > { %p217_p3 = scmp.lt.s32.totalorder (!%p190_p2), %s6908_s21, 1  ;;  %v296_v1 = vlaneseq (!%p190_p2)  ;;  %v9201_v2 = vld [vmem:[%s11793_s3] sm:$0xff] (!%p190_p2)  ;;  %v9154_v6 = vmov (!%p190_p2), 0.0   ;;  %v8698_v12 = vld [vmem:[%s11791_s1 + $0x488] sm:$0xff] (!%p190_p2)   ;;  %vm929_vm0 = vcmask (!%p190_p2), 1040384   ;;  %s9155_s10 = smov (!%p190_p2), 64  }
   0x8   : > { %193 = sbr.rel (%p190_p2) target bundleno = 842 (0x34a), region = 40  ;;  %v9206_v3 = vld [vmem:[%s11794_s4] sm:$0xff] (!%p190_p2)  ;;  %780 = vst [vmem:[#allocation2] sm:$0xff] (!%p190_p2), %v9154_v6  ;;  %781 = vst [vmem:[#allocation2 + $0x8] sm:$0xff] (!%p190_p2), %v9154_v6 }
   0x9   : > { %v9210_v4 = vshrl.u32 (!%p190_p2), %v296_v1, 7  ;;  %v8696_v5 = vld [vmem:[%s11791_s1 + $0x480] sm:$0xff] (!%p190_p2)   ;;  %782 = vst [vmem:[#allocation2 + $0x10] sm:$0xff] (!%p190_p2), %v9154_v6  ;;  %783 = vst [vmem:[#allocation2 + $0x18] sm:$0xff] (!%p190_p2), %v9154_v6 }
   0xa   : > { %784 = vst [vmem:[#allocation2 + $0x20] sm:$0xff] (!%p190_p2), %v9154_v6  ;;  %785 = vst [vmem:[#allocation2 + $0x28] sm:$0xff] (!%p190_p2), %v9154_v6  ;;  %v8697_v7 = vld [vmem:[%s11791_s1 + $0x440] sm:$0xff] (!%p190_p2)   ;;  %7874 = vmatprep.subr.bf16.mxu0 (!%p190_p2), %v8696_v5 }
   0xb   : > { %786 = vst [vmem:[#allocation2 + $0x30] sm:$0xff] (!%p190_p2), %v9154_v6  ;;  %787 = vst [vmem:[#allocation2 + $0x38] sm:$0xff] (!%p190_p2), %v9154_v6  ;;  %v9220_v8 = vsub.s32 (!%p190_p2), 3, %v9210_v4  ;;  %v9223_v9 = vsub.s32 (!%p190_p2), 0, %v9210_v4  ;;  %v9226_v10 = vsub.s32 (!%p190_p2), 1, %v9210_v4  ;;  %v9229_v11 = vsub.s32 (!%p190_p2), 2, %v9210_v4  ;;  %7875 = vmatpush3.bf16.msra.mxu0 (!%p190_p2), %v8697_v7 }
   0xc   : > { %788 = vst [vmem:[#allocation2 + $0x40] sm:$0xff] (!%p190_p2), %v9154_v6  ;;  %789 = vst [vmem:[#allocation2 + $0x48] sm:$0xff] (!%p190_p2), %v9154_v6  ;;  %v9240_v13 = vsub.s32 (!%p190_p2), 4, %v9210_v4  ;;  %7876 = vmatprep.subr.bf16.mxu0 (!%p190_p2), %v8698_v12  ;;  %v9284_v33 = vsub.s32 (!%p190_p2), 5, %v9210_v4 }
   0xd   : > { %790 = vst [vmem:[#allocation2 + $0x50] sm:$0xff] (!%p190_p2), %v9154_v6  ;;  %791 = vst [vmem:[#allocation2 + $0x58] sm:$0xff] (!%p190_p2), %v9154_v6  ;;  %v9245_v15 = vrot.slane (!%p190_p2), %v9201_v2, %v9220_v8  ;;  %v9249_v16 = vrot.slane (!%p190_p2), %v9206_v3, %v9220_v8  ;;  %v9254_v18 = vrot.slane (!%p190_p2), %v9201_v2, %v9223_v9 }
   0xe   : > { %792 = vst [vmem:[#allocation2 + $0x60] sm:$0xff] (!%p190_p2), %v9154_v6  ;;  %793 = vst [vmem:[#allocation2 + $0x68] sm:$0xff] (!%p190_p2), %v9154_v6  ;;  %v9258_v19 = vrot.slane (!%p190_p2), %v9206_v3, %v9223_v9  ;;  %v303_v21 = vrot.slane (!%p190_p2), %v9201_v2, %v9226_v10  ;;  %v9265_v22 = vrot.slane (!%p190_p2), %v9206_v3, %v9226_v10 }
   0xf   : > { %s11797_s21 = smov (!%p217_p3, %s6908_s21), 1  ;;  %794 = vst [vmem:[#allocation2 + $0x70] sm:$0xff] %v9154_v6  ;;  %795 = vst [vmem:[#allocation2 + $0x78] sm:$0xff] %v9154_v6  ;;  %v9271_v25 = vrot.slane %v9201_v2, %v9229_v11  ;;  %v9275_v26 = vrot.slane %v9206_v3, %v9229_v11  ;;  %v9304_v63 = vrot.slane %v9201_v2, %v9240_v13 }
  0x10   : > { %796 = vst [vmem:[#allocation2 + $0x80] sm:$0xff] %v9154_v6  ;;  %797 = vst [vmem:[#allocation2 + $0x88] sm:$0xff] %v9154_v6  ;;  %s7872_s29 = sshll.u32 %s11797_s21, 9 }
  0x11   : > { %813 = vst [vmem:[#allocation2 + $0x108] sm:$0xff] %v9154_v6  ;;  %814 = vst [vmem:[#allocation2 + $0x110] sm:$0xff] %v9154_v6  ;;  %s9237_s9 = scalar_lea.vmem %s11790_s0, %s7872_s29 }
  0x12   : > { %830 = vst [vmem:[#allocation2 + $0x190] sm:$0xff] %v9154_v6  ;;  %831 = vst [vmem:[#allocation2 + $0x198] sm:$0xff] %v9154_v6  ;;  %v231_v14 = vld [vmem:[%s9237_s9 + $0x18] sm:$0xff]  ;;  %v228_v17 = vld [vmem:[%s9237_s9] sm:$0xff] }
  0x13   : > { %847 = vst [vmem:[#allocation2 + $0x218] sm:$0xff] %v9154_v6  ;;  %848 = vst [vmem:[#allocation2 + $0x220] sm:$0x3] %v9154_v6  ;;  %v229_v20 = vld [vmem:[%s9237_s9 + $0x8] sm:$0xff]  ;;  %v244_v23 = vld [vmem:[%s9237_s9 + $0x80] sm:$0xff]  ;;  %v379_v28 = vmul.f32 %v9245_v15, %v231_v14  ;;  %v376_v29 = vmul.f32 %v9254_v18, %v228_v17 }
  0x14   : > { %849 = vst [vmem:[#allocation2 + $0x228] sm:$0x3] %v9154_v6  ;;  %850 = vst [vmem:[#allocation2 + $0x230] sm:$0x3] %v9154_v6  ;;  %v230_v24 = vld [vmem:[%s9237_s9 + $0x10] sm:$0xff]  ;;  %v245_v27 = vld [vmem:[%s9237_s9 + $0x88] sm:$0xff]  ;;  %v392_v30 = vmul.f32 %v9254_v18, %v244_v23  ;;  %v377_v34 = vmul.f32 %v303_v21, %v229_v20 }
  0x15   : > { %851 = vst [vmem:[#allocation2 + $0x238] sm:$0x3] %v9154_v6  ;;  %852 = vst [vmem:[#allocation2 + $0x240] sm:$0x3] %v9154_v6  ;;  %v260_v31 = vld [vmem:[%s9237_s9 + $0x100] sm:$0xff]  ;;  %v261_v32 = vld [vmem:[%s9237_s9 + $0x108] sm:$0xff]  ;;  %v378_v35 = vmul.f32 %v9271_v25, %v230_v24  ;;  %v393_v36 = vmul.f32 %v303_v21, %v245_v27  ;;  %v527_v38 = vadd.f32 %v9249_v16, %v379_v28 }
  0x16   : > { %853 = vst [vmem:[#allocation2 + $0x248] sm:$0x3] %v9154_v6  ;;  %854 = vst [vmem:[#allocation2 + $0x250] sm:$0x3] %v9154_v6  ;;  %v408_v37 = vmul.f32 %v9254_v18, %v260_v31  ;;  %v524_v39 = vadd.f32 %v9258_v19, %v376_v29  ;;  %v540_v40 = vadd.f32 %v9258_v19, %v392_v30  ;;  %v276_v57 = vld [vmem:[%s9237_s9 + $0x180] sm:$0xff]  ;;  %v277_v58 = vld [vmem:[%s9237_s9 + $0x188] sm:$0xff] }
  0x17   : > { %855 = vst [vmem:[#allocation2 + $0x258] sm:$0x3] %v9154_v6  ;;  %856 = vst [vmem:[#allocation2 + $0x260] sm:$0x3] %v9154_v6  ;;  %v409_v41 = vmul.f32 %v303_v21, %v261_v32  ;;  %v525_v42 = vadd.f32 %v9265_v22, %v377_v34  ;;  %v526_v43 = vadd.f32 %v9275_v26, %v378_v35  ;;  %vm591_vm1 = vcmp.gt.f32.partialorder %v527_v38, 0.0  ;;  %v246_v61 = vld [vmem:[%s9237_s9 + $0x90] sm:$0xff] }
  0x18   : > { %857 = vst [vmem:[#allocation2 + $0x268] sm:$0x3] %v9154_v6  ;;  %858 = vst [vmem:[#allocation2 + $0x270] sm:$0x3] %v9154_v6  ;;  %v541_v44 = vadd.f32 %v9265_v22, %v393_v36  ;;  %v556_v45 = vadd.f32 %v9258_v19, %v408_v37  ;;  %v655_v46 = vmul.f32 0.2, %v527_v38  ;;  %v424_v12 = vmul.f32 %v9254_v18, %v276_v57 }
  0x19   : > { %859 = vst [vmem:[#allocation2 + $0x278] sm:$0x3] %v9154_v6  ;;  %860 = vst [vmem:[#allocation2 + $0x280] sm:$0x3] %v9154_v6  ;;  %vm588_vm2 = vcmp.gt.f32.partialorder %v524_v39, 0.0  ;;  %vm589_vm3 = vcmp.gt.f32.partialorder %v525_v42, 0.0  ;;  %v557_v7 = vadd.f32 %v9265_v22, %v409_v41  ;;  %v425_v14 = vmul.f32 %v303_v21, %v277_v58 }
  0x1a   : > { %861 = vst [vmem:[#allocation2 + $0x288] sm:$0x3] %v9154_v6  ;;  %862 = vst [vmem:[#allocation2 + $0x290] sm:$0x3] %v9154_v6  ;;  %v652_v47 = vmul.f32 0.2, %v524_v39  ;;  %v9295_v50 = vsel %vm591_vm1, %v527_v38, %v655_v46  ;;  %v394_v23 = vmul.f32 %v9271_v25, %v246_v61  ;;  %v572_v18 = vadd.f32 %v9258_v19, %v424_v12 }
  0x1b   : > { %863 = vst [vmem:[#allocation2 + $0x298] sm:$0x3] %v9154_v6  ;;  %864 = vst [vmem:[#allocation2 + $0x2a0] sm:$0x3] %v9154_v6  ;;  %v653_v48 = vmul.f32 0.2, %v525_v42  ;;  %v573_v21 = vadd.f32 %v9265_v22, %v425_v14 }
  0x1c   : > { %vm604_vm4 = vcmp.gt.f32.partialorder %v540_v40, 0.0  ;;  %v668_v49 = vmul.f32 0.2, %v540_v40  ;;  %v716_v51 = vsel %vm588_vm2, %v524_v39, %v652_v47  ;;  %vm590_vm5 = vcmp.gt.f32.partialorder %v526_v43, 0.0  ;;  %v247_v62 = vld [vmem:[%s9237_s9 + $0x98] sm:$0xff]  ;;  %v262_v37 = vld [vmem:[%s9237_s9 + $0x110] sm:$0xff] }
  0x1d   : > { %v654_v52 = vmul.f32 0.2, %v526_v43  ;;  %v933_v53 = vrot.slane %v9295_v50, 7  ;;  %v930_v54 = vrot.slane %v716_v51, 7  ;;  %v717_v55 = vsel %vm589_vm3, %v525_v42, %v653_v48  ;;  %v8699_v12 = vld [vmem:[%s11791_s1 + $0x448] sm:$0xff]  }
  0x1e   : > { %v732_v56 = vsel %vm604_vm4, %v540_v40, %v668_v49  ;;  %v931_v59 = vrot.slane %v717_v55, 7  ;;  %vm605_vm6 = vcmp.gt.f32.partialorder %v541_v44, 0.0  ;;  %v669_v1 = vmul.f32 0.2, %v541_v44  ;;  %v263_v40 = vld [vmem:[%s9237_s9 + $0x118] sm:$0xff]  ;;  %7877 = vmatpush3.bf16.msra.mxu0 %v8699_v12  ;;  %v8706_v12 = vld [vmem:[%s11791_s1 + $0x4a0] sm:$0xff]  }
  0x1f   : > { %v946_v60 = vrot.slane %v732_v56, 7  ;;  %1048 = vrot.lane.b32.xlu1 %v933_v53, %s9155_s10  ;;  %1042 = vrot.lane.b32.xlu0 %v930_v54, %s9155_s10  ;;  %v9311_v0 = vsel %vm590_vm5, %v526_v43, %v654_v52  ;;  %vm620_vm7 = vcmp.gt.f32.partialorder %v556_v45, 0.0  ;;  %v684_v5 = vmul.f32 0.2, %v556_v45 }
  0x20   : > { %v733_v17 = vsel %vm605_vm6, %v541_v44, %v669_v1  ;;  %v395_v24 = vmul.f32 %v9245_v15, %v247_v62  ;;  %vm621_vm8 = vcmp.gt.f32.partialorder %v557_v7, 0.0  ;;  %v685_v29 = vmul.f32 0.2, %v557_v7 }
  0x21   : > { %v947_v6 = vsel %vm929_vm0, %v930_v54, %v946_v60  ;;  %v748_v20 = vsel %vm620_vm7, %v556_v45, %v684_v5  ;;  %v948_v27 = vrot.slane %v733_v17, 7  ;;  %v932_v30 = vrot.slane %v9311_v0, 7  ;;  %v278_v45 = vld [vmem:[%s9237_s9 + $0x190] sm:$0xff] }
  0x22   : > { %v978_v28 = vrot.slane %v748_v20, 7  ;;  %v542_v31 = vadd.f32 %v9275_v26, %v394_v23  ;;  %v749_v35 = vsel %vm621_vm8, %v557_v7, %v685_v29  ;;  %v543_v36 = vadd.f32 %v9249_v16, %v395_v24  ;;  %v8700_v24 = vld [vmem:[%s11791_s1 + $0x490] sm:$0xff]   ;;  %v233_v29 = vld [vmem:[%s9237_s9 + $0x28] sm:$0xff] }
  0x23   : > { %1044 = vrot.lane.b32.xlu0 %v931_v59, %s9155_s10  ;;  %1074 = vrot.lane.b32.xlu1 %v947_v6, %s9155_s10  ;;  %v949_v32 = vsel %vm929_vm0, %v931_v59, %v948_v27  ;;  %v980_v38 = vrot.slane %v749_v35, 7  ;;  %vm636_vm9 = vcmp.gt.f32.partialorder %v572_v18, 0.0  ;;  %v700_v39 = vmul.f32 0.2, %v572_v18  ;;  %v279_v59 = vld [vmem:[%s9237_s9 + $0x198] sm:$0xff] }
  0x24   : > { %v979_v34 = vsel %vm929_vm0, %v946_v60, %v978_v28  ;;  %vm637_vm10 = vcmp.gt.f32.partialorder %v573_v21, 0.0  ;;  %v701_v41 = vmul.f32 0.2, %v573_v21  ;;  %vm606_vm11 = vcmp.gt.f32.partialorder %v542_v31, 0.0  ;;  %v232_v60 = vld [vmem:[%s9237_s9 + $0x20] sm:$0xff]  ;;  %7878 = vmatprep.subr.bf16.mxu0 %v8700_v24 }
  0x25   : > { %v670_v19 = vmul.f32 0.2, %v542_v31  ;;  %vm607_vm12 = vcmp.gt.f32.partialorder %v543_v36, 0.0  ;;  %v981_v22 = vsel %vm929_vm0, %v948_v27, %v980_v38  ;;  %v9332_v42 = vsel %vm636_vm9, %v572_v18, %v700_v39 }
  0x26   : > { %v671_v43 = vmul.f32 0.2, %v543_v36  ;;  %v410_v44 = vmul.f32 %v9271_v25, %v262_v37  ;;  %v1010_v46 = vrot.slane %v9332_v42, 7  ;;  %v9337_v47 = vsel %vm637_vm10, %v573_v21, %v701_v41  ;;  %v8702_v37 = vld [vmem:[%s11791_s1 + $0x498] sm:$0xff]  }
  0x27   : > { %1046 = vrot.lane.b32.xlu0 %v932_v30, %s9155_s10  ;;  %1076 = vrot.lane.b32.xlu1 %v949_v32, %s9155_s10  ;;  %v9339_v48 = vsel %vm606_vm11, %v542_v31, %v670_v19  ;;  %v411_v49 = vmul.f32 %v9245_v15, %v263_v40  ;;  %v1012_v51 = vrot.slane %v9337_v47, 7  ;;  %v426_v58 = vmul.f32 %v9271_v25, %v278_v45  ;;  %v248_v25 = vld [vmem:[%s9237_s9 + $0xa0] sm:$0xff]  ;;  %v265_v45 = vld [vmem:[%s9237_s9 + $0x128] sm:$0xff] }
  0x28   : > { %v950_v52 = vrot.slane %v9339_v48, 7  ;;  %v9344_v54 = vsel %vm607_vm12, %v543_v36, %v671_v43  ;;  %v558_v55 = vadd.f32 %v9275_v26, %v410_v44  ;;  %v9353_v61 = vsub.s32 6, %v9210_v4  ;;  %v264_v19 = vld [vmem:[%s9237_s9 + $0x120] sm:$0xff] }
  0x29   : > { %v952_v56 = vrot.slane %v9344_v54, 7  ;;  %v559_v57 = vadd.f32 %v9249_v16, %v411_v49  ;;  %v1011_v62 = vsel %vm929_vm0, %v978_v28, %v1010_v46  ;;  %v1013_v0 = vsel %vm929_vm0, %v980_v38, %v1012_v51  ;;  %v8703_v38 = vld [vmem:[%s11791_s1 + $0x500] sm:$0xff]  }
  0x2a   : > { %vm622_vm13 = vcmp.gt.f32.partialorder %v558_v55, 0.0  ;;  %v686_v1 = vmul.f32 0.2, %v558_v55  ;;  %v951_v5 = vsel %vm929_vm0, %v932_v30, %v950_v52  ;;  %v574_v7 = vadd.f32 %v9275_v26, %v426_v58  ;;  %7902 = vmatprep.subr.bf16.mxu1 %v8703_v38 }
  0x2b   : > { %1106 = vrot.lane.b32.xlu0 %v979_v34, %s9155_s10  ;;  %1108 = vrot.lane.b32.xlu1 %v981_v22, %s9155_s10  ;;  %vm623_vm14 = vcmp.gt.f32.partialorder %v559_v57, 0.0  ;;  %v687_v6 = vmul.f32 0.2, %v559_v57  ;;  %v427_v17 = vmul.f32 %v9245_v15, %v279_v59  ;;  %v380_v20 = vmul.f32 %v9304_v63, %v232_v60  ;;  %v249_v15 = vld [vmem:[%s9237_s9 + $0xa8] sm:$0xff] }
  0x2c   : > { %v750_v14 = vsel %vm622_vm13, %v558_v55, %v686_v1  ;;  %v9373_v23 = vrot.slane %v9206_v3, %v9240_v13  ;;  %v953_v26 = vsel %vm929_vm0, %v933_v53, %v952_v56  ;;  %vm638_vm15 = vcmp.gt.f32.partialorder %v574_v7, 0.0  ;;  %v281_v1 = vld [vmem:[%s9237_s9 + $0x1a8] sm:$0xff] }
  0x2d   : > { %v9381_v27 = vsel %vm623_vm14, %v559_v57, %v687_v6  ;;  %v702_v28 = vmul.f32 0.2, %v574_v7  ;;  %v982_v30 = vrot.slane %v750_v14, 7  ;;  %v575_v18 = vadd.f32 %v9249_v16, %v427_v17  ;;  %v8701_v16 = vld [vmem:[%s11791_s1 + $0x450] sm:$0xff]  }
  0x2e   : > { %v528_v21 = vadd.f32 %v9373_v23, %v380_v20  ;;  %v9391_v50 = vrot.slane %v9201_v2, %v9284_v33  ;;  %v984_v53 = vrot.slane %v9381_v27, 7  ;;  %v9398_v32 = vrot.slane %v9206_v3, %v9284_v33  ;;  %7879 = vmatpush3.bf16.msra.mxu0 %v8701_v16  ;;  %v235_v16 = vld [vmem:[%s9237_s9 + $0x38] sm:$0xff] }
  0x2f   : > { %1138 = vrot.lane.b32.xlu0 %v1011_v62, %s9155_s10  ;;  %1140 = vrot.lane.b32.xlu1 %v1013_v0, %s9155_s10  ;;  %v9394_v31 = vsel %vm638_vm15, %v574_v7, %v702_v28  ;;  %v396_v34 = vmul.f32 %v9304_v63, %v248_v25  ;;  %vm639_vm1 = vcmp.gt.f32.partialorder %v575_v18, 0.0  ;;  %v703_v36 = vmul.f32 0.2, %v575_v18  ;;  %v8705_v25 = vld [vmem:[%s11791_s1 + $0x4c0] sm:$0xff]  }
  0x30   : > { %v1014_v35 = vrot.slane %v9394_v31, 7  ;;  %vm592_vm2 = vcmp.gt.f32.partialorder %v528_v21, 0.0  ;;  %v656_v39 = vmul.f32 0.2, %v528_v21  ;;  %v381_v40 = vmul.f32 %v9391_v50, %v233_v29  ;;  %7880 = vmatprep.subr.bf16.mxu0 %v8702_v37  ;;  %7903 = vmatpush3.bf16.msra.mxu1 %v8705_v25 }
  0x31   : > { %v544_v41 = vadd.f32 %v9373_v23, %v396_v34  ;;  %v983_v22 = vsel %vm929_vm0, %v950_v52, %v982_v30  ;;  %v9417_v43 = vsel %vm639_vm1, %v575_v18, %v703_v36  ;;  %v397_v44 = vmul.f32 %v9391_v50, %v249_v15  ;;  %v234_v15 = vld [vmem:[%s9237_s9 + $0x30] sm:$0xff]  ;;  %v8708_v36 = vld [vmem:[%s11791_s1 + $0x460] sm:$0xff]  }
  0x32   : > { %v9422_v48 = vsub.s32 7, %v9210_v4  ;;  %v985_v49 = vsel %vm929_vm0, %v952_v56, %v984_v53  ;;  %v1016_v54 = vrot.slane %v9417_v43, 7  ;;  %v529_v55 = vadd.f32 %v9398_v32, %v381_v40  ;;  %v280_v4 = vld [vmem:[%s9237_s9 + $0x1a0] sm:$0xff]  ;;  %v8704_v56 = vld [vmem:[%s11791_s1 + $0x458] sm:$0xff]   ;;  %v250_v40 = vld [vmem:[%s9237_s9 + $0xb0] sm:$0xff] }
  0x33   : > { %1078 = vrot.lane.b32.xlu0 %v951_v5, %s9155_s10  ;;  %1080 = vrot.lane.b32.xlu1 %v953_v26, %s9155_s10  ;;  %vm608_vm3 = vcmp.gt.f32.partialorder %v544_v41, 0.0  ;;  %v9428_v52 = vsel %vm592_vm2, %v528_v21, %v656_v39  ;;  %v672_v57 = vmul.f32 0.2, %v544_v41  ;;  %v545_v58 = vadd.f32 %v9398_v32, %v397_v44  ;;  %v8707_v26 = vld [vmem:[%s11791_s1 + $0x508] sm:$0xff]  }
  0x34   : > { %v412_v59 = vmul.f32 %v9304_v63, %v264_v19  ;;  %v1015_v60 = vsel %vm929_vm0, %v982_v30, %v1014_v35  ;;  %vm593_vm4 = vcmp.gt.f32.partialorder %v529_v55, 0.0  ;;  %v657_v62 = vmul.f32 0.2, %v529_v55  ;;  %7881 = vmatpush3.bf16.msra.mxu0 %v8704_v56  ;;  %7904 = vmatprep.subr.bf16.mxu1 %v8707_v26  ;;  %v266_v19 = vld [vmem:[%s9237_s9 + $0x130] sm:$0xff]  ;;  %v8724_v43 = vld [vmem:[%s11791_s1 + $0x4e8] sm:$0xff]  }
  0x35   : > { %v413_v0 = vmul.f32 %v9391_v50, %v265_v45  ;;  %v9447_v5 = vsel %vm608_vm3, %v544_v41, %v672_v57  ;;  %vm609_vm5 = vcmp.gt.f32.partialorder %v545_v58, 0.0  ;;  %v673_v6 = vmul.f32 0.2, %v545_v58  ;;  %7882 = vmatprep.subr.bf16.mxu0 %v8706_v12  ;;  %v251_v41 = vld [vmem:[%s9237_s9 + $0xb8] sm:$0xff] }
  0x36   : > { %v560_v7 = vadd.f32 %v9373_v23, %v412_v59  ;;  %v1017_v14 = vsel %vm929_vm0, %v984_v53, %v1016_v54  ;;  %v934_v17 = vrot.slane %v9428_v52, 7  ;;  %v428_v24 = vmul.f32 %v9304_v63, %v280_v4  ;;  %v8711_v4 = vld [vmem:[%s11791_s1 + $0x510] sm:$0xff]  }
  0x37   : > { %1110 = vrot.lane.b32.xlu0 %v983_v22, %s9155_s10  ;;  %1112 = vrot.lane.b32.xlu1 %v985_v49, %s9155_s10  ;;  %v561_v20 = vadd.f32 %v9398_v32, %v413_v0  ;;  %v721_v27 = vsel %vm593_vm4, %v529_v55, %v657_v62  ;;  %v737_v28 = vsel %vm609_vm5, %v545_v58, %v673_v6  ;;  %v954_v30 = vrot.slane %v9447_v5, 7  ;;  %v8710_v58 = vld [vmem:[%s11791_s1 + $0x4a8] sm:$0xff]   ;;  %v282_v6 = vld [vmem:[%s9237_s9 + $0x1b0] sm:$0xff] }
  0x38   : > { %vm624_vm6 = vcmp.gt.f32.partialorder %v560_v7, 0.0  ;;  %v688_v29 = vmul.f32 0.2, %v560_v7  ;;  %v956_v18 = vrot.slane %v737_v28, 7  ;;  %v576_v53 = vadd.f32 %v9373_v23, %v428_v24  ;;  %v8709_v23 = vld [vmem:[%s11791_s1 + $0x4c8] sm:$0xff]   ;;  %7883 = vmatpush3.bf16.msra.mxu0 %v8708_v36 }
  0x39   : > { %vm625_vm7 = vcmp.gt.f32.partialorder %v561_v20, 0.0  ;;  %v689_v63 = vmul.f32 0.2, %v561_v20  ;;  %v429_v34 = vmul.f32 %v9391_v50, %v281_v1  ;;  %v935_v37 = vrot.slane %v721_v27, 7  ;;  %7905 = vmatpush3.bf16.msra.mxu1 %v8709_v23  ;;  %7884 = vmatprep.subr.bf16.mxu0 %v8710_v58  ;;  %v8712_v1 = vld [vmem:[%s11791_s1 + $0x468] sm:$0xff]  }
  0x3a   : > { %v9467_v21 = vsel %vm624_vm6, %v560_v7, %v688_v29  ;;  %v9479_v39 = vrot.slane %v9201_v2, %v9353_v61  ;;  %vm640_vm8 = vcmp.gt.f32.partialorder %v576_v53, 0.0  ;;  %v704_v22 = vmul.f32 0.2, %v576_v53  ;;  %7906 = vmatprep.subr.bf16.mxu1 %v8711_v4 }
  0x3b   : > { %1142 = vrot.lane.b32.xlu0 %v1015_v60, %s9155_s10  ;;  %1144 = vrot.lane.b32.xlu1 %v1017_v14, %s9155_s10  ;;  %v9475_v38 = vsel %vm625_vm7, %v561_v20, %v689_v63  ;;  %v986_v50 = vrot.slane %v9467_v21, 7  ;;  %v577_v44 = vadd.f32 %v9398_v32, %v429_v34  ;;  %v9493_v55 = vrot.slane %v9206_v3, %v9353_v61  ;;  %v8713_v20 = vld [vmem:[%s11791_s1 + $0x4d0] sm:$0xff]  }
  0x3c   : > { %v988_v45 = vrot.slane %v9475_v38, 7  ;;  %v382_v49 = vmul.f32 %v9479_v39, %v234_v15  ;;  %v327_v57 = vrot.slane %v9201_v2, %v9422_v48  ;;  %v955_v32 = vsel %vm929_vm0, %v934_v17, %v954_v30  ;;  %7885 = vmatpush3.bf16.msra.mxu0 %v8712_v1  ;;  %v283_v15 = vld [vmem:[%s9237_s9 + $0x1b8] sm:$0xff] }
  0x3d   : > { %v957_v59 = vsel %vm929_vm0, %v935_v37, %v956_v18  ;;  %v9510_v2 = vsel %vm640_vm8, %v576_v53, %v704_v22  ;;  %v705_v56 = vmul.f32 0.2, %v577_v44  ;;  %v475_v47 = vrot.slane %v9206_v3, %v9422_v48  ;;  %7907 = vmatpush3.bf16.msra.mxu1 %v8713_v20  ;;  %v236_v22 = vld [vmem:[%s9237_s9 + $0x40] sm:$0xff]  ;;  %v8718_v1 = vld [vmem:[%s11791_s1 + $0x4b8] sm:$0xff]  }
  0x3e   : > { %v530_v42 = vadd.f32 %v9493_v55, %v382_v49  ;;  %vm641_vm9 = vcmp.gt.f32.partialorder %v577_v44, 0.0  ;;  %v398_v60 = vmul.f32 %v9479_v39, %v250_v40  ;;  %v399_v62 = vmul.f32 %v327_v57, %v251_v41  ;;  %v268_v20 = vld [vmem:[%s9237_s9 + $0x140] sm:$0xff] }
  0x3f   : > { %1170 = vrot.lane.b32.xlu0 %v1010_v46, %s9155_s10  ;;  %1172 = vrot.lane.b32.xlu1 %v1012_v51, %s9155_s10  ;;  %v383_v46 = vmul.f32 %v327_v57, %v235_v16  ;;  %v267_v51 = vld [vmem:[%s9237_s9 + $0x138] sm:$0xff]  ;;  %v414_v0 = vmul.f32 %v9479_v39, %v266_v19  ;;  %v987_v25 = vsel %vm929_vm0, %v954_v30, %v986_v50  ;;  %v1018_v24 = vrot.slane %v9510_v2, 7  ;;  %v241_v2 = vld [vmem:[%s9237_s9 + $0x68] sm:$0xff] }
  0x40   : > { %v989_v3 = vsel %vm929_vm0, %v956_v18, %v988_v45  ;;  %vm594_vm10 = vcmp.gt.f32.partialorder %v530_v42, 0.0  ;;  %v658_v5 = vmul.f32 0.2, %v530_v42  ;;  %v546_v12 = vadd.f32 %v9493_v55, %v398_v60  ;;  %v8715_v30 = vld [vmem:[%s11791_s1 + $0x518] sm:$0xff]  }
  0x41   : > { %v531_v7 = vadd.f32 %v475_v47, %v383_v46  ;;  %v547_v14 = vadd.f32 %v475_v47, %v399_v62  ;;  %v9541_v26 = vsel %vm641_vm9, %v577_v44, %v705_v56  ;;  %v562_v27 = vadd.f32 %v9493_v55, %v414_v0  ;;  %7908 = vmatprep.subr.bf16.mxu1 %v8715_v30  ;;  %v8717_v46 = vld [vmem:[%s11791_s1 + $0x4d8] sm:$0xff]   ;;  %v237_v62 = vld [vmem:[%s9237_s9 + $0x48] sm:$0xff] }
  0x42   : > { %v415_v52 = vmul.f32 %v327_v57, %v267_v51  ;;  %v9547_v28 = vsel %vm594_vm10, %v530_v42, %v658_v5  ;;  %vm610_vm12 = vcmp.gt.f32.partialorder %v546_v12, 0.0  ;;  %v674_v63 = vmul.f32 0.2, %v546_v12  ;;  %v252_v42 = vld [vmem:[%s9237_s9 + $0xc0] sm:$0xff]  ;;  %7909 = vmatpush3.bf16.msra.mxu1 %v8717_v46  ;;  %v253_v5 = vld [vmem:[%s9237_s9 + $0xc8] sm:$0xff] }
  0x43   : > { %1050 = vrot.lane.b32.xlu0 %v934_v17, %s9155_s10  ;;  %1052 = vrot.lane.b32.xlu1 %v935_v37, %s9155_s10  ;;  %v8714_v17 = vld [vmem:[%s11791_s1 + $0x4b0] sm:$0xff]   ;;  %vm595_vm11 = vcmp.gt.f32.partialorder %v531_v7, 0.0  ;;  %v659_v29 = vmul.f32 0.2, %v531_v7  ;;  %vm611_vm13 = vcmp.gt.f32.partialorder %v547_v14, 0.0  ;;  %vm626_vm14 = vcmp.gt.f32.partialorder %v562_v27, 0.0 }
  0x44   : > { %v675_v18 = vmul.f32 0.2, %v547_v14  ;;  %7886 = vmatprep.subr.bf16.mxu0 %v8714_v17  ;;  %v690_v34 = vmul.f32 0.2, %v562_v27  ;;  %v563_v16 = vadd.f32 %v475_v47, %v415_v52  ;;  %v430_v36 = vmul.f32 %v9479_v39, %v282_v6  ;;  %v9561_v37 = vld [vmem:[%s11793_s3 + $0x8] sm:$0xff]  ;;  %v8719_v52 = vld [vmem:[%s11791_s1 + $0x520] sm:$0xff]  }
  0x45   : > { %v9555_v53 = vsel %vm595_vm11, %v531_v7, %v659_v29  ;;  %v1020_v40 = vrot.slane %v9541_v26, 7  ;;  %v738_v41 = vsel %vm610_vm12, %v546_v12, %v674_v63  ;;  %v431_v23 = vmul.f32 %v327_v57, %v283_v15  ;;  %v9573_v39 = vld [vmem:[%s11794_s4 + $0x8] sm:$0xff]  ;;  %7910 = vmatprep.subr.bf16.mxu1 %v8719_v52  ;;  %v8739_v26 = vld [vmem:[%s11791_s1 + $0x600] sm:$0xff]  }
  0x46   : > { %v739_v19 = vsel %vm611_vm13, %v547_v14, %v675_v18  ;;  %v936_v44 = vrot.slane %v9547_v28, 7  ;;  %v958_v49 = vrot.slane %v738_v41, 7  ;;  %v9568_v58 = vsel %vm626_vm14, %v562_v27, %v690_v34  ;;  %v269_v27 = vld [vmem:[%s9237_s9 + $0x148] sm:$0xff]  ;;  %v8720_v18 = vld [vmem:[%s11791_s1 + $0x478] sm:$0xff]  }
  0x47   : > { %1082 = vrot.lane.b32.xlu0 %v955_v32, %s9155_s10  ;;  %1084 = vrot.lane.b32.xlu1 %v957_v59, %s9155_s10  ;;  %vm627_vm15 = vcmp.gt.f32.partialorder %v563_v16, 0.0  ;;  %v8716_v32 = vld [vmem:[%s11791_s1 + $0x470] sm:$0xff]   ;;  %v937_v57 = vrot.slane %v9555_v53, 7  ;;  %v691_v59 = vmul.f32 0.2, %v563_v16  ;;  %v578_v4 = vadd.f32 %v9493_v55, %v430_v36 }
  0x48   : > { %v579_v56 = vadd.f32 %v475_v47, %v431_v23  ;;  %v1019_v51 = vsel %vm929_vm0, %v986_v50, %v1018_v24  ;;  %v960_v60 = vrot.slane %v739_v19, 7  ;;  %v990_v55 = vrot.slane %v9568_v58, 7  ;;  %7887 = vmatpush3.bf16.msra.mxu0 %v8716_v32  ;;  %v8721_v19 = vld [vmem:[%s11791_s1 + $0x4e0] sm:$0xff]   ;;  %v8722_v32 = vld [vmem:[%s11791_s1 + $0x528] sm:$0xff]   ;;  %v8732_v58 = vld [vmem:[%s11791_s1 + $0x4f8] sm:$0xff]  }
  0x49   : > { %v9594_v47 = vrot.slane %v9561_v37, %v9223_v9  ;;  %v1021_v0 = vsel %vm929_vm0, %v988_v45, %v1020_v40  ;;  %v9603_v21 = vsel %vm627_vm15, %v563_v16, %v691_v59  ;;  %vm642_vm1 = vcmp.gt.f32.partialorder %v578_v4, 0.0  ;;  %7888 = vmatprep.subr.bf16.mxu0 %v8718_v1  ;;  %7911 = vmatpush3.bf16.msra.mxu1 %v8721_v19  ;;  %v255_v19 = vld [vmem:[%s9237_s9 + $0xd8] sm:$0xff] }
  0x4a   : > { %v706_v50 = vmul.f32 0.2, %v578_v4  ;;  %v992_v38 = vrot.slane %v9603_v21, 7  ;;  %v707_v45 = vmul.f32 0.2, %v579_v56  ;;  %v9620_v7 = vrot.slane %v9573_v39, %v9223_v9  ;;  %7912 = vmatprep.subr.bf16.mxu1 %v8722_v32 }
  0x4b   : > { %1114 = vrot.lane.b32.xlu0 %v987_v25, %s9155_s10  ;;  %1116 = vrot.lane.b32.xlu1 %v989_v3, %s9155_s10  ;;  %v9611_v25 = vsel %vm929_vm0, %v936_v44, %v958_v49  ;;  %v384_v3 = vmul.f32 %v9594_v47, %v236_v22  ;;  %v9624_v12 = vrot.slane %v9561_v37, %v9226_v10  ;;  %vm643_vm2 = vcmp.gt.f32.partialorder %v579_v56, 0.0 }
  0x4c   : > { %v9616_v6 = vsel %vm642_vm1, %v578_v4, %v706_v50  ;;  %v9628_v14 = vrot.slane %v9573_v39, %v9226_v10  ;;  %v9640_v9 = vsel %vm929_vm0, %v937_v57, %v960_v60  ;;  %v9645_v10 = vsel %vm929_vm0, %v958_v49, %v990_v55  ;;  %7889 = vmatpush3.bf16.msra.mxu0 %v8720_v18  ;;  %v254_v18 = vld [vmem:[%s9237_s9 + $0xd0] sm:$0xff] }
  0x4d   : > { %v400_v17 = vmul.f32 %v9594_v47, %v252_v42  ;;  %v9651_v29 = vsel %vm929_vm0, %v960_v60, %v992_v38  ;;  %v532_v15 = vadd.f32 %v9620_v7, %v384_v3  ;;  %v385_v30 = vmul.f32 %v9624_v12, %v237_v62  ;;  %v8723_v42 = vld [vmem:[%s11791_s1 + $0x580] sm:$0xff]   ;;  %v285_v60 = vld [vmem:[%s9237_s9 + $0x1c8] sm:$0xff]  ;;  %7913 = vmatpush3.bf16.msra.mxu1 %v8724_v43 }
  0x4e   : > { %v401_v63 = vmul.f32 %v9624_v12, %v253_v5  ;;  %v1022_v34 = vrot.slane %v9616_v6, 7  ;;  %v416_v36 = vmul.f32 %v9594_v47, %v268_v20  ;;  %v417_v41 = vmul.f32 %v9624_v12, %v269_v27  ;;  %7930 = vmatprep.subr.bf16.mxu0 %v8723_v42 }
  0x4f   : > { %1146 = vrot.lane.b32.xlu0 %v1019_v51, %s9155_s10  ;;  %1148 = vrot.lane.b32.xlu1 %v1021_v0, %s9155_s10  ;;  %v548_v16 = vadd.f32 %v9620_v7, %v400_v17  ;;  %v9666_v23 = vsel %vm643_vm2, %v579_v56, %v707_v45  ;;  %vm596_vm3 = vcmp.gt.f32.partialorder %v532_v15, 0.0  ;;  %v660_v22 = vmul.f32 0.2, %v532_v15  ;;  %v238_v17 = vld [vmem:[%s9237_s9 + $0x50] sm:$0xff] }
  0x50   : > { %v533_v49 = vadd.f32 %v9628_v14, %v385_v30  ;;  %v549_v4 = vadd.f32 %v9628_v14, %v401_v63  ;;  %v564_v56 = vadd.f32 %v9620_v7, %v416_v36  ;;  %v565_v31 = vadd.f32 %v9628_v14, %v417_v41  ;;  %v239_v63 = vld [vmem:[%s9237_s9 + $0x58] sm:$0xff] }
  0x51   : > { %vm612_vm4 = vcmp.gt.f32.partialorder %v548_v16, 0.0  ;;  %v676_v59 = vmul.f32 0.2, %v548_v16  ;;  %v9683_v46 = vsel %vm596_vm3, %v532_v15, %v660_v22  ;;  %v433_v15 = vmul.f32 %v9624_v12, %v285_v60 }
  0x52   : > { %vm597_vm5 = vcmp.gt.f32.partialorder %v533_v49, 0.0  ;;  %v661_v51 = vmul.f32 0.2, %v533_v49  ;;  %vm613_vm6 = vcmp.gt.f32.partialorder %v549_v4, 0.0  ;;  %v677_v0 = vmul.f32 0.2, %v549_v4 }
  0x53   : > { %1174 = vrot.lane.b32.xlu0 %v1014_v35, %s9155_s10  ;;  %1176 = vrot.lane.b32.xlu1 %v1016_v54, %s9155_s10  ;;  %v284_v35 = vld [vmem:[%s9237_s9 + $0x1c0] sm:$0xff]  ;;  %v938_v54 = vrot.slane %v9683_v46, 7  ;;  %v740_v62 = vsel %vm612_vm4, %v548_v16, %v676_v59  ;;  %vm628_vm7 = vcmp.gt.f32.partialorder %v564_v56, 0.0  ;;  %v692_v45 = vmul.f32 0.2, %v564_v56  ;;  %v8726_v16 = vld [vmem:[%s11791_s1 + $0x530] sm:$0xff]  }
  0x54   : > { %v9692_v50 = vsel %vm597_vm5, %v533_v49, %v661_v51  ;;  %v962_v1 = vrot.slane %v740_v62, 7  ;;  %v741_v5 = vsel %vm613_vm6, %v549_v4, %v677_v0  ;;  %vm629_vm8 = vcmp.gt.f32.partialorder %v565_v31, 0.0  ;;  %v270_v4 = vld [vmem:[%s9237_s9 + $0x150] sm:$0xff]  ;;  %7914 = vmatprep.subr.bf16.mxu1 %v8726_v16 }
  0x55   : > { %v939_v3 = vrot.slane %v9692_v50, 7  ;;  %v693_v20 = vmul.f32 0.2, %v565_v31  ;;  %v964_v52 = vrot.slane %v741_v5, 7  ;;  %v756_v28 = vsel %vm628_vm7, %v564_v56, %v692_v45  ;;  %v273_v50 = vld [vmem:[%s9237_s9 + $0x168] sm:$0xff] }
  0x56   : > { %v9704_v27 = vsel %vm929_vm0, %v938_v54, %v962_v1  ;;  %v994_v53 = vrot.slane %v756_v28, 7  ;;  %v339_v30 = vrot.slane %v9561_v37, %v9229_v11  ;;  %v9724_v12 = vrot.slane %v9573_v39, %v9229_v11  ;;  %v8728_v11 = vld [vmem:[%s11791_s1 + $0x4f0] sm:$0xff]  }
  0x57   : > { %1054 = vrot.lane.b32.xlu0 %v936_v44, %s9155_s10  ;;  %1056 = vrot.lane.b32.xlu1 %v937_v57, %s9155_s10  ;;  %v432_v44 = vmul.f32 %v9594_v47, %v284_v35  ;;  %v757_v57 = vsel %vm629_vm8, %v565_v31, %v693_v20  ;;  %v9719_v36 = vsel %vm929_vm0, %v939_v3, %v964_v52  ;;  %v1024_v22 = vrot.slane %v9666_v23, 7  ;;  %v286_v28 = vld [vmem:[%s9237_s9 + $0x1d0] sm:$0xff] }
  0x58   : > { %v996_v47 = vrot.slane %v757_v57, 7  ;;  %v9733_v49 = vsel %vm929_vm0, %v962_v1, %v994_v53  ;;  %v581_v32 = vadd.f32 %v9628_v14, %v433_v15  ;;  %v386_v59 = vmul.f32 %v339_v30, %v238_v17  ;;  %7915 = vmatpush3.bf16.msra.mxu1 %v8728_v11  ;;  %v8730_v14 = vld [vmem:[%s11791_s1 + $0x538] sm:$0xff]  }
  0x59   : > { %v580_v41 = vadd.f32 %v9620_v7, %v432_v44  ;;  %v491_v31 = vrot.slane %v9573_v39, %v9220_v8  ;;  %v402_v35 = vmul.f32 %v339_v30, %v254_v18  ;;  %v271_v1 = vld [vmem:[%s9237_s9 + $0x158] sm:$0xff]  ;;  %7916 = vmatprep.subr.bf16.mxu1 %v8730_v14  ;;  %v418_v5 = vmul.f32 %v339_v30, %v270_v4  ;;  %v240_v14 = vld [vmem:[%s9237_s9 + $0x60] sm:$0xff] }
  0x5a   : > { %v9740_v7 = vsel %vm929_vm0, %v964_v52, %v996_v47  ;;  %vm645_vm10 = vcmp.gt.f32.partialorder %v581_v32, 0.0  ;;  %v709_v56 = vmul.f32 0.2, %v581_v32  ;;  %v534_v62 = vadd.f32 %v9724_v12, %v386_v59  ;;  %v287_v44 = vld [vmem:[%s9237_s9 + $0x1d8] sm:$0xff] }
  0x5b   : > { %1086 = vrot.lane.b32.xlu0 %v9611_v25, %s9155_s10  ;;  %1088 = vrot.lane.b32.xlu1 %v9640_v9, %s9155_s10  ;;  %vm644_vm9 = vcmp.gt.f32.partialorder %v580_v41, 0.0  ;;  %v708_v25 = vmul.f32 0.2, %v580_v41  ;;  %v343_v9 = vrot.slane %v9561_v37, %v9220_v8  ;;  %v1023_v8 = vsel %vm929_vm0, %v990_v55, %v1022_v34 }
  0x5c   : > { %v9757_v43 = vsel %vm645_vm10, %v581_v32, %v709_v56  ;;  %vm598_vm11 = vcmp.gt.f32.partialorder %v534_v62, 0.0  ;;  %7917 = vmatpush3.bf16.msra.mxu1 %v8732_v58  ;;  %v662_v17 = vmul.f32 0.2, %v534_v62  ;;  %v434_v18 = vmul.f32 %v339_v30, %v286_v28 }
  0x5d   : > { %v9748_v42 = vsel %vm644_vm9, %v580_v41, %v708_v25  ;;  %v387_v51 = vmul.f32 %v343_v9, %v239_v63  ;;  %v403_v0 = vmul.f32 %v343_v9, %v255_v19  ;;  %v419_v20 = vmul.f32 %v343_v9, %v271_v1  ;;  %7958 = vmatprep.subr.bf16.mxu1 %v8739_v26  ;;  %v258_v26 = vld [vmem:[%s9237_s9 + $0xf0] sm:$0xff] }
  0x5e   : > { %v1026_v60 = vrot.slane %v9748_v42, 7  ;;  %v9798_v41 = vsel %vm598_vm11, %v534_v62, %v662_v17  ;;  %v582_v59 = vadd.f32 %v9724_v12, %v434_v18  ;;  %v351_v25 = vrot.slane %v9561_v37, %v9284_v33 }
  0x5f   : > { %1118 = vrot.lane.b32.xlu0 %v9645_v10, %s9155_s10  ;;  %1120 = vrot.lane.b32.xlu1 %v9651_v29, %s9155_s10  ;;  %v1025_v10 = vsel %vm929_vm0, %v992_v38, %v1024_v22  ;;  %v1028_v29 = vrot.slane %v9757_v43, 7  ;;  %v535_v21 = vadd.f32 %v491_v31, %v387_v51  ;;  %v550_v38 = vadd.f32 %v9724_v12, %v402_v35 }
  0x60   : > { %v9775_v45 = vsel %vm929_vm0, %v994_v53, %v1026_v60  ;;  %v551_v52 = vadd.f32 %v491_v31, %v403_v0  ;;  %v566_v53 = vadd.f32 %v9724_v12, %v418_v5  ;;  %v567_v63 = vadd.f32 %v491_v31, %v419_v20 }
  0x61   : > { %v9783_v55 = vsel %vm929_vm0, %v996_v47, %v1028_v29  ;;  %v663_v57 = vmul.f32 0.2, %v535_v21  ;;  %v678_v15 = vmul.f32 0.2, %v550_v38  ;;  %vm614_vm12 = vcmp.gt.f32.partialorder %v550_v38, 0.0 }
  0x62   : > { %v679_v16 = vmul.f32 0.2, %v551_v52  ;;  %v435_v47 = vmul.f32 %v343_v9, %v287_v44  ;;  %vm599_vm13 = vcmp.gt.f32.partialorder %v535_v21, 0.0  ;;  %vm615_vm14 = vcmp.gt.f32.partialorder %v551_v52, 0.0 }
  0x63   : > { %1150 = vrot.lane.b32.xlu0 %v1023_v8, %s9155_s10  ;;  %1152 = vrot.lane.b32.xlu1 %v1025_v10, %s9155_s10  ;;  %v694_v19 = vmul.f32 0.2, %v566_v53  ;;  %v742_v32 = vsel %vm614_vm12, %v550_v38, %v678_v15  ;;  %vm630_vm15 = vcmp.gt.f32.partialorder %v566_v53, 0.0  ;;  %v695_v30 = vmul.f32 0.2, %v567_v63 }
  0x64   : > { %vm631_vm1 = vcmp.gt.f32.partialorder %v567_v63, 0.0  ;;  %v940_v12 = vrot.slane %v9798_v41, 7  ;;  %v743_v11 = vsel %vm615_vm14, %v551_v52, %v679_v16  ;;  %v9816_v9 = vsel %vm599_vm13, %v535_v21, %v663_v57  ;;  %v289_v21 = vld [vmem:[%s9237_s9 + $0x1e8] sm:$0xff] }
  0x65   : > { %v966_v4 = vrot.slane %v742_v32, 7  ;;  %v758_v46 = vsel %vm630_vm15, %v566_v53, %v694_v19  ;;  %v710_v56 = vmul.f32 0.2, %v582_v59  ;;  %v389_v51 = vmul.f32 %v351_v25, %v241_v2  ;;  %v272_v19 = vld [vmem:[%s9237_s9 + $0x160] sm:$0xff] }
  0x66   : > { %v968_v35 = vrot.slane %v743_v11, 7  ;;  %vm646_vm2 = vcmp.gt.f32.partialorder %v582_v59, 0.0  ;;  %v421_v8 = vmul.f32 %v351_v25, %v273_v50  ;;  %v941_v10 = vrot.slane %v9816_v9, 7 }
  0x67   : > { %1178 = vrot.lane.b32.xlu0 %v1018_v24, %s9155_s10  ;;  %1180 = vrot.lane.b32.xlu1 %v1020_v40, %s9155_s10  ;;  %v257_v24 = vld [vmem:[%s9237_s9 + $0xe8] sm:$0xff]  ;;  %v583_v40 = vadd.f32 %v491_v31, %v435_v47  ;;  %v998_v5 = vrot.slane %v758_v46, 7  ;;  %v9845_v38 = vsel %vm929_vm0, %v940_v12, %v966_v4  ;;  %v9850_v52 = vrot.slane %v9573_v39, %v9240_v13 }
  0x68   : > { %v405_v31 = vmul.f32 %v351_v25, %v257_v24  ;;  %v242_v24 = vld [vmem:[%s9237_s9 + $0x70] sm:$0xff]  ;;  %v503_v11 = vrot.slane %v9573_v39, %v9353_v61 }
  0x69   : > { %v711_v62 = vmul.f32 0.2, %v583_v40  ;;  %vm647_vm3 = vcmp.gt.f32.partialorder %v583_v40, 0.0  ;;  %v9862_v53 = vsel %vm929_vm0, %v966_v4, %v998_v5  ;;  %v259_v4 = vld [vmem:[%s9237_s9 + $0xf8] sm:$0xff] }
  0x6b   : > { %1058 = vrot.lane.b32.xlu0 %v938_v54, %s9155_s10  ;;  %1060 = vrot.lane.b32.xlu1 %v939_v3, %s9155_s10  ;;  %v499_v54 = vrot.slane %v9573_v39, %v9284_v33  ;;  %v9822_v3 = vsel %vm631_vm1, %v567_v63, %v695_v30  ;;  %v9831_v33 = vrot.slane %v9561_v37, %v9240_v13  ;;  %v256_v13 = vld [vmem:[%s9237_s9 + $0xe0] sm:$0xff] }
  0x6c   : > { %v1000_v58 = vrot.slane %v9822_v3, 7  ;;  %v9857_v44 = vsel %vm647_vm3, %v583_v40, %v711_v62  ;;  %v437_v63 = vmul.f32 %v351_v25, %v289_v21  ;;  %v243_v25 = vld [vmem:[%s9237_s9 + $0x78] sm:$0xff] }
  0x6d   : > { %v537_v0 = vadd.f32 %v499_v54, %v389_v51  ;;  %v553_v1 = vadd.f32 %v499_v54, %v405_v31  ;;  %v388_v20 = vmul.f32 %v9831_v33, %v240_v14  ;;  %v569_v17 = vadd.f32 %v499_v54, %v421_v8 }
  0x6e   : > { %v9869_v18 = vsel %vm929_vm0, %v968_v35, %v1000_v58  ;;  %v1032_v32 = vrot.slane %v9857_v44, 7  ;;  %v585_v2 = vadd.f32 %v499_v54, %v437_v63  ;;  %v404_v40 = vmul.f32 %v9831_v33, %v256_v13 }
  0x6f   : > { %1090 = vrot.lane.b32.xlu0 %v9704_v27, %s9155_s10  ;;  %1092 = vrot.lane.b32.xlu1 %v9719_v36, %s9155_s10  ;;  %v9835_v27 = vsel %vm646_vm2, %v582_v59, %v710_v56  ;;  %vm601_vm4 = vcmp.gt.f32.partialorder %v537_v0, 0.0  ;;  %v665_v36 = vmul.f32 0.2, %v537_v0  ;;  %vm617_vm5 = vcmp.gt.f32.partialorder %v553_v1, 0.0  ;;  %v274_v56 = vld [vmem:[%s9237_s9 + $0x170] sm:$0xff] }
  0x70   : > { %v681_v28 = vmul.f32 0.2, %v553_v1  ;;  %v1030_v57 = vrot.slane %v9835_v27, 7  ;;  %vm633_vm6 = vcmp.gt.f32.partialorder %v569_v17, 0.0  ;;  %v9879_v30 = vadd.f32 %v9850_v52, %v388_v20  ;;  %v290_v20 = vld [vmem:[%s9237_s9 + $0x1f0] sm:$0xff] }
  0x71   : > { %v697_v59 = vmul.f32 0.2, %v569_v17  ;;  %vm649_vm7 = vcmp.gt.f32.partialorder %v585_v2, 0.0  ;;  %v713_v50 = vmul.f32 0.2, %v585_v2  ;;  %v9903_v14 = vmul.f32 %v9831_v33, %v272_v19 }
  0x72   : > { %v745_v15 = vsel %vm617_vm5, %v553_v1, %v681_v28  ;;  %v9898_v46 = vsel %vm929_vm0, %v998_v5, %v1030_v57  ;;  %v9915_v62 = vmul.f32 0.2, %v9879_v30  ;;  %v507_v1 = vrot.slane %v9573_v39, %v9422_v48 }
  0x73   : > { %1122 = vrot.lane.b32.xlu0 %v9733_v49, %s9155_s10  ;;  %1124 = vrot.lane.b32.xlu1 %v9740_v7, %s9155_s10  ;;  %v9855_v49 = vsel %vm929_vm0, %v941_v10, %v968_v35  ;;  %v9859_v7 = vsel %vm601_vm4, %v537_v0, %v665_v36  ;;  %v972_v47 = vrot.slane %v745_v15, 7  ;;  %v761_v54 = vsel %vm633_vm6, %v569_v17, %v697_v59  ;;  %v275_v35 = vld [vmem:[%s9237_s9 + $0x178] sm:$0xff] }
  0x74   : > { %v943_v16 = vrot.slane %v9859_v7, 7  ;;  %v1004_v51 = vrot.slane %v761_v54, 7  ;;  %v9917_v0 = vsel %vm649_vm7, %v585_v2, %v713_v50  ;;  %vm600_vm10 = vcmp.gt.f32.partialorder %v9879_v30, 0.0 }
  0x75   : > { %v1036_v6 = vrot.slane %v9917_v0, 7  ;;  %vm1363_vm4 = vcmask 1048065   ;;  %vm1202_vm6 = vcmask 523264   ;;  %vm1382_vm7 = vcmask 1048064  }
  0x76   : > { %v9925_v5 = vsel %vm929_vm0, %v972_v47, %v1004_v51 }
  0x77   : > { %1154 = vrot.lane.b32.xlu0 %v9775_v45, %s9155_s10  ;;  %1156 = vrot.lane.b32.xlu1 %v9783_v55, %s9155_s10  ;;  %v9887_v45 = vsel %vm929_vm0, %v943_v16, %v972_v47  ;;  %v355_v55 = vrot.slane %v9561_v37, %v9353_v61  ;;  %v359_v61 = vrot.slane %v9561_v37, %v9422_v48 }
  0x78   : > { %v9922_v37 = vadd.f32 %v9850_v52, %v404_v40  ;;  %v9932_v28 = vsel %vm929_vm0, %v1004_v51, %v1036_v6 }
  0x79   : > { %v390_v31 = vmul.f32 %v355_v55, %v242_v24  ;;  %v406_v8 = vmul.f32 %v355_v55, %v258_v26  ;;  %v391_v23 = vmul.f32 %v359_v61, %v243_v25  ;;  %v407_v36 = vmul.f32 %v359_v61, %v259_v4 }
  0x7a   : > { %v422_v21 = vmul.f32 %v355_v55, %v274_v56  ;;  %v423_v39 = vmul.f32 %v359_v61, %v275_v35  ;;  %v438_v59 = vmul.f32 %v355_v55, %v290_v20  ;;  %v288_v35 = vld [vmem:[%s9237_s9 + $0x1e0] sm:$0xff]  ;;  %vm616_vm2 = vcmp.gt.f32.partialorder %v9922_v37, 0.0 }
  0x7b   : > { %1182 = vrot.lane.b32.xlu0 %v1022_v34, %s9155_s10  ;;  %1184 = vrot.lane.b32.xlu1 %v1024_v22, %s9155_s10  ;;  %v538_v34 = vadd.f32 %v503_v11, %v390_v31  ;;  %v554_v22 = vadd.f32 %v503_v11, %v406_v8  ;;  %v539_v17 = vadd.f32 %v507_v1, %v391_v23  ;;  %v680_v23 = vmul.f32 0.2, %v9922_v37 }
  0x7c   : > { %v555_v15 = vadd.f32 %v507_v1, %v407_v36  ;;  %v570_v47 = vadd.f32 %v503_v11, %v422_v21  ;;  %v571_v19 = vadd.f32 %v507_v1, %v423_v39  ;;  %v586_v50 = vadd.f32 %v503_v11, %v438_v59 }
  0x7d   : > { %vm602_vm8 = vcmp.gt.f32.partialorder %v538_v34, 0.0  ;;  %v666_v48 = vmul.f32 0.2, %v538_v34  ;;  %vm618_vm9 = vcmp.gt.f32.partialorder %v554_v22, 0.0  ;;  %v682_v13 = vmul.f32 0.2, %v554_v22 }
  0x7e   : > { %vm603_vm11 = vcmp.gt.f32.partialorder %v539_v17, 0.0  ;;  %v667_v41 = vmul.f32 0.2, %v539_v17  ;;  %vm619_vm12 = vcmp.gt.f32.partialorder %v555_v15, 0.0  ;;  %v683_v9 = vmul.f32 0.2, %v555_v15 }
  0x7f   : > { %1062 = vrot.lane.b32.xlu0 %v940_v12, %s9155_s10  ;;  %1064 = vrot.lane.b32.xlu1 %v941_v10, %s9155_s10  ;;  %v9940_v63 = vsel %vm602_vm8, %v538_v34, %v666_v48  ;;  %v746_v12 = vsel %vm618_vm9, %v554_v22, %v682_v13  ;;  %vm634_vm13 = vcmp.gt.f32.partialorder %v570_v47, 0.0  ;;  %v291_v10 = vld [vmem:[%s9237_s9 + $0x1f8] sm:$0xff]  ;;  %v698_v40 = vmul.f32 0.2, %v570_v47 }
  0x80   : > { %v944_v2 = vrot.slane %v9940_v63, 7  ;;  %v974_v24 = vrot.slane %v746_v12, 7  ;;  %v9949_v26 = vsel %vm603_vm11, %v539_v17, %v667_v41  ;;  %vm635_vm14 = vcmp.gt.f32.partialorder %v571_v19, 0.0 }
  0x81   : > { %v699_v55 = vmul.f32 0.2, %v571_v19  ;;  %v945_v25 = vrot.slane %v9949_v26, 7  ;;  %v747_v54 = vsel %vm619_vm12, %v555_v15, %v683_v9  ;;  %v762_v51 = vsel %vm634_vm13, %v570_v47, %v698_v40 }
  0x82   : > { %v9955_v4 = vsel %vm929_vm0, %v944_v2, %v974_v24  ;;  %v976_v56 = vrot.slane %v747_v54, 7  ;;  %v439_v31 = vmul.f32 %v359_v61, %v291_v10  ;;  %vm650_vm15 = vcmp.gt.f32.partialorder %v586_v50, 0.0 }
  0x83   : > { %1094 = vrot.lane.b32.xlu0 %v9845_v38, %s9155_s10  ;;  %1096 = vrot.lane.b32.xlu1 %v9855_v49, %s9155_s10  ;;  %v763_v38 = vsel %vm635_vm14, %v571_v19, %v699_v55  ;;  %v1006_v49 = vrot.slane %v762_v51, 7  ;;  %v714_v34 = vmul.f32 0.2, %v586_v50  ;;  %v1033_v11 = vsel %vm929_vm0, %v1000_v58, %v1032_v32 }
  0x84   : > { %v1008_v8 = vrot.slane %v763_v38, 7  ;;  %v9971_v61 = vsel %vm929_vm0, %v945_v25, %v976_v56  ;;  %v587_v22 = vadd.f32 %v507_v1, %v439_v31  ;;  %v436_v58 = vmul.f32 %v9831_v33, %v288_v35 }
  0x85   : > { %v9976_v36 = vsel %vm929_vm0, %v974_v24, %v1006_v49  ;;  %v9981_v3 = vsel %vm650_vm15, %v586_v50, %v714_v34  ;;  %v728_v33 = vsel %vm600_vm10, %v9879_v30, %v9915_v62  ;;  %v744_v39 = vsel %vm616_vm2, %v9922_v37, %v680_v23 }
  0x86   : > { %v1038_v21 = vrot.slane %v9981_v3, 7  ;;  %vm651_vm1 = vcmp.gt.f32.partialorder %v587_v22, 0.0  ;;  %v715_v20 = vmul.f32 0.2, %v587_v22  ;;  %v942_v30 = vrot.slane %v728_v33, 7 }
  0x87   : > { %1126 = vrot.lane.b32.xlu0 %v9862_v53, %s9155_s10  ;;  %1128 = vrot.lane.b32.xlu1 %v9869_v18, %s9155_s10  ;;  %v568_v53 = vadd.f32 %v9850_v52, %v9903_v14  ;;  %v9979_v18 = vsel %vm929_vm0, %v976_v56, %v1008_v8  ;;  %v970_v62 = vrot.slane %v744_v39, 7  ;;  %vm1434_vm8 = vcmask 1040896  }
  0x88   : > { %v9992_v14 = vsel %vm929_vm0, %v1006_v49, %v1038_v21  ;;  %v9994_v1 = vsel %vm651_vm1, %v587_v22, %v715_v20  ;;  %vm1380_vm9 = vcmask 523265   ;;  %vm1451_vm10 = vcmask 516096  }
  0x89   : > { %v1040_v48 = vrot.slane %v9994_v1, 7  ;;  %v696_v17 = vmul.f32 0.2, %v568_v53  ;;  %vm632_vm3 = vcmp.gt.f32.partialorder %v568_v53, 0.0  ;;  %v971_v42 = vsel %vm929_vm0, %v942_v30, %v970_v62  ;;  %v8749_v1 = vld [vmem:[%s11791_s1 + $0x5d0] sm:$0xff]  }
  0x8a   : > { %vm5449_vm11 = vcmask 1046528   ;;  %vm6848_vm12 = vcmask 261120  }
  0x8b   : > { %1158 = vrot.lane.b32.xlu0 %v9898_v46, %s9155_s10  ;;  %1160 = vrot.lane.b32.xlu1 %v1033_v11, %s9155_s10  ;;  %v584_v46 = vadd.f32 %v9850_v52, %v436_v58  ;;  %v10006_v13 = vsel %vm929_vm0, %v1008_v8, %v1040_v48  ;;  %v760_v15 = vsel %vm632_vm3, %v568_v53, %v696_v17 }
  0x8d   : > { %v712_v47 = vmul.f32 0.2, %v584_v46  ;;  %vm648_vm5 = vcmp.gt.f32.partialorder %v584_v46, 0.0 }
  0x8f   : > { %1186 = vrot.lane.b32.xlu0 %v1026_v60, %s9155_s10  ;;  %1188 = vrot.lane.b32.xlu1 %v1028_v29, %s9155_s10  ;;  %v1002_v60 = vrot.slane %v760_v15, 7  ;;  %v10021_v19 = vsel %vm648_vm5, %v584_v46, %v712_v47 }
  0x91   : > { %v10014_v37 = vpop.permute.xlu1 %1048  ;;  %v1043_v52 = vpop.permute.xlu0 %1042  ;;  %v1003_v7 = vsel %vm929_vm0, %v970_v62, %v1002_v60 }
  0x92   : > { %1364 = vst.msk [vmem:[#allocation2] sm:$0xfe] %vm1363_vm4, %v1043_v52 }
  0x93   : > { %1066 = vrot.lane.b32.xlu0 %v942_v30, %s9155_s10  ;;  %1068 = vrot.lane.b32.xlu1 %v943_v16, %s9155_s10  ;;  %v1034_v16 = vrot.slane %v10021_v19, 7 }
  0x95   : > { %v1045_v43 = vpop.permute.xlu0 %1044  ;;  %v1075_v29 = vpop.permute.xlu1 %1074 }
  0x96   : > { %v1203_v59 = vsel %vm1202_vm6, %v1043_v52, %v1045_v43  ;;  %1383 = vst.msk [vmem:[#allocation2 + $0x88] sm:$0xff] %vm1382_vm7, %v1075_v29 }
  0x97   : > { %1365 = vst [vmem:[#allocation2 + $0x8] sm:$0xfe] %v1203_v59  ;;  %1098 = vrot.lane.b32.xlu0 %v971_v42, %s9155_s10  ;;  %1100 = vrot.lane.b32.xlu1 %v9887_v45, %s9155_s10  ;;  %v1035_v45 = vsel %vm929_vm0, %v1002_v60, %v1034_v16  ;;  %vm2168_vm0 = vsmask.f32 7424 }
  0x99   : > { %v1047_v41 = vpop.permute.xlu0 %1046  ;;  %v1077_v12 = vpop.permute.xlu1 %1076  ;;  %v1827_v38 = vld [vmem:[#allocation2] sm:$0xfe] }
  0x9a   : > { %v1204_v24 = vsel %vm1202_vm6, %v1045_v43, %v1047_v41  ;;  %v1205_v9 = vsel %vm1202_vm6, %v1047_v41, %v10014_v37  ;;  %v1218_v10 = vsel %vm1202_vm6, %v1075_v29, %v1077_v12 }
  0x9b   : > { %1366 = vst [vmem:[#allocation2 + $0x10] sm:$0xfe] %v1204_v24  ;;  %1367 = vst [vmem:[#allocation2 + $0x18] sm:$0xfe] %v1205_v9  ;;  %1130 = vrot.lane.b32.xlu0 %v1003_v7, %s9155_s10  ;;  %1132 = vrot.lane.b32.xlu1 %v9925_v5, %s9155_s10 }
  0x9c   : > { %1384 = vst [vmem:[#allocation2 + $0x90] sm:$0xff] %v1218_v10 }
  0x9d   : > { %v1107_v40 = vpop.permute.xlu0 %1106  ;;  %v1109_v55 = vpop.permute.xlu1 %1108  ;;  %v1470_v54 = vld [vmem:[#allocation2 + $0x88] sm:$0xff] }
  0x9e   : > { %1400 = vst.msk [vmem:[#allocation2 + $0x110] sm:$0xff] %vm1382_vm7, %v1107_v40  ;;  %v1233_v50 = vsel %vm1202_vm6, %v1107_v40, %v1109_v55  ;;  %v1828_v56 = vld [vmem:[#allocation2 + $0x8] sm:$0xfe]  ;;  %v1861_v5 = vpack.c.bf16 %v1470_v54, %v1827_v38 }
  0x9f   : > { %1162 = vrot.lane.b32.xlu0 %v1035_v45, %s9155_s10  ;;  %1164 = vrot.lane.b32.xlu1 %v9932_v28, %s9155_s10  ;;  %v1862_v51 = vpack.c.bf16 %v1218_v10, %v1828_v56 }
  0xa0   : > { %v2172_v11 = vshll.u32 %v1861_v5, 16  ;;  %v2170_v60 = vshrl.u32 %v1861_v5, 16  ;;  %v8729_v5 = vld [vmem:[%s11791_s1 + $0x548] sm:$0xff]  }
  0xa1   : > { %v1139_v31 = vpop.permute.xlu0 %1138  ;;  %v1141_v35 = vpop.permute.xlu1 %1140  ;;  %v2184_v49 = vshll.u32 %v1862_v51, 16  ;;  %v2182_v53 = vshrl.u32 %v1862_v51, 16 }
  0xa2   : > { %1417 = vst.msk [vmem:[#allocation2 + $0x198] sm:$0xff] %vm1382_vm7, %v1139_v31  ;;  %v1248_v8 = vsel %vm1202_vm6, %v1139_v31, %v1141_v35  ;;  %v1830_v20 = vld [vmem:[#allocation2 + $0x18] sm:$0xfe]  ;;  %v8731_v31 = vld [vmem:[%s11791_s1 + $0x590] sm:$0xff]  }
  0xa3   : > { %1190 = vrot.lane.b32.xlu0 %v1030_v57, %s9155_s10  ;;  %1192 = vrot.lane.b32.xlu1 %v1032_v32, %s9155_s10  ;;  %v10053_v28 = vpack.c.bf16 %v1248_v8, %v1233_v50  ;;  %v2186_v34 = vrot.slane %v2184_v49, 1  ;;  %v1829_v57 = vld [vmem:[#allocation2 + $0x10] sm:$0xfe] }
  0xa5   : > { %v1079_v23 = vpop.permute.xlu0 %1078  ;;  %v10055_v22 = vpop.permute.xlu1 %1080  ;;  %v2189_v58 = vshll.u32 %v10053_v28, 16  ;;  %v2187_v44 = vor.u32 %v2186_v34, %v2182_v53  ;;  %v1487_v52 = vld [vmem:[#allocation2 + $0x110] sm:$0xff]  ;;  %v2381_v3 = vshrl.u32 %v10053_v28, 16 }
  0xa6   : > { %v1219_v33 = vsel %vm1202_vm6, %v1077_v12, %v1079_v23  ;;  %v1220_v27 = vsel %vm1202_vm6, %v1079_v23, %v10055_v22 }
  0xa7   : > { %1385 = vst [vmem:[#allocation2 + $0x98] sm:$0xff] %v1219_v33  ;;  %1386 = vst [vmem:[#allocation2 + $0xa0] sm:$0xff] %v1220_v27  ;;  %1070 = vrot.lane.b32.xlu0 %v944_v2, %s9155_s10  ;;  %1072 = vrot.lane.b32.xlu1 %v945_v25, %s9155_s10  ;;  %v10067_v32 = vrot.slane %v2189_v58, 1  ;;  %v1864_v39 = vpack.c.bf16 %v1220_v27, %v1830_v20  ;;  %v1863_v17 = vpack.c.bf16 %v1219_v33, %v1829_v57  ;;  %v8741_v58 = vld [vmem:[%s11791_s1 + $0x5c0] sm:$0xff]   ;;  %v8743_v27 = vld [vmem:[%s11791_s1 + $0x608] sm:$0xff]  }
  0xa8   : > { %v2174_v25 = vrot.slane %v2172_v11, 1  ;;  %v8733_v11 = vld [vmem:[%s11791_s1 + $0x550] sm:$0xff]   ;;  %v8735_v57 = vld [vmem:[%s11791_s1 + $0x558] sm:$0xff]  }
  0xa9   : > { %v1111_v46 = vpop.permute.xlu0 %1110  ;;  %v10069_v30 = vpop.permute.xlu1 %1112  ;;  %v2192_v62 = vsel %vm2168_vm0, %v2187_v44, %v10067_v32  ;;  %v1504_v15 = vld [vmem:[#allocation2 + $0x198] sm:$0xff]  ;;  %v2208_v47 = vshll.u32 %v1864_v39, 16  ;;  %v2196_v42 = vshll.u32 %v1863_v17, 16  ;;  %v2194_v56 = vshrl.u32 %v1863_v17, 16  ;;  %v8745_v44 = vld [vmem:[%s11791_s1 + $0x5c8] sm:$0xff]  }
  0xaa   : > { %v1234_v63 = vsel %vm1202_vm6, %v1109_v55, %v1111_v46  ;;  %v1235_v2 = vsel %vm1202_vm6, %v1111_v46, %v10069_v30  ;;  %3391 = vmatprep.mubr.bf16.mxu0 %v2192_v62  ;;  %v10076_v26 = vpack.c.bf16 %v1504_v15, %v1487_v52  ;;  %v2175_v12 = vor.u32 %v2174_v25, %v2170_v60  ;;  %v8727_v55 = vld [vmem:[%s11791_s1 + $0x588] sm:$0xff]   ;;  %v8747_v62 = vld [vmem:[%s11791_s1 + $0x610] sm:$0xff]   ;;  %v8736_v52 = vld [vmem:[%s11791_s1 + $0x5a0] sm:$0xff]  }
  0xab   : > { %1102 = vrot.lane.b32.xlu0 %v9955_v4, %s9155_s10  ;;  %1104 = vrot.lane.b32.xlu1 %v9971_v61, %s9155_s10  ;;  %v8725_v4 = vld [vmem:[%s11791_s1 + $0x540] sm:$0xff]   ;;  %v2210_v9 = vrot.slane %v2208_v47, 1  ;;  %v2198_v45 = vrot.slane %v2196_v42, 1  ;;  %v8738_v25 = vld [vmem:[%s11791_s1 + $0x5a8] sm:$0xff]  }
  0xac   : > { %v2177_v43 = vshll.u32 %v10076_v26, 16  ;;  %v2373_v60 = vshrl.u32 %v10076_v26, 16 }
  0xad   : > { %v1143_v29 = vpop.permute.xlu0 %1142  ;;  %v10083_v59 = vpop.permute.xlu1 %1144  ;;  %v2199_v8 = vor.u32 %v2198_v45, %v2194_v56 }
  0xae   : > { %v1249_v7 = vsel %vm1202_vm6, %v1141_v35, %v1143_v29  ;;  %v1250_v41 = vsel %vm1202_vm6, %v1143_v29, %v10083_v59  ;;  %v10088_v24 = vrot.slane %v2177_v43, 1 }
  0xaf   : > { %1134 = vrot.lane.b32.xlu0 %v9976_v36, %s9155_s10  ;;  %1136 = vrot.lane.b32.xlu1 %v9979_v18, %s9155_s10  ;;  %v10097_v61 = vpack.c.bf16 %v1250_v41, %v1235_v2  ;;  %v10099_v10 = vpack.c.bf16 %v1249_v7, %v1234_v63  ;;  %v2206_v36 = vshrl.u32 %v1864_v39, 16  ;;  %v8737_v63 = vld [vmem:[%s11791_s1 + $0x560] sm:$0xff]   ;;  %v2383_v41 = vor.u32 %v2381_v3, %v10067_v32 }
  0xb0   : > { %v2180_v40 = vsel %vm2168_vm0, %v2175_v12, %v10088_v24  ;;  %v8757_v3 = vld [vmem:[%s11791_s1 + $0x640] sm:$0xff]  }
  0xb1   : > { %v1171_v54 = vpop.permute.xlu0 %1170  ;;  %v10106_v50 = vpop.permute.xlu1 %1172  ;;  %3392 = vmatmul.mubr.bf16.vlgmr.msra.gmra.mrb[0].mxu0 %v2180_v40  ;;  %v2213_v18 = vshll.u32 %v10097_v61, 16  ;;  %v2201_v51 = vshll.u32 %v10099_v10, 16  ;;  %v2211_v35 = vor.u32 %v2210_v9, %v2206_v36  ;;  %v8750_v9 = vld [vmem:[%s11791_s1 + $0x618] sm:$0xff]  }
  0xb2   : > { %1435 = vst.msk [vmem:[#allocation2 + $0x220] sm:$0x1] %vm1434_vm8, %v1171_v54  ;;  %v1263_v38 = vsel %vm1202_vm6, %v1171_v54, %v10106_v50  ;;  %7931 = vmatpush3.bf16.msra.mxu0 %v8725_v4  ;;  %v8740_v54 = vld [vmem:[%s11791_s1 + $0x568] sm:$0xff]  }
  0xb3   : > { %1436 = vst [vmem:[#allocation2 + $0x228] sm:$0x1] %v1263_v38  ;;  %1166 = vrot.lane.b32.xlu0 %v9992_v14, %s9155_s10  ;;  %1168 = vrot.lane.b32.xlu1 %v10006_v13, %s9155_s10  ;;  %v10123_v49 = vrot.slane %v2213_v18, 1  ;;  %v10125_v34 = vrot.slane %v2201_v51, 1  ;;  %v8751_v18 = vld [vmem:[%s11791_s1 + $0x5d8] sm:$0xff]   ;;  %v8752_v38 = vld [vmem:[%s11791_s1 + $0x620] sm:$0xff]  }
  0xb4   : > { %7932 = vmatprep.subr.bf16.mxu0 %v8727_v55 }
  0xb5   : > { %v1051_v23 = vpop.permute.xlu0 %1050  ;;  %v10130_v14 = vpop.permute.xlu1 %1052  ;;  %v2216_v13 = vsel %vm2168_vm0, %v2211_v35, %v10123_v49  ;;  %v2204_v53 = vsel %vm2168_vm0, %v2199_v8, %v10125_v34 }
  0xb6   : > { %v1206_v20 = vsel %vm1202_vm6, %v10014_v37, %v1051_v23  ;;  %v1207_v33 = vsel %vm1202_vm6, %v1051_v23, %v10130_v14  ;;  %7933 = vmatpush3.bf16.msra.mxu0 %v8729_v5  ;;  %3440 = vmatprep.mubr.bf16.mxu1 %v2216_v13  ;;  %v8734_v37 = vld [vmem:[%s11791_s1 + $0x598] sm:$0xff]   ;;  %v8742_v5 = vld [vmem:[%s11791_s1 + $0x5b0] sm:$0xff]  }
  0xb7   : > { %1368 = vst [vmem:[#allocation2 + $0x20] sm:$0xfe] %v1206_v20  ;;  %1369 = vst [vmem:[#allocation2 + $0x28] sm:$0xfe] %v1207_v33  ;;  %1194 = vrot.lane.b32.xlu0 %v1034_v16, %s9155_s10  ;;  %1196 = vrot.lane.b32.xlu1 %v1036_v6, %s9155_s10  ;;  %v8744_v23 = vld [vmem:[%s11791_s1 + $0x570] sm:$0xff]  }
  0xb8   : > { %7934 = vmatprep.subr.bf16.mxu0 %v8731_v31  ;;  %3441 = vmatmul.mubr.bf16.vlgmr.msra.gmra.mrb[0].mxu1 %v2204_v53 }
  0xb9   : > { %v1083_v19 = vpop.permute.xlu0 %1082  ;;  %v10161_v16 = vpop.permute.xlu1 %1084  ;;  %v1844_v39 = vld [vmem:[#allocation2 + $0x220] sm:$0x1]  ;;  %7959 = vmatpush3.bf16.msra.mxu1 %v8741_v58 }
  0xba   : > { %v1221_v0 = vsel %vm1202_vm6, %v10055_v22, %v1083_v19  ;;  %v1222_v6 = vsel %vm1202_vm6, %v1083_v19, %v10161_v16  ;;  %7935 = vmatpush3.bf16.msra.mxu0 %v8733_v11  ;;  %v1845_v17 = vld [vmem:[#allocation2 + $0x228] sm:$0x1]  ;;  %v1878_v46 = vpack.c.bf16 %v1844_v39, %v1844_v39  ;;  %7960 = vmatprep.subr.bf16.mxu1 %v8743_v27  ;;  %v8753_v58 = vld [vmem:[%s11791_s1 + $0x5e0] sm:$0xff]   ;;  %v8746_v27 = vld [vmem:[%s11791_s1 + $0x5b8] sm:$0xff]  }
  0xbb   : > { %1387 = vst [vmem:[#allocation2 + $0xa8] sm:$0xff] %v1221_v0  ;;  %1388 = vst [vmem:[#allocation2 + $0xb0] sm:$0xff] %v1222_v6  ;;  %1200 = vrot.lane.b32.xlu0 %v1040_v48, %s9155_s10  ;;  %1198 = vrot.lane.b32.xlu1 %v1038_v21, %s9155_s10  ;;  %v1879_v22 = vpack.c.bf16 %v1845_v17, %v1845_v17  ;;  %v8748_v19 = vld [vmem:[%s11791_s1 + $0x578] sm:$0xff]   ;;  %s7873_s10 = sshll.u32 %s11797_s21, 5 }
  0xbc   : > { %7936 = vmatprep.subr.bf16.mxu0 %v8734_v37  ;;  %v2377_v15 = vshll.u32 %v1878_v46, 16  ;;  %v8755_v46 = vld [vmem:[%s11791_s1 + $0x680] sm:$0xff]   ;;  %s226_s17 = scalar_lea.vmem %s11795_s5, %s7873_s10 }
  0xbd   : > { %v1115_v48 = vpop.permute.xlu0 %1114  ;;  %v10185_v2 = vpop.permute.xlu1 %1116  ;;  %v2385_v21 = vshll.u32 %v1879_v22, 16  ;;  %7961 = vmatpush3.bf16.msra.mxu1 %v8745_v44 }
  0xbe   : > { %v1236_v47 = vsel %vm1202_vm6, %v10069_v30, %v1115_v48  ;;  %v1237_v42 = vsel %vm1202_vm6, %v1115_v48, %v10185_v2  ;;  %7937 = vmatpush3.bf16.msra.mxu0 %v8735_v57  ;;  %v2379_v43 = vrot.slane %v2377_v15, 1  ;;  %7962 = vmatprep.subr.bf16.mxu1 %v8747_v62  ;;  %v1832_v29 = vld [vmem:[#allocation2 + $0x28] sm:$0xfe]  ;;  %v1831_v7 = vld [vmem:[#allocation2 + $0x20] sm:$0xfe]  ;;  %v2375_v30 = vor.u32 %v2373_v60, %v10088_v24 }
  0xbf   : > { %v2387_v12 = vrot.slane %v2385_v21, 1  ;;  %7938 = vmatprep.subr.bf16.mxu0 %v8736_v52  ;;  %v1866_v4 = vpack.c.bf16 %v1222_v6, %v1832_v29  ;;  %v10207_v36 = vpack.c.bf16 %v1221_v0, %v1831_v7  ;;  %v8756_v62 = vld [vmem:[%s11791_s1 + $0x5e8] sm:$0xff]  }
  0xc0   : > { %v2380_v51 = vsel %vm2168_vm0, %v2375_v30, %v2379_v43  ;;  %v2389_v30 = vshrl.u32 %v10099_v10, 16 }
  0xc1   : > { %v1147_v45 = vpop.permute.xlu0 %1146  ;;  %v10201_v40 = vpop.permute.xlu1 %1148  ;;  %v2388_v55 = vsel %vm2168_vm0, %v2383_v41, %v2387_v12  ;;  %7963 = vmatpush3.bf16.msra.mxu1 %v8749_v1  ;;  %v2232_v32 = vshll.u32 %v1866_v4, 16  ;;  %v2230_v13 = vshrl.u32 %v1866_v4, 16  ;;  %v2220_v37 = vshll.u32 %v10207_v36, 16  ;;  %v8760_v1 = vld [vmem:[%s11791_s1 + $0x5f0] sm:$0xff]  }
  0xc2   : > { %v1251_v24 = vsel %vm1202_vm6, %v10083_v59, %v1147_v45  ;;  %v1252_v56 = vsel %vm1202_vm6, %v1147_v45, %v10201_v40  ;;  %3399 = vmatprep.mubr.bf16.mxu0 %v2388_v55  ;;  %7939 = vmatpush3.bf16.msra.mxu0 %v8737_v63  ;;  %v8758_v63 = vld [vmem:[%s11791_s1 + $0x630] sm:$0xff]   ;;  %v2397_v12 = vshrl.u32 %v10097_v61, 16  ;;  %v8761_v45 = vld [vmem:[%s11791_s1 + $0x648] sm:$0xff]  }
  0xc3   : > { %3400 = vmatmul.mubr.bf16.gmra.mrb[4].mxu0 %v2380_v51  ;;  %7940 = vmatprep.subr.bf16.mxu0 %v8738_v25  ;;  %v10223_v31 = vpack.c.bf16 %v1252_v56, %v1237_v42  ;;  %v2234_v59 = vrot.slane %v2232_v32, 1  ;;  %v10225_v35 = vpack.c.bf16 %v1251_v24, %v1236_v47  ;;  %v2222_v15 = vrot.slane %v2220_v37, 1  ;;  %v8762_v47 = vld [vmem:[%s11791_s1 + $0x638] sm:$0xff]   ;;  %v8763_v24 = vld [vmem:[%s11791_s1 + $0x690] sm:$0xff]  }
  0xc4   : > { %7964 = vmatprep.subr.bf16.mxu1 %v8750_v9  ;;  %v8759_v9 = vld [vmem:[%s11791_s1 + $0x688] sm:$0xff]   ;;  %v2399_v32 = vor.u32 %v2397_v12, %v10123_v49  ;;  %v8764_v56 = vld [vmem:[%s11791_s1 + $0x5f8] sm:$0xff]  }
  0xc5   : > { %v1175_v8 = vpop.permute.xlu0 %1174  ;;  %v10227_v11 = vpop.permute.xlu1 %1176  ;;  %v2237_v53 = vshll.u32 %v10223_v31, 16  ;;  %7965 = vmatpush3.bf16.msra.mxu1 %v8751_v18  ;;  %v2235_v57 = vor.u32 %v2234_v59, %v2230_v13  ;;  %v2225_v39 = vshll.u32 %v10225_v35, 16 }
  0xc6   : > { %v1264_v20 = vsel %vm1202_vm6, %v10106_v50, %v1175_v8  ;;  %v1265_v33 = vsel %vm1202_vm6, %v1175_v8, %v10227_v11  ;;  %7941 = vmatpush3.bf16.msra.mxu0 %v8740_v54  ;;  %7966 = vmatprep.subr.bf16.mxu1 %v8752_v38  ;;  %v8754_v50 = vld [vmem:[%s11791_s1 + $0x628] sm:$0xff]  }
  0xc7   : > { %1437 = vst [vmem:[#allocation2 + $0x230] sm:$0x1] %v1264_v20  ;;  %1438 = vst [vmem:[#allocation2 + $0x238] sm:$0x1] %v1265_v33  ;;  %7942 = vmatprep.subr.bf16.mxu0 %v8742_v5  ;;  %v10244_v44 = vrot.slane %v2237_v53, 1  ;;  %v10274_v48 = vrot.slane %v2225_v39, 1  ;;  %v2391_v5 = vor.u32 %v2389_v30, %v10125_v34 }
  0xc9   : > { %v1055_v0 = vpop.permute.xlu0 %1054  ;;  %v10253_v6 = vpop.permute.xlu1 %1056  ;;  %v2240_v17 = vsel %vm2168_vm0, %v2235_v57, %v10244_v44  ;;  %7967 = vmatpush3.bf16.msra.mxu1 %v8753_v58  ;;  %v8771_v58 = vld [vmem:[%s11791_s1 + $0x700] sm:$0xff]  }
  0xca   : > { %v1208_v22 = vsel %vm1202_vm6, %v10130_v14, %v1055_v0  ;;  %v1209_v52 = vsel %vm1202_vm6, %v1055_v0, %v10253_v6  ;;  %7943 = vmatpush3.bf16.msra.mxu0 %v8744_v23  ;;  %3489 = vmatprep.mubr.bf16.mxu0 %v2240_v17  ;;  %v2218_v14 = vshrl.u32 %v10207_v36, 16 }
  0xcb   : > { %1370 = vst [vmem:[#allocation2 + $0x30] sm:$0xfe] %v1208_v22  ;;  %1371 = vst [vmem:[#allocation2 + $0x38] sm:$0xfe] %v1209_v52  ;;  %7944 = vmatprep.subr.bf16.mxu0 %v8746_v27  ;;  %7968 = vmatprep.subr.bf16.mxu1 %v8754_v50  ;;  %v8765_v50 = vld [vmem:[%s11791_s1 + $0x650] sm:$0xff]  }
  0xcc   : > { %v2223_v43 = vor.u32 %v2222_v15, %v2218_v14 }
  0xcd   : > { %v1087_v21 = vpop.permute.xlu0 %1086  ;;  %v10279_v25 = vpop.permute.xlu1 %1088  ;;  %7969 = vmatpush3.bf16.msra.mxu1 %v8756_v62  ;;  %v8767_v62 = vld [vmem:[%s11791_s1 + $0x658] sm:$0xff]  }
  0xce   : > { %v1223_v42 = vsel %vm1202_vm6, %v10161_v16, %v1087_v21  ;;  %v1224_v60 = vsel %vm1202_vm6, %v1087_v21, %v10279_v25  ;;  %7945 = vmatpush3.bf16.msra.mxu0 %v8748_v19  ;;  %v1847_v29 = vld [vmem:[#allocation2 + $0x238] sm:$0x1]  ;;  %v1846_v7 = vld [vmem:[#allocation2 + $0x230] sm:$0x1]  ;;  %7970 = vmatprep.subr.bf16.mxu1 %v8758_v63  ;;  %v2228_v16 = vsel %vm2168_vm0, %v2223_v43, %v10274_v48 }
  0xcf   : > { %1389 = vst [vmem:[#allocation2 + $0xb8] sm:$0xff] %v1223_v42  ;;  %1390 = vst [vmem:[#allocation2 + $0xc0] sm:$0xff] %v1224_v60  ;;  %v1881_v41 = vpack.c.bf16 %v1847_v29, %v1847_v29  ;;  %v1880_v4 = vpack.c.bf16 %v1846_v7, %v1846_v7  ;;  %7986 = vmatprep.subr.bf16.mxu0 %v8755_v46 }
  0xd1   : > { %v1119_v55 = vpop.permute.xlu0 %1118  ;;  %v10298_v54 = vpop.permute.xlu1 %1120  ;;  %3490 = vmatmul.mubr.bf16.vlgmr.msra.gmra.mrb[8].mxu0 %v2228_v16  ;;  %v2401_v36 = vshll.u32 %v1881_v41, 16  ;;  %v2393_v18 = vshll.u32 %v1880_v4, 16  ;;  %7971 = vmatpush3.bf16.msra.mxu1 %v8760_v1 }
  0xd2   : > { %v1238_v51 = vsel %vm1202_vm6, %v10185_v2, %v1119_v55  ;;  %v1239_v38 = vsel %vm1202_vm6, %v1119_v55, %v10298_v54  ;;  %7987 = vmatpush3.bf16.msra.mxu0 %v8757_v3  ;;  %7972 = vmatprep.subr.bf16.mxu1 %v8762_v47  ;;  %v1834_v49 = vld [vmem:[#allocation2 + $0x38] sm:$0xfe]  ;;  %v1833_v59 = vld [vmem:[#allocation2 + $0x30] sm:$0xfe]  ;;  %v8768_v47 = vld [vmem:[%s11791_s1 + $0x6a0] sm:$0xff]  }
  0xd3   : > { %v2403_v8 = vrot.slane %v2401_v36, 1  ;;  %v2395_v23 = vrot.slane %v2393_v18, 1  ;;  %7988 = vmatprep.subr.bf16.mxu0 %v8759_v9  ;;  %v1868_v13 = vpack.c.bf16 %v1224_v60, %v1834_v49  ;;  %v1867_v53 = vpack.c.bf16 %v1223_v42, %v1833_v59  ;;  %v8775_v9 = vld [vmem:[%s11791_s1 + $0x708] sm:$0xff]   ;;  %v8781_v59 = vld [vmem:[%s11791_s1 + $0x6d0] sm:$0xff]  }
  0xd4   : > { %v8770_v55 = vld [vmem:[%s11791_s1 + $0x6a8] sm:$0xff]  }
  0xd5   : > { %v1151_v20 = vpop.permute.xlu0 %1150  ;;  %v10315_v2 = vpop.permute.xlu1 %1152  ;;  %v2404_v33 = vsel %vm2168_vm0, %v2399_v32, %v2403_v8  ;;  %v2396_v34 = vsel %vm2168_vm0, %v2391_v5, %v2395_v23  ;;  %7973 = vmatpush3.bf16.msra.mxu1 %v8764_v56  ;;  %v2256_v27 = vshll.u32 %v1868_v13, 16  ;;  %v2244_v19 = vshll.u32 %v1867_v53, 16  ;;  %v8777_v32 = vld [vmem:[%s11791_s1 + $0x6c8] sm:$0xff]   ;;  %v8779_v56 = vld [vmem:[%s11791_s1 + $0x710] sm:$0xff]  }
  0xd6   : > { %v1253_v37 = vsel %vm1202_vm6, %v10201_v40, %v1151_v20  ;;  %v1254_v57 = vsel %vm1202_vm6, %v1151_v20, %v10315_v2  ;;  %3448 = vmatprep.mubr.bf16.mxu1 %v2404_v33  ;;  %7989 = vmatpush3.bf16.msra.mxu0 %v8761_v45  ;;  %v8766_v40 = vld [vmem:[%s11791_s1 + $0x698] sm:$0xff]   ;;  %v2254_v15 = vshrl.u32 %v1868_v13, 16  ;;  %v2242_v1 = vshrl.u32 %v1867_v53, 16  ;;  %v8769_v45 = vld [vmem:[%s11791_s1 + $0x660] sm:$0xff]  }
  0xd7   : > { %3449 = vmatmul.mubr.bf16.gmra.mrb[4].mxu1 %v2396_v34  ;;  %7990 = vmatprep.subr.bf16.mxu0 %v8763_v24  ;;  %v10326_v39 = vpack.c.bf16 %v1254_v57, %v1239_v38  ;;  %v2258_v0 = vrot.slane %v2256_v27, 1  ;;  %v10328_v17 = vpack.c.bf16 %v1253_v37, %v1238_v51  ;;  %v2246_v46 = vrot.slane %v2244_v19, 1  ;;  %v8774_v24 = vld [vmem:[%s11791_s1 + $0x6b0] sm:$0xff]   ;;  %v8782_v13 = vld [vmem:[%s11791_s1 + $0x718] sm:$0xff]  }
  0xd8   : > { %8014 = vmatprep.subr.bf16.mxu1 %v8771_v58  ;;  %v2405_v53 = vshrl.u32 %v10225_v35, 16  ;;  %v8776_v58 = vld [vmem:[%s11791_s1 + $0x670] sm:$0xff]  }
  0xd9   : > { %v1179_v22 = vpop.permute.xlu0 %1178  ;;  %v10336_v52 = vpop.permute.xlu1 %1180  ;;  %v2261_v63 = vshll.u32 %v10326_v39, 16  ;;  %v2249_v14 = vshll.u32 %v10328_v17, 16  ;;  %v2259_v42 = vor.u32 %v2258_v0, %v2254_v15  ;;  %v2247_v43 = vor.u32 %v2246_v46, %v2242_v1  ;;  %v8778_v0 = vld [vmem:[%s11791_s1 + $0x6b8] sm:$0xff]  }
  0xda   : > { %v1266_v3 = vsel %vm1202_vm6, %v10227_v11, %v1179_v22  ;;  %v1267_v21 = vsel %vm1202_vm6, %v1179_v22, %v10336_v52  ;;  %7991 = vmatpush3.bf16.msra.mxu0 %v8765_v50  ;;  %v8773_v11 = vld [vmem:[%s11791_s1 + $0x6c0] sm:$0xff]   ;;  %v2407_v19 = vor.u32 %v2405_v53, %v10274_v48 }
  0xdb   : > { %1439 = vst [vmem:[#allocation2 + $0x240] sm:$0x1] %v1266_v3  ;;  %1440 = vst [vmem:[#allocation2 + $0x248] sm:$0x1] %v1267_v21  ;;  %v10347_v60 = vrot.slane %v2261_v63, 1  ;;  %v10349_v29 = vrot.slane %v2249_v14, 1  ;;  %7992 = vmatprep.subr.bf16.mxu0 %v8766_v40 }
  0xdc   : > { %v8780_v3 = vld [vmem:[%s11791_s1 + $0x678] sm:$0xff]  }
  0xdd   : > { %v1059_v7 = vpop.permute.xlu0 %1058  ;;  %v10354_v41 = vpop.permute.xlu1 %1060  ;;  %v2264_v12 = vsel %vm2168_vm0, %v2259_v42, %v10347_v60  ;;  %v2252_v4 = vsel %vm2168_vm0, %v2247_v43, %v10349_v29 }
  0xde   : > { %v1210_v16 = vsel %vm1202_vm6, %v10253_v6, %v1059_v7  ;;  %v1211_v30 = vsel %vm1202_vm6, %v1059_v7, %v10354_v41  ;;  %3538 = vmatprep.mubr.bf16.mxu1 %v2264_v12  ;;  %7993 = vmatpush3.bf16.msra.mxu0 %v8767_v62  ;;  %v8772_v6 = vld [vmem:[%s11791_s1 + $0x668] sm:$0xff]   ;;  %v8785_v7 = vld [vmem:[%s11791_s1 + $0x6e0] sm:$0xff]  }
  0xdf   : > { %1372 = vst [vmem:[#allocation2 + $0x40] sm:$0xfe] %v1210_v16  ;;  %1373 = vst [vmem:[#allocation2 + $0x48] sm:$0xfe] %v1211_v30  ;;  %3539 = vmatmul.mubr.bf16.vlgmr.msra.gmra.mrb[8].mxu1 %v2252_v4  ;;  %7994 = vmatprep.subr.bf16.mxu0 %v8768_v47  ;;  %v8784_v47 = vld [vmem:[%s11791_s1 + $0x720] sm:$0xff]   ;;  %v8787_v30 = vld [vmem:[%s11791_s1 + $0x728] sm:$0xff]  }
  0xe0   : > { %8015 = vmatpush3.bf16.msra.mxu1 %v8773_v11 }
  0xe1   : > { %v1091_v36 = vpop.permute.xlu0 %1090  ;;  %v10379_v18 = vpop.permute.xlu1 %1092  ;;  %8016 = vmatprep.subr.bf16.mxu1 %v8775_v9 }
  0xe2   : > { %v1225_v51 = vsel %vm1202_vm6, %v10279_v25, %v1091_v36  ;;  %v1226_v38 = vsel %vm1202_vm6, %v1091_v36, %v10379_v18  ;;  %v1849_v5 = vld [vmem:[#allocation2 + $0x248] sm:$0x1]  ;;  %v1848_v49 = vld [vmem:[#allocation2 + $0x240] sm:$0x1]  ;;  %7995 = vmatpush3.bf16.msra.mxu0 %v8769_v45  ;;  %v2413_v25 = vshrl.u32 %v10223_v31, 16 }
  0xe3   : > { %1391 = vst [vmem:[#allocation2 + $0xc8] sm:$0xff] %v1225_v51  ;;  %1392 = vst [vmem:[#allocation2 + $0xd0] sm:$0xff] %v1226_v38  ;;  %v1883_v8 = vpack.c.bf16 %v1849_v5, %v1849_v5  ;;  %v1882_v23 = vpack.c.bf16 %v1848_v49, %v1848_v49  ;;  %7996 = vmatprep.subr.bf16.mxu0 %v8770_v55  ;;  %v8789_v5 = vld [vmem:[%s11791_s1 + $0x6e8] sm:$0xff]  }
  0xe4   : > { %8017 = vmatpush3.bf16.msra.mxu1 %v8777_v32  ;;  %v2415_v50 = vor.u32 %v2413_v25, %v10244_v44 }
  0xe5   : > { %v1123_v20 = vpop.permute.xlu0 %1122  ;;  %v10402_v33 = vpop.permute.xlu1 %1124  ;;  %v2417_v34 = vshll.u32 %v1883_v8, 16  ;;  %v2409_v27 = vshll.u32 %v1882_v23, 16  ;;  %8018 = vmatprep.subr.bf16.mxu1 %v8779_v56 }
  0xe6   : > { %v1240_v37 = vsel %vm1202_vm6, %v10298_v54, %v1123_v20  ;;  %v1241_v57 = vsel %vm1202_vm6, %v1123_v20, %v10402_v33  ;;  %7997 = vmatpush3.bf16.msra.mxu0 %v8772_v6  ;;  %v1836_v40 = vld [vmem:[#allocation2 + $0x48] sm:$0xfe]  ;;  %v1835_v46 = vld [vmem:[#allocation2 + $0x40] sm:$0xfe]  ;;  %v8783_v54 = vld [vmem:[%s11791_s1 + $0x6d8] sm:$0xff]  }
  0xe7   : > { %v2419_v62 = vrot.slane %v2417_v34, 1  ;;  %v2411_v22 = vrot.slane %v2409_v27, 1  ;;  %7998 = vmatprep.subr.bf16.mxu0 %v8774_v24  ;;  %v1870_v15 = vpack.c.bf16 %v1226_v38, %v1836_v40  ;;  %v1869_v63 = vpack.c.bf16 %v1225_v51, %v1835_v46  ;;  %v8788_v38 = vld [vmem:[%s11791_s1 + $0x740] sm:$0xff]   ;;  %v8791_v20 = vld [vmem:[%s11791_s1 + $0x730] sm:$0xff]  }
  0xe8   : > { %8019 = vmatpush3.bf16.msra.mxu1 %v8781_v59 }
  0xe9   : > { %v1155_v44 = vpop.permute.xlu0 %1154  ;;  %v10416_v1 = vpop.permute.xlu1 %1156  ;;  %v2420_v48 = vsel %vm2168_vm0, %v2415_v50, %v2419_v62  ;;  %v2412_v14 = vsel %vm2168_vm0, %v2407_v19, %v2411_v22  ;;  %v2280_v21 = vshll.u32 %v1870_v15, 16  ;;  %8020 = vmatprep.subr.bf16.mxu1 %v8782_v13  ;;  %v2268_v11 = vshll.u32 %v1869_v63, 16 }
  0xea   : > { %v1255_v42 = vsel %vm1202_vm6, %v10315_v2, %v1155_v44  ;;  %v1256_v43 = vsel %vm1202_vm6, %v1155_v44, %v10416_v1  ;;  %3497 = vmatprep.mubr.bf16.mxu0 %v2420_v48  ;;  %7999 = vmatpush3.bf16.msra.mxu0 %v8776_v58  ;;  %v8786_v2 = vld [vmem:[%s11791_s1 + $0x780] sm:$0xff]   ;;  %v2278_v6 = vshrl.u32 %v1870_v15, 16  ;;  %v2266_v36 = vshrl.u32 %v1869_v63, 16  ;;  %v8796_v15 = vld [vmem:[%s11791_s1 + $0x750] sm:$0xff]   ;;  %v8797_v63 = vld [vmem:[%s11791_s1 + $0x6f8] sm:$0xff]  }
  0xeb   : > { %3498 = vmatmul.mubr.bf16.gmra.mrb[12].mxu0 %v2412_v14  ;;  %8000 = vmatprep.subr.bf16.mxu0 %v8778_v0  ;;  %v10433_v12 = vpack.c.bf16 %v1256_v43, %v1241_v57  ;;  %v2282_v4 = vrot.slane %v2280_v21, 1  ;;  %v10435_v9 = vpack.c.bf16 %v1255_v42, %v1240_v37  ;;  %v2270_v16 = vrot.slane %v2268_v11, 1  ;;  %v8792_v37 = vld [vmem:[%s11791_s1 + $0x748] sm:$0xff]   ;;  %v8793_v57 = vld [vmem:[%s11791_s1 + $0x6f0] sm:$0xff]   ;;  %v8795_v0 = vld [vmem:[%s11791_s1 + $0x738] sm:$0xff]  }
  0xec   : > { %8021 = vmatpush3.bf16.msra.mxu1 %v8783_v54  ;;  %v8803_v48 = vld [vmem:[%s11791_s1 + $0x800] sm:$0xff]   ;;  %v2429_v14 = vshrl.u32 %v10326_v39, 16 }
  0xed   : > { %v1183_v45 = vpop.permute.xlu0 %1182  ;;  %v10443_v55 = vpop.permute.xlu1 %1184  ;;  %v2285_v32 = vshll.u32 %v10433_v12, 16  ;;  %v2273_v24 = vshll.u32 %v10435_v9, 16  ;;  %8022 = vmatprep.subr.bf16.mxu1 %v8784_v47  ;;  %v2283_v49 = vor.u32 %v2282_v4, %v2278_v6  ;;  %v2271_v8 = vor.u32 %v2270_v16, %v2266_v36 }
  0xee   : > { %v1268_v56 = vsel %vm1202_vm6, %v10336_v52, %v1183_v45  ;;  %v1269_v51 = vsel %vm1202_vm6, %v1183_v45, %v10443_v55  ;;  %8001 = vmatpush3.bf16.msra.mxu0 %v8780_v3  ;;  %v8790_v52 = vld [vmem:[%s11791_s1 + $0x788] sm:$0xff]   ;;  %v2421_v3 = vshrl.u32 %v10328_v17, 16  ;;  %v2431_v4 = vor.u32 %v2429_v14, %v10347_v60 }
  0xef   : > { %1441 = vst [vmem:[#allocation2 + $0x250] sm:$0x1] %v1268_v56  ;;  %1442 = vst [vmem:[#allocation2 + $0x258] sm:$0x1] %v1269_v51  ;;  %v10457_v59 = vrot.slane %v2285_v32, 1  ;;  %v10459_v23 = vrot.slane %v2273_v24, 1  ;;  %8042 = vmatprep.subr.bf16.mxu0 %v8786_v2 }
  0xf0   : > { %8023 = vmatpush3.bf16.msra.mxu1 %v8785_v7  ;;  %v2423_v2 = vor.u32 %v2421_v3, %v10349_v29  ;;  %v8799_v24 = vld [vmem:[%s11791_s1 + $0x758] sm:$0xff]   ;;  %v8807_v3 = vld [vmem:[%s11791_s1 + $0x808] sm:$0xff]  }
  0xf1   : > { %v1063_v13 = vpop.permute.xlu0 %1062  ;;  %v10464_v25 = vpop.permute.xlu1 %1064  ;;  %v2288_v53 = vsel %vm2168_vm0, %v2283_v49, %v10457_v59  ;;  %v2276_v58 = vsel %vm2168_vm0, %v2271_v8, %v10459_v23  ;;  %8024 = vmatprep.subr.bf16.mxu1 %v8787_v30 }
  0xf2   : > { %v1212_v34 = vsel %vm1202_vm6, %v10354_v41, %v1063_v13  ;;  %v1213_v27 = vsel %vm1202_vm6, %v1063_v13, %v10464_v25  ;;  %3587 = vmatprep.mubr.bf16.mxu0 %v2288_v53  ;;  %v8794_v41 = vld [vmem:[%s11791_s1 + $0x790] sm:$0xff]  }
  0xf3   : > { %1374 = vst [vmem:[#allocation2 + $0x50] sm:$0xfe] %v1212_v34  ;;  %1375 = vst [vmem:[#allocation2 + $0x58] sm:$0xfe] %v1213_v27  ;;  %3588 = vmatmul.mubr.bf16.vlgmr.msra.gmra.mrb[16].mxu0 %v2276_v58  ;;  %v8801_v58 = vld [vmem:[%s11791_s1 + $0x760] sm:$0xff]  }
  0xf4   : > { %8043 = vmatpush3.bf16.msra.mxu0 %v8788_v38  ;;  %8025 = vmatpush3.bf16.msra.mxu1 %v8789_v5  ;;  %v8800_v38 = vld [vmem:[%s11791_s1 + $0x7a0] sm:$0xff]  }
  0xf5   : > { %v1095_v50 = vpop.permute.xlu0 %1094  ;;  %v10486_v19 = vpop.permute.xlu1 %1096  ;;  %8044 = vmatprep.subr.bf16.mxu0 %v8790_v52  ;;  %8026 = vmatprep.subr.bf16.mxu1 %v8791_v20 }
  0xf6   : > { %v1227_v40 = vsel %vm1202_vm6, %v10379_v18, %v1095_v50  ;;  %v1228_v46 = vsel %vm1202_vm6, %v1095_v50, %v10486_v19  ;;  %v1851_v62 = vld [vmem:[#allocation2 + $0x258] sm:$0x1]  ;;  %v1850_v22 = vld [vmem:[#allocation2 + $0x250] sm:$0x1] }
  0xf7   : > { %1393 = vst [vmem:[#allocation2 + $0xd8] sm:$0xff] %v1227_v40  ;;  %1394 = vst [vmem:[#allocation2 + $0xe0] sm:$0xff] %v1228_v46  ;;  %v1885_v54 = vpack.c.bf16 %v1851_v62, %v1851_v62  ;;  %v1884_v44 = vpack.c.bf16 %v1850_v22, %v1850_v22  ;;  %v8798_v18 = vld [vmem:[%s11791_s1 + $0x798] sm:$0xff]   ;;  %v8805_v62 = vld [vmem:[%s11791_s1 + $0x7c0] sm:$0xff]  }
  0xf8   : > { %8045 = vmatpush3.bf16.msra.mxu0 %v8792_v37  ;;  %8027 = vmatpush3.bf16.msra.mxu1 %v8793_v57 }
  0xf9   : > { %v1127_v21 = vpop.permute.xlu0 %1126  ;;  %v10509_v47 = vpop.permute.xlu1 %1128  ;;  %v2433_v42 = vshll.u32 %v1885_v54, 16  ;;  %v2425_v43 = vshll.u32 %v1884_v44, 16  ;;  %8046 = vmatprep.subr.bf16.mxu0 %v8794_v41  ;;  %8028 = vmatprep.subr.bf16.mxu1 %v8795_v0 }
  0xfa   : > { %v1242_v11 = vsel %vm1202_vm6, %v10402_v33, %v1127_v21  ;;  %v1243_v7 = vsel %vm1202_vm6, %v1127_v21, %v10509_v47  ;;  %v1838_v16 = vld [vmem:[#allocation2 + $0x58] sm:$0xfe]  ;;  %v1837_v30 = vld [vmem:[#allocation2 + $0x50] sm:$0xfe] }
  0xfb   : > { %v2435_v45 = vrot.slane %v2433_v42, 1  ;;  %v2427_v6 = vrot.slane %v2425_v43, 1  ;;  %v1872_v32 = vpack.c.bf16 %v1228_v46, %v1838_v16  ;;  %v1871_v36 = vpack.c.bf16 %v1227_v40, %v1837_v30  ;;  %v8804_v46 = vld [vmem:[%s11791_s1 + $0x768] sm:$0xff]   ;;  %v8808_v43 = vld [vmem:[%s11791_s1 + $0x770] sm:$0xff]  }
  0xfc   : > { %8047 = vmatpush3.bf16.msra.mxu0 %v8796_v15  ;;  %8029 = vmatpush3.bf16.msra.mxu1 %v8797_v63 }
  0xfd   : > { %v1159_v33 = vpop.permute.xlu0 %1158  ;;  %v10520_v56 = vpop.permute.xlu1 %1160  ;;  %v2436_v51 = vsel %vm2168_vm0, %v2431_v4, %v2435_v45  ;;  %v2428_v60 = vsel %vm2168_vm0, %v2423_v2, %v2427_v6  ;;  %v2304_v29 = vshll.u32 %v1872_v32, 16  ;;  %8048 = vmatprep.subr.bf16.mxu0 %v8798_v18  ;;  %8070 = vmatprep.subr.bf16.mxu1 %v8803_v48  ;;  %v2292_v8 = vshll.u32 %v1871_v36, 16  ;;  %v8811_v2 = vld [vmem:[%s11791_s1 + $0x810] sm:$0xff]  }
  0xfe   : > { %v1257_v5 = vsel %vm1202_vm6, %v10416_v1, %v1159_v33  ;;  %v1258_v49 = vsel %vm1202_vm6, %v1159_v33, %v10520_v56  ;;  %3546 = vmatprep.mubr.bf16.mxu1 %v2436_v51  ;;  %v8802_v1 = vld [vmem:[%s11791_s1 + $0x7a8] sm:$0xff]   ;;  %v2302_v37 = vshrl.u32 %v1872_v32, 16  ;;  %v2290_v41 = vshrl.u32 %v1871_v36, 16  ;;  %v8812_v32 = vld [vmem:[%s11791_s1 + $0x778] sm:$0xff]   ;;  %v8813_v33 = vld [vmem:[%s11791_s1 + $0x7d0] sm:$0xff]  }
  0xff   : > { %3547 = vmatmul.mubr.bf16.gmra.mrb[12].mxu1 %v2428_v60  ;;  %v10531_v52 = vpack.c.bf16 %v1258_v49, %v1243_v7  ;;  %v2306_v13 = vrot.slane %v2304_v29, 1  ;;  %v10533_v53 = vpack.c.bf16 %v1257_v5, %v1242_v11  ;;  %v2294_v20 = vrot.slane %v2292_v8, 1  ;;  %v8809_v11 = vld [vmem:[%s11791_s1 + $0x7c8] sm:$0xff]   ;;  %v8814_v49 = vld [vmem:[%s11791_s1 + $0x818] sm:$0xff]   ;;  %v10609_v8 = vld [vmem:[%s11791_s1 + $0x840] sm:$0xff]  }
 0x100   : > { %8049 = vmatpush3.bf16.msra.mxu0 %v8799_v24  ;;  %v2445_v51 = vshrl.u32 %v10433_v12, 16 }
 0x101   : > { %v1187_v34 = vpop.permute.xlu0 %1186  ;;  %v10541_v27 = vpop.permute.xlu1 %1188  ;;  %v2309_v57 = vshll.u32 %v10531_v52, 16  ;;  %v2297_v50 = vshll.u32 %v10533_v53, 16  ;;  %8050 = vmatprep.subr.bf16.mxu0 %v8800_v38  ;;  %v2307_v22 = vor.u32 %v2306_v13, %v2302_v37  ;;  %v2295_v63 = vor.u32 %v2294_v20, %v2290_v41 }
 0x102   : > { %v1270_v0 = vsel %vm1202_vm6, %v10443_v55, %v1187_v34  ;;  %v1271_v40 = vsel %vm1202_vm6, %v1187_v34, %v10541_v27  ;;  %v8806_v55 = vld [vmem:[%s11791_s1 + $0x7b0] sm:$0xff]   ;;  %v2447_v20 = vor.u32 %v2445_v51, %v10457_v59 }
 0x103   : > { %1443 = vst [vmem:[#allocation2 + $0x260] sm:$0x1] %v1270_v0  ;;  %1444 = vst [vmem:[#allocation2 + $0x268] sm:$0x1] %v1271_v40  ;;  %v10555_v15 = vrot.slane %v2309_v57, 1  ;;  %v10557_v54 = vrot.slane %v2297_v50, 1 }
 0x104   : > { %8051 = vmatpush3.bf16.msra.mxu0 %v8801_v58  ;;  %v8816_v40 = vld [vmem:[%s11791_s1 + $0x7d8] sm:$0xff]  }
 0x105   : > { %v1067_v44 = vpop.permute.xlu0 %1066  ;;  %v10562_v18 = vpop.permute.xlu1 %1068  ;;  %v2312_v48 = vsel %vm2168_vm0, %v2307_v22, %v10555_v15  ;;  %v2300_v14 = vsel %vm2168_vm0, %v2295_v63, %v10557_v54  ;;  %8052 = vmatprep.subr.bf16.mxu0 %v8802_v1  ;;  %v8817_v22 = vld [vmem:[%s11791_s1 + $0x820] sm:$0xff]  }
 0x106   : > { %v1214_v21 = vsel %vm1202_vm6, %v10464_v25, %v1067_v44  ;;  %v1215_v42 = vsel %vm1202_vm6, %v1067_v44, %v10562_v18  ;;  %3636 = vmatprep.mubr.bf16.mxu1 %v2312_v48  ;;  %v8810_v25 = vld [vmem:[%s11791_s1 + $0x7b8] sm:$0xff]  }
 0x107   : > { %1376 = vst [vmem:[#allocation2 + $0x60] sm:$0xfe] %v1214_v21  ;;  %1377 = vst [vmem:[#allocation2 + $0x68] sm:$0xfe] %v1215_v42  ;;  %3637 = vmatmul.mubr.bf16.vlgmr.msra.gmra.mrb[16].mxu1 %v2300_v14  ;;  %v8819_v21 = vld [vmem:[%s11791_s1 + $0x7e0] sm:$0xff]  }
 0x108   : > { %8053 = vmatpush3.bf16.msra.mxu0 %v8804_v46  ;;  %8071 = vmatpush3.bf16.msra.mxu1 %v8805_v62 }
 0x109   : > { %v1099_v7 = vpop.permute.xlu0 %1098  ;;  %v10581_v4 = vpop.permute.xlu1 %1100  ;;  %8054 = vmatprep.subr.bf16.mxu0 %v8806_v55  ;;  %8072 = vmatprep.subr.bf16.mxu1 %v8807_v3 }
 0x10a   : > { %v1229_v16 = vsel %vm1202_vm6, %v10486_v19, %v1099_v7  ;;  %v1230_v30 = vsel %vm1202_vm6, %v1099_v7, %v10581_v4  ;;  %v1853_v45 = vld [vmem:[#allocation2 + $0x268] sm:$0x1]  ;;  %v1852_v6 = vld [vmem:[#allocation2 + $0x260] sm:$0x1]  ;;  %v2437_v19 = vshrl.u32 %v10435_v9, 16 }
 0x10b   : > { %1395 = vst [vmem:[#allocation2 + $0xe8] sm:$0xff] %v1229_v16  ;;  %1396 = vst [vmem:[#allocation2 + $0xf0] sm:$0xff] %v1230_v30  ;;  %v1887_v36 = vpack.c.bf16 %v1853_v45, %v1853_v45  ;;  %v1886_v24 = vpack.c.bf16 %v1852_v6, %v1852_v6 }
 0x10c   : > { %8055 = vmatpush3.bf16.msra.mxu0 %v8808_v43  ;;  %8073 = vmatpush3.bf16.msra.mxu1 %v8809_v11  ;;  %v2439_v1 = vor.u32 %v2437_v19, %v10459_v23 }
 0x10d   : > { %v1131_v60 = vpop.permute.xlu0 %1130  ;;  %v10601_v29 = vpop.permute.xlu1 %1132  ;;  %v2449_v38 = vshll.u32 %v1887_v36, 16  ;;  %v2441_v5 = vshll.u32 %v1886_v24, 16  ;;  %8056 = vmatprep.subr.bf16.mxu0 %v8810_v25  ;;  %8074 = vmatprep.subr.bf16.mxu1 %v8811_v2 }
 0x10e   : > { %v1244_v13 = vsel %vm1202_vm6, %v10509_v47, %v1131_v60  ;;  %v1245_v58 = vsel %vm1202_vm6, %v1131_v60, %v10601_v29  ;;  %v1840_v34 = vld [vmem:[#allocation2 + $0x68] sm:$0xfe]  ;;  %v1839_v37 = vld [vmem:[#allocation2 + $0x60] sm:$0xfe] }
 0x10f   : > { %v2451_v57 = vrot.slane %v2449_v38, 1  ;;  %v2443_v41 = vrot.slane %v2441_v5, 1  ;;  %v1874_v50 = vpack.c.bf16 %v1230_v30, %v1840_v34  ;;  %v1873_v0 = vpack.c.bf16 %v1229_v16, %v1839_v37  ;;  %v8823_v5 = vld [vmem:[%s11791_s1 + $0x830] sm:$0xff]   ;;  %v8826_v34 = vld [vmem:[%s11791_s1 + $0x838] sm:$0xff]  }
 0x110   : > { %8057 = vmatpush3.bf16.msra.mxu0 %v8812_v32  ;;  %8075 = vmatpush3.bf16.msra.mxu1 %v8813_v33  ;;  %v8818_v33 = vld [vmem:[%s11791_s1 + $0x848] sm:$0xff]  }
 0x111   : > { %v1163_v47 = vpop.permute.xlu0 %1162  ;;  %v10620_v46 = vpop.permute.xlu1 %1164  ;;  %v2452_v62 = vsel %vm2168_vm0, %v2447_v20, %v2451_v57  ;;  %v2444_v59 = vsel %vm2168_vm0, %v2439_v1, %v2443_v41  ;;  %v2328_v23 = vshll.u32 %v1874_v50, 16  ;;  %8076 = vmatprep.subr.bf16.mxu1 %v8814_v49  ;;  %8576 = vmatprep.subr.bf16.mxu0 %v10609_v8  ;;  %v2316_v44 = vshll.u32 %v1873_v0, 16  ;;  %v8825_v20 = vld [vmem:[%s11791_s1 + $0x7f0] sm:$0xff]  }
 0x112   : > { %v1259_v63 = vsel %vm1202_vm6, %v10520_v56, %v1163_v47  ;;  %v1260_v55 = vsel %vm1202_vm6, %v1163_v47, %v10620_v46  ;;  %3595 = vmatprep.mubr.bf16.mxu0 %v2452_v62  ;;  %v8820_v56 = vld [vmem:[%s11791_s1 + $0x828] sm:$0xff]   ;;  %v2326_v7 = vshrl.u32 %v1874_v50, 16  ;;  %v2314_v2 = vshrl.u32 %v1873_v0, 16 }
 0x113   : > { %3596 = vmatmul.mubr.bf16.gmra.mrb[20].mxu0 %v2444_v59  ;;  %v10632_v48 = vpack.c.bf16 %v1260_v55, %v1245_v58  ;;  %v2330_v14 = vrot.slane %v2328_v23, 1  ;;  %v10634_v3 = vpack.c.bf16 %v1259_v63, %v1244_v13  ;;  %v2318_v42 = vrot.slane %v2316_v44, 1  ;;  %v8821_v58 = vld [vmem:[%s11791_s1 + $0x850] sm:$0xff]   ;;  %v8824_v63 = vld [vmem:[%s11791_s1 + $0x858] sm:$0xff]   ;;  %v8830_v55 = vld [vmem:[%s11791_s1 + $0x40] sm:$0xff]  }
 0x114   : > { %8077 = vmatpush3.bf16.msra.mxu1 %v8816_v40  ;;  %v8828_v40 = vld [vmem:[%s11791_s1 + $0x7f8] sm:$0xff]   ;;  %v2461_v47 = vshrl.u32 %v10531_v52, 16  ;;  %v2453_v62 = vshrl.u32 %v10533_v53, 16 }
 0x115   : > { %v1191_v43 = vpop.permute.xlu0 %1190  ;;  %v10642_v11 = vpop.permute.xlu1 %1192  ;;  %v2333_v25 = vshll.u32 %v10632_v48, 16  ;;  %v2321_v16 = vshll.u32 %v10634_v3, 16  ;;  %8078 = vmatprep.subr.bf16.mxu1 %v8817_v22  ;;  %v2331_v6 = vor.u32 %v2330_v14, %v2326_v7  ;;  %v2319_v36 = vor.u32 %v2318_v42, %v2314_v2 }
 0x116   : > { %v1272_v30 = vsel %vm1202_vm6, %v10541_v27, %v1191_v43  ;;  %v1273_v45 = vsel %vm1202_vm6, %v1191_v43, %v10642_v11  ;;  %v8822_v27 = vld [vmem:[%s11791_s1 + $0x7e8] sm:$0xff]   ;;  %v2455_v42 = vor.u32 %v2453_v62, %v10557_v54 }
 0x117   : > { %1445 = vst [vmem:[#allocation2 + $0x270] sm:$0x1] %v1272_v30  ;;  %1446 = vst [vmem:[#allocation2 + $0x278] sm:$0x1] %v1273_v45  ;;  %v10650_v32 = vrot.slane %v2333_v25, 1  ;;  %v10652_v24 = vrot.slane %v2321_v16, 1 }
 0x118   : > { %8079 = vmatpush3.bf16.msra.mxu1 %v8819_v21  ;;  %v2463_v21 = vor.u32 %v2461_v47, %v10555_v15  ;;  %v8827_v15 = vld [vmem:[%s11791_s1 + $0x860] sm:$0xff]  }
 0x119   : > { %v1071_v51 = vpop.permute.xlu0 %1070  ;;  %v1073_v19 = vpop.permute.xlu1 %1072  ;;  %v2336_v60 = vsel %vm2168_vm0, %v2331_v6, %v10650_v32  ;;  %v2324_v38 = vsel %vm2168_vm0, %v2319_v36, %v10652_v24  ;;  %8080 = vmatprep.subr.bf16.mxu1 %v8820_v56 }
 0x11a   : > { %v1216_v49 = vsel %vm1202_vm6, %v10562_v18, %v1071_v51  ;;  %v1217_v13 = vsel %vm1202_vm6, %v1071_v51, %v1073_v19  ;;  %1381 = vst.msk [vmem:[#allocation2 + $0x80] sm:$0xfe] %vm1380_vm9, %v1073_v19  ;;  %3685 = vmatprep.mubr.bf16.mxu0 %v2336_v60 }
 0x11b   : > { %1378 = vst [vmem:[#allocation2 + $0x70] sm:$0xfe] %v1216_v49  ;;  %1379 = vst [vmem:[#allocation2 + $0x78] sm:$0xfe] %v1217_v13  ;;  %3686 = vmatmul.mubr.bf16.vlgmr.msra.gmra.mrb[24].mxu0 %v2324_v38 }
 0x11c   : > { %8577 = vmatpush3.bf16.msra.mxu0 %v10609_v8  ;;  %8081 = vmatpush3.bf16.msra.mxu1 %v8822_v27 }
 0x11d   : > { %v1103_v18 = vpop.permute.xlu0 %1102  ;;  %v1105_v1 = vpop.permute.xlu1 %1104  ;;  %8578 = vmatprep.subr.bf16.mxu0 %v8818_v33  ;;  %8082 = vmatprep.subr.bf16.mxu1 %v8823_v5 }
 0x11e   : > { %v1231_v37 = vsel %vm1202_vm6, %v10581_v4, %v1103_v18  ;;  %v1232_v57 = vsel %vm1202_vm6, %v1103_v18, %v1105_v1  ;;  %1399 = vst.msk [vmem:[#allocation2 + $0x108] sm:$0xff] %vm1202_vm6, %v1105_v1  ;;  %v1855_v8 = vld [vmem:[#allocation2 + $0x278] sm:$0x1]  ;;  %v1854_v41 = vld [vmem:[#allocation2 + $0x270] sm:$0x1] }
 0x11f   : > { %1397 = vst [vmem:[#allocation2 + $0xf8] sm:$0xff] %v1231_v37  ;;  %1398 = vst [vmem:[#allocation2 + $0x100] sm:$0xff] %v1232_v57  ;;  %v1889_v50 = vpack.c.bf16 %v1855_v8, %v1855_v8  ;;  %v1888_v0 = vpack.c.bf16 %v1854_v41, %v1854_v41 }
 0x120   : > { %8579 = vmatpush3.bf16.msra.mxu0 %v8818_v33  ;;  %8083 = vmatpush3.bf16.msra.mxu1 %v8825_v20 }
 0x121   : > { %v1135_v4 = vpop.permute.xlu0 %1134  ;;  %v1137_v59 = vpop.permute.xlu1 %1136  ;;  %v2465_v23 = vshll.u32 %v1889_v50, 16  ;;  %v2457_v22 = vshll.u32 %v1888_v0, 16  ;;  %8580 = vmatprep.subr.bf16.mxu0 %v8821_v58  ;;  %8084 = vmatprep.subr.bf16.mxu1 %v8826_v34  ;;  %v1843_v47 = vld [vmem:[#allocation2 + $0x80] sm:$0xfe] }
 0x122   : > { %v1246_v44 = vsel %vm1202_vm6, %v10601_v29, %v1135_v4  ;;  %v1247_v14 = vsel %vm1202_vm6, %v1135_v4, %v1137_v59  ;;  %1416 = vst.msk [vmem:[#allocation2 + $0x190] sm:$0xff] %vm1202_vm6, %v1137_v59  ;;  %v1842_v56 = vld [vmem:[#allocation2 + $0x78] sm:$0xfe]  ;;  %v1841_v43 = vld [vmem:[#allocation2 + $0x70] sm:$0xfe] }
 0x123   : > { %v2467_v7 = vrot.slane %v2465_v23, 1  ;;  %v2459_v25 = vrot.slane %v2457_v22, 1  ;;  %v1876_v2 = vpack.c.bf16 %v1232_v57, %v1842_v56  ;;  %v1875_v16 = vpack.c.bf16 %v1231_v37, %v1841_v43  ;;  %v8831_v57 = vld [vmem:[%s11791_s1] sm:$0xff]  }
 0x124   : > { %8581 = vmatpush3.bf16.msra.mxu0 %v8821_v58  ;;  %8085 = vmatpush3.bf16.msra.mxu1 %v8828_v40  ;;  %v8829_v58 = vld [vmem:[%s11791_s1 + $0x868] sm:$0xff]   ;;  %v8832_v40 = vld [vmem:[%s11791_s1 + $0x870] sm:$0xff]  }
 0x125   : > { %v1167_v30 = vpop.permute.xlu0 %1166  ;;  %v1169_v45 = vpop.permute.xlu1 %1168  ;;  %v2468_v29 = vsel %vm2168_vm0, %v2463_v21, %v2467_v7  ;;  %v2460_v6 = vsel %vm2168_vm0, %v2455_v42, %v2459_v25  ;;  %8582 = vmatprep.subr.bf16.mxu0 %v8824_v63  ;;  %v2352_v54 = vshll.u32 %v1876_v2, 16  ;;  %8108 = vmatprep.subr.bf16.mxu1 %v8830_v55  ;;  %v2340_v27 = vshll.u32 %v1875_v16, 16  ;;  %v1486_v1 = vld [vmem:[#allocation2 + $0x108] sm:$0xff]  ;;  %v8835_v7 = vld [vmem:[%s11791_s1 + $0x878] sm:$0xff]   ;;  %v8836_v25 = vld [vmem:[%s11791_s1 + $0x50] sm:$0xff]  }
 0x126   : > { %v1261_v36 = vsel %vm1202_vm6, %v10620_v46, %v1167_v30  ;;  %v1262_v33 = vsel %vm1202_vm6, %v1167_v30, %v1169_v45  ;;  %1433 = vst.msk [vmem:[#allocation2 + $0x218] sm:$0xff] %vm1202_vm6, %v1169_v45  ;;  %3644 = vmatprep.mubr.bf16.mxu1 %v2468_v29  ;;  %v2350_v13 = vshrl.u32 %v1876_v2, 16  ;;  %v2338_v20 = vshrl.u32 %v1875_v16, 16  ;;  %v8834_v42 = vld [vmem:[%s11791_s1 + $0x8] sm:$0xff]   ;;  %v8837_v45 = vld [vmem:[%s11791_s1 + $0x10] sm:$0xff]  }
 0x127   : > { %3645 = vmatmul.mubr.bf16.gmra.mrb[20].mxu1 %v2460_v6  ;;  %v10711_v51 = vpack.c.bf16 %v1262_v33, %v1247_v14  ;;  %v2354_v19 = vrot.slane %v2352_v54, 1  ;;  %v10713_v60 = vpack.c.bf16 %v1261_v36, %v1246_v44  ;;  %v2342_v38 = vrot.slane %v2340_v27, 1  ;;  %v8838_v36 = vld [vmem:[%s11791_s1 + $0x58] sm:$0xff]   ;;  %v8839_v33 = vld [vmem:[%s11791_s1 + $0xc0] sm:$0xff]  }
 0x128   : > { %8583 = vmatpush3.bf16.msra.mxu0 %v8824_v63  ;;  %v1877_v4 = vpack.c.bf16 %v1486_v1, %v1843_v47  ;;  %v2477_v16 = vshrl.u32 %v10632_v48, 16 }
 0x129   : > { %v1195_v5 = vpop.permute.xlu0 %1194  ;;  %v1197_v49 = vpop.permute.xlu1 %1196  ;;  %8584 = vmatprep.subr.bf16.mxu0 %v8827_v15  ;;  %v2357_v46 = vshll.u32 %v10711_v51, 16  ;;  %v2345_v18 = vshll.u32 %v10713_v60, 16  ;;  %v2355_v8 = vor.u32 %v2354_v19, %v2350_v13  ;;  %v2343_v50 = vor.u32 %v2342_v38, %v2338_v20  ;;  %v1503_v62 = vld [vmem:[#allocation2 + $0x190] sm:$0xff] }
 0x12a   : > { %v1274_v34 = vsel %vm1202_vm6, %v10642_v11, %v1195_v5  ;;  %v1275_v37 = vsel %vm1202_vm6, %v1195_v5, %v1197_v49  ;;  %v8833_v11 = vld [vmem:[%s11791_s1 + $0x48] sm:$0xff]   ;;  %v2364_v56 = vshll.u32 %v1877_v4, 16  ;;  %v2362_v54 = vshrl.u32 %v1877_v4, 16 }
 0x12b   : > { %1447 = vst [vmem:[#allocation2 + $0x280] sm:$0x1] %v1274_v34  ;;  %1448 = vst [vmem:[#allocation2 + $0x288] sm:$0x1] %v1275_v37  ;;  %v10726_v41 = vrot.slane %v2357_v46, 1  ;;  %v10728_v0 = vrot.slane %v2345_v18, 1  ;;  %v2479_v13 = vor.u32 %v2477_v16, %v10650_v32 }
 0x12c   : > { %8585 = vmatpush3.bf16.msra.mxu0 %v8827_v15  ;;  %v2469_v15 = vshrl.u32 %v10634_v3, 16  ;;  %v2366_v27 = vrot.slane %v2364_v56, 1  ;;  %v2493_v32 = vshrl.u32 %v10711_v51, 16  ;;  %v8841_v16 = vld [vmem:[%s11791_s1 + $0x80] sm:$0xff]  }
 0x12d   : > { %v1201_v59 = vpop.permute.xlu0 %1200  ;;  %v1199_v23 = vpop.permute.xlu1 %1198  ;;  %v2360_v22 = vsel %vm2168_vm0, %v2355_v8, %v10726_v41  ;;  %8586 = vmatprep.subr.bf16.mxu0 %v8829_v58  ;;  %v2348_v63 = vsel %vm2168_vm0, %v2343_v50, %v10728_v0  ;;  %v1520_v55 = vld [vmem:[#allocation2 + $0x218] sm:$0xff]  ;;  %v8842_v50 = vld [vmem:[%s11791_s1 + $0x60] sm:$0xff]  }
 0x12e   : > { %1452 = vst.msk [vmem:[#allocation2 + $0x2a0] sm:$0x1] %vm1451_vm10, %v1201_v59  ;;  %v1276_v44 = vsel %vm1202_vm6, %v1197_v49, %v1199_v23  ;;  %v1277_v14 = vsel %vm1202_vm6, %v1199_v23, %v1201_v59  ;;  %3734 = vmatprep.mubr.bf16.mxu1 %v2360_v22  ;;  %v10743_v21 = vpack.c.bf16 %v1520_v55, %v1503_v62  ;;  %v8840_v8 = vld [vmem:[%s11791_s1 + $0x18] sm:$0xff]  }
 0x12f   : > { %1449 = vst [vmem:[#allocation2 + $0x290] sm:$0x1] %v1276_v44  ;;  %1450 = vst [vmem:[#allocation2 + $0x298] sm:$0x1] %v1277_v14  ;;  %3735 = vmatmul.mubr.bf16.vlgmr.msra.gmra.mrb[24].mxu1 %v2348_v63  ;;  %v2471_v46 = vor.u32 %v2469_v15, %v10652_v24  ;;  %v2485_v24 = vshrl.u32 %v10713_v60, 16  ;;  %v2495_v59 = vor.u32 %v2493_v32, %v10726_v41  ;;  %v1454_v14 = vld [vmem:[#allocation2 + $0x8] sm:$0xff] }
 0x130   : > { %8587 = vmatpush3.bf16.msra.mxu0 %v8829_v58  ;;  %8109 = vmatpush3.bf16.msra.mxu1 %v8831_v57  ;;  %v2369_v43 = vshll.u32 %v10743_v21, 16  ;;  %v8846_v41 = vld [vmem:[%s11791_s1 + $0x68] sm:$0xff]  }
 0x131   : > { %8588 = vmatprep.subr.bf16.mxu0 %v8832_v40  ;;  %8110 = vmatprep.subr.bf16.mxu1 %v8833_v11  ;;  %v2487_v55 = vor.u32 %v2485_v24, %v10728_v0  ;;  %v9112_v0 = vld [vmem:[#allocation2 + $0x90] sm:$0xff]  ;;  %v8865_v32 = vld [vmem:[%s11791_s1 + $0x108] sm:$0xff]  }
 0x132   : > { %v1857_v2 = vld [vmem:[#allocation2 + $0x288] sm:$0x1]  ;;  %v1856_v30 = vld [vmem:[#allocation2 + $0x280] sm:$0x1]  ;;  %v2371_v19 = vrot.slane %v2369_v43, 1  ;;  %v8867_v24 = vld [vmem:[%s11791_s1 + $0x150] sm:$0xff]  }
 0x133   : > { %v1891_v29 = vpack.c.bf16 %v1857_v2, %v1857_v2  ;;  %v1890_v6 = vpack.c.bf16 %v1856_v30, %v1856_v30  ;;  %v1456_v30 = vld [vmem:[#allocation2 + $0x18] sm:$0xff] }
 0x134   : > { %8589 = vmatpush3.bf16.msra.mxu0 %v8832_v40  ;;  %8111 = vmatpush3.bf16.msra.mxu1 %v8834_v42  ;;  %v2367_v40 = vor.u32 %v2366_v27, %v2362_v54  ;;  %v8844_v42 = vld [vmem:[%s11791_s1 + $0x20] sm:$0xff]   ;;  %v8845_v27 = vld [vmem:[%s11791_s1 + $0x88] sm:$0xff]  }
 0x135   : > { %v2481_v38 = vshll.u32 %v1891_v29, 16  ;;  %v2473_v5 = vshll.u32 %v1890_v6, 16  ;;  %8590 = vmatprep.subr.bf16.mxu0 %v8835_v7  ;;  %8112 = vmatprep.subr.bf16.mxu1 %v8836_v25  ;;  %v1860_v49 = vld [vmem:[#allocation2 + $0x2a0] sm:$0x1]  ;;  %v1522_v25 = vpack.c.bf16 %v9112_v0, %v1454_v14  ;;  %v8843_v29 = vld [vmem:[%s11791_s1 + $0xc8] sm:$0xff]  }
 0x136   : > { %v1859_v58 = vld [vmem:[#allocation2 + $0x298] sm:$0x1]  ;;  %v1858_v20 = vld [vmem:[#allocation2 + $0x290] sm:$0x1]  ;;  %v1894_v18 = vpack.c.bf16 %v1860_v49, %v1860_v49  ;;  %v2372_v22 = vsel %vm2168_vm0, %v2367_v40, %v2371_v19  ;;  %v8848_v6 = vld [vmem:[%s11791_s1 + $0x28] sm:$0xff]  }
 0x137   : > { %v2483_v1 = vrot.slane %v2481_v38, 1  ;;  %v2475_v34 = vrot.slane %v2473_v5, 1  ;;  %v1893_v37 = vpack.c.bf16 %v1859_v58, %v1859_v58  ;;  %v1892_v57 = vpack.c.bf16 %v1858_v20, %v1858_v20  ;;  %v9113_v54 = vld [vmem:[#allocation2 + $0xa0] sm:$0xff]  ;;  %v8852_v38 = vld [vmem:[%s11791_s1 + $0x30] sm:$0xff]   ;;  %v8854_v5 = vld [vmem:[%s11791_s1 + $0x78] sm:$0xff]  }
 0x138   : > { %8591 = vmatpush3.bf16.msra.mxu0 %v8835_v7  ;;  %8113 = vmatpush3.bf16.msra.mxu1 %v8837_v45  ;;  %v2505_v23 = vshll.u32 %v1894_v18, 16  ;;  %v2501_v7 = vshrl.u32 %v10743_v21, 16  ;;  %v8849_v49 = vld [vmem:[%s11791_s1 + $0x90] sm:$0xff]   ;;  %v8859_v58 = vld [vmem:[%s11791_s1 + $0x140] sm:$0xff]   ;;  %v8853_v18 = vld [vmem:[%s11791_s1 + $0x98] sm:$0xff]  }
 0x139   : > { %v2484_v11 = vsel %vm2168_vm0, %v2479_v13, %v2483_v1  ;;  %v2476_v47 = vsel %vm2168_vm0, %v2471_v46, %v2475_v34  ;;  %v2497_v62 = vshll.u32 %v1893_v37, 16  ;;  %v2489_v4 = vshll.u32 %v1892_v57, 16  ;;  %8114 = vmatprep.subr.bf16.mxu1 %v8838_v36  ;;  %8136 = vmatprep.subr.bf16.mxu0 %v8839_v33  ;;  %v8850_v33 = vld [vmem:[%s11791_s1 + $0x70] sm:$0xff]   ;;  %v8851_v13 = vld [vmem:[%s11791_s1 + $0xd8] sm:$0xff]   ;;  %v1453_v20 = vld [vmem:[#allocation2] sm:$0xff] }
 0x13a   : > { %3693 = vmatprep.mubr.bf16.mxu0 %v2484_v11  ;;  %v2507_v2 = vrot.slane %v2505_v23, 1  ;;  %v2503_v45 = vor.u32 %v2501_v7, %v2371_v19  ;;  %v1524_v36 = vpack.c.bf16 %v9113_v54, %v1456_v30  ;;  %v8847_v19 = vld [vmem:[%s11791_s1 + $0xd0] sm:$0xff]   ;;  %v8856_v46 = vld [vmem:[%s11791_s1 + $0x38] sm:$0xff]   ;;  %v8855_v1 = vld [vmem:[%s11791_s1 + $0xe0] sm:$0xff]  }
 0x13b   : > { %3694 = vmatmul.mubr.bf16.gmra.mrb[28].mxu0 %v2476_v47  ;;  %v2499_v63 = vrot.slane %v2497_v62, 1  ;;  %v2491_v44 = vrot.slane %v2489_v4, 1  ;;  %v9114_v34 = vld [vmem:[#allocation2 + $0x88] sm:$0xff]  ;;  %v8861_v57 = vld [vmem:[%s11791_s1 + $0x100] sm:$0xff]   ;;  %v8862_v62 = vld [vmem:[%s11791_s1 + $0xf0] sm:$0xff]  }
 0x13c   : > { %8592 = vmatprep.mubr.bf16.mxu0 %v2372_v22  ;;  %8115 = vmatpush3.bf16.msra.mxu1 %v8840_v8  ;;  %v2508_v15 = vsel %vm2168_vm0, %v2503_v45, %v2507_v2  ;;  %v1521_v37 = vpack.c.bf16 %v9114_v34, %v1453_v20  ;;  %v8863_v8 = vld [vmem:[%s11791_s1 + $0x148] sm:$0xff]   ;;  %v8869_v4 = vld [vmem:[%s11791_s1 + $0x110] sm:$0xff]   ;;  %v8870_v22 = vld [vmem:[%s11791_s1 + $0x158] sm:$0xff]  }
 0x13d   : > { %v2500_v56 = vsel %vm2168_vm0, %v2495_v59, %v2499_v63  ;;  %v2492_v43 = vsel %vm2168_vm0, %v2487_v55, %v2491_v44  ;;  %8116 = vmatprep.subr.bf16.mxu1 %v8842_v50  ;;  %v8857_v50 = vld [vmem:[%s11791_s1 + $0xa0] sm:$0xff]   ;;  %v8858_v40 = vld [vmem:[%s11791_s1 + $0xe8] sm:$0xff]   ;;  %v9115_v59 = vld [vmem:[#allocation2 + $0xb0] sm:$0xff] }
 0x13e   : > { %3742 = vmatprep.mubr.bf16.mxu1 %v2500_v56  ;;  %v8860_v11 = vld [vmem:[%s11791_s1 + $0xa8] sm:$0xff]   ;;  %v8864_v63 = vld [vmem:[%s11791_s1 + $0xb0] sm:$0xff]   ;;  %v8866_v55 = vld [vmem:[%s11791_s1 + $0xf8] sm:$0xff]  }
 0x13f   : > { %3743 = vmatmul.mubr.bf16.gmra.mrb[28].mxu1 %v2492_v43  ;;  %v1458_v47 = vld [vmem:[#allocation2 + $0x28] sm:$0xff]  ;;  %v8872_v44 = vld [vmem:[%s11791_s1 + $0x118] sm:$0xff]   ;;  %v8874_v14 = vld [vmem:[%s11791_s1 + $0x160] sm:$0xff]  }
 0x140   : > { %4648 = vmatprep.mubr.bf16.mxu1 %v1522_v25  ;;  %8117 = vmatpush3.bf16.msra.mxu1 %v8844_v42  ;;  %v1526_v23 = vpack.c.bf16 %v9115_v59, %v1458_v47  ;;  %v8868_v42 = vld [vmem:[%s11791_s1 + $0xb8] sm:$0xff]   ;;  %v8871_v56 = vld [vmem:[%s11791_s1 + $0x1c0] sm:$0xff]   ;;  %v1455_v43 = vld [vmem:[#allocation2 + $0x10] sm:$0xff] }
 0x141   : > { %8118 = vmatprep.subr.bf16.mxu1 %v8846_v41  ;;  %v8876_v41 = vld [vmem:[%s11791_s1 + $0x120] sm:$0xff]   ;;  %v8878_v7 = vld [vmem:[%s11791_s1 + $0x168] sm:$0xff]   ;;  %v9116_v25 = vld [vmem:[#allocation2 + $0x98] sm:$0xff] }
 0x142   : > { %v8873_v0 = vld [vmem:[%s11791_s1 + $0x180] sm:$0xff]   ;;  %v1523_v2 = vpack.c.bf16 %v9116_v25, %v1455_v43  ;;  %v8877_v30 = vld [vmem:[%s11791_s1 + $0x188] sm:$0xff]   ;;  %v8884_v54 = vld [vmem:[%s11791_s1 + $0x130] sm:$0xff]  }
 0x143   : > { %8593 = vmatmul.mubr.bf16.vlgmr.msra.gmra.mrb[32].mxu0 %v2508_v15  ;;  %v8880_v45 = vld [vmem:[%s11791_s1 + $0x128] sm:$0xff]   ;;  %v1460_v15 = vld [vmem:[#allocation2 + $0x38] sm:$0xff]  ;;  %v8893_v20 = vld [vmem:[%s11791_s1 + $0x200] sm:$0xff]  }
 0x144   : > { %8137 = vmatpush3.bf16.msra.mxu0 %v8841_v16  ;;  %4697 = vmatprep.mubr.bf16.mxu0 %v1524_v36  ;;  %v8875_v16 = vld [vmem:[%s11791_s1 + $0x1c8] sm:$0xff]   ;;  %v8886_v36 = vld [vmem:[%s11791_s1 + $0x178] sm:$0xff]   ;;  %v8905_v43 = vld [vmem:[%s11791_s1 + $0x280] sm:$0xff]  }
 0x145   : > { %8138 = vmatprep.subr.bf16.mxu0 %v8843_v29  ;;  %8119 = vmatpush3.bf16.msra.mxu1 %v8848_v6  ;;  %v8882_v29 = vld [vmem:[%s11791_s1 + $0x170] sm:$0xff]   ;;  %v8895_v34 = vld [vmem:[%s11791_s1 + $0x248] sm:$0xff]   ;;  %v8902_v47 = vld [vmem:[%s11791_s1 + $0x258] sm:$0xff]  }
 0x146   : > { %8120 = vmatprep.subr.bf16.mxu1 %v8850_v33  ;;  %v8879_v6 = vld [vmem:[%s11791_s1 + $0x1d0] sm:$0xff]   ;;  %v8909_v25 = vld [vmem:[%s11791_s1 + $0x288] sm:$0xff]  }
 0x147   : > { %v8881_v33 = vld [vmem:[%s11791_s1 + $0x190] sm:$0xff]  }
 0x148   : > { %8139 = vmatpush3.bf16.msra.mxu0 %v8845_v27  ;;  %v8883_v27 = vld [vmem:[%s11791_s1 + $0x1d8] sm:$0xff]  }
 0x149   : > { %8140 = vmatprep.subr.bf16.mxu0 %v8847_v19  ;;  %8121 = vmatpush3.bf16.msra.mxu1 %v8852_v38  ;;  %v9117_v19 = vld [vmem:[#allocation2 + $0xc0] sm:$0xff] }
 0x14a   : > { %8122 = vmatprep.subr.bf16.mxu1 %v8854_v5  ;;  %v1528_v38 = vpack.c.bf16 %v9117_v19, %v1460_v15  ;;  %v8885_v5 = vld [vmem:[%s11791_s1 + $0x198] sm:$0xff]  }
 0x14c   : > { %8141 = vmatpush3.bf16.msra.mxu0 %v8849_v49  ;;  %v8888_v49 = vld [vmem:[%s11791_s1 + $0x138] sm:$0xff]  }
 0x14d   : > { %8142 = vmatprep.subr.bf16.mxu0 %v8851_v13  ;;  %8123 = vmatpush3.bf16.msra.mxu1 %v8856_v46  ;;  %v8891_v13 = vld [vmem:[%s11791_s1 + $0x240] sm:$0xff]  }
 0x14e   : > { %8164 = vmatprep.subr.bf16.mxu1 %v8859_v58  ;;  %v1457_v46 = vld [vmem:[#allocation2 + $0x20] sm:$0xff] }
 0x14f   : > { %v8887_v58 = vld [vmem:[%s11791_s1 + $0x1e0] sm:$0xff]  }
 0x150   : > { %8143 = vmatpush3.bf16.msra.mxu0 %v8853_v18  ;;  %4649 = vmatmul.mubr.bf16.vlgmr.msra.gmra.mrb[32].mxu1 %v1521_v37  ;;  %v9118_v18 = vld [vmem:[#allocation2 + $0xa8] sm:$0xff]  ;;  %v8889_v37 = vld [vmem:[%s11791_s1 + $0x1a0] sm:$0xff]  }
 0x151   : > { %8144 = vmatprep.subr.bf16.mxu0 %v8855_v1  ;;  %4656 = vmatprep.mubr.bf16.mxu1 %v10053_v28  ;;  %v1525_v1 = vpack.c.bf16 %v9118_v18, %v1457_v46  ;;  %v8920_v46 = vld [vmem:[%s11791_s1 + $0x238] sm:$0xff]  }
 0x152   : > { %8165 = vmatpush3.bf16.msra.mxu1 %v8861_v57  ;;  %v8890_v57 = vld [vmem:[%s11791_s1 + $0x1e8] sm:$0xff]   ;;  %v8917_v18 = vld [vmem:[%s11791_s1 + $0x298] sm:$0xff]  }
 0x153   : > { %8166 = vmatprep.subr.bf16.mxu1 %v8863_v8  ;;  %v8897_v8 = vld [vmem:[%s11791_s1 + $0x208] sm:$0xff]  }
 0x154   : > { %8145 = vmatpush3.bf16.msra.mxu0 %v8857_v50  ;;  %v8899_v50 = vld [vmem:[%s11791_s1 + $0x250] sm:$0xff]  }
 0x155   : > { %8146 = vmatprep.subr.bf16.mxu0 %v8858_v40  ;;  %v8892_v40 = vld [vmem:[%s11791_s1 + $0x1a8] sm:$0xff]  }
 0x156   : > { %8167 = vmatpush3.bf16.msra.mxu1 %v8865_v32  ;;  %v8894_v32 = vld [vmem:[%s11791_s1 + $0x1f0] sm:$0xff]  }
 0x157   : > { %8168 = vmatprep.subr.bf16.mxu1 %v8867_v24  ;;  %v1462_v24 = vld [vmem:[#allocation2 + $0x48] sm:$0xff] }
 0x158   : > { %8147 = vmatpush3.bf16.msra.mxu0 %v8860_v11  ;;  %4657 = vmatmul.mubr.bf16.gmra.mrb[36].mxu1 %v10076_v26  ;;  %v8901_v11 = vld [vmem:[%s11791_s1 + $0x210] sm:$0xff]  }
 0x159   : > { %8148 = vmatprep.subr.bf16.mxu0 %v8862_v62  ;;  %4746 = vmatprep.mubr.bf16.mxu1 %v1526_v23  ;;  %v8896_v62 = vld [vmem:[%s11791_s1 + $0x1b0] sm:$0xff]   ;;  %v8898_v23 = vld [vmem:[%s11791_s1 + $0x1f8] sm:$0xff]  }
 0x15a   : > { %8169 = vmatpush3.bf16.msra.mxu1 %v8869_v4  ;;  %v9119_v4 = vld [vmem:[#allocation2 + $0xd0] sm:$0xff] }
 0x15b   : > { %8170 = vmatprep.subr.bf16.mxu1 %v8870_v22  ;;  %v1530_v59 = vpack.c.bf16 %v9119_v4, %v1462_v24  ;;  %v8900_v22 = vld [vmem:[%s11791_s1 + $0x1b8] sm:$0xff]   ;;  %v8921_v4 = vld [vmem:[%s11791_s1 + $0x2a0] sm:$0xff]  }
 0x15c   : > { %8149 = vmatpush3.bf16.msra.mxu0 %v8864_v63  ;;  %v8904_v63 = vld [vmem:[%s11791_s1 + $0x218] sm:$0xff]  }
 0x15d   : > { %8150 = vmatprep.subr.bf16.mxu0 %v8866_v55  ;;  %v8906_v55 = vld [vmem:[%s11791_s1 + $0x260] sm:$0xff]  }
 0x15e   : > { %8171 = vmatpush3.bf16.msra.mxu1 %v8872_v44  ;;  %v1459_v44 = vld [vmem:[#allocation2 + $0x30] sm:$0xff] }
 0x15f   : > { %8172 = vmatprep.subr.bf16.mxu1 %v8874_v14  ;;  %v8903_v14 = vld [vmem:[%s11791_s1 + $0x2c0] sm:$0xff]  }
 0x160   : > { %8151 = vmatpush3.bf16.msra.mxu0 %v8868_v42  ;;  %v8908_v42 = vld [vmem:[%s11791_s1 + $0x220] sm:$0xff]  }
 0x161   : > { %8192 = vmatprep.subr.bf16.mxu0 %v8871_v56  ;;  %v8910_v56 = vld [vmem:[%s11791_s1 + $0x268] sm:$0xff]  }
 0x162   : > { %8173 = vmatpush3.bf16.msra.mxu1 %v8876_v41  ;;  %v9120_v41 = vld [vmem:[#allocation2 + $0xb8] sm:$0xff] }
 0x163   : > { %4698 = vmatmul.mubr.bf16.vlgmr.msra.gmra.mrb[36].mxu0 %v1523_v2  ;;  %8174 = vmatprep.subr.bf16.mxu1 %v8878_v7  ;;  %v1527_v7 = vpack.c.bf16 %v9120_v41, %v1459_v44  ;;  %v8912_v2 = vld [vmem:[%s11791_s1 + $0x228] sm:$0xff]   ;;  %v8926_v44 = vld [vmem:[%s11791_s1 + $0x2f0] sm:$0xff]  }
 0x164   : > { %4705 = vmatprep.mubr.bf16.mxu0 %v10097_v61  ;;  %8193 = vmatpush3.bf16.msra.mxu0 %v8873_v0  ;;  %v8907_v0 = vld [vmem:[%s11791_s1 + $0x2c8] sm:$0xff]  }
 0x165   : > { %8194 = vmatprep.subr.bf16.mxu0 %v8875_v16  ;;  %v8914_v16 = vld [vmem:[%s11791_s1 + $0x270] sm:$0xff]  }
 0x166   : > { %8175 = vmatpush3.bf16.msra.mxu1 %v8880_v45  ;;  %v8911_v45 = vld [vmem:[%s11791_s1 + $0x2d0] sm:$0xff]  }
 0x167   : > { %8176 = vmatprep.subr.bf16.mxu1 %v8882_v29 }
 0x168   : > { %8195 = vmatpush3.bf16.msra.mxu0 %v8877_v30 }
 0x169   : > { %8196 = vmatprep.subr.bf16.mxu0 %v8879_v6  ;;  %v1464_v6 = vld [vmem:[#allocation2 + $0x58] sm:$0xff] }
 0x16a   : > { %8177 = vmatpush3.bf16.msra.mxu1 %v8884_v54 }
 0x16b   : > { %4706 = vmatmul.mubr.bf16.gmra.mrb[40].mxu0 %v10099_v10  ;;  %8178 = vmatprep.subr.bf16.mxu1 %v8886_v36  ;;  %v8916_v36 = vld [vmem:[%s11791_s1 + $0x230] sm:$0xff]  }
 0x16c   : > { %8197 = vmatpush3.bf16.msra.mxu0 %v8881_v33  ;;  %4795 = vmatprep.mubr.bf16.mxu0 %v1528_v38  ;;  %v8913_v38 = vld [vmem:[%s11791_s1 + $0x290] sm:$0xff]  }
 0x16d   : > { %8198 = vmatprep.subr.bf16.mxu0 %v8883_v27  ;;  %v8918_v27 = vld [vmem:[%s11791_s1 + $0x278] sm:$0xff]  }
 0x16e   : > { %8179 = vmatpush3.bf16.msra.mxu1 %v8888_v49  ;;  %v9121_v49 = vld [vmem:[#allocation2 + $0xe0] sm:$0xff] }
 0x16f   : > { %8220 = vmatprep.subr.bf16.mxu1 %v8891_v13  ;;  %v1532_v13 = vpack.c.bf16 %v9121_v49, %v1464_v6 }
 0x170   : > { %8199 = vmatpush3.bf16.msra.mxu0 %v8885_v5  ;;  %v8915_v5 = vld [vmem:[%s11791_s1 + $0x2d8] sm:$0xff]  }
 0x171   : > { %8200 = vmatprep.subr.bf16.mxu0 %v8887_v58  ;;  %4747 = vmatmul.mubr.bf16.vlgmr.msra.gmra.mrb[40].mxu1 %v1525_v1 }
 0x172   : > { %4754 = vmatprep.mubr.bf16.mxu1 %v10223_v31  ;;  %8221 = vmatpush3.bf16.msra.mxu1 %v8893_v20  ;;  %v8923_v20 = vld [vmem:[%s11791_s1 + $0x340] sm:$0xff]  }
 0x173   : > { %8222 = vmatprep.subr.bf16.mxu1 %v8895_v34  ;;  %v1461_v34 = vld [vmem:[#allocation2 + $0x40] sm:$0xff] }
 0x174   : > { %8201 = vmatpush3.bf16.msra.mxu0 %v8889_v37  ;;  %v8919_v37 = vld [vmem:[%s11791_s1 + $0x2e0] sm:$0xff]  }
 0x175   : > { %8202 = vmatprep.subr.bf16.mxu0 %v8890_v57 }
 0x176   : > { %8223 = vmatpush3.bf16.msra.mxu1 %v8897_v8 }
 0x177   : > { %8224 = vmatprep.subr.bf16.mxu1 %v8899_v50 }
 0x178   : > { %8203 = vmatpush3.bf16.msra.mxu0 %v8892_v40  ;;  %v8925_v40 = vld [vmem:[%s11791_s1 + $0x300] sm:$0xff]  }
 0x179   : > { %8204 = vmatprep.subr.bf16.mxu0 %v8894_v32  ;;  %4755 = vmatmul.mubr.bf16.gmra.mrb[44].mxu1 %v10225_v35 }
 0x17a   : > { %8225 = vmatpush3.bf16.msra.mxu1 %v8901_v11  ;;  %4844 = vmatprep.mubr.bf16.mxu1 %v1530_v59  ;;  %v9122_v11 = vld [vmem:[#allocation2 + $0xc8] sm:$0xff] }
 0x17b   : > { %8226 = vmatprep.subr.bf16.mxu1 %v8902_v47  ;;  %v1529_v47 = vpack.c.bf16 %v9122_v11, %v1461_v34  ;;  %v8943_v34 = vld [vmem:[%s11791_s1 + $0x3d0] sm:$0xff]  }
 0x17c   : > { %8205 = vmatpush3.bf16.msra.mxu0 %v8896_v62  ;;  %v8927_v62 = vld [vmem:[%s11791_s1 + $0x348] sm:$0xff]  }
 0x17d   : > { %8206 = vmatprep.subr.bf16.mxu0 %v8898_v23  ;;  %v8922_v23 = vld [vmem:[%s11791_s1 + $0x2e8] sm:$0xff]  }
 0x17e   : > { %8227 = vmatpush3.bf16.msra.mxu1 %v8904_v63  ;;  %v8929_v63 = vld [vmem:[%s11791_s1 + $0x308] sm:$0xff]  }
 0x17f   : > { %8228 = vmatprep.subr.bf16.mxu1 %v8906_v55  ;;  %v8931_v55 = vld [vmem:[%s11791_s1 + $0x350] sm:$0xff]  }
 0x180   : > { %8207 = vmatpush3.bf16.msra.mxu0 %v8900_v22  ;;  %v8924_v22 = vld [vmem:[%s11791_s1 + $0x2a8] sm:$0xff]  }
 0x181   : > { %8248 = vmatprep.subr.bf16.mxu0 %v8903_v14  ;;  %v1466_v14 = vld [vmem:[#allocation2 + $0x68] sm:$0xff] }
 0x182   : > { %8229 = vmatpush3.bf16.msra.mxu1 %v8908_v42 }
 0x183   : > { %4796 = vmatmul.mubr.bf16.vlgmr.msra.gmra.mrb[44].mxu0 %v1527_v7  ;;  %8230 = vmatprep.subr.bf16.mxu1 %v8910_v56  ;;  %v8928_v56 = vld [vmem:[%s11791_s1 + $0x2b0] sm:$0xff]   ;;  %v8934_v7 = vld [vmem:[%s11791_s1 + $0x358] sm:$0xff]  }
 0x184   : > { %4803 = vmatprep.mubr.bf16.mxu0 %v10326_v39  ;;  %8249 = vmatpush3.bf16.msra.mxu0 %v8905_v43  ;;  %v7890_v30 = vpop.f32.mrb[0].mxu0  ;;  %v8933_v43 = vld [vmem:[%s11791_s1 + $0x310] sm:$0xff]  }
 0x185   : > { %8250 = vmatprep.subr.bf16.mxu0 %v8907_v0  ;;  %v7891_v29 = vpop.f32.mrb[1].mxu0 }
 0x186   : > { %v7892_v15 = vadd.f32 %v7891_v29, %v7890_v30  ;;  %v7893_v54 = vpop.f32.mrb[2].mxu0  ;;  %8231 = vmatpush3.bf16.msra.mxu1 %v8912_v2  ;;  %v8930_v2 = vld [vmem:[%s11791_s1 + $0x2f8] sm:$0xff]  }
 0x187   : > { %v7894_v33 = vpop.f32.mrb[3].mxu0  ;;  %8232 = vmatprep.subr.bf16.mxu1 %v8914_v16  ;;  %v9123_v16 = vld [vmem:[#allocation2 + $0xf0] sm:$0xff]  ;;  %v8936_v29 = vld [vmem:[%s11791_s1 + $0x318] sm:$0xff]  }
 0x188   : > { %8251 = vmatpush3.bf16.msra.mxu0 %v8909_v25  ;;  %v7895_v19 = vadd.f32 %v7894_v33, %v7893_v54  ;;  %v1534_v30 = vpack.c.bf16 %v9123_v16, %v1466_v14  ;;  %v8938_v54 = vld [vmem:[%s11791_s1 + $0x360] sm:$0xff]  }
 0x189   : > { %8252 = vmatprep.subr.bf16.mxu0 %v8911_v45  ;;  %v8935_v33 = vld [vmem:[%s11791_s1 + $0x3c0] sm:$0xff]  }
 0x18a   : > { %8233 = vmatpush3.bf16.msra.mxu1 %v8916_v36  ;;  %v1463_v36 = vld [vmem:[#allocation2 + $0x50] sm:$0xff]  ;;  %v8955_v14 = vld [vmem:[%s11791_s1 + $0x8c0] sm:$0xff]  }
 0x18b   : > { %4804 = vmatmul.mubr.bf16.gmra.mrb[48].mxu0 %v10328_v17  ;;  %v7918_v58 = vpop.f32.mrb[0].mxu1  ;;  %8234 = vmatprep.subr.bf16.mxu1 %v8918_v27  ;;  %v8940_v27 = vld [vmem:[%s11791_s1 + $0x320] sm:$0xff]  }
 0x18c   : > { %8253 = vmatpush3.bf16.msra.mxu0 %v8913_v38  ;;  %4893 = vmatprep.mubr.bf16.mxu0 %v1532_v13  ;;  %v7919_v1 = vpop.f32.mrb[1].mxu1  ;;  %v8937_v38 = vld [vmem:[%s11791_s1 + $0x380] sm:$0xff]   ;;  %v8939_v13 = vld [vmem:[%s11791_s1 + $0x3c8] sm:$0xff]  }
 0x18d   : > { %8254 = vmatprep.subr.bf16.mxu0 %v8915_v5  ;;  %v7920_v57 = vadd.f32 %v7919_v1, %v7918_v58  ;;  %v7921_v8 = vpop.f32.mrb[2].mxu1  ;;  %v9124_v5 = vld [vmem:[#allocation2 + $0xd8] sm:$0xff]  ;;  %v8946_v58 = vld [vmem:[%s11791_s1 + $0x370] sm:$0xff]   ;;  %v8957_v16 = vld [vmem:[%s11791_s1 + $0x880] sm:$0xff]  }
 0x18e   : > { %8235 = vmatpush3.bf16.msra.mxu1 %v8920_v46  ;;  %v7922_v50 = vpop.f32.mrb[3].mxu1  ;;  %v1531_v49 = vpack.c.bf16 %v9124_v5, %v1463_v36  ;;  %v8944_v46 = vld [vmem:[%s11791_s1 + $0x328] sm:$0xff]  }
 0x18f   : > { %v11036_v32 = vadd.f32 %v7920_v57, %v7892_v15  ;;  %v7923_v24 = vadd.f32 %v7922_v50, %v7921_v8  ;;  %8276 = vmatprep.subr.bf16.mxu1 %v8923_v20  ;;  %v8932_v15 = vld [vmem:[%s11791_s1 + $0x2b8] sm:$0xff]   ;;  %v8948_v50 = vld [vmem:[%s11791_s1 + $0x330] sm:$0xff]   ;;  %v8954_v36 = vld [vmem:[%s11791_s1 + $0x3e8] sm:$0xff]  }
 0x190   : > { %8255 = vmatpush3.bf16.msra.mxu0 %v8917_v18  ;;  %v8941_v18 = vld [vmem:[%s11791_s1 + $0x388] sm:$0xff]  }
 0x191   : > { %8256 = vmatprep.subr.bf16.mxu0 %v8919_v37  ;;  %v11044_v59 = vadd.f32 %v7923_v24, %v7895_v19  ;;  %4845 = vmatmul.mubr.bf16.vlgmr.msra.gmra.mrb[48].mxu1 %v1529_v47  ;;  %v8942_v19 = vld [vmem:[%s11791_s1 + $0x368] sm:$0xff]   ;;  %v1468_v37 = vld [vmem:[#allocation2 + $0x78] sm:$0xff] }
 0x192   : > { %4852 = vmatprep.mubr.bf16.mxu1 %v10433_v12  ;;  %8277 = vmatpush3.bf16.msra.mxu1 %v8925_v40  ;;  %v8950_v24 = vld [vmem:[%s11791_s1 + $0x378] sm:$0xff]  }
 0x193   : > { %8278 = vmatprep.subr.bf16.mxu1 %v8927_v62  ;;  %v8945_v62 = vld [vmem:[%s11791_s1 + $0x390] sm:$0xff]  }
 0x194   : > { %8257 = vmatpush3.bf16.msra.mxu0 %v8921_v4  ;;  %v8947_v4 = vld [vmem:[%s11791_s1 + $0x3d8] sm:$0xff]  }
 0x195   : > { %8258 = vmatprep.subr.bf16.mxu0 %v8922_v23 }
 0x196   : > { %v7896_v42 = vpop.f32.mrb[4].mxu0  ;;  %8279 = vmatpush3.bf16.msra.mxu1 %v8929_v63  ;;  %v9125_v63 = vld [vmem:[#allocation2 + $0x100] sm:$0xff] }
 0x197   : > { %v7897_v41 = vpop.f32.mrb[5].mxu0  ;;  %8280 = vmatprep.subr.bf16.mxu1 %v8931_v55  ;;  %v1536_v55 = vpack.c.bf16 %v9125_v63, %v1468_v37  ;;  %v8965_v37 = vld [vmem:[%s11791_s1 + $0x890] sm:$0xff]  }
 0x198   : > { %v11071_v0 = vadd.f32 %v7897_v41, %v7896_v42  ;;  %8259 = vmatpush3.bf16.msra.mxu0 %v8924_v22  ;;  %v7899_v25 = vpop.f32.mrb[6].mxu0  ;;  %v1467_v63 = vld [vmem:[#allocation2 + $0x70] sm:$0xff] }
 0x199   : > { %v7900_v45 = vpop.f32.mrb[7].mxu0  ;;  %8260 = vmatprep.subr.bf16.mxu0 %v8926_v44  ;;  %4853 = vmatmul.mubr.bf16.gmra.mrb[52].mxu1 %v10435_v9 }
 0x19a   : > { %v11080_v6 = vadd.f32 %v7900_v45, %v7899_v25  ;;  %8281 = vmatpush3.bf16.msra.mxu1 %v8933_v43  ;;  %4942 = vmatprep.mubr.bf16.mxu1 %v1534_v30  ;;  %v1465_v43 = vld [vmem:[#allocation2 + $0x60] sm:$0xff]  ;;  %v9126_v30 = vld [vmem:[#allocation2 + $0xe8] sm:$0xff] }
 0x19b   : > { %8282 = vmatprep.subr.bf16.mxu1 %v8934_v7  ;;  %v8951_v7 = vld [vmem:[%s11791_s1 + $0x3e0] sm:$0xff]   ;;  %v1533_v45 = vpack.c.bf16 %v9126_v30, %v1465_v43  ;;  %v8976_v30 = vld [vmem:[%s11791_s1 + $0x8f0] sm:$0xff]  }
 0x19c   : > { %8261 = vmatpush3.bf16.msra.mxu0 %v8928_v56  ;;  %v8949_v56 = vld [vmem:[%s11791_s1 + $0x398] sm:$0xff]  }
 0x19d   : > { %8262 = vmatprep.subr.bf16.mxu0 %v8930_v2 }
 0x19e   : > { %8283 = vmatpush3.bf16.msra.mxu1 %v8936_v29  ;;  %v8959_v29 = vld [vmem:[%s11791_s1 + $0x8c8] sm:$0xff]  }
 0x19f   : > { %8284 = vmatprep.subr.bf16.mxu1 %v8938_v54  ;;  %v5058_v54 = vld [vmem:[#allocation2 + $0x8] sm:$0xfc] }
 0x1a0   : > { %8263 = vmatpush3.bf16.msra.mxu0 %v8932_v15 }
 0x1a1   : > { %8304 = vmatprep.subr.bf16.mxu0 %v8935_v33 }
 0x1a2   : > { %8285 = vmatpush3.bf16.msra.mxu1 %v8940_v27 }
 0x1a3   : > { %4894 = vmatmul.mubr.bf16.vlgmr.msra.gmra.mrb[52].mxu0 %v1531_v49  ;;  %8286 = vmatprep.subr.bf16.mxu1 %v8942_v19  ;;  %v8963_v19 = vld [vmem:[%s11791_s1 + $0x8d0] sm:$0xff]   ;;  %v5454_v49 = vrot.slane %v10053_v28, 1 }
 0x1a4   : > { %4901 = vmatprep.mubr.bf16.mxu0 %v10531_v52  ;;  %8305 = vmatpush3.bf16.msra.mxu0 %v8937_v38  ;;  %v7946_v20 = vpop.f32.mrb[8].mxu0  ;;  %v9127_v38 = vld [vmem:[#allocation2 + $0x90] sm:$0xff] }
 0x1a5   : > { %8306 = vmatprep.subr.bf16.mxu0 %v8939_v13  ;;  %v7947_v1 = vpop.f32.mrb[9].mxu0  ;;  %v5092_v5 = vpack.c.bf16 %v9127_v38, %v5058_v54  ;;  %v8956_v13 = vld [vmem:[%s11791_s1 + $0x3a8] sm:$0xff]   ;;  %v8977_v54 = vld [vmem:[%s11791_s1 + $0x8b0] sm:$0xff]   ;;  %v1469_v38 = vld [vmem:[#allocation2 + $0x80] sm:$0xff] }
 0x1a6   : > { %v7948_v57 = vadd.f32 %v7947_v1, %v7946_v20  ;;  %v7949_v8 = vpop.f32.mrb[10].mxu0  ;;  %8287 = vmatpush3.bf16.msra.mxu1 %v8944_v46  ;;  %v8958_v20 = vld [vmem:[%s11791_s1 + $0x3f0] sm:$0xff]  }
 0x1a7   : > { %v7950_v40 = vpop.f32.mrb[11].mxu0  ;;  %8288 = vmatprep.subr.bf16.mxu1 %v8946_v58 }
 0x1a8   : > { %v3492_v11 = vadd.f32 %v7948_v57, %v11036_v32  ;;  %8307 = vmatpush3.bf16.msra.mxu0 %v8941_v18  ;;  %v7951_v47 = vadd.f32 %v7950_v40, %v7949_v8  ;;  %v8952_v32 = vld [vmem:[%s11791_s1 + $0x338] sm:$0xff]   ;;  %v5453_v57 = vrot.slane %v5092_v5, 1 }
 0x1a9   : > { %8308 = vmatprep.subr.bf16.mxu0 %v8943_v34  ;;  %v8967_v8 = vld [vmem:[%s11791_s1 + $0x8d8] sm:$0xff]  }
 0x1aa   : > { %v3495_v23 = vadd.f32 %v7951_v47, %v11044_v59  ;;  %v7924_v22 = vpop.f32.mrb[4].mxu1  ;;  %8289 = vmatpush3.bf16.msra.mxu1 %v8948_v50  ;;  %v8960_v50 = vld [vmem:[%s11791_s1 + $0x3b0] sm:$0xff]   ;;  %v8968_v47 = vld [vmem:[%s11791_s1 + $0x898] sm:$0xff]  }
 0x1ab   : > { %4902 = vmatmul.mubr.bf16.gmra.mrb[56].mxu0 %v10533_v53  ;;  %v7925_v44 = vpop.f32.mrb[5].mxu1  ;;  %8290 = vmatprep.subr.bf16.mxu1 %v8950_v24  ;;  %v8962_v24 = vld [vmem:[%s11791_s1 + $0x3f8] sm:$0xff]  }
 0x1ac   : > { %v7926_v42 = vadd.f32 %v7925_v44, %v7924_v22  ;;  %8309 = vmatpush3.bf16.msra.mxu0 %v8945_v62  ;;  %4991 = vmatprep.mubr.bf16.mxu0 %v1536_v55  ;;  %v7927_v59 = vpop.f32.mrb[6].mxu1  ;;  %v8970_v62 = vld [vmem:[%s11791_s1 + $0x8e0] sm:$0xff]   ;;  %v8973_v44 = vld [vmem:[%s11791_s1 + $0x8e8] sm:$0xff]   ;;  %v8975_v5 = vld [vmem:[%s11791_s1 + $0x418] sm:$0xff]  }
 0x1ad   : > { %v7928_v41 = vpop.f32.mrb[7].mxu1  ;;  %8310 = vmatprep.subr.bf16.mxu0 %v8947_v4  ;;  %v8964_v4 = vld [vmem:[%s11791_s1 + $0x3b8] sm:$0xff]   ;;  %v8971_v55 = vld [vmem:[%s11791_s1 + $0x8a0] sm:$0xff]  }
 0x1ae   : > { %v11144_v25 = vadd.f32 %v7926_v42, %v11071_v0  ;;  %v7929_v2 = vadd.f32 %v7928_v41, %v7927_v59  ;;  %8291 = vmatpush3.bf16.msra.mxu1 %v8952_v32  ;;  %v8953_v0 = vld [vmem:[%s11791_s1 + $0x3a0] sm:$0xff]   ;;  %v8969_v41 = vld [vmem:[%s11791_s1 + $0x408] sm:$0xff]  }
 0x1af   : > { %8342 = vmatprep.subr.bf16.mxu1 %v8955_v14 }
 0x1b0   : > { %v11153_v15 = vadd.f32 %v7929_v2, %v11080_v6  ;;  %8311 = vmatpush3.bf16.msra.mxu0 %v8949_v56  ;;  %v8961_v6 = vld [vmem:[%s11791_s1 + $0x888] sm:$0xff]   ;;  %v9128_v56 = vld [vmem:[#allocation2 + $0xf8] sm:$0xff] }
 0x1b1   : > { %8312 = vmatprep.subr.bf16.mxu0 %v8951_v7  ;;  %4943 = vmatmul.mubr.bf16.vlgmr.msra.gmra.mrb[56].mxu1 %v1533_v45  ;;  %v1535_v43 = vpack.c.bf16 %v9128_v56, %v1467_v63  ;;  %v8974_v7 = vld [vmem:[%s11791_s1 + $0x8a8] sm:$0xff]  }
 0x1b2   : > { %4950 = vmatprep.mubr.bf16.mxu1 %v10632_v48  ;;  %8343 = vmatpush3.bf16.msra.mxu1 %v8957_v16  ;;  %v7974_v33 = vpop.f32.mrb[8].mxu1 }
 0x1b3   : > { %8344 = vmatprep.subr.bf16.mxu1 %v8959_v29  ;;  %v7975_v27 = vpop.f32.mrb[9].mxu1  ;;  %v5075_v29 = vld [vmem:[#allocation2 + $0x228] sm:$0x3] }
 0x1b4   : > { %8313 = vmatpush3.bf16.msra.mxu0 %v8953_v0  ;;  %v7976_v46 = vadd.f32 %v7975_v27, %v7974_v33  ;;  %v7977_v58 = vpop.f32.mrb[10].mxu1  ;;  %v5057_v33 = vld [vmem:[#allocation2] sm:$0xfc] }
 0x1b5   : > { %8314 = vmatprep.subr.bf16.mxu0 %v8954_v36  ;;  %v7978_v18 = vpop.f32.mrb[11].mxu1 }
 0x1b6   : > { %v11175_v1 = vadd.f32 %v7976_v46, %v3492_v11  ;;  %8345 = vmatpush3.bf16.msra.mxu1 %v8961_v6  ;;  %v7979_v34 = vadd.f32 %v7978_v18, %v7977_v58  ;;  %v5455_v11 = vsel %vm5449_vm11, %v5453_v57, %v5454_v49  ;;  %v9129_v46 = vld [vmem:[#allocation2 + $0x108] sm:$0xff] }
 0x1b7   : > { %8346 = vmatprep.subr.bf16.mxu1 %v8963_v19  ;;  %v5109_v19 = vpack.c.bf16 %v5075_v29, %v5075_v29  ;;  %v1537_v58 = vpack.c.bf16 %v9129_v46, %v1469_v38  ;;  %v8994_v38 = vld [vmem:[%s11791_s1 + $0x960] sm:$0xff]  }
 0x1b8   : > { %8315 = vmatpush3.bf16.msra.mxu0 %v8956_v13  ;;  %v11186_v40 = vadd.f32 %v7979_v34, %v3495_v23  ;;  %v8966_v23 = vld [vmem:[%s11791_s1 + $0x400] sm:$0xff]   ;;  %v8980_v34 = vld [vmem:[%s11791_s1 + $0x8b8] sm:$0xff]  }
 0x1b9   : > { %8316 = vmatprep.subr.bf16.mxu0 %v8958_v20  ;;  %4951 = vmatmul.mubr.bf16.gmra.mrb[60].mxu1 %v10634_v3  ;;  %v8991_v46 = vld [vmem:[%s11791_s1 + $0x9c0] sm:$0xff]  }
 0x1ba   : > { %8347 = vmatpush3.bf16.msra.mxu1 %v8965_v37  ;;  %6417 = vmatprep.mubr.bf16.mxu1 %v5455_v11  ;;  %v9130_v37 = vld [vmem:[#allocation2 + $0x88] sm:$0xff]  ;;  %v5503_v11 = vrot.slane %v5109_v19, 1 }
 0x1bb   : > { %8348 = vmatprep.subr.bf16.mxu1 %v8967_v8  ;;  %v5091_v57 = vpack.c.bf16 %v9130_v37, %v5057_v33  ;;  %v5451_v8 = vrot.slane %v10076_v26, 1  ;;  %v8983_v26 = vld [vmem:[%s11791_s1 + $0x900] sm:$0xff]  }
 0x1bc   : > { %8317 = vmatpush3.bf16.msra.mxu0 %v8960_v50  ;;  %v8982_v50 = vld [vmem:[%s11791_s1 + $0x940] sm:$0xff]   ;;  %v5504_v63 = vsel %vm5449_vm11, %v5454_v49, %v5503_v11 }
 0x1bd   : > { %8318 = vmatprep.subr.bf16.mxu0 %v8962_v24  ;;  %v8978_v24 = vld [vmem:[%s11791_s1 + $0x420] sm:$0xff]  }
 0x1be   : > { %v7952_v22 = vpop.f32.mrb[12].mxu0  ;;  %8349 = vmatpush3.bf16.msra.mxu1 %v8968_v47  ;;  %v5074_v47 = vld [vmem:[#allocation2 + $0x220] sm:$0x3] }
 0x1bf   : > { %v7953_v32 = vpop.f32.mrb[13].mxu0  ;;  %8350 = vmatprep.subr.bf16.mxu1 %v8970_v62  ;;  %v5450_v62 = vrot.slane %v5091_v57, 1  ;;  %v8993_v11 = vld [vmem:[%s11791_s1 + $0x980] sm:$0xff]  }
 0x1c0   : > { %v7954_v14 = vadd.f32 %v7953_v32, %v7952_v22  ;;  %8319 = vmatpush3.bf16.msra.mxu0 %v8964_v4  ;;  %v7955_v42 = vpop.f32.mrb[14].mxu0  ;;  %v8985_v4 = vld [vmem:[%s11791_s1 + $0x948] sm:$0xff]   ;;  %v5108_v22 = vpack.c.bf16 %v5074_v47, %v5074_v47 }
 0x1c1   : > { %v7956_v59 = vpop.f32.mrb[15].mxu0  ;;  %8596 = vmatprep.subr.bf16.mxu0 %v8966_v23 }
 0x1c2   : > { %v11220_v2 = vadd.f32 %v7954_v14, %v11144_v25  ;;  %v7957_v16 = vadd.f32 %v7956_v59, %v7955_v42  ;;  %8351 = vmatpush3.bf16.msra.mxu1 %v8971_v55  ;;  %v8972_v25 = vld [vmem:[%s11791_s1 + $0x410] sm:$0xff]   ;;  %v5060_v55 = vld [vmem:[#allocation2 + $0x18] sm:$0xfc]  ;;  %v9131_v59 = vld [vmem:[#allocation2 + $0xa0] sm:$0xff]  ;;  %v5501_v49 = vrot.slane %v5108_v22, 1 }
 0x1c3   : > { %4992 = vmatmul.mubr.bf16.vlgmr.msra.gmra.mrb[60].mxu0 %v1535_v43  ;;  %8352 = vmatprep.subr.bf16.mxu1 %v8973_v44  ;;  %v8986_v44 = vld [vmem:[%s11791_s1 + $0x908] sm:$0xff]   ;;  %v8988_v42 = vld [vmem:[%s11791_s1 + $0x950] sm:$0xff]   ;;  %v5094_v56 = vpack.c.bf16 %v9131_v59, %v5060_v55 }
 0x1c4   : > { %v11226_v45 = vadd.f32 %v7957_v16, %v11153_v15  ;;  %4999 = vmatprep.mubr.bf16.mxu0 %v10711_v51  ;;  %8597 = vmatpush3.bf16.msra.mxu0 %v8966_v23  ;;  %v8979_v15 = vld [vmem:[%s11791_s1 + $0x8f8] sm:$0xff]   ;;  %v5452_v23 = vsel %vm5449_vm11, %v5450_v62, %v5451_v8  ;;  %v8984_v16 = vld [vmem:[%s11791_s1 + $0x430] sm:$0xff]   ;;  %v8995_v62 = vld [vmem:[%s11791_s1 + $0x9c8] sm:$0xff]  }
 0x1c5   : > { %8598 = vmatprep.subr.bf16.mxu0 %v8969_v41  ;;  %v5059_v22 = vld [vmem:[#allocation2 + $0x10] sm:$0xfc] }
 0x1c6   : > { %8353 = vmatpush3.bf16.msra.mxu1 %v8974_v7  ;;  %v8002_v0 = vpop.f32.mrb[16].mxu0 }
 0x1c7   : > { %8354 = vmatprep.subr.bf16.mxu1 %v8976_v30  ;;  %v8003_v36 = vpop.f32.mrb[17].mxu0 }
 0x1c8   : > { %8599 = vmatpush3.bf16.msra.mxu0 %v8969_v41  ;;  %v8004_v6 = vadd.f32 %v8003_v36, %v8002_v0  ;;  %v8005_v27 = vpop.f32.mrb[18].mxu0  ;;  %v5460_v41 = vrot.slane %v10097_v61, 1  ;;  %v5459_v0 = vrot.slane %v5094_v56, 1  ;;  %v9001_v56 = vld [vmem:[%s11791_s1 + $0x990] sm:$0xff]  }
 0x1c9   : > { %8600 = vmatprep.subr.bf16.mxu0 %v8972_v25  ;;  %v8006_v13 = vpop.f32.mrb[19].mxu0 }
 0x1ca   : > { %v11242_v20 = vadd.f32 %v8004_v6, %v11175_v1  ;;  %8355 = vmatpush3.bf16.msra.mxu1 %v8977_v54  ;;  %v8007_v18 = vadd.f32 %v8006_v13, %v8005_v27  ;;  %v8990_v54 = vld [vmem:[%s11791_s1 + $0x958] sm:$0xff]   ;;  %v5461_v33 = vsel %vm5449_vm11, %v5459_v0, %v5460_v41  ;;  %v5062_v27 = vld [vmem:[#allocation2 + $0x28] sm:$0xfc] }
 0x1cb   : > { %5000 = vmatmul.mubr.bf16.gmra.mrb[64].mxu0 %v10713_v60  ;;  %8356 = vmatprep.subr.bf16.mxu1 %v8979_v15  ;;  %v5502_v15 = vsel %vm5449_vm11, %v5451_v8, %v5501_v49  ;;  %v8996_v8 = vld [vmem:[%s11791_s1 + $0x920] sm:$0xff]   ;;  %v9008_v0 = vld [vmem:[%s11791_s1 + $0x938] sm:$0xff]  }
 0x1cc   : > { %8601 = vmatpush3.bf16.msra.mxu0 %v8972_v25  ;;  %8612 = vmatprep.mubr.bf16.mxu0 %v1537_v58  ;;  %v11253_v1 = vadd.f32 %v8007_v18, %v11186_v40  ;;  %v8981_v40 = vld [vmem:[%s11791_s1 + $0x428] sm:$0xff]   ;;  %v8989_v25 = vld [vmem:[%s11791_s1 + $0x910] sm:$0xff]  }
 0x1cd   : > { %8602 = vmatprep.subr.bf16.mxu0 %v8975_v5  ;;  %v9132_v58 = vld [vmem:[#allocation2 + $0xb0] sm:$0xff] }
 0x1ce   : > { %8357 = vmatpush3.bf16.msra.mxu1 %v8980_v34  ;;  %v5096_v18 = vpack.c.bf16 %v9132_v58, %v5062_v27 }
 0x1cf   : > { %8370 = vmatprep.subr.bf16.mxu1 %v8982_v50  ;;  %v5466_v50 = vrot.slane %v10223_v31, 1  ;;  %v9036_v31 = vld [vmem:[%s11791_s1 + $0xa30] sm:$0xff]  }
 0x1d0   : > { %8603 = vmatpush3.bf16.msra.mxu0 %v8975_v5  ;;  %v5465_v47 = vrot.slane %v5096_v18, 1 }
 0x1d1   : > { %8604 = vmatprep.subr.bf16.mxu0 %v8978_v24  ;;  %6418 = vmatmul.mubr.bf16.vlgmr.msra.gmra.mrb[64].mxu1 %v5452_v23  ;;  %v8999_v23 = vld [vmem:[%s11791_s1 + $0x9d0] sm:$0xff]  }
 0x1d2   : > { %v7980_v32 = vpop.f32.mrb[12].mxu1  ;;  %6425 = vmatprep.mubr.bf16.mxu1 %v5504_v63  ;;  %8371 = vmatpush3.bf16.msra.mxu1 %v8983_v26  ;;  %v8997_v26 = vld [vmem:[%s11791_s1 + $0x988] sm:$0xff]   ;;  %v5077_v63 = vld [vmem:[#allocation2 + $0x238] sm:$0x3] }
 0x1d3   : > { %v7981_v14 = vpop.f32.mrb[13].mxu1  ;;  %8372 = vmatprep.subr.bf16.mxu1 %v8985_v4  ;;  %v9000_v4 = vld [vmem:[%s11791_s1 + $0x928] sm:$0xff]   ;;  %v5111_v49 = vpack.c.bf16 %v5077_v63, %v5077_v63  ;;  %v9021_v63 = vld [vmem:[%s11791_s1 + $0xa10] sm:$0xff]  }
 0x1d4   : > { %v7982_v43 = vadd.f32 %v7981_v14, %v7980_v32  ;;  %8605 = vmatpush3.bf16.msra.mxu0 %v8978_v24  ;;  %v7983_v28 = vpop.f32.mrb[14].mxu1  ;;  %v8998_v24 = vld [vmem:[%s11791_s1 + $0x968] sm:$0xff]   ;;  %v9004_v32 = vld [vmem:[%s11791_s1 + $0x930] sm:$0xff]   ;;  %v9006_v14 = vld [vmem:[%s11791_s1 + $0x978] sm:$0xff]  }
 0x1d5   : > { %v7984_v7 = vpop.f32.mrb[15].mxu1  ;;  %8606 = vmatprep.subr.bf16.mxu0 %v8981_v40 }
 0x1d6   : > { %v11282_v30 = vadd.f32 %v7982_v43, %v11220_v2  ;;  %v7985_v29 = vadd.f32 %v7984_v7, %v7983_v28  ;;  %8373 = vmatpush3.bf16.msra.mxu1 %v8986_v44  ;;  %v8987_v2 = vld [vmem:[%s11791_s1 + $0x438] sm:$0xff]  }
 0x1d7   : > { %8374 = vmatprep.subr.bf16.mxu1 %v8988_v42  ;;  %v9133_v43 = vld [vmem:[#allocation2 + $0x98] sm:$0xff] }
 0x1d8   : > { %v11291_v36 = vadd.f32 %v7985_v29, %v11226_v45  ;;  %8607 = vmatpush3.bf16.msra.mxu0 %v8981_v40  ;;  %v8992_v45 = vld [vmem:[%s11791_s1 + $0x918] sm:$0xff]   ;;  %v9002_v40 = vld [vmem:[%s11791_s1 + $0x970] sm:$0xff]   ;;  %v5093_v28 = vpack.c.bf16 %v9133_v43, %v5059_v22 }
 0x1d9   : > { %8608 = vmatprep.subr.bf16.mxu0 %v8984_v16  ;;  %6426 = vmatmul.mubr.bf16.gmra.mrb[68].mxu1 %v5502_v15  ;;  %v9011_v15 = vld [vmem:[%s11791_s1 + $0xa40] sm:$0xff]   ;;  %v9016_v22 = vld [vmem:[%s11791_s1 + $0x9b0] sm:$0xff]   ;;  %v9024_v43 = vld [vmem:[%s11791_s1 + $0xa18] sm:$0xff]  }
 0x1da   : > { %8375 = vmatpush3.bf16.msra.mxu1 %v8989_v25  ;;  %6466 = vmatprep.mubr.bf16.mxu1 %v5461_v33  ;;  %v8030_v6 = vpop.f32.mrb[16].mxu1  ;;  %v9007_v33 = vld [vmem:[%s11791_s1 + $0x9e0] sm:$0xff]  }
 0x1db   : > { %8376 = vmatprep.subr.bf16.mxu1 %v8990_v54  ;;  %v8031_v19 = vpop.f32.mrb[17].mxu1  ;;  %v5457_v54 = vrot.slane %v10099_v10, 1  ;;  %v5076_v10 = vld [vmem:[#allocation2 + $0x230] sm:$0x3] }
 0x1dc   : > { %8609 = vmatpush3.bf16.msra.mxu0 %v8984_v16  ;;  %v8032_v5 = vadd.f32 %v8031_v19, %v8030_v6  ;;  %v8033_v13 = vpop.f32.mrb[18].mxu1  ;;  %v9003_v16 = vld [vmem:[%s11791_s1 + $0x9d8] sm:$0xff]   ;;  %v5456_v6 = vrot.slane %v5093_v28, 1  ;;  %v5078_v28 = vld [vmem:[#allocation2 + $0x240] sm:$0x3] }
 0x1dd   : > { %8610 = vmatprep.subr.bf16.mxu0 %v8987_v2  ;;  %v8034_v34 = vpop.f32.mrb[19].mxu1  ;;  %v5064_v19 = vld [vmem:[#allocation2 + $0x38] sm:$0xfc] }
 0x1de   : > { %v11310_v37 = vadd.f32 %v8032_v5, %v11242_v20  ;;  %8377 = vmatpush3.bf16.msra.mxu1 %v8992_v45  ;;  %v8035_v57 = vadd.f32 %v8034_v34, %v8033_v13  ;;  %v5507_v45 = vrot.slane %v5111_v49, 1  ;;  %v9015_v5 = vld [vmem:[%s11791_s1 + $0xa48] sm:$0xff]   ;;  %v9009_v13 = vld [vmem:[%s11791_s1 + $0x9a0] sm:$0xff]   ;;  %v5110_v34 = vpack.c.bf16 %v5076_v10, %v5076_v10 }
 0x1df   : > { %8378 = vmatprep.subr.bf16.mxu1 %v8994_v38 }
 0x1e0   : > { %8611 = vmatpush3.bf16.msra.mxu0 %v8987_v2  ;;  %v11323_v20 = vadd.f32 %v8035_v57, %v11253_v1  ;;  %v5467_v1 = vsel %vm5449_vm11, %v5465_v47, %v5466_v50  ;;  %v9010_v57 = vld [vmem:[%s11791_s1 + $0x9e8] sm:$0xff]  }
 0x1e1   : > { %8398 = vmatprep.subr.bf16.mxu0 %v8991_v46  ;;  %v5458_v46 = vsel %vm5449_vm11, %v5456_v6, %v5457_v54  ;;  %v9023_v6 = vld [vmem:[%s11791_s1 + $0xac0] sm:$0xff]  }
 0x1e2   : > { %8379 = vmatpush3.bf16.msra.mxu1 %v8996_v8  ;;  %v5508_v8 = vsel %vm5449_vm11, %v5460_v41, %v5507_v45  ;;  %v9012_v41 = vld [vmem:[%s11791_s1 + $0x9a8] sm:$0xff]  }
 0x1e3   : > { %8613 = vmatmul.mubr.bf16.vlgmr.msra.gmra.mrb[32].mxu0 %v10743_v21  ;;  %8380 = vmatprep.subr.bf16.mxu1 %v8998_v24 }
 0x1e4   : > { %8399 = vmatpush3.bf16.msra.mxu0 %v8993_v11  ;;  %6515 = vmatprep.mubr.bf16.mxu0 %v5467_v1  ;;  %v5505_v1 = vrot.slane %v5110_v34, 1 }
 0x1e5   : > { %8400 = vmatprep.subr.bf16.mxu0 %v8995_v62  ;;  %v9017_v62 = vld [vmem:[%s11791_s1 + $0xa08] sm:$0xff]  }
 0x1e6   : > { %v8008_v55 = vpop.f32.mrb[20].mxu0  ;;  %8381 = vmatpush3.bf16.msra.mxu1 %v9000_v4  ;;  %v9134_v4 = vld [vmem:[#allocation2 + $0xc0] sm:$0xff] }
 0x1e7   : > { %v8009_v44 = vpop.f32.mrb[21].mxu0  ;;  %8382 = vmatprep.subr.bf16.mxu1 %v9002_v40  ;;  %v5098_v61 = vpack.c.bf16 %v9134_v4, %v5064_v19  ;;  %v9014_v40 = vld [vmem:[%s11791_s1 + $0x9f0] sm:$0xff]  }
 0x1e8   : > { %v8010_v42 = vadd.f32 %v8009_v44, %v8008_v55  ;;  %8401 = vmatpush3.bf16.msra.mxu0 %v8997_v26  ;;  %v8011_v59 = vpop.f32.mrb[22].mxu0  ;;  %v9019_v26 = vld [vmem:[%s11791_s1 + $0xa50] sm:$0xff]   ;;  %v5506_v44 = vsel %vm5449_vm11, %v5457_v54, %v5505_v1  ;;  %v9020_v54 = vld [vmem:[%s11791_s1 + $0x9b8] sm:$0xff]  }
 0x1e9   : > { %v8012_v7 = vpop.f32.mrb[23].mxu0  ;;  %8402 = vmatprep.subr.bf16.mxu0 %v8999_v23  ;;  %v5472_v23 = vrot.slane %v10326_v39, 1  ;;  %v5471_v55 = vrot.slane %v5098_v61, 1  ;;  %v9034_v4 = vld [vmem:[%s11791_s1 + $0xa70] sm:$0xff]  }
 0x1ea   : > { %v11357_v29 = vadd.f32 %v8010_v42, %v11282_v30  ;;  %v8013_v25 = vadd.f32 %v8012_v7, %v8011_v59  ;;  %8383 = vmatpush3.bf16.msra.mxu1 %v9004_v32  ;;  %v9005_v30 = vld [vmem:[%s11791_s1 + $0x998] sm:$0xff]   ;;  %v5061_v59 = vld [vmem:[#allocation2 + $0x20] sm:$0xfc] }
 0x1eb   : > { %8384 = vmatprep.subr.bf16.mxu1 %v9006_v14  ;;  %v9022_v32 = vld [vmem:[%s11791_s1 + $0xa58] sm:$0xff]   ;;  %v5079_v14 = vld [vmem:[#allocation2 + $0x248] sm:$0x3]  ;;  %v5473_v42 = vsel %vm5449_vm11, %v5471_v55, %v5472_v23 }
 0x1ec   : > { %v11367_v2 = vadd.f32 %v8013_v25, %v11291_v36  ;;  %8403 = vmatpush3.bf16.msra.mxu0 %v9001_v56  ;;  %v9013_v36 = vld [vmem:[%s11791_s1 + $0xa00] sm:$0xff]   ;;  %v5113_v7 = vpack.c.bf16 %v5079_v14, %v5079_v14 }
 0x1ed   : > { %8404 = vmatprep.subr.bf16.mxu0 %v9003_v16  ;;  %v9026_v16 = vld [vmem:[%s11791_s1 + $0xa60] sm:$0xff]  }
 0x1ee   : > { %8385 = vmatpush3.bf16.msra.mxu1 %v9008_v0  ;;  %v8058_v27 = vpop.f32.mrb[24].mxu0  ;;  %v5511_v19 = vrot.slane %v5113_v7, 1  ;;  %v9043_v7 = vld [vmem:[%s11791_s1 + $0xb40] sm:$0xff]  }
 0x1ef   : > { %8426 = vmatprep.subr.bf16.mxu1 %v9011_v15  ;;  %v8059_v38 = vpop.f32.mrb[25].mxu0  ;;  %v9135_v15 = vld [vmem:[#allocation2 + $0xa8] sm:$0xff] }
 0x1f0   : > { %8405 = vmatpush3.bf16.msra.mxu0 %v9005_v30  ;;  %v8060_v58 = vadd.f32 %v8059_v38, %v8058_v27  ;;  %v8061_v18 = vpop.f32.mrb[26].mxu0  ;;  %v5095_v30 = vpack.c.bf16 %v9135_v15, %v5061_v59  ;;  %v5463_v27 = vrot.slane %v10225_v35, 1  ;;  %v5112_v38 = vpack.c.bf16 %v5078_v28, %v5078_v28  ;;  %v9025_v35 = vld [vmem:[%s11791_s1 + $0xa80] sm:$0xff]   ;;  %v9035_v59 = vld [vmem:[%s11791_s1 + $0xad8] sm:$0xff]   ;;  %v5080_v15 = vld [vmem:[#allocation2 + $0x250] sm:$0x3] }
 0x1f1   : > { %8406 = vmatprep.subr.bf16.mxu0 %v9007_v33  ;;  %6467 = vmatmul.mubr.bf16.vlgmr.msra.gmra.mrb[72].mxu1 %v5458_v46  ;;  %v8062_v24 = vpop.f32.mrb[27].mxu0  ;;  %v9027_v46 = vld [vmem:[%s11791_s1 + $0xac8] sm:$0xff]   ;;  %v9137_v28 = vld [vmem:[#allocation2 + $0xb8] sm:$0xff] }
 0x1f2   : > { %v11392_v11 = vadd.f32 %v8060_v58, %v11310_v37  ;;  %6474 = vmatprep.mubr.bf16.mxu1 %v5508_v8  ;;  %8427 = vmatpush3.bf16.msra.mxu1 %v9013_v36  ;;  %v8063_v47 = vadd.f32 %v8062_v24, %v8061_v18  ;;  %v9028_v36 = vld [vmem:[%s11791_s1 + $0xa20] sm:$0xff]   ;;  %v5478_v58 = vrot.slane %v10433_v12, 1  ;;  %v5066_v8 = vld [vmem:[#allocation2 + $0x48] sm:$0xfc]  ;;  %v5512_v24 = vsel %vm5449_vm11, %v5466_v50, %v5511_v19  ;;  %v9136_v50 = vld [vmem:[#allocation2 + $0xd0] sm:$0xff] }
 0x1f3   : > { %8428 = vmatprep.subr.bf16.mxu1 %v9015_v5  ;;  %v9030_v5 = vld [vmem:[%s11791_s1 + $0xa68] sm:$0xff]   ;;  %v5100_v1 = vpack.c.bf16 %v9136_v50, %v5066_v8  ;;  %v9041_v19 = vld [vmem:[%s11791_s1 + $0xaa0] sm:$0xff]   ;;  %v5484_v50 = vrot.slane %v10531_v52, 1  ;;  %v9063_v12 = vld [vmem:[%s11791_s1 + $0xbd0] sm:$0xff]  }
 0x1f4   : > { %8407 = vmatpush3.bf16.msra.mxu0 %v9009_v13  ;;  %v11404_v37 = vadd.f32 %v8063_v47, %v11323_v20  ;;  %v9018_v20 = vld [vmem:[%s11791_s1 + $0x9f8] sm:$0xff]   ;;  %v5509_v47 = vrot.slane %v5112_v38, 1  ;;  %v9049_v8 = vld [vmem:[%s11791_s1 + $0xb08] sm:$0xff]  }
 0x1f5   : > { %8408 = vmatprep.subr.bf16.mxu0 %v9010_v57  ;;  %v9032_v57 = vld [vmem:[%s11791_s1 + $0xa28] sm:$0xff]  }
 0x1f6   : > { %8429 = vmatpush3.bf16.msra.mxu1 %v9017_v62  ;;  %v9031_v62 = vld [vmem:[%s11791_s1 + $0xad0] sm:$0xff]   ;;  %v9076_v52 = vld [vmem:[%s11791_s1 + $0xba8] sm:$0xff]  }
 0x1f7   : > { %8430 = vmatprep.subr.bf16.mxu1 %v9019_v26 }
 0x1f8   : > { %8409 = vmatpush3.bf16.msra.mxu0 %v9012_v41 }
 0x1f9   : > { %8410 = vmatprep.subr.bf16.mxu0 %v9014_v40  ;;  %6475 = vmatmul.mubr.bf16.gmra.mrb[76].mxu1 %v5506_v44  ;;  %v9033_v44 = vld [vmem:[%s11791_s1 + $0xa90] sm:$0xff]  }
 0x1fa   : > { %v8036_v56 = vpop.f32.mrb[20].mxu1  ;;  %8431 = vmatpush3.bf16.msra.mxu1 %v9021_v63  ;;  %6564 = vmatprep.mubr.bf16.mxu1 %v5473_v42  ;;  %v5063_v63 = vld [vmem:[#allocation2 + $0x30] sm:$0xfc]  ;;  %v5477_v42 = vrot.slane %v5100_v1, 1 }
 0x1fb   : > { %v8037_v49 = vpop.f32.mrb[21].mxu1  ;;  %8432 = vmatprep.subr.bf16.mxu1 %v9022_v32  ;;  %v5081_v32 = vld [vmem:[#allocation2 + $0x258] sm:$0x3] }
 0x1fc   : > { %v8038_v25 = vadd.f32 %v8037_v49, %v8036_v56  ;;  %8411 = vmatpush3.bf16.msra.mxu0 %v9016_v22  ;;  %v8039_v0 = vpop.f32.mrb[22].mxu1  ;;  %v9038_v22 = vld [vmem:[%s11791_s1 + $0xa78] sm:$0xff]   ;;  %v5510_v56 = vsel %vm5449_vm11, %v5463_v27, %v5509_v47  ;;  %v5097_v49 = vpack.c.bf16 %v9137_v28, %v5063_v63  ;;  %v9051_v47 = vld [vmem:[%s11791_s1 + $0xb50] sm:$0xff]  }
 0x1fd   : > { %v8040_v33 = vpop.f32.mrb[23].mxu1  ;;  %8412 = vmatprep.subr.bf16.mxu0 %v9018_v20  ;;  %v9054_v63 = vld [vmem:[%s11791_s1 + $0xb58] sm:$0xff]  }
 0x1fe   : > { %v11439_v45 = vadd.f32 %v8038_v25, %v11357_v29  ;;  %v8041_v10 = vadd.f32 %v8040_v33, %v8039_v0  ;;  %8433 = vmatpush3.bf16.msra.mxu1 %v9024_v43  ;;  %v5462_v29 = vrot.slane %v5095_v30, 1  ;;  %v9040_v43 = vld [vmem:[%s11791_s1 + $0xa38] sm:$0xff]   ;;  %v5469_v25 = vrot.slane %v10328_v17, 1  ;;  %v9039_v0 = vld [vmem:[%s11791_s1 + $0xae0] sm:$0xff]   ;;  %v9047_v17 = vld [vmem:[%s11791_s1 + $0xb48] sm:$0xff]  }
 0x1ff   : > { %8434 = vmatprep.subr.bf16.mxu1 %v9026_v16  ;;  %v9037_v16 = vld [vmem:[%s11791_s1 + $0xa98] sm:$0xff]   ;;  %v5468_v33 = vrot.slane %v5097_v49, 1  ;;  %v9058_v49 = vld [vmem:[%s11791_s1 + $0xb60] sm:$0xff]  }
 0x200   : > { %v11449_v13 = vadd.f32 %v8041_v10, %v11367_v2  ;;  %8413 = vmatpush3.bf16.msra.mxu0 %v9020_v54  ;;  %v5464_v18 = vsel %vm5449_vm11, %v5462_v29, %v5463_v27  ;;  %v9029_v2 = vld [vmem:[%s11791_s1 + $0xa88] sm:$0xff]   ;;  %v5068_v29 = vld [vmem:[#allocation2 + $0x58] sm:$0xfc] }
 0x201   : > { %8454 = vmatprep.subr.bf16.mxu0 %v9023_v6  ;;  %v9045_v6 = vld [vmem:[%s11791_s1 + $0xb00] sm:$0xff]   ;;  %v5470_v38 = vsel %vm5449_vm11, %v5468_v33, %v5469_v25  ;;  %v9062_v33 = vld [vmem:[%s11791_s1 + $0xb68] sm:$0xff]  }
 0x202   : > { %8435 = vmatpush3.bf16.msra.mxu1 %v9028_v36  ;;  %v8086_v34 = vpop.f32.mrb[24].mxu1 }
 0x203   : > { %6516 = vmatmul.mubr.bf16.vlgmr.msra.gmra.mrb[68].mxu0 %v5464_v18  ;;  %8436 = vmatprep.subr.bf16.mxu1 %v9030_v5  ;;  %v8087_v26 = vpop.f32.mrb[25].mxu1  ;;  %v5114_v5 = vpack.c.bf16 %v5080_v15, %v5080_v15 }
 0x204   : > { %6523 = vmatprep.mubr.bf16.mxu0 %v5512_v24  ;;  %8455 = vmatpush3.bf16.msra.mxu0 %v9025_v35  ;;  %v8088_v61 = vadd.f32 %v8087_v26, %v8086_v34  ;;  %v8089_v41 = vpop.f32.mrb[26].mxu1 }
 0x205   : > { %8456 = vmatprep.subr.bf16.mxu0 %v9027_v46  ;;  %v8090_v40 = vpop.f32.mrb[27].mxu1  ;;  %v9042_v46 = vld [vmem:[%s11791_s1 + $0xae8] sm:$0xff]  }
 0x206   : > { %v11481_v20 = vadd.f32 %v8088_v61, %v11392_v11  ;;  %8437 = vmatpush3.bf16.msra.mxu1 %v9032_v57  ;;  %v8091_v55 = vadd.f32 %v8090_v40, %v8089_v41  ;;  %v5115_v11 = vpack.c.bf16 %v5081_v32, %v5081_v32  ;;  %v5513_v61 = vrot.slane %v5114_v5, 1  ;;  %v9048_v32 = vld [vmem:[%s11791_s1 + $0xab0] sm:$0xff]  }
 0x207   : > { %8438 = vmatprep.subr.bf16.mxu1 %v9034_v4  ;;  %v9044_v4 = vld [vmem:[%s11791_s1 + $0xaa8] sm:$0xff]  }
 0x208   : > { %8457 = vmatpush3.bf16.msra.mxu0 %v9029_v2  ;;  %v11487_v14 = vadd.f32 %v8091_v55, %v11404_v37  ;;  %v5479_v37 = vsel %vm5449_vm11, %v5477_v42, %v5478_v58  ;;  %v5515_v54 = vrot.slane %v5115_v11, 1  ;;  %v5083_v42 = vld [vmem:[#allocation2 + $0x268] sm:$0x3] }
 0x209   : > { %8458 = vmatprep.subr.bf16.mxu0 %v9031_v62  ;;  %v9138_v62 = vld [vmem:[#allocation2 + $0xe0] sm:$0xff]  ;;  %v5117_v28 = vpack.c.bf16 %v5083_v42, %v5083_v42  ;;  %v9069_v42 = vld [vmem:[%s11791_s1 + $0xb98] sm:$0xff]  }
 0x20a   : > { %8439 = vmatpush3.bf16.msra.mxu1 %v9036_v31  ;;  %v5516_v18 = vsel %vm5449_vm11, %v5472_v23, %v5515_v54  ;;  %v5102_v39 = vpack.c.bf16 %v9138_v62, %v5068_v29  ;;  %v9046_v31 = vld [vmem:[%s11791_s1 + $0xaf0] sm:$0xff]   ;;  %v9060_v54 = vld [vmem:[%s11791_s1 + $0xb20] sm:$0xff]  }
 0x20b   : > { %6524 = vmatmul.mubr.bf16.gmra.mrb[72].mxu0 %v5510_v56  ;;  %8440 = vmatprep.subr.bf16.mxu1 %v9038_v22  ;;  %v5065_v56 = vld [vmem:[#allocation2 + $0x40] sm:$0xfc]  ;;  %v5519_v15 = vrot.slane %v5117_v28, 1  ;;  %v9066_v29 = vld [vmem:[%s11791_s1 + $0xb70] sm:$0xff]  }
 0x20c   : > { %8459 = vmatpush3.bf16.msra.mxu0 %v9033_v44  ;;  %6613 = vmatprep.mubr.bf16.mxu0 %v5479_v37  ;;  %v5483_v22 = vrot.slane %v5102_v39, 1  ;;  %v5514_v44 = vsel %vm5449_vm11, %v5469_v25, %v5513_v61  ;;  %v9052_v37 = vld [vmem:[%s11791_s1 + $0xab8] sm:$0xff]   ;;  %v9055_v25 = vld [vmem:[%s11791_s1 + $0xbc0] sm:$0xff]   ;;  %v5490_v39 = vrot.slane %v10632_v48, 1  ;;  %v9144_v48 = vld [vmem:[#allocation2 + $0x108] sm:$0xff] }
 0x20d   : > { %8460 = vmatprep.subr.bf16.mxu0 %v9035_v59  ;;  %v9050_v59 = vld [vmem:[%s11791_s1 + $0xaf8] sm:$0xff]  }
 0x20e   : > { %v8064_v30 = vpop.f32.mrb[28].mxu0  ;;  %8441 = vmatpush3.bf16.msra.mxu1 %v9040_v43  ;;  %v5485_v11 = vsel %vm5449_vm11, %v5483_v22, %v5484_v50  ;;  %v9056_v43 = vld [vmem:[%s11791_s1 + $0xb18] sm:$0xff]  }
 0x20f   : > { %v8065_v10 = vpop.f32.mrb[29].mxu0  ;;  %8482 = vmatprep.subr.bf16.mxu1 %v9043_v7  ;;  %v9139_v7 = vld [vmem:[#allocation2 + $0xc8] sm:$0xff]  ;;  %v9141_v22 = vld [vmem:[#allocation2 + $0xd8] sm:$0xff] }
 0x210   : > { %v8066_v27 = vadd.f32 %v8065_v10, %v8064_v30  ;;  %8461 = vmatpush3.bf16.msra.mxu0 %v9037_v16  ;;  %v8067_v36 = vpop.f32.mrb[30].mxu0  ;;  %v5099_v16 = vpack.c.bf16 %v9139_v7, %v5065_v56  ;;  %v5082_v30 = vld [vmem:[#allocation2 + $0x260] sm:$0x3] }
 0x211   : > { %v8068_v35 = vpop.f32.mrb[31].mxu0  ;;  %8462 = vmatprep.subr.bf16.mxu0 %v9039_v0  ;;  %6565 = vmatmul.mubr.bf16.vlgmr.msra.gmra.mrb[80].mxu1 %v5470_v38  ;;  %v5475_v0 = vrot.slane %v10435_v9, 1  ;;  %v9057_v10 = vld [vmem:[%s11791_s1 + $0xb80] sm:$0xff]   ;;  %v9059_v9 = vld [vmem:[%s11791_s1 + $0xbc8] sm:$0xff]   ;;  %v5520_v38 = vsel %vm5449_vm11, %v5478_v58, %v5519_v15 }
 0x212   : > { %v3696_v2 = vadd.f32 %v8066_v27, %v11439_v45  ;;  %v8069_v34 = vadd.f32 %v8068_v35, %v8067_v36  ;;  %v8092_v57 = vpop.f32.mrb[28].mxu1  ;;  %6572 = vmatprep.mubr.bf16.mxu1 %v5516_v18  ;;  %8483 = vmatpush3.bf16.msra.mxu1 %v9045_v6  ;;  %v5474_v6 = vrot.slane %v5099_v16, 1  ;;  %v5116_v27 = vpack.c.bf16 %v5082_v30, %v5082_v30  ;;  %v9064_v36 = vld [vmem:[%s11791_s1 + $0xb28] sm:$0xff]   ;;  %v9073_v15 = vld [vmem:[%s11791_s1 + $0xba0] sm:$0xff]  }
 0x213   : > { %v8093_v24 = vpop.f32.mrb[29].mxu1  ;;  %8484 = vmatprep.subr.bf16.mxu1 %v9047_v17  ;;  %v9061_v35 = vld [vmem:[%s11791_s1 + $0xb88] sm:$0xff]  }
 0x214   : > { %v3699_v23 = vadd.f32 %v8069_v34, %v11449_v13  ;;  %v8094_v26 = vadd.f32 %v8093_v24, %v8092_v57  ;;  %8463 = vmatpush3.bf16.msra.mxu0 %v9041_v19  ;;  %v8095_v45 = vpop.f32.mrb[30].mxu1  ;;  %v9053_v13 = vld [vmem:[%s11791_s1 + $0xb10] sm:$0xff]   ;;  %v5476_v17 = vsel %vm5449_vm11, %v5474_v6, %v5475_v0  ;;  %v5070_v19 = vld [vmem:[#allocation2 + $0x68] sm:$0xfc]  ;;  %v5517_v57 = vrot.slane %v5116_v27, 1 }
 0x215   : > { %v8096_v41 = vpop.f32.mrb[31].mxu1  ;;  %8464 = vmatprep.subr.bf16.mxu0 %v9042_v46  ;;  %v9068_v24 = vld [vmem:[%s11791_s1 + $0xb30] sm:$0xff]   ;;  %v5072_v6 = vld [vmem:[#allocation2 + $0x78] sm:$0xfc]  ;;  %v9081_v27 = vld [vmem:[%s11791_s1 + $0xc08] sm:$0xff]  }
 0x216   : > { %v11540_v1 = vadd.f32 %v8094_v26, %v3696_v2  ;;  %v8097_v40 = vadd.f32 %v8096_v41, %v8095_v45  ;;  %8485 = vmatpush3.bf16.msra.mxu1 %v9049_v8  ;;  %v9140_v2 = vld [vmem:[#allocation2 + $0xf0] sm:$0xff]  ;;  %v9070_v26 = vld [vmem:[%s11791_s1 + $0xb78] sm:$0xff]  }
 0x217   : > { %8486 = vmatprep.subr.bf16.mxu1 %v9051_v47  ;;  %v5104_v34 = vpack.c.bf16 %v9140_v2, %v5070_v19  ;;  %v5085_v47 = vld [vmem:[#allocation2 + $0x278] sm:$0x3]  ;;  %v5067_v45 = vld [vmem:[#allocation2 + $0x50] sm:$0xfc] }
 0x218   : > { %v11548_v55 = vadd.f32 %v8097_v40, %v3699_v23  ;;  %8465 = vmatpush3.bf16.msra.mxu0 %v9044_v4  ;;  %v9065_v4 = vld [vmem:[%s11791_s1 + $0xb90] sm:$0xff]   ;;  %v5518_v40 = vsel %vm5449_vm11, %v5475_v0, %v5517_v57 }
 0x219   : > { %8466 = vmatprep.subr.bf16.mxu0 %v9046_v31  ;;  %6573 = vmatmul.mubr.bf16.gmra.mrb[84].mxu1 %v5514_v44  ;;  %v5489_v61 = vrot.slane %v5104_v34, 1  ;;  %v5119_v31 = vpack.c.bf16 %v5085_v47, %v5085_v47  ;;  %v9075_v44 = vld [vmem:[%s11791_s1 + $0xc40] sm:$0xff]   ;;  %v9080_v57 = vld [vmem:[%s11791_s1 + $0xbb0] sm:$0xff]  }
 0x21a   : > { %8487 = vmatpush3.bf16.msra.mxu1 %v9053_v13  ;;  %6662 = vmatprep.mubr.bf16.mxu1 %v5485_v11  ;;  %v9072_v13 = vld [vmem:[%s11791_s1 + $0xb38] sm:$0xff]   ;;  %v5481_v11 = vrot.slane %v10533_v53, 1 }
 0x21b   : > { %8488 = vmatprep.subr.bf16.mxu1 %v9054_v63  ;;  %v5101_v63 = vpack.c.bf16 %v9141_v22, %v5067_v45  ;;  %v5069_v45 = vld [vmem:[#allocation2 + $0x60] sm:$0xfc]  ;;  %v9143_v22 = vld [vmem:[#allocation2 + $0xe8] sm:$0xff] }
 0x21c   : > { %8467 = vmatpush3.bf16.msra.mxu0 %v9048_v32 }
 0x21d   : > { %8468 = vmatprep.subr.bf16.mxu0 %v9050_v59  ;;  %v5480_v16 = vrot.slane %v5101_v63, 1  ;;  %v5103_v63 = vpack.c.bf16 %v9143_v22, %v5069_v45  ;;  %v9099_v45 = vld [vmem:[%s11791_s1 + $0xca0] sm:$0xff]  }
 0x21e   : > { %8489 = vmatpush3.bf16.msra.mxu1 %v9056_v43  ;;  %v9071_v43 = vld [vmem:[%s11791_s1 + $0xbe0] sm:$0xff]  }
 0x21f   : > { %8490 = vmatprep.subr.bf16.mxu1 %v9058_v49  ;;  %v5523_v49 = vrot.slane %v5119_v31, 1  ;;  %v5482_v30 = vsel %vm5449_vm11, %v5480_v16, %v5481_v11 }
 0x220   : > { %8469 = vmatpush3.bf16.msra.mxu0 %v9052_v37  ;;  %v5084_v37 = vld [vmem:[#allocation2 + $0x270] sm:$0x3] }
 0x221   : > { %8510 = vmatprep.subr.bf16.mxu0 %v9055_v25  ;;  %v9077_v25 = vld [vmem:[%s11791_s1 + $0xc00] sm:$0xff]  }
 0x222   : > { %8491 = vmatpush3.bf16.msra.mxu1 %v9060_v54  ;;  %v9079_v54 = vld [vmem:[%s11791_s1 + $0xc48] sm:$0xff]  }
 0x223   : > { %6614 = vmatmul.mubr.bf16.vlgmr.msra.gmra.mrb[76].mxu0 %v5476_v17  ;;  %v8124_v5 = vpop.f32.mrb[32].mxu1  ;;  %8492 = vmatprep.subr.bf16.mxu1 %v9062_v33  ;;  %v5118_v33 = vpack.c.bf16 %v5084_v37, %v5084_v37  ;;  %v7869_v17 = vld [vmem:[#allocation3] ss:$0 sm:$0xff] }
 0x224   : > { %6621 = vmatprep.mubr.bf16.mxu0 %v5520_v38  ;;  %8511 = vmatpush3.bf16.msra.mxu0 %v9057_v10  ;;  %v8125_v46 = vpop.f32.mrb[33].mxu1  ;;  %v9156_v38 = vmov 0  }
 0x225   : > { %8512 = vmatprep.subr.bf16.mxu0 %v9059_v9  ;;  %v8126_v18 = vadd.f32 %v8125_v46, %v8124_v5  ;;  %v8127_v58 = vpop.f32.mrb[34].mxu1  ;;  %v5524_v9 = vsel %vm5449_vm11, %v5484_v50, %v5523_v49  ;;  %8695 = vset.pattern.permute.xlu0 %v9156_v38  ;;  %v5521_v50 = vrot.slane %v5118_v33, 1  ;;  %v9078_v5 = vld [vmem:[%s11791_s1 + $0xbf0] sm:$0xff]   ;;  %v5486_v49 = vrot.slane %v5103_v63, 1 }
 0x226   : > { %8493 = vmatpush3.bf16.msra.mxu1 %v9064_v36  ;;  %v8128_v8 = vpop.f32.mrb[35].mxu1  ;;  %v9142_v36 = vld [vmem:[#allocation2 + $0x100] sm:$0xff]  ;;  %6837 = vperm.xlu0 %8695, %v7869_v17   ;;  %v9085_v46 = vld [vmem:[%s11791_s1 + $0xc10] sm:$0xff]  }
 0x227   : > { %v11605_v62 = vadd.f32 %v8126_v18, %v11481_v20  ;;  %v8129_v23 = vadd.f32 %v8128_v8, %v8127_v58  ;;  %8494 = vmatprep.subr.bf16.mxu1 %v9066_v29  ;;  %v9067_v20 = vld [vmem:[%s11791_s1 + $0xbd8] sm:$0xff]   ;;  %v5106_v19 = vpack.c.bf16 %v9142_v36, %v5072_v6  ;;  %v5496_v29 = vrot.slane %v10711_v51, 1  ;;  %v5073_v6 = vld [vmem:[#allocation2 + $0x80] sm:$0xfc] }
 0x228   : > { %8513 = vmatpush3.bf16.msra.mxu0 %v9061_v35  ;;  %v9086_v58 = vld [vmem:[%s11791_s1 + $0xc58] sm:$0xff]   ;;  %v5522_v8 = vsel %vm5449_vm11, %v5481_v11, %v5521_v50  ;;  %v5086_v11 = vld [vmem:[#allocation2 + $0x280] sm:$0x3]  ;;  %v5107_v17 = vpack.c.bf16 %v9144_v48, %v5073_v6  ;;  %v5071_v50 = vld [vmem:[#allocation2 + $0x70] sm:$0xfc] }
 0x229   : > { %8514 = vmatprep.subr.bf16.mxu0 %v9063_v12  ;;  %v11615_v41 = vadd.f32 %v8129_v23, %v11487_v14  ;;  %v5491_v14 = vsel %vm5449_vm11, %v5489_v61, %v5490_v39  ;;  %v5495_v12 = vrot.slane %v5106_v19, 1  ;;  %v9082_v23 = vld [vmem:[%s11791_s1 + $0xbf8] sm:$0xff]   ;;  %v5499_v19 = vrot.slane %v10743_v21, 1 }
 0x22a   : > { %8495 = vmatpush3.bf16.msra.mxu1 %v9068_v24  ;;  %v5087_v24 = vld [vmem:[#allocation2 + $0x288] sm:$0x3]  ;;  %v5089_v36 = vld [vmem:[#allocation2 + $0x298] sm:$0x3] }
 0x22b   : > { %6622 = vmatmul.mubr.bf16.gmra.mrb[80].mxu0 %v5518_v40  ;;  %v8130_v32 = vpop.f32.mrb[36].mxu1  ;;  %8496 = vmatprep.subr.bf16.mxu1 %v9070_v26  ;;  %v5497_v26 = vsel %vm5449_vm11, %v5495_v12, %v5496_v29  ;;  %v5121_v31 = vpack.c.bf16 %v5087_v24, %v5087_v24  ;;  %v9089_v40 = vld [vmem:[%s11791_s1 + $0xc60] sm:$0xff]   ;;  %v5123_v12 = vpack.c.bf16 %v5089_v36, %v5089_v36 }
 0x22c   : > { %8515 = vmatpush3.bf16.msra.mxu0 %v9065_v4  ;;  %6711 = vmatprep.mubr.bf16.mxu0 %v5491_v14  ;;  %v8131_v59 = vpop.f32.mrb[37].mxu1  ;;  %v9087_v14 = vld [vmem:[%s11791_s1 + $0xc80] sm:$0xff]  }
 0x22d   : > { %8516 = vmatprep.subr.bf16.mxu0 %v9067_v20  ;;  %v8132_v56 = vadd.f32 %v8131_v59, %v8130_v32  ;;  %v8133_v28 = vpop.f32.mrb[38].mxu1  ;;  %v9088_v20 = vld [vmem:[%s11791_s1 + $0xc18] sm:$0xff]   ;;  %v5527_v59 = vrot.slane %v5121_v31, 1 }
 0x22e   : > { %8497 = vmatpush3.bf16.msra.mxu1 %v9072_v13  ;;  %v8134_v7 = vpop.f32.mrb[39].mxu1 }
 0x22f   : > { %v11641_v0 = vadd.f32 %v8132_v56, %v11540_v1  ;;  %v8135_v53 = vadd.f32 %v8134_v7, %v8133_v28  ;;  %8538 = vmatprep.subr.bf16.mxu1 %v9075_v44  ;;  %v9074_v1 = vld [vmem:[%s11791_s1 + $0xbe8] sm:$0xff]   ;;  %v5487_v44 = vrot.slane %v10634_v3, 1 }
 0x230   : > { %8517 = vmatpush3.bf16.msra.mxu0 %v9069_v42  ;;  %v9092_v56 = vld [vmem:[%s11791_s1 + $0xc68] sm:$0xff]  }
 0x231   : > { %8518 = vmatprep.subr.bf16.mxu0 %v9071_v43  ;;  %v11651_v10 = vadd.f32 %v8135_v53, %v11548_v55  ;;  %6663 = vmatmul.mubr.bf16.vlgmr.msra.gmra.mrb[88].mxu1 %v5482_v30  ;;  %v9083_v55 = vld [vmem:[%s11791_s1 + $0xc50] sm:$0xff]   ;;  %v9090_v3 = vld [vmem:[%s11791_s1 + $0xc88] sm:$0xff]   ;;  %v5120_v53 = vpack.c.bf16 %v5086_v11, %v5086_v11 }
 0x232   : > { %6670 = vmatprep.mubr.bf16.mxu1 %v5524_v9  ;;  %8539 = vmatpush3.bf16.msra.mxu1 %v9077_v25  ;;  %v5488_v25 = vsel %vm5449_vm11, %v5486_v49, %v5487_v44  ;;  %v9095_v30 = vld [vmem:[%s11791_s1 + $0xc70] sm:$0xff]  }
 0x233   : > { %8540 = vmatprep.subr.bf16.mxu1 %v9079_v54  ;;  %v9094_v54 = vld [vmem:[%s11791_s1 + $0xc28] sm:$0xff]   ;;  %v9093_v9 = vld [vmem:[%s11791_s1 + $0xc90] sm:$0xff]  }
 0x234   : > { %8519 = vmatpush3.bf16.msra.mxu0 %v9073_v15  ;;  %v5528_v15 = vsel %vm5449_vm11, %v5490_v39, %v5527_v59 }
 0x235   : > { %8520 = vmatprep.subr.bf16.mxu0 %v9074_v1 }
 0x236   : > { %v8152_v35 = vpop.f32.mrb[36].mxu0  ;;  %8541 = vmatpush3.bf16.msra.mxu1 %v9081_v27  ;;  %v5525_v27 = vrot.slane %v5120_v53, 1 }
 0x237   : > { %v8153_v18 = vpop.f32.mrb[37].mxu0  ;;  %8542 = vmatprep.subr.bf16.mxu1 %v9083_v55 }
 0x238   : > { %v8154_v2 = vadd.f32 %v8153_v18, %v8152_v35  ;;  %v8155_v34 = vpop.f32.mrb[38].mxu0  ;;  %8521 = vmatpush3.bf16.msra.mxu0 %v9076_v52  ;;  %v9098_v52 = vld [vmem:[%s11791_s1 + $0xc78] sm:$0xff]  }
 0x239   : > { %v8156_v47 = vpop.f32.mrb[39].mxu0  ;;  %8522 = vmatprep.subr.bf16.mxu0 %v9078_v5  ;;  %6671 = vmatmul.mubr.bf16.gmra.mrb[92].mxu1 %v5522_v8  ;;  %v9096_v18 = vld [vmem:[%s11791_s1 + $0xc98] sm:$0xff]  }
 0x23a   : > { %v11689_v4 = vadd.f32 %v11605_v62, %v8154_v2  ;;  %v8157_v61 = vadd.f32 %v8156_v47, %v8155_v34  ;;  %8543 = vmatpush3.bf16.msra.mxu1 %v9085_v46  ;;  %6760 = vmatprep.mubr.bf16.mxu1 %v5497_v26  ;;  %v9084_v62 = vld [vmem:[%s11791_s1 + $0xbb8] sm:$0xff]   ;;  %v5498_v46 = vrot.slane %v5107_v17, 1 }
 0x23b   : > { %8544 = vmatprep.subr.bf16.mxu1 %v9086_v58  ;;  %v5526_v58 = vsel %vm5449_vm11, %v5487_v44, %v5525_v27  ;;  %v9100_v34 = vld [vmem:[%s11791_s1 + $0xc38] sm:$0xff]  }
 0x23c   : > { %v11698_v13 = vadd.f32 %v11615_v41, %v8157_v61  ;;  %8523 = vmatpush3.bf16.msra.mxu0 %v9080_v57  ;;  %v9091_v41 = vld [vmem:[%s11791_s1 + $0xc20] sm:$0xff]   ;;  %v9145_v57 = vld [vmem:[#allocation2 + $0xf8] sm:$0xff]  ;;  %v5500_v24 = vsel %vm5449_vm11, %v5498_v46, %v5499_v19  ;;  %v5088_v61 = vld [vmem:[#allocation2 + $0x290] sm:$0x3] }
 0x23d   : > { %8524 = vmatprep.subr.bf16.mxu0 %v9082_v23  ;;  %v5105_v8 = vpack.c.bf16 %v9145_v57, %v5071_v50  ;;  %v5493_v23 = vrot.slane %v10713_v60, 1  ;;  %v9101_v60 = vld [vmem:[%s11791_s1 + $0xca8] sm:$0xff]  }
 0x23e   : > { %v8158_v32 = vpop.f32.mrb[40].mxu0  ;;  %8545 = vmatpush3.bf16.msra.mxu1 %v9088_v20 }
 0x23f   : > { %v8159_v42 = vpop.f32.mrb[41].mxu0  ;;  %8546 = vmatprep.subr.bf16.mxu1 %v9089_v40  ;;  %v5492_v40 = vrot.slane %v5105_v8, 1 }
 0x240   : > { %v8160_v43 = vadd.f32 %v8159_v42, %v8158_v32  ;;  %v8161_v28 = vpop.f32.mrb[42].mxu0  ;;  %8525 = vmatpush3.bf16.msra.mxu0 %v9084_v62  ;;  %v9102_v42 = vld [vmem:[%s11791_s1 + $0xcb0] sm:$0xff]  }
 0x241   : > { %v8162_v37 = vpop.f32.mrb[43].mxu0  ;;  %8616 = vmatprep.subr.bf16.mxu0 %v9087_v14  ;;  %v5494_v63 = vsel %vm5449_vm11, %v5492_v40, %v5493_v23 }
 0x242   : > { %v8637_v7 = vadd.f32 %v11641_v0, %v8160_v43  ;;  %v8163_v16 = vadd.f32 %v8162_v37, %v8161_v28  ;;  %8547 = vmatpush3.bf16.msra.mxu1 %v9091_v41 }
 0x243   : > { %6712 = vmatmul.mubr.bf16.vlgmr.msra.gmra.mrb[84].mxu0 %v5488_v25  ;;  %8548 = vmatprep.subr.bf16.mxu1 %v9092_v56  ;;  %v5090_v56 = vld [vmem:[#allocation2 + $0x2a0] sm:$0x3] }
 0x244   : > { %v8657_v0 = vadd.f32 %v11651_v10, %v8163_v16  ;;  %6719 = vmatprep.mubr.bf16.mxu0 %v5528_v15  ;;  %8617 = vmatpush3.bf16.msra.mxu0 %v9087_v14  ;;  %v8180_v33 = vpop.f32.mrb[40].mxu1  ;;  %v9097_v10 = vld [vmem:[%s11791_s1 + $0xc30] sm:$0xff]   ;;  %v5122_v14 = vpack.c.bf16 %v5088_v61, %v5088_v61 }
 0x245   : > { %8618 = vmatprep.subr.bf16.mxu0 %v9090_v3  ;;  %v8181_v1 = vpop.f32.mrb[41].mxu1 }
 0x246   : > { %v8182_v39 = vadd.f32 %v8181_v1, %v8180_v33  ;;  %v8183_v55 = vpop.f32.mrb[42].mxu1  ;;  %8549 = vmatpush3.bf16.msra.mxu1 %v9094_v54  ;;  %v5529_v41 = vrot.slane %v5122_v14, 1 }
 0x247   : > { %v8184_v38 = vpop.f32.mrb[43].mxu1  ;;  %8550 = vmatprep.subr.bf16.mxu1 %v9095_v30 }
 0x248   : > { %8619 = vmatpush3.bf16.msra.mxu0 %v9090_v3  ;;  %v8648_v5 = vadd.f32 %v11689_v4, %v8182_v39  ;;  %v8185_v35 = vadd.f32 %v8184_v38, %v8183_v55  ;;  %v5531_v4 = vrot.slane %v5123_v12, 1  ;;  %v5530_v49 = vsel %vm5449_vm11, %v5493_v23, %v5529_v41 }
 0x249   : > { %8620 = vmatprep.subr.bf16.mxu0 %v9093_v9 }
 0x24a   : > { %v8668_v2 = vadd.f32 %v11698_v13, %v8185_v35  ;;  %8551 = vmatpush3.bf16.msra.mxu1 %v9097_v10  ;;  %v5532_v32 = vsel %vm5449_vm11, %v5496_v29, %v5531_v4  ;;  %v9103_v29 = vld [vmem:[%s11791_s1 + $0xcb8] sm:$0xff]  }
 0x24b   : > { %6720 = vmatmul.mubr.bf16.gmra.mrb[88].mxu0 %v5526_v58  ;;  %8552 = vmatprep.subr.bf16.mxu1 %v9098_v52 }
 0x24c   : > { %8621 = vmatpush3.bf16.msra.mxu0 %v9093_v9  ;;  %8632 = vmatprep.mubr.bf16.mxu0 %v5500_v24  ;;  %v8186_v47 = vpop.f32.mrb[44].mxu1 }
 0x24d   : > { %8622 = vmatprep.subr.bf16.mxu0 %v9096_v18  ;;  %v8187_v26 = vpop.f32.mrb[45].mxu1 }
 0x24e   : > { %v8188_v20 = vadd.f32 %v8187_v26, %v8186_v47  ;;  %v8189_v31 = vpop.f32.mrb[46].mxu1  ;;  %8553 = vmatpush3.bf16.msra.mxu1 %v9100_v34 }
 0x24f   : > { %v8190_v13 = vpop.f32.mrb[47].mxu1 }
 0x250   : > { %8623 = vmatpush3.bf16.msra.mxu0 %v9096_v18  ;;  %v8638_v62 = vadd.f32 %v8637_v7, %v8188_v20  ;;  %v8191_v22 = vadd.f32 %v8190_v13, %v8189_v31  ;;  %v5124_v7 = vpack.c.bf16 %v5090_v56, %v5090_v56 }
 0x251   : > { %8624 = vmatprep.subr.bf16.mxu0 %v9099_v45  ;;  %6761 = vmatmul.mubr.bf16.vlgmr.msra.gmra.mrb[96].mxu1 %v5494_v63 }
 0x252   : > { %v8658_v44 = vadd.f32 %v8657_v0, %v8191_v22  ;;  %6768 = vmatprep.mubr.bf16.mxu1 %v5532_v32  ;;  %v5533_v53 = vrot.slane %v5124_v7, 1 }
 0x254   : > { %8625 = vmatpush3.bf16.msra.mxu0 %v9099_v45  ;;  %v5534_v1 = vsel %vm5449_vm11, %v5499_v19, %v5533_v53 }
 0x255   : > { %8626 = vmatprep.subr.bf16.mxu0 %v9101_v60 }
 0x256   : > { %v8208_v59 = vpop.f32.mrb[44].mxu0 }
 0x257   : > { %v8209_v11 = vpop.f32.mrb[45].mxu0 }
 0x258   : > { %v8210_v43 = vadd.f32 %v8209_v11, %v8208_v59  ;;  %v8211_v28 = vpop.f32.mrb[46].mxu0  ;;  %8627 = vmatpush3.bf16.msra.mxu0 %v9101_v60 }
 0x259   : > { %v8212_v51 = vpop.f32.mrb[47].mxu0  ;;  %8628 = vmatprep.subr.bf16.mxu0 %v9102_v42  ;;  %6769 = vmatmul.mubr.bf16.gmra.mrb[100].mxu1 %v5530_v49 }
 0x25a   : > { %v8649_v37 = vadd.f32 %v8648_v5, %v8210_v43  ;;  %v8213_v3 = vadd.f32 %v8212_v51, %v8211_v28 }
 0x25c   : > { %v8669_v16 = vadd.f32 %v8668_v2, %v8213_v3  ;;  %8629 = vmatpush3.bf16.msra.mxu0 %v9102_v42 }
 0x25d   : > { %8630 = vmatprep.subr.bf16.mxu0 %v9103_v29 }
 0x25e   : > { %v8214_v25 = vpop.f32.mrb[48].mxu0 }
 0x25f   : > { %v8215_v54 = vpop.f32.mrb[49].mxu0 }
 0x260   : > { %v8216_v15 = vadd.f32 %v8215_v54, %v8214_v25  ;;  %v8217_v30 = vpop.f32.mrb[50].mxu0  ;;  %8631 = vmatpush3.bf16.msra.mxu0 %v9103_v29 }
 0x261   : > { %v8218_v0 = vpop.f32.mrb[51].mxu0 }
 0x262   : > { %v8639_v33 = vadd.f32 %v8638_v62, %v8216_v15  ;;  %v8219_v6 = vadd.f32 %v8218_v0, %v8217_v30 }
 0x263   : > { %8633 = vmatmul.mubr.bf16.vlgmr.msra.gmra.mrb[32].mxu0 %v5534_v1 }
 0x264   : > { %v8659_v9 = vadd.f32 %v8658_v44, %v8219_v6  ;;  %v8236_v48 = vpop.f32.mrb[48].mxu1 }
 0x265   : > { %v8237_v17 = vpop.f32.mrb[49].mxu1 }
 0x266   : > { %v8238_v39 = vadd.f32 %v8237_v17, %v8236_v48  ;;  %v8239_v27 = vpop.f32.mrb[50].mxu1 }
 0x267   : > { %v8240_v55 = vpop.f32.mrb[51].mxu1 }
 0x268   : > { %v8650_v10 = vadd.f32 %v8649_v37, %v8238_v39  ;;  %v8241_v36 = vadd.f32 %v8240_v55, %v8239_v27 }
 0x26a   : > { %v8670_v38 = vadd.f32 %v8669_v16, %v8241_v36 }
 0x26c   : > { %v8242_v52 = vpop.f32.mrb[52].mxu1 }
 0x26d   : > { %v8243_v50 = vpop.f32.mrb[53].mxu1 }
 0x26e   : > { %v8244_v5 = vadd.f32 %v8243_v50, %v8242_v52  ;;  %v8245_v35 = vpop.f32.mrb[54].mxu1 }
 0x26f   : > { %v8246_v46 = vpop.f32.mrb[55].mxu1 }
 0x270   : > { %v8640_v18 = vadd.f32 %v8639_v33, %v8244_v5  ;;  %v8247_v12 = vadd.f32 %v8246_v46, %v8245_v35 }
 0x272   : > { %v8660_v21 = vadd.f32 %v8659_v9, %v8247_v12 }
 0x276   : > { %v8264_v58 = vpop.f32.mrb[52].mxu0 }
 0x277   : > { %v8265_v19 = vpop.f32.mrb[53].mxu0 }
 0x278   : > { %v8266_v2 = vadd.f32 %v8265_v19, %v8264_v58  ;;  %v8267_v34 = vpop.f32.mrb[54].mxu0 }
 0x279   : > { %v8268_v57 = vpop.f32.mrb[55].mxu0 }
 0x27a   : > { %v8651_v8 = vadd.f32 %v8650_v10, %v8266_v2  ;;  %v8269_v24 = vadd.f32 %v8268_v57, %v8267_v34 }
 0x27c   : > { %v8671_v47 = vadd.f32 %v8670_v38, %v8269_v24 }
 0x27e   : > { %v8270_v23 = vpop.f32.mrb[56].mxu0 }
 0x27f   : > { %v8271_v26 = vpop.f32.mrb[57].mxu0 }
 0x280   : > { %v8272_v45 = vadd.f32 %v8271_v26, %v8270_v23  ;;  %v8273_v4 = vpop.f32.mrb[58].mxu0 }
 0x281   : > { %v8274_v61 = vpop.f32.mrb[59].mxu0 }
 0x282   : > { %v8641_v20 = vadd.f32 %v8640_v18, %v8272_v45  ;;  %v8275_v31 = vadd.f32 %v8274_v61, %v8273_v4 }
 0x284   : > { %v8661_v40 = vadd.f32 %v8660_v21, %v8275_v31  ;;  %v8292_v13 = vpop.f32.mrb[56].mxu1 }
 0x285   : > { %v8293_v62 = vpop.f32.mrb[57].mxu1 }
 0x286   : > { %v8294_v22 = vadd.f32 %v8293_v62, %v8292_v13  ;;  %v8295_v63 = vpop.f32.mrb[58].mxu1 }
 0x287   : > { %v8296_v14 = vpop.f32.mrb[59].mxu1 }
 0x288   : > { %v8652_v60 = vadd.f32 %v8651_v8, %v8294_v22  ;;  %v8297_v32 = vadd.f32 %v8296_v14, %v8295_v63 }
 0x28a   : > { %v8672_v44 = vadd.f32 %v8671_v47, %v8297_v32 }
 0x28c   : > { %v8298_v41 = vpop.f32.mrb[60].mxu1 }
 0x28d   : > { %v8299_v42 = vpop.f32.mrb[61].mxu1 }
 0x28e   : > { %v8300_v59 = vadd.f32 %v8299_v42, %v8298_v41  ;;  %v8301_v11 = vpop.f32.mrb[62].mxu1 }
 0x28f   : > { %v8302_v56 = vpop.f32.mrb[63].mxu1 }
 0x290   : > { %v8642_v43 = vadd.f32 %v8641_v20, %v8300_v59  ;;  %v8303_v28 = vadd.f32 %v8302_v56, %v8301_v11 }
 0x292   : > { %v8662_v49 = vadd.f32 %v8661_v40, %v8303_v28 }
 0x296   : > { %v8320_v51 = vpop.f32.mrb[60].mxu0 }
 0x297   : > { %v8321_v29 = vpop.f32.mrb[61].mxu0 }
 0x298   : > { %v8322_v37 = vadd.f32 %v8321_v29, %v8320_v51  ;;  %v8323_v3 = vpop.f32.mrb[62].mxu0 }
 0x299   : > { %v8324_v7 = vpop.f32.mrb[63].mxu0 }
 0x29a   : > { %v11771_v16 = vadd.f32 %v8652_v60, %v8322_v37  ;;  %v8325_v25 = vadd.f32 %v8324_v7, %v8323_v3 }
 0x29c   : > { %v11773_v53 = vadd.f32 %v8672_v44, %v8325_v25 }
 0x29e   : > { %v8326_v54 = vpop.f32.mrb[64].mxu0 }
 0x29f   : > { %v8327_v15 = vpop.f32.mrb[65].mxu0 }
 0x2a0   : > { %v8328_v30 = vadd.f32 %v8327_v15, %v8326_v54  ;;  %v8329_v0 = vpop.f32.mrb[66].mxu0 }
 0x2a1   : > { %v8330_v33 = vpop.f32.mrb[67].mxu0 }
 0x2a2   : > { %v11775_v6 = vadd.f32 %v8642_v43, %v8328_v30  ;;  %v8331_v1 = vadd.f32 %v8330_v33, %v8329_v0 }
 0x2a4   : > { %v11777_v9 = vadd.f32 %v8662_v49, %v8331_v1  ;;  %v8358_v48 = vpop.f32.mrb[64].mxu1 }
 0x2a5   : > { %v8359_v17 = vpop.f32.mrb[65].mxu1 }
 0x2a6   : > { %v8360_v39 = vadd.f32 %v8359_v17, %v8358_v48  ;;  %v8361_v27 = vpop.f32.mrb[66].mxu1 }
 0x2a7   : > { %v8362_v55 = vpop.f32.mrb[67].mxu1 }
 0x2a8   : > { %v8363_v10 = vadd.f32 %v8362_v55, %v8361_v27 }
 0x2ac   : > { %v8364_v36 = vpop.f32.mrb[68].mxu1 }
 0x2ad   : > { %v8365_v38 = vpop.f32.mrb[69].mxu1 }
 0x2ae   : > { %v8366_v52 = vadd.f32 %v8365_v38, %v8364_v36  ;;  %v8367_v50 = vpop.f32.mrb[70].mxu1 }
 0x2af   : > { %v8368_v5 = vpop.f32.mrb[71].mxu1 }
 0x2b0   : > { %v8369_v35 = vadd.f32 %v8368_v5, %v8367_v50 }
 0x2c4   : > { %v8386_v46 = vpop.f32.mrb[72].mxu1 }
 0x2c5   : > { %v8387_v18 = vpop.f32.mrb[73].mxu1 }
 0x2c6   : > { %v8388_v12 = vadd.f32 %v8387_v18, %v8386_v46  ;;  %v8389_v21 = vpop.f32.mrb[74].mxu1 }
 0x2c7   : > { %v8390_v58 = vpop.f32.mrb[75].mxu1 }
 0x2c8   : > { %v6469_v19 = vadd.f32 %v8388_v12, %v8360_v39  ;;  %v8391_v2 = vadd.f32 %v8390_v58, %v8389_v21 }
 0x2ca   : > { %v6472_v34 = vadd.f32 %v8391_v2, %v8363_v10 }
 0x2cc   : > { %v8392_v57 = vpop.f32.mrb[76].mxu1 }
 0x2cd   : > { %v8393_v8 = vpop.f32.mrb[77].mxu1 }
 0x2ce   : > { %v8394_v24 = vadd.f32 %v8393_v8, %v8392_v57  ;;  %v8395_v47 = vpop.f32.mrb[78].mxu1 }
 0x2cf   : > { %v8396_v23 = vpop.f32.mrb[79].mxu1 }
 0x2d0   : > { %v6477_v26 = vadd.f32 %v8394_v24, %v8366_v52  ;;  %v8397_v45 = vadd.f32 %v8396_v23, %v8395_v47 }
 0x2d2   : > { %v6480_v4 = vadd.f32 %v8397_v45, %v8369_v35 }
 0x2d6   : > { %v8414_v61 = vpop.f32.mrb[68].mxu0 }
 0x2d7   : > { %v8415_v20 = vpop.f32.mrb[69].mxu0 }
 0x2d8   : > { %v8416_v31 = vadd.f32 %v8415_v20, %v8414_v61  ;;  %v8417_v40 = vpop.f32.mrb[70].mxu0 }
 0x2d9   : > { %v8418_v13 = vpop.f32.mrb[71].mxu0 }
 0x2da   : > { %v6518_v62 = vadd.f32 %v8416_v31, %v6469_v19  ;;  %v8419_v22 = vadd.f32 %v8418_v13, %v8417_v40 }
 0x2dc   : > { %v6521_v63 = vadd.f32 %v8419_v22, %v6472_v34 }
 0x2de   : > { %v8420_v14 = vpop.f32.mrb[72].mxu0 }
 0x2df   : > { %v8421_v60 = vpop.f32.mrb[73].mxu0 }
 0x2e0   : > { %v8422_v32 = vadd.f32 %v8421_v60, %v8420_v14  ;;  %v8423_v44 = vpop.f32.mrb[74].mxu0 }
 0x2e1   : > { %v8424_v41 = vpop.f32.mrb[75].mxu0 }
 0x2e2   : > { %v6526_v42 = vadd.f32 %v8422_v32, %v6477_v26  ;;  %v8425_v59 = vadd.f32 %v8424_v41, %v8423_v44 }
 0x2e4   : > { %v6529_v11 = vadd.f32 %v8425_v59, %v6480_v4  ;;  %v8442_v56 = vpop.f32.mrb[80].mxu1 }
 0x2e5   : > { %v8443_v43 = vpop.f32.mrb[81].mxu1 }
 0x2e6   : > { %v8444_v28 = vadd.f32 %v8443_v43, %v8442_v56  ;;  %v8445_v49 = vpop.f32.mrb[82].mxu1 }
 0x2e7   : > { %v8446_v51 = vpop.f32.mrb[83].mxu1 }
 0x2e8   : > { %v6567_v29 = vadd.f32 %v8444_v28, %v6518_v62  ;;  %v8447_v37 = vadd.f32 %v8446_v51, %v8445_v49 }
 0x2ea   : > { %v6570_v3 = vadd.f32 %v8447_v37, %v6521_v63 }
 0x2ec   : > { %v8448_v7 = vpop.f32.mrb[84].mxu1 }
 0x2ed   : > { %v8449_v25 = vpop.f32.mrb[85].mxu1 }
 0x2ee   : > { %v8450_v54 = vadd.f32 %v8449_v25, %v8448_v7  ;;  %v8451_v15 = vpop.f32.mrb[86].mxu1 }
 0x2ef   : > { %v8452_v30 = vpop.f32.mrb[87].mxu1 }
 0x2f0   : > { %v6575_v0 = vadd.f32 %v8450_v54, %v6526_v42  ;;  %v8453_v33 = vadd.f32 %v8452_v30, %v8451_v15 }
 0x2f2   : > { %v6578_v1 = vadd.f32 %v8453_v33, %v6529_v11 }
 0x2f6   : > { %v8470_v48 = vpop.f32.mrb[76].mxu0 }
 0x2f7   : > { %v8471_v17 = vpop.f32.mrb[77].mxu0 }
 0x2f8   : > { %v8472_v39 = vadd.f32 %v8471_v17, %v8470_v48  ;;  %v8473_v27 = vpop.f32.mrb[78].mxu0 }
 0x2f9   : > { %v8474_v55 = vpop.f32.mrb[79].mxu0 }
 0x2fa   : > { %v6616_v10 = vadd.f32 %v8472_v39, %v6567_v29  ;;  %v8475_v36 = vadd.f32 %v8474_v55, %v8473_v27 }
 0x2fc   : > { %v6619_v38 = vadd.f32 %v8475_v36, %v6570_v3 }
 0x2fe   : > { %v8476_v52 = vpop.f32.mrb[80].mxu0 }
 0x2ff   : > { %v8477_v50 = vpop.f32.mrb[81].mxu0 }
 0x300   : > { %v8478_v5 = vadd.f32 %v8477_v50, %v8476_v52  ;;  %v8479_v35 = vpop.f32.mrb[82].mxu0  ;;  %v6838_v50 = vpop.permute.xlu0 %6837 }
 0x301   : > { %v8480_v46 = vpop.f32.mrb[83].mxu0 }
 0x302   : > { %v6624_v18 = vadd.f32 %v8478_v5, %v6575_v0  ;;  %v8481_v12 = vadd.f32 %v8480_v46, %v8479_v35 }
 0x304   : > { %v6627_v21 = vadd.f32 %v8481_v12, %v6578_v1  ;;  %v8498_v58 = vpop.f32.mrb[88].mxu1 }
 0x305   : > { %v8499_v19 = vpop.f32.mrb[89].mxu1 }
 0x306   : > { %v8500_v2 = vadd.f32 %v8499_v19, %v8498_v58  ;;  %v8501_v34 = vpop.f32.mrb[90].mxu1 }
 0x307   : > { %v8502_v57 = vpop.f32.mrb[91].mxu1 }
 0x308   : > { %v6665_v8 = vadd.f32 %v8500_v2, %v6616_v10  ;;  %v8503_v24 = vadd.f32 %v8502_v57, %v8501_v34 }
 0x30a   : > { %v6668_v47 = vadd.f32 %v8503_v24, %v6619_v38 }
 0x30c   : > { %v8504_v23 = vpop.f32.mrb[92].mxu1 }
 0x30d   : > { %v8505_v26 = vpop.f32.mrb[93].mxu1 }
 0x30e   : > { %v8506_v45 = vadd.f32 %v8505_v26, %v8504_v23  ;;  %v8507_v4 = vpop.f32.mrb[94].mxu1 }
 0x30f   : > { %v8508_v61 = vpop.f32.mrb[95].mxu1 }
 0x310   : > { %v6673_v20 = vadd.f32 %v8506_v45, %v6624_v18  ;;  %v8509_v31 = vadd.f32 %v8508_v61, %v8507_v4 }
 0x312   : > { %v6676_v40 = vadd.f32 %v8509_v31, %v6627_v21 }
 0x316   : > { %v8526_v13 = vpop.f32.mrb[84].mxu0 }
 0x317   : > { %v8527_v62 = vpop.f32.mrb[85].mxu0 }
 0x318   : > { %v8528_v22 = vadd.f32 %v8527_v62, %v8526_v13  ;;  %v8529_v63 = vpop.f32.mrb[86].mxu0 }
 0x319   : > { %v8530_v14 = vpop.f32.mrb[87].mxu0 }
 0x31a   : > { %v6714_v60 = vadd.f32 %v8528_v22, %v6665_v8  ;;  %v8531_v32 = vadd.f32 %v8530_v14, %v8529_v63 }
 0x31c   : > { %v6717_v44 = vadd.f32 %v8531_v32, %v6668_v47 }
 0x31e   : > { %v8532_v41 = vpop.f32.mrb[88].mxu0 }
 0x31f   : > { %v8533_v42 = vpop.f32.mrb[89].mxu0 }
 0x320   : > { %v8534_v59 = vadd.f32 %v8533_v42, %v8532_v41  ;;  %v8535_v11 = vpop.f32.mrb[90].mxu0 }
 0x321   : > { %v8536_v56 = vpop.f32.mrb[91].mxu0 }
 0x322   : > { %v6722_v43 = vadd.f32 %v8534_v59, %v6673_v20  ;;  %v8537_v28 = vadd.f32 %v8536_v56, %v8535_v11 }
 0x324   : > { %v6725_v49 = vadd.f32 %v8537_v28, %v6676_v40  ;;  %v8554_v51 = vpop.f32.mrb[96].mxu1 }
 0x325   : > { %v8555_v29 = vpop.f32.mrb[97].mxu1 }
 0x326   : > { %v8556_v37 = vadd.f32 %v8555_v29, %v8554_v51  ;;  %v8557_v3 = vpop.f32.mrb[98].mxu1 }
 0x327   : > { %v8558_v7 = vpop.f32.mrb[99].mxu1 }
 0x328   : > { %v6763_v25 = vadd.f32 %v8556_v37, %v6714_v60  ;;  %v8559_v54 = vadd.f32 %v8558_v7, %v8557_v3 }
 0x32a   : > { %v6766_v15 = vadd.f32 %v8559_v54, %v6717_v44  ;;  %v8654_v30 = vadd.f32 %v11771_v16, %v6763_v25 }
 0x32c   : > { %v8560_v0 = vpop.f32.mrb[100].mxu1  ;;  %v8674_v33 = vadd.f32 %v11773_v53, %v6766_v15 }
 0x32d   : > { %v8561_v1 = vpop.f32.mrb[101].mxu1 }
 0x32e   : > { %v8562_v48 = vadd.f32 %v8561_v1, %v8560_v0  ;;  %v8563_v17 = vpop.f32.mrb[102].mxu1 }
 0x32f   : > { %v8564_v39 = vpop.f32.mrb[103].mxu1 }
 0x330   : > { %v6771_v27 = vadd.f32 %v8562_v48, %v6722_v43  ;;  %v8565_v55 = vadd.f32 %v8564_v39, %v8563_v17 }
 0x332   : > { %v6774_v10 = vadd.f32 %v8565_v55, %v6725_v49  ;;  %v8644_v36 = vadd.f32 %v11775_v6, %v6771_v27 }
 0x334   : > { %v8664_v38 = vadd.f32 %v11777_v9, %v6774_v10 }
 0x336   : > { %v8634_v52 = vpop.f32.mrb[32].mxu0 }
 0x337   : > { %v8645_v5 = vadd.f32 %v8644_v36, %v8634_v52  ;;  %v6811_v35 = vpop.f32.mrb[33].mxu0 }
 0x338   : > { %v8655_v16 = vadd.f32 %v8654_v30, %v6811_v35  ;;  %v8635_v46 = vpop.f32.mrb[34].mxu0 }
 0x339   : > { %v8665_v18 = vadd.f32 %v8664_v38, %v8635_v46  ;;  %v6842_v53 = vadd.f32 %v8645_v5, %v6838_v50  ;;  %v6814_v12 = vpop.f32.mrb[35].mxu0 }
 0x33a   : > { %v6840_v21 = vadd.f32 %v8655_v16, %v6838_v50  ;;  %v8675_v58 = vadd.f32 %v8674_v33, %v6814_v12 }
 0x33b   : > { %v6843_v19 = vadd.f32 %v8665_v18, %v6838_v50  ;;  %9104 = vtanh.f32 %v6842_v53 }
 0x33c   : > { %9106 = vtanh.f32 %v6840_v21  ;;  %v6841_v2 = vadd.f32 %v8675_v58, %v6838_v50 }
 0x33d   : > { %9108 = vtanh.f32 %v6843_v19 }
 0x33e   : > { %9110 = vtanh.f32 %v6841_v2 }
 0x345   : > { %v9105_v6 = vpop.eup %9104 }
 0x346   : > { %v9107_v9 = vpop.eup %9106  ;;  %6851 = vst.msk [vmem:[%s226_s17 + $0x10] sm:$0xff] %vm6848_vm12, %v9105_v6 }
 0x347   : > { %v9109_v34 = vpop.eup %9108  ;;  %6849 = vst.msk [vmem:[%s226_s17] sm:$0xff] %vm6848_vm12, %v9107_v9 }
 0x348   : > { %v9111_v57 = vpop.eup %9110  ;;  %6852 = vst.msk [vmem:[%s226_s17 + $0x18] sm:$0xff] %vm6848_vm12, %v9109_v34 }
 0x349   : > { %6850 = vst.msk [vmem:[%s226_s17 + $0x8] sm:$0xff] %vm6848_vm12, %v9111_v57 }
 0x34a PF: > { %s17_s20 = sadd.s32 1, %s9152_s20  }
 0x34b   : > { %p14_p4 = scmp.ge.s32.totalorder %s17_s20, 4  }
 0x34d   :  { %16 = sbr.rel (!%p14_p4) target bundleno = 3 (0x3), region = 72 }

</bundles_post_ra>
